<compile_context>
chip_gen: v7x
topology: tpu7x:2x2x1
jax: 0.10.0
libtpu: 0.0.40
codegen_flags: <defaults>
</compile_context>

<pallas_src>
import math

import numpy as np
import jax
import jax.numpy as jnp
from jax import lax
from jax.experimental import pallas as pl
from jax.experimental.pallas import tpu as pltpu


_PADL = 8  # left pad (in low-res/folded columns) -> interior stores stay sublane aligned


# ----------------------------------------------------------------------------
# Fused kernel: deconv -> concat -> conv3x3+ReLU -> conv3x3+ReLU
# ----------------------------------------------------------------------------
def _make_fused_kernel(H, W, Cin, Cskip, Cout):
    """One batch element.  Column-parity folded layouts:
       skip / h1 / output are (2H, W, 2*C) views of the (2H, 2W, C) NHWC maps;
       the concat scratch is additionally row-folded: (H+2, 2, W+PADL+1, 2*Ccat).
       All reshapes below only split/merge dims above the lane dim."""
    Cup = Cout
    Ccat = Cup + Cskip
    H2 = 2 * H
    P = H2 * W            # (high-res row, low-res col) positions per image
    PL = _PADL
    WP = W + PL + 1       # padded low-res column extent

    def kernel(x_ref, skip_ref, wup_ref, bup_ref, w1_ref, b1_ref,
               w2_ref, b2_ref, o_ref, xpad_ref, cat_ref, h1_ref):
        f32 = jnp.float32
        bdt = xpad_ref.dtype

        # --- 0) zero ONLY the 1-pixel halos (interiors are rewritten below) ---
        xpad_ref[0:1] = jnp.zeros((1, WP, Cin), bdt)
        xpad_ref[H + 1:H + 2] = jnp.zeros((1, WP, Cin), bdt)
        xpad_ref[:, PL - 1:PL, :] = jnp.zeros((H + 2, 1, Cin), bdt)
        xpad_ref[:, PL + W:PL + W + 1, :] = jnp.zeros((H + 2, 1, Cin), bdt)

        cat_ref[0:1] = jnp.zeros((1, 2, WP, 2 * Ccat), bdt)
        cat_ref[H + 1:H + 2] = jnp.zeros((1, 2, WP, 2 * Ccat), bdt)
        cat_ref[:, :, PL - 1:PL, :] = jnp.zeros((H + 2, 2, 1, 2 * Ccat), bdt)
        cat_ref[:, :, PL + W:PL + W + 1, :] = jnp.zeros((H + 2, 2, 1, 2 * Ccat), bdt)

        h1_ref[0:1] = jnp.zeros((1, WP, 2 * Cout), bdt)
        h1_ref[H2 + 1:H2 + 2] = jnp.zeros((1, WP, 2 * Cout), bdt)
        h1_ref[:, PL - 1:PL, :] = jnp.zeros((H2 + 2, 1, 2 * Cout), bdt)
        h1_ref[:, PL + W:PL + W + 1, :] = jnp.zeros((H2 + 2, 1, 2 * Cout), bdt)

        # --- 1) stage the low-res input into its padded tile ---
        xpad_ref[1:H + 1, PL:PL + W, :] = x_ref[0].astype(bdt)

        # --- 2) polyphase ConvTranspose2d(k=4, s=2, p=1): no zero-stuffed
        #        intermediate, no im2col; 12 accumulating matmuls on shifted
        #        views (row-phase structural zeros of the packed weight skipped).
        acc0 = jnp.zeros((H * W, 2 * Cout), f32)   # output rows of parity 0
        acc1 = jnp.zeros((H * W, 2 * Cout), f32)   # output rows of parity 1
        for oy in range(3):
            for ox in range(3):
                g = 3 * oy + ox
                patch = xpad_ref[oy:oy + H, PL - 1 + ox:PL - 1 + ox + W, :]
                patch = patch.reshape(H * W, Cin)
                if oy <= 1:
                    acc0 = acc0 + jnp.dot(
                        patch, wup_ref[g * Cin:(g + 1) * Cin, 0:2 * Cout],
                        preferred_element_type=f32)
                if oy >= 1:
                    acc1 = acc1 + jnp.dot(
                        patch, wup_ref[g * Cin:(g + 1) * Cin, 2 * Cout:4 * Cout],
                        preferred_element_type=f32)
        acc0 = (acc0 + bup_ref[:, 0:2 * Cout]).astype(bdt)
        acc1 = (acc1 + bup_ref[:, 2 * Cout:4 * Cout]).astype(bdt)

        # scatter the 4 output phases into the row+column folded concat buffer
        cat_ref[1:H + 1, 0, PL:PL + W, 0:Cup] = acc0[:, 0:Cout].reshape(H, W, Cout)
        cat_ref[1:H + 1, 0, PL:PL + W, Ccat:Ccat + Cup] = (
            acc0[:, Cout:2 * Cout].reshape(H, W, Cout))
        cat_ref[1:H + 1, 1, PL:PL + W, 0:Cup] = acc1[:, 0:Cout].reshape(H, W, Cout)
        cat_ref[1:H + 1, 1, PL:PL + W, Ccat:Ccat + Cup] = (
            acc1[:, Cout:2 * Cout].reshape(H, W, Cout))

        # --- 3) concat: skip goes straight into the other channel groups ---
        sv = skip_ref[0].astype(bdt).reshape(H, 2, W, 2 * Cskip)
        cat_ref[1:H + 1, :, PL:PL + W, Cup:Ccat] = sv[:, :, :, 0:Cskip]
        cat_ref[1:H + 1, :, PL:PL + W, Ccat + Cup:2 * Ccat] = (
            sv[:, :, :, Cskip:2 * Cskip])

        # --- 4) conv1 (3x3, pad 1) + ReLU in column-folded form ---
        def cat_rows(dy, col0, lane0, nl):
            # 2H consecutive high-res rows at output-row offset dy-1, W low-res
            # columns from padded column col0, nl channels from lane lane0,
            # read from the row-folded concat buffer.
            if dy == 1:
                v = cat_ref[1:H + 1, :, col0:col0 + W, lane0:lane0 + nl]
                return v.reshape(H2 * W, nl)
            if dy == 0:
                v = cat_ref[0:H + 1, :, col0:col0 + W, lane0:lane0 + nl]
            else:  # dy == 2
                v = cat_ref[1:H + 2, :, col0:col0 + W, lane0:lane0 + nl]
            v = v.reshape(H2 + 2, W, nl)[1:H2 + 1]
            return v.reshape(H2 * W, nl)

        acc = jnp.zeros((P, 2 * Cout), f32)
        for dy in range(3):
            base = dy * 4 * Ccat
            p_l = cat_rows(dy, PL - 1, Ccat, Ccat)        # col X-1, px=1 half
            acc = acc + jnp.dot(p_l, w1_ref[base:base + Ccat, :],
                                preferred_element_type=f32)
            p_c = cat_rows(dy, PL, 0, 2 * Ccat)           # col X, both halves
            acc = acc + jnp.dot(p_c, w1_ref[base + Ccat:base + 3 * Ccat, :],
                                preferred_element_type=f32)
            p_r = cat_rows(dy, PL + 1, 0, Ccat)           # col X+1, px=0 half
            acc = acc + jnp.dot(p_r, w1_ref[base + 3 * Ccat:base + 4 * Ccat, :],
                                preferred_element_type=f32)
        a1 = jnp.maximum(acc + b1_ref[...], 0.0).astype(bdt)
        h1_ref[1:H2 + 1, PL:PL + W, :] = a1.reshape(H2, W, 2 * Cout)

        # --- 5) conv2 (3x3, pad 1) + ReLU: h1 never leaves VMEM ---
        acc2 = jnp.zeros((P, 2 * Cout), f32)
        for dy in range(3):
            base = dy * 4 * Cout
            p_l = h1_ref[dy:dy + H2, PL - 1:PL - 1 + W, Cout:2 * Cout].reshape(P, Cout)
            acc2 = acc2 + jnp.dot(p_l, w2_ref[base:base + Cout, :],
                                  preferred_element_type=f32)
            p_c = h1_ref[dy:dy + H2, PL:PL + W, :].reshape(P, 2 * Cout)
            acc2 = acc2 + jnp.dot(p_c, w2_ref[base + Cout:base + 3 * Cout, :],
                                  preferred_element_type=f32)
            p_r = h1_ref[dy:dy + H2, PL + 1:PL + 1 + W, 0:Cout].reshape(P, Cout)
            acc2 = acc2 + jnp.dot(p_r, w2_ref[base + 3 * Cout:base + 4 * Cout, :],
                                  preferred_element_type=f32)
        a2 = jnp.maximum(acc2 + b2_ref[...], 0.0)

        # lane-dense bf16 output store: minor dim is 2*Cout (both column parities)
        o_ref[...] = a2.astype(o_ref.dtype).reshape(1, H2, W, 2 * Cout)

    return kernel


def _nbytes(shape, dtype):
    return math.prod(shape) * np.dtype(dtype).itemsize


def unet_up_fused_pallas(x, skip_folded, w_up, b_up, w1f, b1f, w2f, b2f):
    """x: (N,H,W,Cin) bf16; skip_folded: (N,2H,W,2*Cskip) bf16.
    Returns (N, 2H, W, 2*Cout) bf16 (free reshape -> (N, 2H, 2W, Cout) NHWC)."""
    N, H, W, Cin = x.shape
    Cskip = skip_folded.shape[-1] // 2
    Cout = w_up.shape[-1] // 4
    Cup = Cout
    Ccat = Cup + Cskip
    H2 = 2 * H
    cdt = x.dtype
    WP = W + _PADL + 1

    kernel = _make_fused_kernel(H, W, Cin, Cskip, Cout)

    scratch_shapes = [
        pltpu.VMEM((H + 2, WP, Cin), cdt),            # padded low-res input
        pltpu.VMEM((H + 2, 2, WP, 2 * Ccat), cdt),    # row+col folded concat buffer
        pltpu.VMEM((H2 + 2, WP, 2 * Cout), cdt),      # padded h1
    ]

    # VMEM budget derived from the working set (scratch + double-buffered
    # input/output blocks + weights) instead of a hard-coded constant.
    scratch_b = (_nbytes((H + 2, WP, Cin), cdt)
                 + _nbytes((H + 2, 2, WP, 2 * Ccat), cdt)
                 + _nbytes((H2 + 2, WP, 2 * Cout), cdt))
    io_b = (_nbytes((1, H, W, Cin), cdt)
            + _nbytes((1, H2, W, 2 * Cskip), cdt)
            + _nbytes((1, H2, W, 2 * Cout), cdt))
    wgt_b = (_nbytes(w_up.shape, cdt) + _nbytes(w1f.shape, cdt)
             + _nbytes(w2f.shape, cdt) + 3 * _nbytes((1, 4 * Cout), jnp.float32))
    need = 2 * scratch_b + 2 * (2 * io_b + wgt_b) + (4 << 20)
    vmem_bytes = int(min(max(need, 32 << 20), 100 << 20))

    return pl.pallas_call(
        kernel,
        out_shape=jax.ShapeDtypeStruct((N, H2, W, 2 * Cout), cdt),
        grid=(N,),
        in_specs=[
            pl.BlockSpec((1, H, W, Cin), lambda n: (n, 0, 0, 0)),
            pl.BlockSpec((1, H2, W, 2 * Cskip), lambda n: (n, 0, 0, 0)),
            pl.BlockSpec((9 * Cin, 4 * Cout), lambda n: (0, 0)),
            pl.BlockSpec((1, 4 * Cout), lambda n: (0, 0)),
            pl.BlockSpec((12 * Ccat, 2 * Cout), lambda n: (0, 0)),
            pl.BlockSpec((1, 2 * Cout), lambda n: (0, 0)),
            pl.BlockSpec((12 * Cout, 2 * Cout), lambda n: (0, 0)),
            pl.BlockSpec((1, 2 * Cout), lambda n: (0, 0)),
        ],
        out_specs=pl.BlockSpec((1, H2, W, 2 * Cout), lambda n: (n, 0, 0, 0)),
        scratch_shapes=scratch_shapes,
        compiler_params=pltpu.CompilerParams(
            dimension_semantics=("parallel",),
            vmem_limit_bytes=vmem_bytes),
    )(x, skip_folded, w_up, b_up, w1f, b1f, w2f, b2f)


# ----------------------------------------------------------------------------
# Weight repacking (exact rearrangements of the torch parameters)
# ----------------------------------------------------------------------------
def _pack_deconv_weight(w_t):
    """torch ConvTranspose2d weight (Cin, Cout, 4, 4) -> (9*Cin, 4*Cout).
    Row group g = 3*oy + ox is the low-res input pixel at offset (oy-1, ox-1);
    column group 2*py + px is the output phase.  Untouched entries are zero."""
    Cin, Cout = w_t.shape[0], w_t.shape[1]
    w = jnp.zeros((9, Cin, 4, Cout), w_t.dtype)
    for py in range(2):
        for px in range(2):
            gph = 2 * py + px
            for dy in range(2):
                for dx in range(2):
                    g9 = 3 * (py + dy) + (px + dx)
                    w = w.at[g9, :, gph, :].set(
                        w_t[:, :, 3 - py - 2 * dy, 3 - px - 2 * dx])
    return w.reshape(9 * Cin, 4 * Cout)


def _pack_conv3x3_folded(w_oihw):
    """torch Conv2d weight (Cout, Cin, 3, 3) -> column-parity-folded matmul
    weight (12*Cin, 2*Cout).  Per row tap dy the (4*Cin, 2*Cout) block is
      rows [0:Cin]     left  patch (col X-1, px=1 half)
      rows [Cin:2Cin]  centre px=0 half (col X)
      rows [2Cin:3Cin] centre px=1 half
      rows [3Cin:4Cin] right patch (col X+1, px=0 half)
    and the 2*Cout columns are [outputs at even cols | outputs at odd cols]."""
    Cout, Cin = w_oihw.shape[0], w_oihw.shape[1]
    wt = jnp.transpose(w_oihw, (2, 3, 1, 0))      # (kh, kw, Cin, Cout)
    z = jnp.zeros((Cin, Cout), w_oihw.dtype)
    blocks = []
    for dy in range(3):
        left = jnp.concatenate([wt[dy, 0], z], axis=1)           # q0 <- kw=0
        cen0 = jnp.concatenate([wt[dy, 1], wt[dy, 0]], axis=1)   # q0<-kw1, q1<-kw0
        cen1 = jnp.concatenate([wt[dy, 2], wt[dy, 1]], axis=1)   # q0<-kw2, q1<-kw1
        right = jnp.concatenate([z, wt[dy, 2]], axis=1)          # q1 <- kw=2
        blocks.append(jnp.concatenate([left, cen0, cen1, right], axis=0))
    return jnp.concatenate(blocks, axis=0)         # (12*Cin, 2*Cout)


# ----------------------------------------------------------------------------
# Wrappers
# ----------------------------------------------------------------------------
def unet_up_forward_nhwc(x_nhwc, skip_nhwc, params, compute_dtype=jnp.bfloat16):
    """NHWC-in / NHWC-out core (use this directly in an NHWC end-to-end UNet)."""
    N, H, W, _ = x_nhwc.shape
    Cout = params["up_b"].shape[0]
    Cskip = skip_nhwc.shape[-1]

    x = x_nhwc.astype(compute_dtype)
    # free (bitcast) reshape: fold the column parity of the skip into channels
    skip_f = skip_nhwc.astype(compute_dtype).reshape(N, 2 * H, W, 2 * Cskip)

    w_up = _pack_deconv_weight(params["up_w"]).astype(compute_dtype)
    b_up = jnp.tile(params["up_b"], 4).reshape(1, 4 * Cout).astype(jnp.float32)
    w1f = _pack_conv3x3_folded(params["c1_w"]).astype(compute_dtype)
    w2f = _pack_conv3x3_folded(params["c2_w"]).astype(compute_dtype)
    b1f = jnp.tile(params["c1_b"], 2).reshape(1, 2 * Cout).astype(jnp.float32)
    b2f = jnp.tile(params["c2_b"], 2).reshape(1, 2 * Cout).astype(jnp.float32)

    y = unet_up_fused_pallas(x, skip_f, w_up, b_up, w1f, b1f, w2f, b2f)
    return y.reshape(N, 2 * H, 2 * W, Cout)        # free bitcast reshape


def unet_up_forward(inputs0_nchw, skip_nchw, params, compute_dtype=jnp.bfloat16):
    """Module-equivalent NCHW interface (layout glue only; a full NHWC UNet
    should call unet_up_forward_nhwc and skip these transposes)."""
    x = jnp.transpose(inputs0_nchw, (0, 2, 3, 1))
    skip = jnp.transpose(skip_nchw, (0, 2, 3, 1))
    y = unet_up_forward_nhwc(x, skip, params, compute_dtype)
    return jnp.transpose(y, (0, 3, 1, 2))


# ----------------------------------------------------------------------------
# Pure-lax reference (precision-matched: bf16 operands, f32 accumulation)
# ----------------------------------------------------------------------------
def reference_forward(inputs0, skip, params, compute_dtype=jnp.bfloat16):
    dn = ("NCHW", "OIHW", "NCHW")
    f32 = jnp.float32
    x = inputs0.astype(compute_dtype)
    # transposed conv == lhs-dilated conv with spatially flipped kernel
    w_up = jnp.transpose(params["up_w"][:, :, ::-1, ::-1],
                         (1, 0, 2, 3)).astype(compute_dtype)
    up = lax.conv_general_dilated(x, w_up, (1, 1), ((2, 2), (2, 2)),
                                  lhs_dilation=(2, 2), dimension_numbers=dn,
                                  preferred_element_type=f32)
    up = (up + params["up_b"][None, :, None, None]).astype(compute_dtype)
    h = jnp.concatenate([up, skip.astype(compute_dtype)], axis=1)
    h = lax.conv_general_dilated(h, params["c1_w"].astype(compute_dtype),
                                 (1, 1), ((1, 1), (1, 1)),
                                 dimension_numbers=dn,
                                 preferred_element_type=f32)
    h = jnp.maximum(h + params["c1_b"][None, :, None, None], 0.0)
    h = h.astype(compute_dtype)
    h = lax.conv_general_dilated(h, params["c2_w"].astype(compute_dtype),
                                 (1, 1), ((1, 1), (1, 1)),
                                 dimension_numbers=dn,
                                 preferred_element_type=f32)
    h = jnp.maximum(h + params["c2_b"][None, :, None, None], 0.0)
    return h.astype(f32)


def init_params(key, in_size, out_size):
    """Deterministic kaiming-normal-style init (shapes match the torch module)."""
    ks = jax.random.split(key, 6)

    def kaiming(k, shape, fan_in):
        return jax.random.normal(k, shape, jnp.float32) * jnp.sqrt(2.0 / fan_in)

    return {
        "up_w": kaiming(ks[0], (in_size, out_size, 4, 4), out_size * 16),
        "up_b": 0.01 * jax.random.normal(ks[1], (out_size,), jnp.float32),
        "c1_w": kaiming(ks[2], (out_size, 2 * out_size, 3, 3), 2 * out_size * 9),
        "c1_b": 0.01 * jax.random.normal(ks[3], (out_size,), jnp.float32),
        "c2_w": kaiming(ks[4], (out_size, out_size, 3, 3), out_size * 9),
        "c2_b": 0.01 * jax.random.normal(ks[5], (out_size,), jnp.float32),
    }


if __name__ == "__main__":
    in_size, out_size = 8, 4
    N, H, W = 2, 8, 8   # inputs0 spatial; skip is at 2H x 2W

    key = jax.random.PRNGKey(0)
    k_in, k_skip, k_p = jax.random.split(key, 3)
    inputs0 = jax.random.normal(k_in, (N, in_size, H, W), jnp.float32)
    skip = jax.random.normal(k_skip, (N, out_size, 2 * H, 2 * W), jnp.float32)
    params = init_params(k_p, in_size, out_size)

    out = jax.jit(unet_up_forward)(inputs0, skip, params)
    out = jax.block_until_ready(out)
    assert out.shape == (N, out_size, 2 * H, 2 * W), out.shape

    ref = reference_forward(inputs0, skip, params)
    # The kernel emits bf16 (halves the HBM writeback); quantize the
    # precision-matched reference the same way before comparing.
    ref_b = ref.astype(jnp.bfloat16).astype(jnp.float32)
    out_f = out.astype(jnp.float32)
    err = float(jnp.max(jnp.abs(out_f - ref_b)))
    assert jnp.allclose(out_f, ref_b, atol=2e-2, rtol=2e-2), err

    print("KERNEL_OK")
</pallas_src>

<mosaic_0001>
module attributes {stable_mosaic.version = 11 : i64} {
  func.func @kernel(%arg0: i32, %arg1: memref<1x8x8x8xbf16, #tpu.memory_space<vmem>>, %arg2: memref<1x16x8x8xbf16, #tpu.memory_space<vmem>>, %arg3: memref<72x16xbf16, #tpu.memory_space<vmem>>, %arg4: memref<1x16xf32, #tpu.memory_space<vmem>>, %arg5: memref<96x8xbf16, #tpu.memory_space<vmem>>, %arg6: memref<1x8xf32, #tpu.memory_space<vmem>>, %arg7: memref<48x8xbf16, #tpu.memory_space<vmem>>, %arg8: memref<1x8xf32, #tpu.memory_space<vmem>>, %arg9: memref<1x16x8x8xbf16, #tpu.memory_space<vmem>>, %arg10: memref<10x17x8xbf16, #tpu.memory_space<vmem>>, %arg11: memref<10x2x17x16xbf16, #tpu.memory_space<vmem>>, %arg12: memref<18x17x8xbf16, #tpu.memory_space<vmem>>) attributes {dimension_semantics = [#tpu.dimension_semantics<parallel>], iteration_bounds = array<i64: 2>, scalar_prefetch = 0 : i64, scratch_operands = 3 : i64, tpu.core_type = #tpu.core_type<tc>, window_params = [{transform_indices = @transform_0, window_bounds = array<i64: 1, 8, 8, 8>}, {transform_indices = @transform_1, window_bounds = array<i64: 1, 16, 8, 8>}, {pipeline_mode = #tpu.pipeline_mode<synchronous>, transform_indices = @transform_2, window_bounds = array<i64: 72, 16>}, {pipeline_mode = #tpu.pipeline_mode<synchronous>, transform_indices = @transform_3, window_bounds = array<i64: 1, 16>}, {pipeline_mode = #tpu.pipeline_mode<synchronous>, transform_indices = @transform_4, window_bounds = array<i64: 96, 8>}, {pipeline_mode = #tpu.pipeline_mode<synchronous>, transform_indices = @transform_5, window_bounds = array<i64: 1, 8>}, {pipeline_mode = #tpu.pipeline_mode<synchronous>, transform_indices = @transform_6, window_bounds = array<i64: 48, 8>}, {pipeline_mode = #tpu.pipeline_mode<synchronous>, transform_indices = @transform_7, window_bounds = array<i64: 1, 8>}, {transform_indices = @transform_8, window_bounds = array<i64: 1, 16, 8, 8>}]} {
    %cst = arith.constant 0.000000e+00 : bf16
    %0 = vector.broadcast %cst : bf16 to vector<1x17x8xbf16>
    %c0 = arith.constant 0 : index
    %c0_0 = arith.constant 0 : index
    %c0_1 = arith.constant 0 : index
    %1 = vector.load %arg10[%c0, %c0_0, %c0_1] : memref<10x17x8xbf16, #tpu.memory_space<vmem>>, vector<1x17x8xbf16>
    tpu.vector_store %arg10[%c0, %c0_0, %c0_1], %0 {strides = array<i32>} : memref<10x17x8xbf16, #tpu.memory_space<vmem>>, vector<1x17x8xbf16>,
    %cst_2 = arith.constant 0.000000e+00 : bf16
    %2 = vector.broadcast %cst_2 : bf16 to vector<1x17x8xbf16>
    %c9 = arith.constant 9 : index
    %c0_3 = arith.constant 0 : index
    %c0_4 = arith.constant 0 : index
    %3 = vector.load %arg10[%c9, %c0_3, %c0_4] : memref<10x17x8xbf16, #tpu.memory_space<vmem>>, vector<1x17x8xbf16>
    tpu.vector_store %arg10[%c9, %c0_3, %c0_4], %2 {strides = array<i32>} : memref<10x17x8xbf16, #tpu.memory_space<vmem>>, vector<1x17x8xbf16>,
    %cst_5 = arith.constant 0.000000e+00 : bf16
    %4 = vector.broadcast %cst_5 : bf16 to vector<10x1x8xbf16>
    %c0_6 = arith.constant 0 : index
    %c7 = arith.constant 7 : index
    %c0_7 = arith.constant 0 : index
    %5 = vector.load %arg10[%c0_6, %c7, %c0_7] : memref<10x17x8xbf16, #tpu.memory_space<vmem>>, vector<10x1x8xbf16>
    tpu.vector_store %arg10[%c0_6, %c7, %c0_7], %4 {strides = array<i32>} : memref<10x17x8xbf16, #tpu.memory_space<vmem>>, vector<10x1x8xbf16>,
    %cst_8 = arith.constant 0.000000e+00 : bf16
    %6 = vector.broadcast %cst_8 : bf16 to vector<10x1x8xbf16>
    %c0_9 = arith.constant 0 : index
    %c16 = arith.constant 16 : index
    %c0_10 = arith.constant 0 : index
    %7 = vector.load %arg10[%c0_9, %c16, %c0_10] : memref<10x17x8xbf16, #tpu.memory_space<vmem>>, vector<10x1x8xbf16>
    tpu.vector_store %arg10[%c0_9, %c16, %c0_10], %6 {strides = array<i32>} : memref<10x17x8xbf16, #tpu.memory_space<vmem>>, vector<10x1x8xbf16>,
    %cst_11 = arith.constant 0.000000e+00 : bf16
    %8 = vector.broadcast %cst_11 : bf16 to vector<1x2x17x16xbf16>
    %c0_12 = arith.constant 0 : index
    %c0_13 = arith.constant 0 : index
    %c0_14 = arith.constant 0 : index
    %c0_15 = arith.constant 0 : index
    %9 = vector.load %arg11[%c0_12, %c0_13, %c0_14, %c0_15] : memref<10x2x17x16xbf16, #tpu.memory_space<vmem>>, vector<1x2x17x16xbf16>
    tpu.vector_store %arg11[%c0_12, %c0_13, %c0_14, %c0_15], %8 {strides = array<i32>} : memref<10x2x17x16xbf16, #tpu.memory_space<vmem>>, vector<1x2x17x16xbf16>,
    %cst_16 = arith.constant 0.000000e+00 : bf16
    %10 = vector.broadcast %cst_16 : bf16 to vector<1x2x17x16xbf16>
    %c9_17 = arith.constant 9 : index
    %c0_18 = arith.constant 0 : index
    %c0_19 = arith.constant 0 : index
    %c0_20 = arith.constant 0 : index
    %11 = vector.load %arg11[%c9_17, %c0_18, %c0_19, %c0_20] : memref<10x2x17x16xbf16, #tpu.memory_space<vmem>>, vector<1x2x17x16xbf16>
    tpu.vector_store %arg11[%c9_17, %c0_18, %c0_19, %c0_20], %10 {strides = array<i32>} : memref<10x2x17x16xbf16, #tpu.memory_space<vmem>>, vector<1x2x17x16xbf16>,
    %cst_21 = arith.constant 0.000000e+00 : bf16
    %12 = vector.broadcast %cst_21 : bf16 to vector<10x2x1x16xbf16>
    %c0_22 = arith.constant 0 : index
    %c0_23 = arith.constant 0 : index
    %c7_24 = arith.constant 7 : index
    %c0_25 = arith.constant 0 : index
    %13 = vector.load %arg11[%c0_22, %c0_23, %c7_24, %c0_25] : memref<10x2x17x16xbf16, #tpu.memory_space<vmem>>, vector<10x2x1x16xbf16>
    tpu.vector_store %arg11[%c0_22, %c0_23, %c7_24, %c0_25], %12 {strides = array<i32>} : memref<10x2x17x16xbf16, #tpu.memory_space<vmem>>, vector<10x2x1x16xbf16>,
    %cst_26 = arith.constant 0.000000e+00 : bf16
    %14 = vector.broadcast %cst_26 : bf16 to vector<10x2x1x16xbf16>
    %c0_27 = arith.constant 0 : index
    %c0_28 = arith.constant 0 : index
    %c16_29 = arith.constant 16 : index
    %c0_30 = arith.constant 0 : index
    %15 = vector.load %arg11[%c0_27, %c0_28, %c16_29, %c0_30] : memref<10x2x17x16xbf16, #tpu.memory_space<vmem>>, vector<10x2x1x16xbf16>
    tpu.vector_store %arg11[%c0_27, %c0_28, %c16_29, %c0_30], %14 {strides = array<i32>} : memref<10x2x17x16xbf16, #tpu.memory_space<vmem>>, vector<10x2x1x16xbf16>,
    %cst_31 = arith.constant 0.000000e+00 : bf16
    %16 = vector.broadcast %cst_31 : bf16 to vector<1x17x8xbf16>
    %c0_32 = arith.constant 0 : index
    %c0_33 = arith.constant 0 : index
    %c0_34 = arith.constant 0 : index
    %17 = vector.load %arg12[%c0_32, %c0_33, %c0_34] : memref<18x17x8xbf16, #tpu.memory_space<vmem>>, vector<1x17x8xbf16>
    tpu.vector_store %arg12[%c0_32, %c0_33, %c0_34], %16 {strides = array<i32>} : memref<18x17x8xbf16, #tpu.memory_space<vmem>>, vector<1x17x8xbf16>,
    %cst_35 = arith.constant 0.000000e+00 : bf16
    %18 = vector.broadcast %cst_35 : bf16 to vector<1x17x8xbf16>
    %c17 = arith.constant 17 : index
    %c0_36 = arith.constant 0 : index
    %c0_37 = arith.constant 0 : index
    %19 = vector.load %arg12[%c17, %c0_36, %c0_37] : memref<18x17x8xbf16, #tpu.memory_space<vmem>>, vector<1x17x8xbf16>
    tpu.vector_store %arg12[%c17, %c0_36, %c0_37], %18 {strides = array<i32>} : memref<18x17x8xbf16, #tpu.memory_space<vmem>>, vector<1x17x8xbf16>,
    %cst_38 = arith.constant 0.000000e+00 : bf16
    %20 = vector.broadcast %cst_38 : bf16 to vector<18x1x8xbf16>
    %c0_39 = arith.constant 0 : index
    %c7_40 = arith.constant 7 : index
    %c0_41 = arith.constant 0 : index
    %21 = vector.load %arg12[%c0_39, %c7_40, %c0_41] : memref<18x17x8xbf16, #tpu.memory_space<vmem>>, vector<18x1x8xbf16>
    tpu.vector_store %arg12[%c0_39, %c7_40, %c0_41], %20 {strides = array<i32>} : memref<18x17x8xbf16, #tpu.memory_space<vmem>>, vector<18x1x8xbf16>,
    %cst_42 = arith.constant 0.000000e+00 : bf16
    %22 = vector.broadcast %cst_42 : bf16 to vector<18x1x8xbf16>
    %c0_43 = arith.constant 0 : index
    %c16_44 = arith.constant 16 : index
    %c0_45 = arith.constant 0 : index
    %23 = vector.load %arg12[%c0_43, %c16_44, %c0_45] : memref<18x17x8xbf16, #tpu.memory_space<vmem>>, vector<18x1x8xbf16>
    tpu.vector_store %arg12[%c0_43, %c16_44, %c0_45], %22 {strides = array<i32>} : memref<18x17x8xbf16, #tpu.memory_space<vmem>>, vector<18x1x8xbf16>,
    %c0_46 = arith.constant 0 : index
    %c0_47 = arith.constant 0 : index
    %c0_48 = arith.constant 0 : index
    %c0_49 = arith.constant 0 : index
    %24 = vector.load %arg1[%c0_46, %c0_47, %c0_48, %c0_49] : memref<1x8x8x8xbf16, #tpu.memory_space<vmem>>, vector<1x8x8x8xbf16>
    %25 = vector.shape_cast %24 : vector<1x8x8x8xbf16> to vector<8x8x8xbf16>
    %c1 = arith.constant 1 : index
    %c8 = arith.constant 8 : index
    %c0_50 = arith.constant 0 : index
    %26 = vector.load %arg10[%c1, %c8, %c0_50] : memref<10x17x8xbf16, #tpu.memory_space<vmem>>, vector<8x8x8xbf16>
    tpu.vector_store %arg10[%c1, %c8, %c0_50], %25 {strides = array<i32>} : memref<10x17x8xbf16, #tpu.memory_space<vmem>>, vector<8x8x8xbf16>,
    %cst_51 = arith.constant 0.000000e+00 : f32
    %27 = vector.broadcast %cst_51 : f32 to vector<64x8xf32>
    %cst_52 = arith.constant 0.000000e+00 : f32
    %28 = vector.broadcast %cst_52 : f32 to vector<64x8xf32>
    %c0_53 = arith.constant 0 : index
    %c7_54 = arith.constant 7 : index
    %c0_55 = arith.constant 0 : index
    %29 = vector.load %arg10[%c0_53, %c7_54, %c0_55] : memref<10x17x8xbf16, #tpu.memory_space<vmem>>, vector<8x8x8xbf16>
    %30 = vector.shape_cast %29 : vector<8x8x8xbf16> to vector<64x8xbf16>
    %c0_56 = arith.constant 0 : index
    %c0_57 = arith.constant 0 : index
    %31 = vector.load %arg3[%c0_56, %c0_57] : memref<72x16xbf16, #tpu.memory_space<vmem>>, vector<8x8xbf16>
    %cst_58 = arith.constant dense<0.000000e+00> : vector<64x8xf32>
    %32 = tpu.matmul %30, %31, %cst_58 {dimension_numbers = #tpu.dot_dimension_numbers<[1], [0], [0], [1], [0, 0, 1, 1], [], []>} : vector<64x8xbf16>, vector<8x8xbf16>, vector<64x8xf32> -> vector<64x8xf32>
    %33 = arith.addf %27, %32 : vector<64x8xf32>
    %c0_59 = arith.constant 0 : index
    %c8_60 = arith.constant 8 : index
    %c0_61 = arith.constant 0 : index
    %34 = vector.load %arg10[%c0_59, %c8_60, %c0_61] : memref<10x17x8xbf16, #tpu.memory_space<vmem>>, vector<8x8x8xbf16>
    %35 = vector.shape_cast %34 : vector<8x8x8xbf16> to vector<64x8xbf16>
    %c8_62 = arith.constant 8 : index
    %c0_63 = arith.constant 0 : index
    %36 = vector.load %arg3[%c8_62, %c0_63] : memref<72x16xbf16, #tpu.memory_space<vmem>>, vector<8x8xbf16>
    %cst_64 = arith.constant dense<0.000000e+00> : vector<64x8xf32>
    %37 = tpu.matmul %35, %36, %cst_64 {dimension_numbers = #tpu.dot_dimension_numbers<[1], [0], [0], [1], [0, 0, 1, 1], [], []>} : vector<64x8xbf16>, vector<8x8xbf16>, vector<64x8xf32> -> vector<64x8xf32>
    %38 = arith.addf %33, %37 : vector<64x8xf32>
    %c0_65 = arith.constant 0 : index
    %c9_66 = arith.constant 9 : index
    %c0_67 = arith.constant 0 : index
    %39 = vector.load %arg10[%c0_65, %c9_66, %c0_67] : memref<10x17x8xbf16, #tpu.memory_space<vmem>>, vector<8x8x8xbf16>
    %40 = vector.shape_cast %39 : vector<8x8x8xbf16> to vector<64x8xbf16>
    %c16_68 = arith.constant 16 : index
    %c0_69 = arith.constant 0 : index
    %41 = vector.load %arg3[%c16_68, %c0_69] : memref<72x16xbf16, #tpu.memory_space<vmem>>, vector<8x8xbf16>
    %cst_70 = arith.constant dense<0.000000e+00> : vector<64x8xf32>
    %42 = tpu.matmul %40, %41, %cst_70 {dimension_numbers = #tpu.dot_dimension_numbers<[1], [0], [0], [1], [0, 0, 1, 1], [], []>} : vector<64x8xbf16>, vector<8x8xbf16>, vector<64x8xf32> -> vector<64x8xf32>
    %43 = arith.addf %38, %42 : vector<64x8xf32>
    %c1_71 = arith.constant 1 : index
    %c7_72 = arith.constant 7 : index
    %c0_73 = arith.constant 0 : index
    %44 = vector.load %arg10[%c1_71, %c7_72, %c0_73] : memref<10x17x8xbf16, #tpu.memory_space<vmem>>, vector<8x8x8xbf16>
    %45 = vector.shape_cast %44 : vector<8x8x8xbf16> to vector<64x8xbf16>
    %c24 = arith.constant 24 : index
    %c0_74 = arith.constant 0 : index
    %46 = vector.load %arg3[%c24, %c0_74] : memref<72x16xbf16, #tpu.memory_space<vmem>>, vector<8x8xbf16>
    %cst_75 = arith.constant dense<0.000000e+00> : vector<64x8xf32>
    %47 = tpu.matmul %45, %46, %cst_75 {dimension_numbers = #tpu.dot_dimension_numbers<[1], [0], [0], [1], [0, 0, 1, 1], [], []>} : vector<64x8xbf16>, vector<8x8xbf16>, vector<64x8xf32> -> vector<64x8xf32>
    %48 = arith.addf %43, %47 : vector<64x8xf32>
    %c24_76 = arith.constant 24 : index
    %c8_77 = arith.constant 8 : index
    %49 = vector.load %arg3[%c24_76, %c8_77] : memref<72x16xbf16, #tpu.memory_space<vmem>>, vector<8x8xbf16>
    %cst_78 = arith.constant dense<0.000000e+00> : vector<64x8xf32>
    %50 = tpu.matmul %45, %49, %cst_78 {dimension_numbers = #tpu.dot_dimension_numbers<[1], [0], [0], [1], [0, 0, 1, 1], [], []>} : vector<64x8xbf16>, vector<8x8xbf16>, vector<64x8xf32> -> vector<64x8xf32>
    %51 = arith.addf %28, %50 : vector<64x8xf32>
    %c1_79 = arith.constant 1 : index
    %c8_80 = arith.constant 8 : index
    %c0_81 = arith.constant 0 : index
    %52 = vector.load %arg10[%c1_79, %c8_80, %c0_81] : memref<10x17x8xbf16, #tpu.memory_space<vmem>>, vector<8x8x8xbf16>
    %53 = vector.shape_cast %52 : vector<8x8x8xbf16> to vector<64x8xbf16>
    %c32 = arith.constant 32 : index
    %c0_82 = arith.constant 0 : index
    %54 = vector.load %arg3[%c32, %c0_82] : memref<72x16xbf16, #tpu.memory_space<vmem>>, vector<8x8xbf16>
    %cst_83 = arith.constant dense<0.000000e+00> : vector<64x8xf32>
    %55 = tpu.matmul %53, %54, %cst_83 {dimension_numbers = #tpu.dot_dimension_numbers<[1], [0], [0], [1], [0, 0, 1, 1], [], []>} : vector<64x8xbf16>, vector<8x8xbf16>, vector<64x8xf32> -> vector<64x8xf32>
    %56 = arith.addf %48, %55 : vector<64x8xf32>
    %c32_84 = arith.constant 32 : index
    %c8_85 = arith.constant 8 : index
    %57 = vector.load %arg3[%c32_84, %c8_85] : memref<72x16xbf16, #tpu.memory_space<vmem>>, vector<8x8xbf16>
    %cst_86 = arith.constant dense<0.000000e+00> : vector<64x8xf32>
    %58 = tpu.matmul %53, %57, %cst_86 {dimension_numbers = #tpu.dot_dimension_numbers<[1], [0], [0], [1], [0, 0, 1, 1], [], []>} : vector<64x8xbf16>, vector<8x8xbf16>, vector<64x8xf32> -> vector<64x8xf32>
    %59 = arith.addf %51, %58 : vector<64x8xf32>
    %c1_87 = arith.constant 1 : index
    %c9_88 = arith.constant 9 : index
    %c0_89 = arith.constant 0 : index
    %60 = vector.load %arg10[%c1_87, %c9_88, %c0_89] : memref<10x17x8xbf16, #tpu.memory_space<vmem>>, vector<8x8x8xbf16>
    %61 = vector.shape_cast %60 : vector<8x8x8xbf16> to vector<64x8xbf16>
    %c40 = arith.constant 40 : index
    %c0_90 = arith.constant 0 : index
    %62 = vector.load %arg3[%c40, %c0_90] : memref<72x16xbf16, #tpu.memory_space<vmem>>, vector<8x8xbf16>
    %cst_91 = arith.constant dense<0.000000e+00> : vector<64x8xf32>
    %63 = tpu.matmul %61, %62, %cst_91 {dimension_numbers = #tpu.dot_dimension_numbers<[1], [0], [0], [1], [0, 0, 1, 1], [], []>} : vector<64x8xbf16>, vector<8x8xbf16>, vector<64x8xf32> -> vector<64x8xf32>
    %64 = arith.addf %56, %63 : vector<64x8xf32>
    %c40_92 = arith.constant 40 : index
    %c8_93 = arith.constant 8 : index
    %65 = vector.load %arg3[%c40_92, %c8_93] : memref<72x16xbf16, #tpu.memory_space<vmem>>, vector<8x8xbf16>
    %cst_94 = arith.constant dense<0.000000e+00> : vector<64x8xf32>
    %66 = tpu.matmul %61, %65, %cst_94 {dimension_numbers = #tpu.dot_dimension_numbers<[1], [0], [0], [1], [0, 0, 1, 1], [], []>} : vector<64x8xbf16>, vector<8x8xbf16>, vector<64x8xf32> -> vector<64x8xf32>
    %67 = arith.addf %59, %66 : vector<64x8xf32>
    %c2 = arith.constant 2 : index
    %c7_95 = arith.constant 7 : index
    %c0_96 = arith.constant 0 : index
    %68 = vector.load %arg10[%c2, %c7_95, %c0_96] : memref<10x17x8xbf16, #tpu.memory_space<vmem>>, vector<8x8x8xbf16>
    %69 = vector.shape_cast %68 : vector<8x8x8xbf16> to vector<64x8xbf16>
    %c48 = arith.constant 48 : index
    %c8_97 = arith.constant 8 : index
    %70 = vector.load %arg3[%c48, %c8_97] : memref<72x16xbf16, #tpu.memory_space<vmem>>, vector<8x8xbf16>
    %cst_98 = arith.constant dense<0.000000e+00> : vector<64x8xf32>
    %71 = tpu.matmul %69, %70, %cst_98 {dimension_numbers = #tpu.dot_dimension_numbers<[1], [0], [0], [1], [0, 0, 1, 1], [], []>} : vector<64x8xbf16>, vector<8x8xbf16>, vector<64x8xf32> -> vector<64x8xf32>
    %72 = arith.addf %67, %71 : vector<64x8xf32>
    %c2_99 = arith.constant 2 : index
    %c8_100 = arith.constant 8 : index
    %c0_101 = arith.constant 0 : index
    %73 = vector.load %arg10[%c2_99, %c8_100, %c0_101] : memref<10x17x8xbf16, #tpu.memory_space<vmem>>, vector<8x8x8xbf16>
    %74 = vector.shape_cast %73 : vector<8x8x8xbf16> to vector<64x8xbf16>
    %c56 = arith.constant 56 : index
    %c8_102 = arith.constant 8 : index
    %75 = vector.load %arg3[%c56, %c8_102] : memref<72x16xbf16, #tpu.memory_space<vmem>>, vector<8x8xbf16>
    %cst_103 = arith.constant dense<0.000000e+00> : vector<64x8xf32>
    %76 = tpu.matmul %74, %75, %cst_103 {dimension_numbers = #tpu.dot_dimension_numbers<[1], [0], [0], [1], [0, 0, 1, 1], [], []>} : vector<64x8xbf16>, vector<8x8xbf16>, vector<64x8xf32> -> vector<64x8xf32>
    %77 = arith.addf %72, %76 : vector<64x8xf32>
    %c2_104 = arith.constant 2 : index
    %c9_105 = arith.constant 9 : index
    %c0_106 = arith.constant 0 : index
    %78 = vector.load %arg10[%c2_104, %c9_105, %c0_106] : memref<10x17x8xbf16, #tpu.memory_space<vmem>>, vector<8x8x8xbf16>
    %79 = vector.shape_cast %78 : vector<8x8x8xbf16> to vector<64x8xbf16>
    %c64 = arith.constant 64 : index
    %c8_107 = arith.constant 8 : index
    %80 = vector.load %arg3[%c64, %c8_107] : memref<72x16xbf16, #tpu.memory_space<vmem>>, vector<8x8xbf16>
    %cst_108 = arith.constant dense<0.000000e+00> : vector<64x8xf32>
    %81 = tpu.matmul %79, %80, %cst_108 {dimension_numbers = #tpu.dot_dimension_numbers<[1], [0], [0], [1], [0, 0, 1, 1], [], []>} : vector<64x8xbf16>, vector<8x8xbf16>, vector<64x8xf32> -> vector<64x8xf32>
    %82 = arith.addf %77, %81 : vector<64x8xf32>
    %c0_109 = arith.constant 0 : index
    %c0_110 = arith.constant 0 : index
    %83 = vector.load %arg4[%c0_109, %c0_110] : memref<1x16xf32, #tpu.memory_space<vmem>>, vector<1x8xf32>
    %84 = vector.broadcast %83 : vector<1x8xf32> to vector<64x8xf32>
    %85 = arith.addf %64, %84 : vector<64x8xf32>
    %86 = arith.truncf %85 : vector<64x8xf32> to vector<64x8xbf16>
    %c0_111 = arith.constant 0 : index
    %c8_112 = arith.constant 8 : index
    %87 = vector.load %arg4[%c0_111, %c8_112] : memref<1x16xf32, #tpu.memory_space<vmem>>, vector<1x8xf32>
    %88 = vector.broadcast %87 : vector<1x8xf32> to vector<64x8xf32>
    %89 = arith.addf %82, %88 : vector<64x8xf32>
    %90 = arith.truncf %89 : vector<64x8xf32> to vector<64x8xbf16>
    %91 = vector.extract_strided_slice %86 {offsets = [0, 0], sizes = [64, 4], strides = [1, 1]} : vector<64x8xbf16> to vector<64x4xbf16>
    %92 = vector.shape_cast %91 : vector<64x4xbf16> to vector<8x8x4xbf16>
    %c1_113 = arith.constant 1 : index
    %c0_114 = arith.constant 0 : index
    %c8_115 = arith.constant 8 : index
    %c0_116 = arith.constant 0 : index
    %93 = vector.load %arg11[%c1_113, %c0_114, %c8_115, %c0_116] : memref<10x2x17x16xbf16, #tpu.memory_space<vmem>>, vector<8x1x8x4xbf16>
    %94 = vector.shape_cast %93 : vector<8x1x8x4xbf16> to vector<8x8x4xbf16>
    %95 = vector.shape_cast %92 : vector<8x8x4xbf16> to vector<8x1x8x4xbf16>
    tpu.vector_store %arg11[%c1_113, %c0_114, %c8_115, %c0_116], %95 {strides = array<i32>} : memref<10x2x17x16xbf16, #tpu.memory_space<vmem>>, vector<8x1x8x4xbf16>,
    %96 = vector.extract_strided_slice %86 {offsets = [0, 4], sizes = [64, 4], strides = [1, 1]} : vector<64x8xbf16> to vector<64x4xbf16>
    %97 = vector.shape_cast %96 : vector<64x4xbf16> to vector<8x8x4xbf16>
    %c1_117 = arith.constant 1 : index
    %c0_118 = arith.constant 0 : index
    %c8_119 = arith.constant 8 : index
    %c8_120 = arith.constant 8 : index
    %98 = vector.load %arg11[%c1_117, %c0_118, %c8_119, %c8_120] : memref<10x2x17x16xbf16, #tpu.memory_space<vmem>>, vector<8x1x8x4xbf16>
    %99 = vector.shape_cast %98 : vector<8x1x8x4xbf16> to vector<8x8x4xbf16>
    %100 = vector.shape_cast %97 : vector<8x8x4xbf16> to vector<8x1x8x4xbf16>
    tpu.vector_store %arg11[%c1_117, %c0_118, %c8_119, %c8_120], %100 {strides = array<i32>} : memref<10x2x17x16xbf16, #tpu.memory_space<vmem>>, vector<8x1x8x4xbf16>,
    %101 = vector.extract_strided_slice %90 {offsets = [0, 0], sizes = [64, 4], strides = [1, 1]} : vector<64x8xbf16> to vector<64x4xbf16>
    %102 = vector.shape_cast %101 : vector<64x4xbf16> to vector<8x8x4xbf16>
    %c1_121 = arith.constant 1 : index
    %c1_122 = arith.constant 1 : index
    %c8_123 = arith.constant 8 : index
    %c0_124 = arith.constant 0 : index
    %103 = vector.load %arg11[%c1_121, %c1_122, %c8_123, %c0_124] : memref<10x2x17x16xbf16, #tpu.memory_space<vmem>>, vector<8x1x8x4xbf16>
    %104 = vector.shape_cast %103 : vector<8x1x8x4xbf16> to vector<8x8x4xbf16>
    %105 = vector.shape_cast %102 : vector<8x8x4xbf16> to vector<8x1x8x4xbf16>
    tpu.vector_store %arg11[%c1_121, %c1_122, %c8_123, %c0_124], %105 {strides = array<i32>} : memref<10x2x17x16xbf16, #tpu.memory_space<vmem>>, vector<8x1x8x4xbf16>,
    %106 = vector.extract_strided_slice %90 {offsets = [0, 4], sizes = [64, 4], strides = [1, 1]} : vector<64x8xbf16> to vector<64x4xbf16>
    %107 = vector.shape_cast %106 : vector<64x4xbf16> to vector<8x8x4xbf16>
    %c1_125 = arith.constant 1 : index
    %c1_126 = arith.constant 1 : index
    %c8_127 = arith.constant 8 : index
    %c8_128 = arith.constant 8 : index
    %108 = vector.load %arg11[%c1_125, %c1_126, %c8_127, %c8_128] : memref<10x2x17x16xbf16, #tpu.memory_space<vmem>>, vector<8x1x8x4xbf16>
    %109 = vector.shape_cast %108 : vector<8x1x8x4xbf16> to vector<8x8x4xbf16>
    %110 = vector.shape_cast %107 : vector<8x8x4xbf16> to vector<8x1x8x4xbf16>
    tpu.vector_store %arg11[%c1_125, %c1_126, %c8_127, %c8_128], %110 {strides = array<i32>} : memref<10x2x17x16xbf16, #tpu.memory_space<vmem>>, vector<8x1x8x4xbf16>,
    %c0_129 = arith.constant 0 : index
    %c0_130 = arith.constant 0 : index
    %c0_131 = arith.constant 0 : index
    %c0_132 = arith.constant 0 : index
    %111 = vector.load %arg2[%c0_129, %c0_130, %c0_131, %c0_132] : memref<1x16x8x8xbf16, #tpu.memory_space<vmem>>, vector<1x16x8x8xbf16>
    %112 = vector.shape_cast %111 : vector<1x16x8x8xbf16> to vector<16x8x8xbf16>
    %113 = vector.shape_cast %112 : vector<16x8x8xbf16> to vector<8x2x8x8xbf16>
    %114 = vector.extract_strided_slice %113 {offsets = [0, 0, 0, 0], sizes = [8, 2, 8, 4], strides = [1, 1, 1, 1]} : vector<8x2x8x8xbf16> to vector<8x2x8x4xbf16>
    %c1_133 = arith.constant 1 : index
    %c0_134 = arith.constant 0 : index
    %c8_135 = arith.constant 8 : index
    %c4 = arith.constant 4 : index
    %115 = vector.load %arg11[%c1_133, %c0_134, %c8_135, %c4] : memref<10x2x17x16xbf16, #tpu.memory_space<vmem>>, vector<8x2x8x4xbf16>
    tpu.vector_store %arg11[%c1_133, %c0_134, %c8_135, %c4], %114 {strides = array<i32>} : memref<10x2x17x16xbf16, #tpu.memory_space<vmem>>, vector<8x2x8x4xbf16>,
    %116 = vector.extract_strided_slice %113 {offsets = [0, 0, 0, 4], sizes = [8, 2, 8, 4], strides = [1, 1, 1, 1]} : vector<8x2x8x8xbf16> to vector<8x2x8x4xbf16>
    %c1_136 = arith.constant 1 : index
    %c0_137 = arith.constant 0 : index
    %c8_138 = arith.constant 8 : index
    %c12 = arith.constant 12 : index
    %117 = vector.load %arg11[%c1_136, %c0_137, %c8_138, %c12] : memref<10x2x17x16xbf16, #tpu.memory_space<vmem>>, vector<8x2x8x4xbf16>
    tpu.vector_store %arg11[%c1_136, %c0_137, %c8_138, %c12], %116 {strides = array<i32>} : memref<10x2x17x16xbf16, #tpu.memory_space<vmem>>, vector<8x2x8x4xbf16>,
    %cst_139 = arith.constant 0.000000e+00 : f32
    %118 = vector.broadcast %cst_139 : f32 to vector<128x8xf32>
    %c0_140 = arith.constant 0 : index
    %c0_141 = arith.constant 0 : index
    %c7_142 = arith.constant 7 : index
    %c8_143 = arith.constant 8 : index
    %119 = vector.load %arg11[%c0_140, %c0_141, %c7_142, %c8_143] : memref<10x2x17x16xbf16, #tpu.memory_space<vmem>>, vector<9x2x8x8xbf16>
    %120 = vector.shape_cast %119 : vector<9x2x8x8xbf16> to vector<18x8x8xbf16>
    %121 = vector.extract_strided_slice %120 {offsets = [1, 0, 0], sizes = [16, 8, 8], strides = [1, 1, 1]} : vector<18x8x8xbf16> to vector<16x8x8xbf16>
    %122 = vector.shape_cast %121 : vector<16x8x8xbf16> to vector<128x8xbf16>
    %c0_144 = arith.constant 0 : index
    %c0_145 = arith.constant 0 : index
    %123 = vector.load %arg5[%c0_144, %c0_145] : memref<96x8xbf16, #tpu.memory_space<vmem>>, vector<8x8xbf16>
    %cst_146 = arith.constant dense<0.000000e+00> : vector<128x8xf32>
    %124 = tpu.matmul %122, %123, %cst_146 {dimension_numbers = #tpu.dot_dimension_numbers<[1], [0], [0], [1], [0, 0, 1, 1], [], []>} : vector<128x8xbf16>, vector<8x8xbf16>, vector<128x8xf32> -> vector<128x8xf32>
    %125 = arith.addf %118, %124 : vector<128x8xf32>
    %c0_147 = arith.constant 0 : index
    %c0_148 = arith.constant 0 : index
    %c8_149 = arith.constant 8 : index
    %c0_150 = arith.constant 0 : index
    %126 = vector.load %arg11[%c0_147, %c0_148, %c8_149, %c0_150] : memref<10x2x17x16xbf16, #tpu.memory_space<vmem>>, vector<9x2x8x16xbf16>
    %127 = vector.shape_cast %126 : vector<9x2x8x16xbf16> to vector<18x8x16xbf16>
    %128 = vector.extract_strided_slice %127 {offsets = [1, 0, 0], sizes = [16, 8, 16], strides = [1, 1, 1]} : vector<18x8x16xbf16> to vector<16x8x16xbf16>
    %129 = vector.shape_cast %128 : vector<16x8x16xbf16> to vector<128x16xbf16>
    %c8_151 = arith.constant 8 : index
    %c0_152 = arith.constant 0 : index
    %130 = vector.load %arg5[%c8_151, %c0_152] : memref<96x8xbf16, #tpu.memory_space<vmem>>, vector<16x8xbf16>
    %cst_153 = arith.constant dense<0.000000e+00> : vector<128x8xf32>
    %131 = tpu.matmul %129, %130, %cst_153 {dimension_numbers = #tpu.dot_dimension_numbers<[1], [0], [0], [1], [0, 0, 1, 1], [], []>} : vector<128x16xbf16>, vector<16x8xbf16>, vector<128x8xf32> -> vector<128x8xf32>
    %132 = arith.addf %125, %131 : vector<128x8xf32>
    %c0_154 = arith.constant 0 : index
    %c0_155 = arith.constant 0 : index
    %c9_156 = arith.constant 9 : index
    %c0_157 = arith.constant 0 : index
    %133 = vector.load %arg11[%c0_154, %c0_155, %c9_156, %c0_157] : memref<10x2x17x16xbf16, #tpu.memory_space<vmem>>, vector<9x2x8x8xbf16>
    %134 = vector.shape_cast %133 : vector<9x2x8x8xbf16> to vector<18x8x8xbf16>
    %135 = vector.extract_strided_slice %134 {offsets = [1, 0, 0], sizes = [16, 8, 8], strides = [1, 1, 1]} : vector<18x8x8xbf16> to vector<16x8x8xbf16>
    %136 = vector.shape_cast %135 : vector<16x8x8xbf16> to vector<128x8xbf16>
    %c24_158 = arith.constant 24 : index
    %c0_159 = arith.constant 0 : index
    %137 = vector.load %arg5[%c24_158, %c0_159] : memref<96x8xbf16, #tpu.memory_space<vmem>>, vector<8x8xbf16>
    %cst_160 = arith.constant dense<0.000000e+00> : vector<128x8xf32>
    %138 = tpu.matmul %136, %137, %cst_160 {dimension_numbers = #tpu.dot_dimension_numbers<[1], [0], [0], [1], [0, 0, 1, 1], [], []>} : vector<128x8xbf16>, vector<8x8xbf16>, vector<128x8xf32> -> vector<128x8xf32>
    %139 = arith.addf %132, %138 : vector<128x8xf32>
    %c1_161 = arith.constant 1 : index
    %c0_162 = arith.constant 0 : index
    %c7_163 = arith.constant 7 : index
    %c8_164 = arith.constant 8 : index
    %140 = vector.load %arg11[%c1_161, %c0_162, %c7_163, %c8_164] : memref<10x2x17x16xbf16, #tpu.memory_space<vmem>>, vector<8x2x8x8xbf16>
    %141 = vector.shape_cast %140 : vector<8x2x8x8xbf16> to vector<128x8xbf16>
    %c32_165 = arith.constant 32 : index
    %c0_166 = arith.constant 0 : index
    %142 = vector.load %arg5[%c32_165, %c0_166] : memref<96x8xbf16, #tpu.memory_space<vmem>>, vector<8x8xbf16>
    %cst_167 = arith.constant dense<0.000000e+00> : vector<128x8xf32>
    %143 = tpu.matmul %141, %142, %cst_167 {dimension_numbers = #tpu.dot_dimension_numbers<[1], [0], [0], [1], [0, 0, 1, 1], [], []>} : vector<128x8xbf16>, vector<8x8xbf16>, vector<128x8xf32> -> vector<128x8xf32>
    %144 = arith.addf %139, %143 : vector<128x8xf32>
    %c1_168 = arith.constant 1 : index
    %c0_169 = arith.constant 0 : index
    %c8_170 = arith.constant 8 : index
    %c0_171 = arith.constant 0 : index
    %145 = vector.load %arg11[%c1_168, %c0_169, %c8_170, %c0_171] : memref<10x2x17x16xbf16, #tpu.memory_space<vmem>>, vector<8x2x8x16xbf16>
    %146 = vector.shape_cast %145 : vector<8x2x8x16xbf16> to vector<128x16xbf16>
    %c40_172 = arith.constant 40 : index
    %c0_173 = arith.constant 0 : index
    %147 = vector.load %arg5[%c40_172, %c0_173] : memref<96x8xbf16, #tpu.memory_space<vmem>>, vector<16x8xbf16>
    %cst_174 = arith.constant dense<0.000000e+00> : vector<128x8xf32>
    %148 = tpu.matmul %146, %147, %cst_174 {dimension_numbers = #tpu.dot_dimension_numbers<[1], [0], [0], [1], [0, 0, 1, 1], [], []>} : vector<128x16xbf16>, vector<16x8xbf16>, vector<128x8xf32> -> vector<128x8xf32>
    %149 = arith.addf %144, %148 : vector<128x8xf32>
    %c1_175 = arith.constant 1 : index
    %c0_176 = arith.constant 0 : index
    %c9_177 = arith.constant 9 : index
    %c0_178 = arith.constant 0 : index
    %150 = vector.load %arg11[%c1_175, %c0_176, %c9_177, %c0_178] : memref<10x2x17x16xbf16, #tpu.memory_space<vmem>>, vector<8x2x8x8xbf16>
    %151 = vector.shape_cast %150 : vector<8x2x8x8xbf16> to vector<128x8xbf16>
    %c56_179 = arith.constant 56 : index
    %c0_180 = arith.constant 0 : index
    %152 = vector.load %arg5[%c56_179, %c0_180] : memref<96x8xbf16, #tpu.memory_space<vmem>>, vector<8x8xbf16>
    %cst_181 = arith.constant dense<0.000000e+00> : vector<128x8xf32>
    %153 = tpu.matmul %151, %152, %cst_181 {dimension_numbers = #tpu.dot_dimension_numbers<[1], [0], [0], [1], [0, 0, 1, 1], [], []>} : vector<128x8xbf16>, vector<8x8xbf16>, vector<128x8xf32> -> vector<128x8xf32>
    %154 = arith.addf %149, %153 : vector<128x8xf32>
    %c1_182 = arith.constant 1 : index
    %c0_183 = arith.constant 0 : index
    %c7_184 = arith.constant 7 : index
    %c8_185 = arith.constant 8 : index
    %155 = vector.load %arg11[%c1_182, %c0_183, %c7_184, %c8_185] : memref<10x2x17x16xbf16, #tpu.memory_space<vmem>>, vector<9x2x8x8xbf16>
    %156 = vector.shape_cast %155 : vector<9x2x8x8xbf16> to vector<18x8x8xbf16>
    %157 = vector.extract_strided_slice %156 {offsets = [1, 0, 0], sizes = [16, 8, 8], strides = [1, 1, 1]} : vector<18x8x8xbf16> to vector<16x8x8xbf16>
    %158 = vector.shape_cast %157 : vector<16x8x8xbf16> to vector<128x8xbf16>
    %c64_186 = arith.constant 64 : index
    %c0_187 = arith.constant 0 : index
    %159 = vector.load %arg5[%c64_186, %c0_187] : memref<96x8xbf16, #tpu.memory_space<vmem>>, vector<8x8xbf16>
    %cst_188 = arith.constant dense<0.000000e+00> : vector<128x8xf32>
    %160 = tpu.matmul %158, %159, %cst_188 {dimension_numbers = #tpu.dot_dimension_numbers<[1], [0], [0], [1], [0, 0, 1, 1], [], []>} : vector<128x8xbf16>, vector<8x8xbf16>, vector<128x8xf32> -> vector<128x8xf32>
    %161 = arith.addf %154, %160 : vector<128x8xf32>
    %c1_189 = arith.constant 1 : index
    %c0_190 = arith.constant 0 : index
    %c8_191 = arith.constant 8 : index
    %c0_192 = arith.constant 0 : index
    %162 = vector.load %arg11[%c1_189, %c0_190, %c8_191, %c0_192] : memref<10x2x17x16xbf16, #tpu.memory_space<vmem>>, vector<9x2x8x16xbf16>
    %163 = vector.shape_cast %162 : vector<9x2x8x16xbf16> to vector<18x8x16xbf16>
    %164 = vector.extract_strided_slice %163 {offsets = [1, 0, 0], sizes = [16, 8, 16], strides = [1, 1, 1]} : vector<18x8x16xbf16> to vector<16x8x16xbf16>
    %165 = vector.shape_cast %164 : vector<16x8x16xbf16> to vector<128x16xbf16>
    %c72 = arith.constant 72 : index
    %c0_193 = arith.constant 0 : index
    %166 = vector.load %arg5[%c72, %c0_193] : memref<96x8xbf16, #tpu.memory_space<vmem>>, vector<16x8xbf16>
    %cst_194 = arith.constant dense<0.000000e+00> : vector<128x8xf32>
    %167 = tpu.matmul %165, %166, %cst_194 {dimension_numbers = #tpu.dot_dimension_numbers<[1], [0], [0], [1], [0, 0, 1, 1], [], []>} : vector<128x16xbf16>, vector<16x8xbf16>, vector<128x8xf32> -> vector<128x8xf32>
    %168 = arith.addf %161, %167 : vector<128x8xf32>
    %c1_195 = arith.constant 1 : index
    %c0_196 = arith.constant 0 : index
    %c9_197 = arith.constant 9 : index
    %c0_198 = arith.constant 0 : index
    %169 = vector.load %arg11[%c1_195, %c0_196, %c9_197, %c0_198] : memref<10x2x17x16xbf16, #tpu.memory_space<vmem>>, vector<9x2x8x8xbf16>
    %170 = vector.shape_cast %169 : vector<9x2x8x8xbf16> to vector<18x8x8xbf16>
    %171 = vector.extract_strided_slice %170 {offsets = [1, 0, 0], sizes = [16, 8, 8], strides = [1, 1, 1]} : vector<18x8x8xbf16> to vector<16x8x8xbf16>
    %172 = vector.shape_cast %171 : vector<16x8x8xbf16> to vector<128x8xbf16>
    %c88 = arith.constant 88 : index
    %c0_199 = arith.constant 0 : index
    %173 = vector.load %arg5[%c88, %c0_199] : memref<96x8xbf16, #tpu.memory_space<vmem>>, vector<8x8xbf16>
    %cst_200 = arith.constant dense<0.000000e+00> : vector<128x8xf32>
    %174 = tpu.matmul %172, %173, %cst_200 {dimension_numbers = #tpu.dot_dimension_numbers<[1], [0], [0], [1], [0, 0, 1, 1], [], []>} : vector<128x8xbf16>, vector<8x8xbf16>, vector<128x8xf32> -> vector<128x8xf32>
    %175 = arith.addf %168, %174 : vector<128x8xf32>
    %c0_201 = arith.constant 0 : index
    %c0_202 = arith.constant 0 : index
    %176 = vector.load %arg6[%c0_201, %c0_202] : memref<1x8xf32, #tpu.memory_space<vmem>>, vector<1x8xf32>
    %177 = vector.broadcast %176 : vector<1x8xf32> to vector<128x8xf32>
    %178 = arith.addf %175, %177 : vector<128x8xf32>
    %cst_203 = arith.constant 0.000000e+00 : f32
    %179 = vector.broadcast %cst_203 : f32 to vector<128x8xf32>
    %180 = arith.maximumf %178, %179 : vector<128x8xf32>
    %181 = arith.truncf %180 : vector<128x8xf32> to vector<128x8xbf16>
    %182 = vector.shape_cast %181 : vector<128x8xbf16> to vector<16x8x8xbf16>
    %c1_204 = arith.constant 1 : index
    %c8_205 = arith.constant 8 : index
    %c0_206 = arith.constant 0 : index
    %183 = vector.load %arg12[%c1_204, %c8_205, %c0_206] : memref<18x17x8xbf16, #tpu.memory_space<vmem>>, vector<16x8x8xbf16>
    tpu.vector_store %arg12[%c1_204, %c8_205, %c0_206], %182 {strides = array<i32>} : memref<18x17x8xbf16, #tpu.memory_space<vmem>>, vector<16x8x8xbf16>,
    %cst_207 = arith.constant 0.000000e+00 : f32
    %184 = vector.broadcast %cst_207 : f32 to vector<128x8xf32>
    %c0_208 = arith.constant 0 : index
    %c7_209 = arith.constant 7 : index
    %c4_210 = arith.constant 4 : index
    %185 = vector.load %arg12[%c0_208, %c7_209, %c4_210] : memref<18x17x8xbf16, #tpu.memory_space<vmem>>, vector<16x8x4xbf16>
    %186 = vector.shape_cast %185 : vector<16x8x4xbf16> to vector<128x4xbf16>
    %c0_211 = arith.constant 0 : index
    %c0_212 = arith.constant 0 : index
    %187 = vector.load %arg7[%c0_211, %c0_212] : memref<48x8xbf16, #tpu.memory_space<vmem>>, vector<4x8xbf16>
    %cst_213 = arith.constant dense<0.000000e+00> : vector<128x8xf32>
    %188 = tpu.matmul %186, %187, %cst_213 {dimension_numbers = #tpu.dot_dimension_numbers<[1], [0], [0], [1], [0, 0, 1, 1], [], []>} : vector<128x4xbf16>, vector<4x8xbf16>, vector<128x8xf32> -> vector<128x8xf32>
    %189 = arith.addf %184, %188 : vector<128x8xf32>
    %c0_214 = arith.constant 0 : index
    %c8_215 = arith.constant 8 : index
    %c0_216 = arith.constant 0 : index
    %190 = vector.load %arg12[%c0_214, %c8_215, %c0_216] : memref<18x17x8xbf16, #tpu.memory_space<vmem>>, vector<16x8x8xbf16>
    %191 = vector.shape_cast %190 : vector<16x8x8xbf16> to vector<128x8xbf16>
    %c4_217 = arith.constant 4 : index
    %c0_218 = arith.constant 0 : index
    %192 = vector.load %arg7[%c4_217, %c0_218] : memref<48x8xbf16, #tpu.memory_space<vmem>>, vector<8x8xbf16>
    %cst_219 = arith.constant dense<0.000000e+00> : vector<128x8xf32>
    %193 = tpu.matmul %191, %192, %cst_219 {dimension_numbers = #tpu.dot_dimension_numbers<[1], [0], [0], [1], [0, 0, 1, 1], [], []>} : vector<128x8xbf16>, vector<8x8xbf16>, vector<128x8xf32> -> vector<128x8xf32>
    %194 = arith.addf %189, %193 : vector<128x8xf32>
    %c0_220 = arith.constant 0 : index
    %c9_221 = arith.constant 9 : index
    %c0_222 = arith.constant 0 : index
    %195 = vector.load %arg12[%c0_220, %c9_221, %c0_222] : memref<18x17x8xbf16, #tpu.memory_space<vmem>>, vector<16x8x4xbf16>
    %196 = vector.shape_cast %195 : vector<16x8x4xbf16> to vector<128x4xbf16>
    %c12_223 = arith.constant 12 : index
    %c0_224 = arith.constant 0 : index
    %197 = vector.load %arg7[%c12_223, %c0_224] : memref<48x8xbf16, #tpu.memory_space<vmem>>, vector<4x8xbf16>
    %cst_225 = arith.constant dense<0.000000e+00> : vector<128x8xf32>
    %198 = tpu.matmul %196, %197, %cst_225 {dimension_numbers = #tpu.dot_dimension_numbers<[1], [0], [0], [1], [0, 0, 1, 1], [], []>} : vector<128x4xbf16>, vector<4x8xbf16>, vector<128x8xf32> -> vector<128x8xf32>
    %199 = arith.addf %194, %198 : vector<128x8xf32>
    %c1_226 = arith.constant 1 : index
    %c7_227 = arith.constant 7 : index
    %c4_228 = arith.constant 4 : index
    %200 = vector.load %arg12[%c1_226, %c7_227, %c4_228] : memref<18x17x8xbf16, #tpu.memory_space<vmem>>, vector<16x8x4xbf16>
    %201 = vector.shape_cast %200 : vector<16x8x4xbf16> to vector<128x4xbf16>
    %c16_229 = arith.constant 16 : index
    %c0_230 = arith.constant 0 : index
    %202 = vector.load %arg7[%c16_229, %c0_230] : memref<48x8xbf16, #tpu.memory_space<vmem>>, vector<4x8xbf16>
    %cst_231 = arith.constant dense<0.000000e+00> : vector<128x8xf32>
    %203 = tpu.matmul %201, %202, %cst_231 {dimension_numbers = #tpu.dot_dimension_numbers<[1], [0], [0], [1], [0, 0, 1, 1], [], []>} : vector<128x4xbf16>, vector<4x8xbf16>, vector<128x8xf32> -> vector<128x8xf32>
    %204 = arith.addf %199, %203 : vector<128x8xf32>
    %c1_232 = arith.constant 1 : index
    %c8_233 = arith.constant 8 : index
    %c0_234 = arith.constant 0 : index
    %205 = vector.load %arg12[%c1_232, %c8_233, %c0_234] : memref<18x17x8xbf16, #tpu.memory_space<vmem>>, vector<16x8x8xbf16>
    %206 = vector.shape_cast %205 : vector<16x8x8xbf16> to vector<128x8xbf16>
    %c20 = arith.constant 20 : index
    %c0_235 = arith.constant 0 : index
    %207 = vector.load %arg7[%c20, %c0_235] : memref<48x8xbf16, #tpu.memory_space<vmem>>, vector<8x8xbf16>
    %cst_236 = arith.constant dense<0.000000e+00> : vector<128x8xf32>
    %208 = tpu.matmul %206, %207, %cst_236 {dimension_numbers = #tpu.dot_dimension_numbers<[1], [0], [0], [1], [0, 0, 1, 1], [], []>} : vector<128x8xbf16>, vector<8x8xbf16>, vector<128x8xf32> -> vector<128x8xf32>
    %209 = arith.addf %204, %208 : vector<128x8xf32>
    %c1_237 = arith.constant 1 : index
    %c9_238 = arith.constant 9 : index
    %c0_239 = arith.constant 0 : index
    %210 = vector.load %arg12[%c1_237, %c9_238, %c0_239] : memref<18x17x8xbf16, #tpu.memory_space<vmem>>, vector<16x8x4xbf16>
    %211 = vector.shape_cast %210 : vector<16x8x4xbf16> to vector<128x4xbf16>
    %c28 = arith.constant 28 : index
    %c0_240 = arith.constant 0 : index
    %212 = vector.load %arg7[%c28, %c0_240] : memref<48x8xbf16, #tpu.memory_space<vmem>>, vector<4x8xbf16>
    %cst_241 = arith.constant dense<0.000000e+00> : vector<128x8xf32>
    %213 = tpu.matmul %211, %212, %cst_241 {dimension_numbers = #tpu.dot_dimension_numbers<[1], [0], [0], [1], [0, 0, 1, 1], [], []>} : vector<128x4xbf16>, vector<4x8xbf16>, vector<128x8xf32> -> vector<128x8xf32>
    %214 = arith.addf %209, %213 : vector<128x8xf32>
    %c2_242 = arith.constant 2 : index
    %c7_243 = arith.constant 7 : index
    %c4_244 = arith.constant 4 : index
    %215 = vector.load %arg12[%c2_242, %c7_243, %c4_244] : memref<18x17x8xbf16, #tpu.memory_space<vmem>>, vector<16x8x4xbf16>
    %216 = vector.shape_cast %215 : vector<16x8x4xbf16> to vector<128x4xbf16>
    %c32_245 = arith.constant 32 : index
    %c0_246 = arith.constant 0 : index
    %217 = vector.load %arg7[%c32_245, %c0_246] : memref<48x8xbf16, #tpu.memory_space<vmem>>, vector<4x8xbf16>
    %cst_247 = arith.constant dense<0.000000e+00> : vector<128x8xf32>
    %218 = tpu.matmul %216, %217, %cst_247 {dimension_numbers = #tpu.dot_dimension_numbers<[1], [0], [0], [1], [0, 0, 1, 1], [], []>} : vector<128x4xbf16>, vector<4x8xbf16>, vector<128x8xf32> -> vector<128x8xf32>
    %219 = arith.addf %214, %218 : vector<128x8xf32>
    %c2_248 = arith.constant 2 : index
    %c8_249 = arith.constant 8 : index
    %c0_250 = arith.constant 0 : index
    %220 = vector.load %arg12[%c2_248, %c8_249, %c0_250] : memref<18x17x8xbf16, #tpu.memory_space<vmem>>, vector<16x8x8xbf16>
    %221 = vector.shape_cast %220 : vector<16x8x8xbf16> to vector<128x8xbf16>
    %c36 = arith.constant 36 : index
    %c0_251 = arith.constant 0 : index
    %222 = vector.load %arg7[%c36, %c0_251] : memref<48x8xbf16, #tpu.memory_space<vmem>>, vector<8x8xbf16>
    %cst_252 = arith.constant dense<0.000000e+00> : vector<128x8xf32>
    %223 = tpu.matmul %221, %222, %cst_252 {dimension_numbers = #tpu.dot_dimension_numbers<[1], [0], [0], [1], [0, 0, 1, 1], [], []>} : vector<128x8xbf16>, vector<8x8xbf16>, vector<128x8xf32> -> vector<128x8xf32>
    %224 = arith.addf %219, %223 : vector<128x8xf32>
    %c2_253 = arith.constant 2 : index
    %c9_254 = arith.constant 9 : index
    %c0_255 = arith.constant 0 : index
    %225 = vector.load %arg12[%c2_253, %c9_254, %c0_255] : memref<18x17x8xbf16, #tpu.memory_space<vmem>>, vector<16x8x4xbf16>
    %226 = vector.shape_cast %225 : vector<16x8x4xbf16> to vector<128x4xbf16>
    %c44 = arith.constant 44 : index
    %c0_256 = arith.constant 0 : index
    %227 = vector.load %arg7[%c44, %c0_256] : memref<48x8xbf16, #tpu.memory_space<vmem>>, vector<4x8xbf16>
    %cst_257 = arith.constant dense<0.000000e+00> : vector<128x8xf32>
    %228 = tpu.matmul %226, %227, %cst_257 {dimension_numbers = #tpu.dot_dimension_numbers<[1], [0], [0], [1], [0, 0, 1, 1], [], []>} : vector<128x4xbf16>, vector<4x8xbf16>, vector<128x8xf32> -> vector<128x8xf32>
    %229 = arith.addf %224, %228 : vector<128x8xf32>
    %c0_258 = arith.constant 0 : index
    %c0_259 = arith.constant 0 : index
    %230 = vector.load %arg8[%c0_258, %c0_259] : memref<1x8xf32, #tpu.memory_space<vmem>>, vector<1x8xf32>
    %231 = vector.broadcast %230 : vector<1x8xf32> to vector<128x8xf32>
    %232 = arith.addf %229, %231 : vector<128x8xf32>
    %cst_260 = arith.constant 0.000000e+00 : f32
    %233 = vector.broadcast %cst_260 : f32 to vector<128x8xf32>
    %234 = arith.maximumf %232, %233 : vector<128x8xf32>
    %235 = arith.truncf %234 : vector<128x8xf32> to vector<128x8xbf16>
    %236 = vector.shape_cast %235 : vector<128x8xbf16> to vector<1x16x8x8xbf16>
    %c0_261 = arith.constant 0 : index
    %c0_262 = arith.constant 0 : index
    %c0_263 = arith.constant 0 : index
    %c0_264 = arith.constant 0 : index
    %237 = vector.load %arg9[%c0_261, %c0_262, %c0_263, %c0_264] : memref<1x16x8x8xbf16, #tpu.memory_space<vmem>>, vector<1x16x8x8xbf16>
    tpu.vector_store %arg9[%c0_261, %c0_262, %c0_263, %c0_264], %236 {strides = array<i32>} : memref<1x16x8x8xbf16, #tpu.memory_space<vmem>>, vector<1x16x8x8xbf16>,
    return
  }
  func.func @transform_0(%arg0: i32) -> (i32, i32, i32, i32) {
    %c0_i32 = arith.constant 0 : i32
    %c0_i32_0 = arith.constant 0 : i32
    %c0_i32_1 = arith.constant 0 : i32
    %c0_i32_2 = arith.constant 0 : i32
    return %arg0, %c0_i32, %c0_i32_0, %c0_i32_1 : i32, i32, i32, i32
  }
  func.func @transform_1(%arg0: i32) -> (i32, i32, i32, i32) {
    %c0_i32 = arith.constant 0 : i32
    %c0_i32_0 = arith.constant 0 : i32
    %c0_i32_1 = arith.constant 0 : i32
    %c0_i32_2 = arith.constant 0 : i32
    return %arg0, %c0_i32, %c0_i32_0, %c0_i32_1 : i32, i32, i32, i32
  }
  func.func @transform_2(%arg0: i32) -> (i32, i32) {
    %c0_i32 = arith.constant 0 : i32
    %c0_i32_0 = arith.constant 0 : i32
    %c0_i32_1 = arith.constant 0 : i32
    return %c0_i32, %c0_i32_0 : i32, i32
  }
  func.func @transform_3(%arg0: i32) -> (i32, i32) {
    %c0_i32 = arith.constant 0 : i32
    %c0_i32_0 = arith.constant 0 : i32
    %c0_i32_1 = arith.constant 0 : i32
    return %c0_i32, %c0_i32_0 : i32, i32
  }
  func.func @transform_4(%arg0: i32) -> (i32, i32) {
    %c0_i32 = arith.constant 0 : i32
    %c0_i32_0 = arith.constant 0 : i32
    %c0_i32_1 = arith.constant 0 : i32
    return %c0_i32, %c0_i32_0 : i32, i32
  }
  func.func @transform_5(%arg0: i32) -> (i32, i32) {
    %c0_i32 = arith.constant 0 : i32
    %c0_i32_0 = arith.constant 0 : i32
    %c0_i32_1 = arith.constant 0 : i32
    return %c0_i32, %c0_i32_0 : i32, i32
  }
  func.func @transform_6(%arg0: i32) -> (i32, i32) {
    %c0_i32 = arith.constant 0 : i32
    %c0_i32_0 = arith.constant 0 : i32
    %c0_i32_1 = arith.constant 0 : i32
    return %c0_i32, %c0_i32_0 : i32, i32
  }
  func.func @transform_7(%arg0: i32) -> (i32, i32) {
    %c0_i32 = arith.constant 0 : i32
    %c0_i32_0 = arith.constant 0 : i32
    %c0_i32_1 = arith.constant 0 : i32
    return %c0_i32, %c0_i32_0 : i32, i32
  }
  func.func @transform_8(%arg0: i32) -> (i32, i32, i32, i32) {
    %c0_i32 = arith.constant 0 : i32
    %c0_i32_0 = arith.constant 0 : i32
    %c0_i32_1 = arith.constant 0 : i32
    %c0_i32_2 = arith.constant 0 : i32
    return %arg0, %c0_i32, %c0_i32_0, %c0_i32_1 : i32, i32, i32, i32
  }
}

</mosaic_0001>

<bundles_post_ra>
// kernel: tile.18
= control target key start
LH: loop header
LB: loop body
LE: loop exit
PB: predicated region body
PF: predicated region fallthrough
CT: control target
= control target key end

     0   :  { %s22_s0 = inlined_call_operand.vmem [shape: f32[4], index: 0, kind: input, shape index: {}]   ;;  %s23_s1 = inlined_call_operand.vmem [shape: f32[4,4], index: 1, kind: output, shape index: {}]  }
   0x1   :  { %v4_v0 = vld [vmem:[%s22_s0] ss:$0 sm:$0xff] }
   0x2   :  { %5 = vst [vmem:[%s23_s1] sm:$0xf] %v4_v0 }

// kernel: tile.19
= control target key start
LH: loop header
LB: loop body
LE: loop exit
PB: predicated region body
PF: predicated region fallthrough
CT: control target
= control target key end

     0   :  { %vm7_vm0 = vcmask 31744   ;;  %s37_s8 = smov 4   ;;  %s38_s9 = smov 8   ;;  %vm13_vm1 = vcmask 130144   ;;  %vm19_vm2 = vcmask 97344   ;;  %vm25_vm3 = vcmask 64544   ;;  %s55_s0 = inlined_call_operand.vmem [shape: f32[4,4], index: 0, kind: input, shape index: {}]   ;;  %s56_s1 = inlined_call_operand.vmem [shape: f32[1,16], index: 1, kind: output, shape index: {}]  }
   0x1   :  { %v4_v0 = vld [vmem:[%s55_s0] sm:$0xf]  ;;  %s36_s0 = smov 12  }
   0x2   :  { %5 = vst [vmem:[#allocation1] sm:$0xf] %v4_v0 }
   0x9   :  { %v10_v1 = vld [vmem:[#allocation1 + $0x3] sm:$0x1]   ;;  %v22_v2 = vld [vmem:[#allocation1 + $0x1] sm:$0x1]   ;;  %v6_v3 = vld [vmem:[#allocation1] sm:$0x1]  }
   0xa   :  { %11 = vrot.lane.b32.xlu0 %v10_v1, %s36_s0  ;;  %23 = vrot.lane.b32.xlu1 %v22_v2, %s37_s8  ;;  %v16_v4 = vld [vmem:[#allocation1 + $0x2] sm:$0x1]   ;;  %8 = vst.msk [vmem:[#allocation0] sm:$0x1] %vm7_vm0, %v6_v3  }
   0xe   :  { %17 = vrot.lane.b32.xlu0 %v16_v4, %s38_s9 }
  0x7c   :  { %v12_v5 = vpop.permute.xlu0 %11   ;;  %v24_v6 = vpop.permute.xlu1 %23  }
  0x7d   :  { %14 = vst.msk [vmem:[#allocation0] sm:$0x1] %vm13_vm1, %v12_v5  }
  0x80   :  { %v18_v7 = vpop.permute.xlu0 %17  }
  0x81   :  { %20 = vst.msk [vmem:[#allocation0] sm:$0x1] %vm19_vm2, %v18_v7  }
  0x82   :  { %26 = vst.msk [vmem:[#allocation0] sm:$0x1] %vm25_vm3, %v24_v6  }
  0x89   :  { %v30_v8 = vld [vmem:[#allocation0] sm:$0x1] }
  0x8a   :  { %32 = vst [vmem:[%s56_s1] sm:$0x1] %v30_v8 }

// kernel: tile.23
= control target key start
LH: loop header
LB: loop body
LE: loop exit
PB: predicated region body
PF: predicated region fallthrough
CT: control target
= control target key end

     0   :  { %s22_s0 = inlined_call_operand.vmem [shape: f32[4], index: 0, kind: input, shape index: {}]   ;;  %s23_s1 = inlined_call_operand.vmem [shape: f32[2,4], index: 1, kind: output, shape index: {}]  }
   0x1   :  { %v4_v0 = vld [vmem:[%s22_s0] ss:$0 sm:$0xff] }
   0x2   :  { %5 = vst [vmem:[%s23_s1] sm:$0x3] %v4_v0 }

// kernel: tile.24
= control target key start
LH: loop header
LB: loop body
LE: loop exit
PB: predicated region body
PF: predicated region fallthrough
CT: control target
= control target key end

     0   :  { %vm7_vm0 = vcmask 31744   ;;  %vm13_vm1 = vcmask 64544   ;;  %s39_s0 = inlined_call_operand.vmem [shape: f32[2,4], index: 0, kind: input, shape index: {}]   ;;  %s40_s1 = inlined_call_operand.vmem [shape: f32[1,8], index: 1, kind: output, shape index: {}]  }
   0x1   :  { %v4_v0 = vld [vmem:[%s39_s0] sm:$0x3]  ;;  %s22_s0 = smov 4  }
   0x2   :  { %5 = vst [vmem:[#allocation1] sm:$0x3] %v4_v0 }
   0x9   :  { %v10_v1 = vld [vmem:[#allocation1 + $0x1] sm:$0x1]   ;;  %v6_v2 = vld [vmem:[#allocation1] sm:$0x1]  }
   0xa   :  { %11 = vrot.lane.b32.xlu0 %v10_v1, %s22_s0  ;;  %8 = vst.msk [vmem:[#allocation0] sm:$0x1] %vm7_vm0, %v6_v2  }
  0x7c   :  { %v12_v3 = vpop.permute.xlu0 %11  }
  0x7d   :  { %14 = vst.msk [vmem:[#allocation0] sm:$0x1] %vm13_vm1, %v12_v3  }
  0x84   :  { %v18_v4 = vld [vmem:[#allocation0] sm:$0x1] }
  0x85   :  { %20 = vst [vmem:[%s40_s1] sm:$0x1] %v18_v4 }

// kernel: unet_up_forward.1
= control target key start
LH: loop header
LB: loop body
LE: loop exit
PB: predicated region body
PF: predicated region fallthrough
CT: control target
= control target key end

     0   :  { %s11169_s27 = smov 0   ;;  %s13658_s0 = inlined_call_operand.vmem [shape: bf16[2,8,8,8], index: 0, kind: input, shape index: {}]   ;;  %s13659_s1 = inlined_call_operand.vmem [shape: bf16[2,16,8,8], index: 1, kind: input, shape index: {}]   ;;  %s13660_s2 = inlined_call_operand.vmem [shape: bf16[72,16], index: 2, kind: input, shape index: {}]   ;;  %s13661_s3 = inlined_call_operand.vmem [shape: f32[1,16], index: 3, kind: input, shape index: {}]   ;;  %s13662_s4 = inlined_call_operand.vmem [shape: bf16[96,8], index: 4, kind: input, shape index: {}]   ;;  %s13663_s5 = inlined_call_operand.vmem [shape: f32[1,8], index: 5, kind: input, shape index: {}]   ;;  %s13664_s6 = inlined_call_operand.vmem [shape: bf16[48,8], index: 6, kind: input, shape index: {}]   ;;  %s13665_s7 = inlined_call_operand.vmem [shape: f32[1,8], index: 7, kind: input, shape index: {}]   ;;  %s13666_s8 = inlined_call_operand.vmem [shape: bf16[2,16,8,8], index: 8, kind: output, shape index: {}]  }
   0x1 LB: > { %s9363_s28 = sadd.s32 4294967295, %s11117_s27   ;;  %p9367_p0 = scmp.ge.s32.totalorder %s11117_s27, 1  ;;  %s11117_s27 = sphi %s11169_s27, %s18_s27  }
   0x2   : > { %p272_p1 = scmp.lt.s32.totalorder %s11117_s27, 3 }
   0x4   : > { %p273_p2 = pnand %p9367_p0, %p272_p1 }
   0x6   : > { %276 = sbr.rel (%p273_p2) target bundleno = 1793 (0x701), region = 52 }
   0xd   : > { %v11180_v0 = vld [vmem:[%s13660_s2 + $0x10] sm:$0xf]  ;;  %v11185_v1 = vld [vmem:[%s13660_s2 + $0xc] sm:$0xf]  ;;  %vm844_vm0 = vcmask 1043456   ;;  %p11192_p3 = scmp.lt.s32.totalorder %s9363_s28, 1 }
   0xe   : > { %v9430_v2 = vcombine.low %v11180_v0, %v11180_v0  ;;  %v810_v3 = vld [vmem:[%s13660_s2 + $0x4] sm:$0xf]  ;;  %vm327_vm1 = vcmask 60416   ;;  %v11119_v5 = vmov 0   ;;  %v11217_v6 = vld [vmem:[%s13660_s2 + $0x14] sm:$0xf]  ;;  %v9435_v8 = vcombine.low %v11185_v1, %v11185_v1 }
   0xf   : > { %10987 = vmatprep.subr.msk.bf16.mxu0 %vm844_vm0, %v810_v3  ;;  %v846_v4 = vsel %vm844_vm0, %v810_v3, 0  ;;  %329 = vst.msk [vmem:[#allocation2 + $0x4] sm:$0xf] %vm327_vm1, %v11119_v5  ;;  %328 = vst.msk [vmem:[#allocation2] sm:$0xf] %vm327_vm1, %v11119_v5  ;;  %s11120_s18 = smov 120   ;;  %v9448_v9 = vcombine.low %v11217_v6, %v11217_v6 }
  0x10   : > { %337 = vst.msk [vmem:[#allocation2 + $0x6c] sm:$0xf] %vm327_vm1, %v11119_v5  ;;  %338 = vst.msk [vmem:[#allocation2 + $0x70] sm:$0xf] %vm327_vm1, %v11119_v5  ;;  %v809_v7 = vld [vmem:[%s13660_s2] sm:$0xf]  ;;  %1570 = vrot.lane.b32.xlu0 %v9430_v2, %s11120_s18  ;;  %10208 = vmatpush3.bf16.msra.mxu0 %v846_v4 }
  0x11   : > { %551 = vst.msk [vmem:[#allocation4] sm:$0xf] %vm327_vm1, %v11119_v5  ;;  %552 = vst.msk [vmem:[#allocation4 + $0x4] sm:$0xf] %vm327_vm1, %v11119_v5  ;;  %s13765_s28 = smov (!%p11192_p3, %s9363_s28), 1  ;;  %vm342_vm2 = vcmask 60419   ;;  %10988 = vmatprep.subr.msk.bf16.mxu0 %vm844_vm0, %v809_v7  ;;  %1945 = vrot.lane.b32.xlu1 %v9448_v9, %s11120_s18 }
  0x12   : > { %557 = vst.msk [vmem:[#allocation4 + $0xcc] sm:$0xf] %vm327_vm1, %v11119_v5  ;;  %558 = vst.msk [vmem:[#allocation4 + $0xd0] sm:$0xf] %vm327_vm1, %v11119_v5  ;;  %vm343_vm3 = vsmask.f32 7950 }
  0x13   : > { %v348_v10 = vld [vmem:[#allocation2 + $0xc] sm:$0x8]  ;;  %s9934_s19 = sshll.u32 %s13765_s28, 5  ;;  %vm11235_vm4 = vmand %vm342_vm2, %vm343_vm3  ;;  %v13677_v11 = vmov 0  ;;  %v351_v12 = vld [vmem:[#allocation2 + $0x18] sm:$0x8] }
  0x14   : > { %v13678_v11 = vsel %vm11235_vm4, 4294967295, %v13677_v11  ;;  %v354_v13 = vld [vmem:[#allocation2 + $0x24] sm:$0x8]  ;;  %s11242_s22 = scalar_lea.vmem %s13658_s0, %s9934_s19  ;;  %v349_v14 = vsel %vm11235_vm4, 0, %v348_v10  ;;  %v352_v15 = vsel %vm11235_vm4, 0, %v351_v12  ;;  %1643 = vrot.lane.b32.xlu0 %v9435_v8, %s11120_s18  ;;  %vm831_vm5 = vcmask 64512  }
  0x15   : > { %13679 = vst [vmem:[#allocation5_spill] sm:$0xff] %v13678_v11  ;;  %v355_v16 = vsel %vm11235_vm4, 0, %v354_v13  ;;  %v670_v17 = vld [vmem:[%s11242_s22] sm:$0xf]  ;;  %v671_v18 = vld [vmem:[%s11242_s22 + $0x4] sm:$0xf] }
  0x16   : > { %v672_v19 = vld [vmem:[%s11242_s22 + $0x8] sm:$0xf]  ;;  %350 = vst [vmem:[#allocation2 + $0xc] sm:$0x8] %v349_v14  ;;  %353 = vst [vmem:[#allocation2 + $0x18] sm:$0x8] %v352_v15 }
  0x17   : > { %356 = vst [vmem:[#allocation2 + $0x24] sm:$0x8] %v355_v16  ;;  %679 = vst.msk [vmem:[#allocation2 + $0x10] sm:$0xf] %vm327_vm1, %v670_v17  ;;  %v673_v20 = vld [vmem:[%s11242_s22 + $0xc] sm:$0xf] }
  0x18   : > { %680 = vst.msk [vmem:[#allocation2 + $0x1c] sm:$0xf] %vm327_vm1, %v671_v18  ;;  %681 = vst.msk [vmem:[#allocation2 + $0x28] sm:$0xf] %vm327_vm1, %v672_v19  ;;  %v674_v21 = vld [vmem:[%s11242_s22 + $0x10] sm:$0xf] }
  0x19   : > { %v675_v22 = vld [vmem:[%s11242_s22 + $0x14] sm:$0xf]  ;;  %v688_v23 = vld [vmem:[#allocation2 + $0x4] sm:$0xf]  ;;  %682 = vst.msk [vmem:[#allocation2 + $0x34] sm:$0xf] %vm327_vm1, %v673_v20 }
  0x1a   : > { %683 = vst.msk [vmem:[#allocation2 + $0x40] sm:$0xf] %vm327_vm1, %v674_v21  ;;  %v676_v24 = vld [vmem:[%s11242_s22 + $0x18] sm:$0xf]  ;;  %684 = vst.msk [vmem:[#allocation2 + $0x4c] sm:$0xf] %vm327_vm1, %v675_v22 }
  0x1b   : > { %v345_v25 = vld [vmem:[#allocation2] sm:$0x8]  ;;  %v711_v26 = vshrl.u32 %v688_v23, 16  ;;  %v714_v27 = vshll.u32 %v688_v23, 16  ;;  %685 = vst.msk [vmem:[#allocation2 + $0x58] sm:$0xf] %vm327_vm1, %v676_v24 }
  0x1c   : > { %v346_v28 = vsel %vm11235_vm4, 0, %v345_v25  ;;  %v11034_v29 = vld [vmem:[%s13660_s2 + $0x18] ss:$0 sps:$4 sm:$0xff]   ;;  %v357_v30 = vld [vmem:[#allocation2 + $0x30] sm:$0x8]  ;;  %v938_v39 = vsel %vm844_vm0, %v809_v7, 0 }
  0x1d   : > { %347 = vst [vmem:[#allocation2] sm:$0x8] %v346_v28  ;;  %v360_v31 = vld [vmem:[#allocation2 + $0x3c] sm:$0x8]  ;;  %v363_v32 = vld [vmem:[#allocation2 + $0x48] sm:$0x8]  ;;  %2160 = vrot.lane.b32.xlu1 %v11034_v29, %s11120_s18 }
  0x1e   : > { %v713_v33 = vrot.slane %v711_v26, 7  ;;  %v358_v34 = vsel %vm11235_vm4, 0, %v357_v30  ;;  %v361_v35 = vsel %vm11235_vm4, 0, %v360_v31  ;;  %v364_v36 = vsel %vm11235_vm4, 0, %v363_v32  ;;  %v366_v37 = vld [vmem:[#allocation2 + $0x54] sm:$0x8] }
  0x1f   : > { %359 = vst [vmem:[#allocation2 + $0x30] sm:$0x8] %v358_v34  ;;  %362 = vst [vmem:[#allocation2 + $0x3c] sm:$0x8] %v361_v35  ;;  %v367_v38 = vsel %vm11235_vm4, 0, %v366_v37  ;;  %vm330_vm8 = vcmask 57344  }
  0x20   : > { %365 = vst [vmem:[#allocation2 + $0x48] sm:$0x8] %v364_v36  ;;  %vm331_vm6 = vsmask.f32 256  ;;  %vm703_vm7 = vsmask.f32 4368  ;;  %v11280_v41 = vor.u32 %v714_v27, %v713_v33 }
  0x21   : > { %368 = vst [vmem:[#allocation2 + $0x54] sm:$0x8] %v367_v38  ;;  %v690_v40 = vld [vmem:[#allocation2 + $0x10] sm:$0xf]  ;;  %v692_v42 = vld [vmem:[#allocation2 + $0x1c] sm:$0xf]  ;;  %vm11294_vm9 = vmor %vm331_vm6, %vm703_vm7 }
  0x22   : > { %v694_v43 = vld [vmem:[#allocation2 + $0x28] sm:$0xf]  ;;  %v724_v44 = vshrl.u32 %v690_v40, 16  ;;  %v727_v45 = vshll.u32 %v690_v40, 16  ;;  %v9382_v46 = vcombine.low %v688_v23, %v690_v40  ;;  %v737_v47 = vshrl.u32 %v692_v42, 16  ;;  %vm11303_vm10 = vmand %vm330_vm8, %vm331_vm6  ;;  %s9935_s11 = sshll.u32 %s13765_s28, 6 }
  0x23   : > { %v696_v48 = vld [vmem:[#allocation2 + $0x34] sm:$0xf]  ;;  %v11285_v49 = vld [vmem:[%s13660_s2 + $0x8] sm:$0xf]  ;;  %v740_v50 = vshll.u32 %v692_v42, 16  ;;  %v750_v51 = vshrl.u32 %v694_v43, 16  ;;  %v9383_v53 = vcombine.low %v692_v42, %v694_v43  ;;  %s11501_s14 = scalar_lea.vmem %s13659_s1, %s9935_s11 }
  0x24   : > { %v753_v52 = vshll.u32 %v694_v43, 16  ;;  %v698_v54 = vld [vmem:[#allocation2 + $0x40] sm:$0xf]  ;;  %v726_v55 = vrot.slane %v724_v44, 7  ;;  %10209 = vmatprep.mubr.msk.bf16.mxu0 %vm831_vm5, %v9382_v46  ;;  %v739_v56 = vrot.slane %v737_v47, 7  ;;  %v763_v57 = vshrl.u32 %v696_v48, 16 }
  0x25   : > { %v766_v58 = vshll.u32 %v696_v48, 16  ;;  %v700_v59 = vld [vmem:[#allocation2 + $0x4c] sm:$0xf]  ;;  %v691_v61 = vld [vmem:[#allocation2 + $0x18] sm:$0x8]  ;;  %v752_v63 = vrot.slane %v750_v51, 7  ;;  %10210 = vmatmul.mubr.msk.bf16.vlgmr.msra.gmra.mrb[0].mxu0 %vm831_vm5, %v9383_v53  ;;  %v9384_v4 = vcombine.low %v696_v48, %v698_v54 }
  0x26   : > { %v689_v60 = vld [vmem:[#allocation2 + $0xc] sm:$0x8]  ;;  %v693_v62 = vld [vmem:[#allocation2 + $0x24] sm:$0x8]  ;;  %v776_v2 = vshrl.u32 %v698_v54, 16  ;;  %v779_v3 = vshll.u32 %v698_v54, 16  ;;  %v729_v8 = vor.u32 %v727_v45, %v726_v55  ;;  %v742_v9 = vor.u32 %v740_v50, %v739_v56  ;;  %10218 = vmatpush3.bf16.msra.mxu0 %v938_v39 }
  0x27   : > { %v702_v7 = vld [vmem:[#allocation2 + $0x58] sm:$0xf]  ;;  %v765_v10 = vrot.slane %v763_v57, 7  ;;  %v789_v12 = vshrl.u32 %v700_v59, 16  ;;  %v687_v13 = vld [vmem:[#allocation2] sm:$0x8]  ;;  %v755_v15 = vor.u32 %v753_v52, %v752_v63  ;;  %10213 = vmatprep.mubr.msk.bf16.mxu0 %vm831_vm5, %v9384_v4  ;;  %10989 = vmatprep.subr.msk.bf16.mxu0 %vm844_vm0, %v11285_v49 }
  0x28   : > { %v695_v14 = vld [vmem:[#allocation2 + $0x30] sm:$0x8]  ;;  %v778_v16 = vrot.slane %v776_v2, 7  ;;  %v792_v17 = vshll.u32 %v700_v59, 16  ;;  %v802_v18 = vshrl.u32 %v702_v7, 16  ;;  %v805_v21 = vshll.u32 %v702_v7, 16 }
  0x29   : > { %v697_v19 = vld [vmem:[#allocation2 + $0x3c] sm:$0x8]  ;;  %v791_v20 = vrot.slane %v789_v12, 7  ;;  %v9385_v22 = vcombine.low %v700_v59, %v702_v7  ;;  %v706_v23 = vshrl.u32 %v687_v13, 16  ;;  %v719_v26 = vshrl.u32 %v689_v60, 16  ;;  %s11121_s17 = smov 4  }
  0x2a   : > { %v804_v24 = vrot.slane %v802_v18, 7  ;;  %v732_v27 = vshrl.u32 %v691_v61, 16  ;;  %v745_v28 = vshrl.u32 %v693_v62, 16  ;;  %v699_v29 = vld [vmem:[#allocation2 + $0x48] sm:$0x8]  ;;  %v758_v31 = vshrl.u32 %v695_v14, 16 }
  0x2b   : > { %v9374_v30 = vrot.slane %v706_v23, 11  ;;  %v768_v32 = vor.u32 %v766_v58, %v765_v10  ;;  %v771_v33 = vshrl.u32 %v697_v19, 16  ;;  %v9375_v34 = vrot.slane %v719_v26, 11  ;;  %v333_v38 = vld [vmem:[#allocation2 + $0x8] sm:$0x1]  ;;  %s11122_s19 = smov 8  }
  0x2c   : > { %v9376_v35 = vrot.slane %v732_v27, 11  ;;  %v9377_v36 = vrot.slane %v745_v28, 11  ;;  %v781_v37 = vor.u32 %v779_v3, %v778_v16  ;;  %v9378_v40 = vrot.slane %v758_v31, 11  ;;  %v701_v43 = vld [vmem:[#allocation2 + $0x54] sm:$0x8]  ;;  %s11123_s25 = smov 124  }
  0x2d   : > { %v717_v39 = vsel %vm11294_vm9, %v9374_v30, %v11280_v41  ;;  %v9379_v42 = vrot.slane %v771_v33, 11  ;;  %v784_v44 = vshrl.u32 %v699_v29, 16  ;;  %v13682_v45 = vmov 0  ;;  %10214 = vmatmul.mubr.msk.bf16.gmra.mrb[4].mxu0 %vm831_vm5, %v9385_v22  ;;  %v378_v50 = vld [vmem:[#allocation2 + $0x14] sm:$0x1] }
  0x2e   : > { %v13683_v45 = vsel %vm11303_vm10, 4294967295, %v13682_v45  ;;  %v730_v46 = vsel %vm11294_vm9, %v9375_v34, %v729_v8  ;;  %v743_v47 = vsel %vm11294_vm9, %v9376_v35, %v742_v9  ;;  %v756_v41 = vsel %vm11294_vm9, %v9377_v36, %v755_v15  ;;  %v1005_v51 = vld [vmem:[#allocation2 + $0x4] sm:$0xf]  ;;  %v1007_v52 = vld [vmem:[#allocation2 + $0x10] sm:$0xf] }
  0x2f   : > { %13684 = vst [vmem:[#allocation6_spill] sm:$0xff] %v13683_v45  ;;  %v11314_v48 = vor.u32 %v792_v17, %v791_v20  ;;  %v9390_v53 = vcombine.low %v717_v39, %v730_v46  ;;  %v769_v54 = vsel %vm11294_vm9, %v9378_v40, %v768_v32  ;;  %v782_v55 = vsel %vm11294_vm9, %v9379_v42, %v781_v37  ;;  %v381_v56 = vld [vmem:[#allocation2 + $0x20] sm:$0x1]  ;;  %v11035_v57 = vld [vmem:[%s13660_s2 + $0x1c] ss:$0 sps:$4 sm:$0xff]  }
  0x30   : > { %v9391_v58 = vcombine.low %v743_v47, %v756_v41  ;;  %v9392_v59 = vcombine.low %v769_v54, %v782_v55  ;;  %v9380_v60 = vrot.slane %v784_v44, 11  ;;  %v797_v61 = vshrl.u32 %v701_v43, 16  ;;  %v384_v62 = vld [vmem:[#allocation2 + $0x2c] sm:$0x1]  ;;  %v1009_v63 = vld [vmem:[#allocation2 + $0x1c] sm:$0xf]  ;;  %2274 = vrot.lane.b32.xlu0 %v11035_v57, %s11120_s18 }
  0x31   : > { %10219 = vmatprep.mubr.msk.bf16.mxu0 %vm831_vm5, %v9390_v53  ;;  %v807_v2 = vor.u32 %v805_v21, %v804_v24  ;;  %v1162_v3 = vsel %vm844_vm0, %v11285_v49, 0  ;;  %v334_v4 = vsel %vm11303_vm10, 0, %v333_v38  ;;  %v379_v7 = vsel %vm11303_vm10, 0, %v378_v50  ;;  %v1011_v8 = vld [vmem:[#allocation2 + $0x28] sm:$0xf] }
  0x32   : > { %v795_v9 = vsel %vm11294_vm9, %v9380_v60, %v11314_v48  ;;  %v9381_v10 = vrot.slane %v797_v61, 11  ;;  %335 = vst [vmem:[#allocation2 + $0x8] sm:$0x1] %v334_v4  ;;  %380 = vst [vmem:[#allocation2 + $0x14] sm:$0x1] %v379_v7  ;;  %v1025_v12 = vshrl.u32 %v1005_v51, 16 }
  0x33   : > { %vm1021_vm11 = vsmask.f32 3328  ;;  %v387_v13 = vld [vmem:[#allocation2 + $0x38] sm:$0x1]  ;;  %v1028_v49 = vshll.u32 %v1005_v51, 16  ;;  %v1039_v14 = vshrl.u32 %v1007_v52, 16 }
  0x34   : > { %v1042_v15 = vshll.u32 %v1007_v52, 16  ;;  %v382_v16 = vsel %vm11303_vm10, 0, %v381_v56  ;;  %v390_v17 = vld [vmem:[#allocation2 + $0x44] sm:$0x1]  ;;  %vm1022_vm12 = vsmask.f32 7440  ;;  %v808_v21 = vsel %vm11294_vm9, %v9381_v10, %v807_v2 }
  0x35   : > { %v1027_v18 = vrot.slane %v1025_v12, 4  ;;  %383 = vst [vmem:[#allocation2 + $0x20] sm:$0x1] %v382_v16  ;;  %v385_v19 = vsel %vm11303_vm10, 0, %v384_v62  ;;  %v1053_v20 = vshrl.u32 %v1009_v63, 16  ;;  %v1030_v22 = vrot.slane %v1028_v49, 5  ;;  %10220 = vmatmul.mubr.msk.bf16.vlgmr.msra.gmra.mrb[0].mxu0 %vm831_vm5, %v9391_v58  ;;  %vm11362_vm13 = vmor %vm1021_vm11, %vm1022_vm12 }
  0x36   : > { %v1041_v23 = vrot.slane %v1039_v14, 4  ;;  %v1044_v24 = vrot.slane %v1042_v15, 5  ;;  %386 = vst [vmem:[#allocation2 + $0x2c] sm:$0x1] %v385_v19  ;;  %v1013_v26 = vld [vmem:[#allocation2 + $0x34] sm:$0xf]  ;;  %10223 = vmatprep.mubr.msk.bf16.mxu0 %vm831_vm5, %v9392_v59  ;;  %10228 = vmatpush3.bf16.msra.mxu0 %v1162_v3  ;;  %v9393_v40 = vcombine.low %v795_v9, %v808_v21 }
  0x37   : > { %v1055_v27 = vrot.slane %v1053_v20, 4  ;;  %v1056_v28 = vshll.u32 %v1009_v63, 16  ;;  %v1067_v29 = vshrl.u32 %v1011_v8, 16  ;;  %v1070_v30 = vshll.u32 %v1011_v8, 16  ;;  %v1015_v38 = vld [vmem:[#allocation2 + $0x40] sm:$0xf]  ;;  %10990 = vmatprep.subr.msk.bf16.mxu0 %vm844_vm0, %v11185_v1 }
  0x38   : > { %v1031_v31 = vor.u32 %v1030_v22, %v1027_v18  ;;  %v1045_v32 = vor.u32 %v1044_v24, %v1041_v23  ;;  %v388_v33 = vsel %vm11303_vm10, 0, %v387_v13  ;;  %v391_v34 = vsel %vm11303_vm10, 0, %v390_v17  ;;  %v393_v46 = vld [vmem:[#allocation2 + $0x50] sm:$0x1]  ;;  %v396_v52 = vld [vmem:[#allocation2 + $0x5c] sm:$0x1] }
  0x39   : > { %v1058_v35 = vrot.slane %v1056_v28, 5  ;;  %v1069_v36 = vrot.slane %v1067_v29, 4  ;;  %v1072_v37 = vrot.slane %v1070_v30, 5  ;;  %389 = vst [vmem:[#allocation2 + $0x38] sm:$0x1] %v388_v33  ;;  %v1081_v39 = vshrl.u32 %v1013_v26, 16 }
  0x3a   : > { %392 = vst [vmem:[#allocation2 + $0x44] sm:$0x1] %v391_v34  ;;  %v375_v42 = vld [vmem:[#allocation2 + $0x8] sm:$0x1]  ;;  %v1008_v43 = vld [vmem:[#allocation2 + $0x14] sm:$0x1] }
  0x3b   : > { %v11348_v44 = vrot.slane %v1031_v31, 4  ;;  %v11352_v47 = vsel %vm844_vm0, %v11185_v1, 0  ;;  %v376_v41 = vsel %vm11303_vm10, 0, %v375_v42  ;;  %v1048_v48 = vshll.u32 %v1008_v43, 16  ;;  %v1017_v53 = vld [vmem:[#allocation2 + $0x4c] sm:$0xf] }
  0x3c   : > { %v1059_v50 = vor.u32 %v1058_v35, %v1055_v27  ;;  %v1073_v51 = vor.u32 %v1072_v37, %v1069_v36  ;;  %377 = vst [vmem:[#allocation2 + $0x8] sm:$0x1] %v376_v41  ;;  %v1010_v54 = vld [vmem:[#allocation2 + $0x20] sm:$0x1]  ;;  %v1083_v55 = vrot.slane %v1081_v39, 4  ;;  %v1084_v56 = vshll.u32 %v1013_v26, 16 }
  0x3d   : > { %v1095_v57 = vshrl.u32 %v1015_v38, 16  ;;  %v1098_v58 = vshll.u32 %v1015_v38, 16  ;;  %v11356_v59 = vrot.slane %v1045_v32, 4  ;;  %v11358_v60 = vrot.slane %v1048_v48, 5  ;;  %v1012_v1 = vld [vmem:[#allocation2 + $0x2c] sm:$0x1]  ;;  %10224 = vmatmul.mubr.msk.bf16.gmra.mrb[4].mxu0 %vm831_vm5, %v9393_v40 }
  0x3e   : > { %v1060_v61 = vrot.slane %v1059_v50, 4  ;;  %v1062_v62 = vshll.u32 %v1010_v54, 16  ;;  %v13685_v63 = vmov 0  ;;  %v1076_v2 = vshll.u32 %v1012_v1, 16  ;;  %v1019_v13 = vld [vmem:[#allocation2 + $0x58] sm:$0xf] }
  0x3f   : > { %v13686_v63 = vsel %vm11362_vm13, 4294967295, %v13685_v63  ;;  %v1086_v3 = vrot.slane %v1084_v56, 5  ;;  %v1097_v4 = vrot.slane %v1095_v57, 4  ;;  %v1100_v7 = vrot.slane %v1098_v58, 5  ;;  %v1237_v23 = vld [vmem:[#allocation2 + $0xc] sm:$0x8] }
  0x40   : > { %13687 = vst [vmem:[#allocation7_spill] sm:$0xff] %v13686_v63  ;;  %v1064_v8 = vrot.slane %v1062_v62, 5  ;;  %v1074_v9 = vrot.slane %v1073_v51, 4  ;;  %v394_v10 = vsel %vm11303_vm10, 0, %v393_v46  ;;  %v397_v12 = vsel %vm11303_vm10, 0, %v396_v52 }
  0x41   : > { %v1078_v49 = vrot.slane %v1076_v2, 5  ;;  %v1014_v14 = vld [vmem:[#allocation2 + $0x38] sm:$0x1]  ;;  %v1016_v15 = vld [vmem:[#allocation2 + $0x44] sm:$0x1]  ;;  %v1087_v16 = vor.u32 %v1086_v3, %v1083_v55  ;;  %v1101_v17 = vor.u32 %v1100_v7, %v1097_v4  ;;  %v1109_v18 = vshrl.u32 %v1017_v53, 16 }
  0x42   : > { %395 = vst [vmem:[#allocation2 + $0x50] sm:$0x1] %v394_v10  ;;  %398 = vst [vmem:[#allocation2 + $0x5c] sm:$0x1] %v397_v12  ;;  %v1051_v19 = vsel %vm11362_vm13, %v11356_v59, %v11358_v60  ;;  %v1090_v20 = vshll.u32 %v1014_v14, 16  ;;  %v1104_v21 = vshll.u32 %v1016_v15, 16  ;;  %v1065_v24 = vsel %vm11362_vm13, %v1060_v61, %v1064_v8 }
  0x43   : > { %v1112_v22 = vshll.u32 %v1017_v53, 16  ;;  %v1088_v26 = vrot.slane %v1087_v16, 4  ;;  %v1102_v27 = vrot.slane %v1101_v17, 4  ;;  %v1111_v28 = vrot.slane %v1109_v18, 4  ;;  %v1238_v29 = vld [vmem:[#allocation2 + $0x10] sm:$0xf] }
  0x44   : > { %v1006_v30 = vld [vmem:[#allocation2 + $0x8] sm:$0x1]  ;;  %v1079_v31 = vsel %vm11362_vm13, %v1074_v9, %v1078_v49  ;;  %v1092_v32 = vrot.slane %v1090_v20, 5  ;;  %v1106_v33 = vrot.slane %v1104_v21, 5  ;;  %v1123_v36 = vshrl.u32 %v1019_v13, 16 }
  0x45   : > { %v1114_v34 = vrot.slane %v1112_v22, 5  ;;  %v1034_v35 = vshll.u32 %v1006_v30, 16  ;;  %v1126_v37 = vshll.u32 %v1019_v13, 16  ;;  %v1254_v38 = vshrl.u32 %v1237_v23, 16  ;;  %v1239_v43 = vld [vmem:[#allocation2 + $0x18] sm:$0x8] }
  0x46   : > { %v1093_v39 = vsel %vm11362_vm13, %v1088_v26, %v1092_v32  ;;  %v1107_v40 = vsel %vm11362_vm13, %v1102_v27, %v1106_v33  ;;  %v1259_v46 = vshrl.u32 %v1238_v29, 16  ;;  %v11036_v41 = vld [vmem:[%s13660_s2 + $0x20] ss:$0 sps:$4 sm:$0xff]   ;;  %v9399_v50 = vcombine.low %v1065_v24, %v1079_v31  ;;  %v1240_v53 = vld [vmem:[#allocation2 + $0x1c] sm:$0xf] }
  0x47   : > { %v1115_v42 = vor.u32 %v1114_v34, %v1111_v28  ;;  %v1036_v48 = vrot.slane %v1034_v35, 5  ;;  %v1125_v51 = vrot.slane %v1123_v36, 4  ;;  %v1128_v52 = vrot.slane %v1126_v37, 5  ;;  %2508 = vrot.lane.b32.xlu1 %v11036_v41, %s11120_s18  ;;  %v1241_v2 = vld [vmem:[#allocation2 + $0x24] sm:$0x8] }
  0x48   : > { %v9400_v54 = vcombine.low %v1093_v39, %v1107_v40  ;;  %v9406_v58 = vrot.slane %v1254_v38, 11  ;;  %v11387_v59 = vcombine.low %v1238_v29, %v1240_v53  ;;  %v11392_v3 = vld [vmem:[#allocation2 + $0x28] sm:$0xf]  ;;  %v1261_v7 = vrot.slane %v1259_v46, 7  ;;  %v1243_v10 = vld [vmem:[#allocation2 + $0x30] sm:$0x8] }
  0x49   : > { %v1018_v55 = vld [vmem:[#allocation2 + $0x50] sm:$0x1]  ;;  %v1020_v56 = vld [vmem:[#allocation2 + $0x5c] sm:$0x1]  ;;  %v1116_v57 = vrot.slane %v1115_v42, 4  ;;  %v1037_v60 = vsel %vm11362_vm13, %v11348_v44, %v1036_v48  ;;  %v1129_v61 = vor.u32 %v1128_v52, %v1125_v51  ;;  %v1262_v8 = vshll.u32 %v1238_v29, 16 }
  0x4a   : > { %v1118_v1 = vshll.u32 %v1018_v55, 16  ;;  %v1132_v62 = vshll.u32 %v1020_v56, 16  ;;  %v9398_v4 = vcombine.low %v1037_v60, %v1051_v19  ;;  %v1267_v9 = vshrl.u32 %v1239_v43, 16  ;;  %10259 = vmatprep.mubr.msk.bf16.mxu1 %vm831_vm5, %v11387_v59  ;;  %v677_v44 = vld [vmem:[%s11242_s22 + $0x1c] sm:$0xf] }
  0x4b   : > { %v1130_v13 = vrot.slane %v1129_v61, 4  ;;  %v1272_v14 = vshrl.u32 %v1240_v53, 16  ;;  %v1264_v15 = vor.u32 %v1262_v8, %v1261_v7  ;;  %v1275_v17 = vshll.u32 %v1240_v53, 16  ;;  %v11398_v18 = vld [vmem:[#allocation2 + $0x34] sm:$0xf] }
  0x4c   : > { %v1120_v12 = vrot.slane %v1118_v1, 5  ;;  %v1134_v49 = vrot.slane %v1132_v62, 5  ;;  %10229 = vmatprep.mubr.msk.bf16.mxu0 %vm831_vm5, %v9398_v4  ;;  %v9407_v16 = vrot.slane %v1267_v9, 11  ;;  %v1280_v19 = vshrl.u32 %v1241_v2, 16  ;;  %686 = vst.msk [vmem:[#allocation2 + $0x64] sm:$0xf] %vm327_vm1, %v677_v44 }
  0x4d   : > { %10230 = vmatmul.mubr.msk.bf16.vlgmr.msra.gmra.mrb[0].mxu0 %vm831_vm5, %v9399_v50  ;;  %v1274_v22 = vrot.slane %v1272_v14, 7  ;;  %v1285_v23 = vshrl.u32 %v11392_v3, 16  ;;  %v1245_v24 = vld [vmem:[#allocation2 + $0x3c] sm:$0x8]  ;;  %v11407_v26 = vld [vmem:[#allocation2 + $0x40] sm:$0xf]  ;;  %v1265_v28 = vsel %vm11294_vm9, %v9406_v58, %v1264_v15 }
  0x4e   : > { %v1121_v20 = vsel %vm11362_vm13, %v1116_v57, %v1120_v12  ;;  %v1135_v21 = vsel %vm11362_vm13, %v1130_v13, %v1134_v49  ;;  %10233 = vmatprep.mubr.msk.bf16.mxu0 %vm831_vm5, %v9400_v54  ;;  %10238 = vmatpush3.bf16.msra.mxu0 %v11352_v47  ;;  %v1288_v29 = vshll.u32 %v11392_v3, 16  ;;  %v1293_v32 = vshrl.u32 %v1243_v10, 16  ;;  %v1247_v34 = vld [vmem:[#allocation2 + $0x48] sm:$0x8]  ;;  %v11418_v36 = vld [vmem:[#allocation2 + $0x4c] sm:$0xf] }
  0x4f   : > { %v9401_v27 = vcombine.low %v1121_v20, %v1135_v21  ;;  %v1277_v30 = vor.u32 %v1275_v17, %v1274_v22  ;;  %v1287_v31 = vrot.slane %v1285_v23, 7  ;;  %v1298_v33 = vshrl.u32 %v11398_v18, 16  ;;  %10991 = vmatprep.subr.msk.bf16.mxu0 %vm844_vm0, %v11180_v0  ;;  %v369_v46 = vld [vmem:[#allocation2 + $0x60] sm:$0x8]  ;;  %v1249_v41 = vld [vmem:[#allocation2 + $0x54] sm:$0x8] }
  0x50   : > { %v1301_v35 = vshll.u32 %v11398_v18, 16  ;;  %v1306_v37 = vshrl.u32 %v1245_v24, 16  ;;  %v1311_v47 = vshrl.u32 %v11407_v26, 16  ;;  %v1314_v38 = vshll.u32 %v11407_v26, 16  ;;  %v11426_v53 = vld [vmem:[#allocation2 + $0x58] sm:$0xf] }
  0x51   : > { %v1278_v39 = vsel %vm11294_vm9, %v9407_v16, %v1277_v30  ;;  %v9408_v40 = vrot.slane %v1280_v19, 11  ;;  %v1290_v42 = vor.u32 %v1288_v29, %v1287_v31  ;;  %v1300_v43 = vrot.slane %v1298_v33, 7  ;;  %v1713_v19 = vld [vmem:[#allocation2 + $0x10] sm:$0xf]  ;;  %v1715_v23 = vld [vmem:[#allocation2 + $0x1c] sm:$0xf] }
  0x52   : > { %v11424_v48 = vcombine.low %v1265_v28, %v1278_v39  ;;  %v9409_v50 = vrot.slane %v1293_v32, 11  ;;  %v1313_v51 = vrot.slane %v1311_v47, 7  ;;  %v1319_v52 = vshrl.u32 %v1247_v34, 16  ;;  %v1717_v47 = vld [vmem:[#allocation2 + $0x28] sm:$0xf] }
  0x53   : > { %v1303_v54 = vor.u32 %v1301_v35, %v1300_v43  ;;  %v9410_v55 = vrot.slane %v1306_v37, 11  ;;  %v1324_v56 = vshrl.u32 %v11418_v36, 16  ;;  %v1327_v57 = vshll.u32 %v11418_v36, 16  ;;  %v11430_v58 = vld [vmem:[#allocation2 + $0x64] sm:$0xf] }
  0x54   : > { %v1316_v60 = vor.u32 %v1314_v38, %v1313_v51  ;;  %v370_v1 = vsel %vm11235_vm4, 0, %v369_v46  ;;  %v9411_v61 = vrot.slane %v1319_v52, 11  ;;  %v1337_v2 = vshrl.u32 %v11426_v53, 16  ;;  %v1714_v39 = vld [vmem:[#allocation2 + $0x14] sm:$0x1] }
  0x55   : > { %10234 = vmatmul.mubr.msk.bf16.gmra.mrb[4].mxu0 %vm831_vm5, %v9401_v27  ;;  %v1326_v62 = vrot.slane %v1324_v56, 7  ;;  %371 = vst [vmem:[#allocation2 + $0x60] sm:$0x8] %v370_v1  ;;  %v1291_v4 = vsel %vm11294_vm9, %v9408_v40, %v1290_v42  ;;  %v1304_v7 = vsel %vm11294_vm9, %v9409_v50, %v1303_v54  ;;  %v1332_v8 = vshrl.u32 %v1249_v41, 16  ;;  %v1716_v40 = vld [vmem:[#allocation2 + $0x20] sm:$0x1] }
  0x56   : > { %10239 = vmatprep.mubr.msk.bf16.mxu0 %vm831_vm5, %v11424_v48  ;;  %v1350_v9 = vshrl.u32 %v11430_v58, 16  ;;  %v1317_v10 = vsel %vm11294_vm9, %v9410_v55, %v1316_v60  ;;  %v1339_v13 = vrot.slane %v1337_v2, 7  ;;  %v1340_v49 = vshll.u32 %v11426_v53, 16  ;;  %v1719_v46 = vld [vmem:[#allocation2 + $0x34] sm:$0xf] }
  0x57   : > { %v1329_v12 = vor.u32 %v1327_v57, %v1326_v62  ;;  %v11446_v14 = vcombine.low %v1291_v4, %v1304_v7  ;;  %v1353_v16 = vshll.u32 %v11430_v58, 16  ;;  %v9412_v20 = vrot.slane %v1332_v8, 11  ;;  %v399_v41 = vld [vmem:[#allocation2 + $0x68] sm:$0x1]  ;;  %v1721_v52 = vld [vmem:[#allocation2 + $0x40] sm:$0xf] }
  0x58   : > { %v1352_v15 = vrot.slane %v1350_v9, 7  ;;  %v1342_v21 = vor.u32 %v1340_v49, %v1339_v13  ;;  %v1492_v22 = vsel %vm844_vm0, %v11180_v0, 0  ;;  %v1730_v29 = vshrl.u32 %v1713_v19, 16  ;;  %v1723_v54 = vld [vmem:[#allocation2 + $0x4c] sm:$0xf] }
  0x59   : > { %v1330_v44 = vsel %vm11294_vm9, %v9411_v61, %v1329_v12  ;;  %v1733_v30 = vshll.u32 %v1713_v19, 16  ;;  %v1744_v31 = vshrl.u32 %v1715_v23, 16  ;;  %v1747_v32 = vshll.u32 %v1715_v23, 16 }
  0x5a   : > { %v11451_v17 = vcombine.low %v1317_v10, %v1330_v44  ;;  %v1355_v28 = vor.u32 %v1353_v16, %v1352_v15  ;;  %v1343_v33 = vsel %vm11294_vm9, %v9412_v20, %v1342_v21  ;;  %v1732_v35 = vrot.slane %v1730_v29, 4  ;;  %v1718_v10 = vld [vmem:[#allocation2 + $0x2c] sm:$0x1]  ;;  %v1720_v16 = vld [vmem:[#allocation2 + $0x38] sm:$0x1] }
  0x5b   : > { %v1735_v37 = vrot.slane %v1733_v30, 5  ;;  %v1746_v42 = vrot.slane %v1744_v31, 4  ;;  %v1749_v43 = vrot.slane %v1747_v32, 5  ;;  %v1758_v50 = vshrl.u32 %v1717_v47, 16  ;;  %v1724_v30 = vld [vmem:[#allocation2 + $0x50] sm:$0x1] }
  0x5c   : > { %v1251_v24 = vld [vmem:[#allocation2 + $0x60] sm:$0x8]  ;;  %v1761_v51 = vshll.u32 %v1717_v47, 16  ;;  %v1739_v56 = vshll.u32 %v1714_v39, 16  ;;  %v1753_v57 = vshll.u32 %v1716_v40, 16  ;;  %v1772_v1 = vshrl.u32 %v1719_v46, 16 }
  0x5d   : > { %10240 = vmatmul.mubr.msk.bf16.vlgmr.msra.gmra.mrb[0].mxu0 %vm831_vm5, %v11446_v14  ;;  %v1345_v27 = vshrl.u32 %v1251_v24, 16  ;;  %v1736_v55 = vor.u32 %v1735_v37, %v1732_v35  ;;  %v1750_v60 = vor.u32 %v1749_v43, %v1746_v42  ;;  %v1775_v61 = vshll.u32 %v1719_v46, 16 }
  0x5e   : > { %10243 = vmatprep.mubr.msk.bf16.mxu0 %vm831_vm5, %v11451_v17  ;;  %10248 = vmatpush3.bf16.msra.mxu0 %v1492_v22  ;;  %v400_v62 = vsel %vm11303_vm10, 0, %v399_v41  ;;  %v1786_v2 = vshrl.u32 %v1721_v52, 16  ;;  %v1789_v4 = vshll.u32 %v1721_v52, 16  ;;  %v1800_v7 = vshrl.u32 %v1723_v54, 16 }
  0x5f   : > { %v9413_v34 = vrot.slane %v1345_v27, 11  ;;  %10994 = vmatprep.subr.msk.bf16.mxu0 %vm844_vm0, %v11217_v6  ;;  %v1803_v8 = vshll.u32 %v1723_v54, 16  ;;  %401 = vst [vmem:[#allocation2 + $0x68] sm:$0x1] %v400_v62  ;;  %v11475_v9 = vcombine.low %v11392_v3, %v11398_v18  ;;  %v1760_v12 = vrot.slane %v1758_v50, 4 }
  0x60   : > { %v1763_v13 = vrot.slane %v1761_v51, 5  ;;  %v1867_v49 = vsel %vm844_vm0, %v11217_v6, 0  ;;  %v1737_v44 = vrot.slane %v1736_v55, 4  ;;  %v1741_v15 = vrot.slane %v1739_v56, 5  ;;  %v1725_v3 = vld [vmem:[#allocation2 + $0x58] sm:$0xf] }
  0x61   : > { %v1356_v0 = vsel %vm11294_vm9, %v9413_v34, %v1355_v28  ;;  %v1751_v19 = vrot.slane %v1750_v60, 4  ;;  %v1755_v20 = vrot.slane %v1753_v57, 5  ;;  %v1774_v21 = vrot.slane %v1772_v1, 4  ;;  %v1727_v28 = vld [vmem:[#allocation2 + $0x64] sm:$0xf] }
  0x62   : > { %v11465_v38 = vcombine.low %v1343_v33, %v1356_v0  ;;  %v1777_v22 = vrot.slane %v1775_v61, 5  ;;  %v1788_v18 = vrot.slane %v1786_v2, 4  ;;  %v1791_v23 = vrot.slane %v1789_v4, 5  ;;  %v1726_v51 = vld [vmem:[#allocation2 + $0x5c] sm:$0x1] }
  0x63   : > { %v1802_v24 = vrot.slane %v1800_v7, 4  ;;  %v1805_v27 = vrot.slane %v1803_v8, 5  ;;  %v1764_v29 = vor.u32 %v1763_v13, %v1760_v12  ;;  %v1742_v6 = vsel %vm11362_vm13, %v1737_v44, %v1741_v15  ;;  %v11508_v60 = vld [vmem:[%s13661_s3] ss:$0 sm:$0xff]  ;;  %v2773_v8 = vld [vmem:[%s11501_s14 + $0x4] sm:$0xf] }
  0x64   : > { %v1781_v31 = vshll.u32 %v1720_v16, 16  ;;  %v1814_v32 = vshrl.u32 %v1725_v3, 16  ;;  %v1817_v33 = vshll.u32 %v1725_v3, 16  ;;  %v1756_v34 = vsel %vm11362_vm13, %v1751_v19, %v1755_v20  ;;  %2617 = vrot.lane.b32.xlu0 %v11508_v60, %s11120_s18  ;;  %v2772_v7 = vld [vmem:[%s11501_s14] sm:$0xf]  ;;  %2806 = vrot.lane.b32.xlu1 %v2773_v8, %s11121_s17 }
  0x65   : > { %10244 = vmatmul.mubr.msk.bf16.gmra.mrb[4].mxu0 %vm831_vm5, %v11465_v38  ;;  %v1778_v0 = vor.u32 %v1777_v22, %v1774_v21  ;;  %v1828_v35 = vshrl.u32 %v1727_v28, 16  ;;  %v1831_v37 = vshll.u32 %v1727_v28, 16  ;;  %v1792_v47 = vor.u32 %v1791_v23, %v1788_v18  ;;  %v2774_v21 = vld [vmem:[%s11501_s14 + $0x8] sm:$0xf] }
  0x66   : > { %10249 = vmatprep.mubr.msk.bf16.mxu0 %vm831_vm5, %v11387_v59  ;;  %v11479_v59 = vcombine.low %v11407_v26, %v11418_v36  ;;  %v1767_v26 = vshll.u32 %v1718_v10, 16  ;;  %v1722_v36 = vld [vmem:[#allocation2 + $0x44] sm:$0x1]  ;;  %v1806_v40 = vor.u32 %v1805_v27, %v1802_v24  ;;  %v1809_v42 = vshll.u32 %v1724_v30, 16  ;;  %v1728_v4 = vld [vmem:[#allocation2 + $0x68] sm:$0x1] }
  0x67   : > { %v1795_v39 = vshll.u32 %v1722_v36, 16  ;;  %v11494_v43 = vcombine.low %v11426_v53, %v11430_v58  ;;  %v1765_v41 = vrot.slane %v1764_v29, 4  ;;  %v1783_v50 = vrot.slane %v1781_v31, 5  ;;  %v372_v58 = vld [vmem:[#allocation2 + $0x6c] sm:$0x8] }
  0x68   : > { %v1769_v46 = vrot.slane %v1767_v26, 5  ;;  %v1816_v52 = vrot.slane %v1814_v32, 4  ;;  %v1819_v54 = vrot.slane %v1817_v33, 5  ;;  %v11503_v55 = vcombine.low %v1742_v6, %v1756_v34  ;;  %2804 = vrot.lane.b32.xlu0 %v2772_v7, %s11121_s17  ;;  %2869 = vrot.lane.b32.xlu1 %v2772_v7, %s11122_s19  ;;  %v2776_v26 = vld [vmem:[%s11501_s14 + $0x10] sm:$0xf] }
  0x69   : > { %v1779_v56 = vrot.slane %v1778_v0, 4  ;;  %v1830_v57 = vrot.slane %v1828_v35, 4  ;;  %v1833_v53 = vrot.slane %v1831_v37, 5  ;;  %v1793_v1 = vrot.slane %v1792_v47, 4  ;;  %v2775_v36 = vld [vmem:[%s11501_s14 + $0xc] sm:$0xf] }
  0x6a   : > { %v1797_v61 = vrot.slane %v1795_v39, 5  ;;  %v1807_v62 = vrot.slane %v1806_v40, 4  ;;  %v1811_v2 = vrot.slane %v1809_v42, 5  ;;  %v1820_v10 = vor.u32 %v1819_v54, %v1816_v52  ;;  %v2778_v6 = vld [vmem:[%s11501_s14 + $0x18] sm:$0xf] }
  0x6b   : > { %v1823_v12 = vshll.u32 %v1726_v51, 16  ;;  %v1770_v13 = vsel %vm11362_vm13, %v1765_v41, %v1769_v46  ;;  %v1834_v44 = vor.u32 %v1833_v53, %v1830_v57  ;;  %v1837_v15 = vshll.u32 %v1728_v4, 16  ;;  %v2777_v31 = vld [vmem:[%s11501_s14 + $0x14] sm:$0xf]  ;;  %v2779_v40 = vld [vmem:[%s11501_s14 + $0x1c] sm:$0xf] }
  0x6c   : > { %v1798_v16 = vsel %vm11362_vm13, %v1793_v1, %v1797_v61  ;;  %v1812_v19 = vsel %vm11362_vm13, %v1807_v62, %v1811_v2  ;;  %v373_v20 = vsel %vm11235_vm4, 0, %v372_v58  ;;  %v1821_v3 = vrot.slane %v1820_v10, 4  ;;  %2808 = vrot.lane.b32.xlu0 %v2774_v21, %s11121_s17  ;;  %2873 = vrot.lane.b32.xlu1 %v2774_v21, %s11122_s19  ;;  %v339_v32 = vld [vmem:[#allocation2 + $0x74] sm:$0x1]  ;;  %v11593_v41 = vld [vmem:[#allocation2 + $0x28] sm:$0xf] }
  0x6d   : > { %10250 = vmatmul.mubr.msk.bf16.vlgmr.msra.gmra.mrb[0].mxu0 %vm831_vm5, %v11475_v9  ;;  %374 = vst [vmem:[#allocation2 + $0x6c] sm:$0x8] %v373_v20  ;;  %v1825_v18 = vrot.slane %v1823_v12, 5  ;;  %v11534_v23 = vcombine.low %v1798_v16, %v1812_v19  ;;  %v1835_v24 = vrot.slane %v1834_v44, 4  ;;  %v1839_v27 = vrot.slane %v1837_v15, 5 }
  0x6e   : > { %10253 = vmatprep.mubr.msk.bf16.mxu0 %vm831_vm5, %v11479_v59  ;;  %10278 = vmatpush3.bf16.msra.mxu0 %v1867_v49  ;;  %v1784_v49 = vsel %vm11362_vm13, %v1779_v56, %v1783_v50  ;;  %v340_v34 = vsel %vm11303_vm10, 0, %v339_v32  ;;  %v2059_v51 = vshrl.u32 %v11593_v41, 16  ;;  %v2026_v52 = vld [vmem:[#allocation2 + $0x24] sm:$0x8]  ;;  %v11601_v54 = vld [vmem:[#allocation2 + $0x34] sm:$0xf] }
  0x6f   : > { %v11531_v22 = vcombine.low %v1770_v13, %v1784_v49  ;;  %v1826_v28 = vsel %vm11362_vm13, %v1821_v3, %v1825_v18  ;;  %v1840_v29 = vsel %vm11362_vm13, %v1835_v24, %v1839_v27  ;;  %341 = vst [vmem:[#allocation2 + $0x74] sm:$0x1] %v340_v34  ;;  %v2054_v57 = vshrl.u32 %v2026_v52, 16  ;;  %v11606_v1 = vld [vmem:[#allocation2 + $0x40] sm:$0xf] }
  0x70   : > { %2871 = vrot.lane.b32.xlu0 %v2773_v8, %s11122_s19  ;;  %v11549_v30 = vcombine.low %v1826_v28, %v1840_v29  ;;  %2812 = vrot.lane.b32.xlu1 %v2776_v26, %s11121_s17  ;;  %v2061_v53 = vrot.slane %v2059_v51, 7  ;;  %v2062_v58 = vshll.u32 %v11593_v41, 16  ;;  %v11608_v61 = vld [vmem:[#allocation2 + $0x4c] sm:$0xf]  ;;  %v11610_v62 = vld [vmem:[#allocation2 + $0x58] sm:$0xf] }
  0x71   : > { %v2072_v2 = vshrl.u32 %v11601_v54, 16  ;;  %v2085_v4 = vshrl.u32 %v11606_v1, 16  ;;  %v9454_v10 = vrot.slane %v2054_v57, 11  ;;  %v2030_v12 = vld [vmem:[#allocation2 + $0x3c] sm:$0x8]  ;;  %v2098_v44 = vshrl.u32 %v11608_v61, 16 }
  0x72   : > { %v2032_v49 = vld [vmem:[#allocation2 + $0x48] sm:$0x8]  ;;  %v2111_v15 = vshrl.u32 %v11610_v62, 16  ;;  %v2075_v20 = vshll.u32 %v11601_v54, 16  ;;  %v2034_v21 = vld [vmem:[#allocation2 + $0x54] sm:$0x8] }
  0x73   : > { %v2074_v3 = vrot.slane %v2072_v2, 7  ;;  %v2080_v18 = vshrl.u32 %v2030_v12, 16  ;;  %v2087_v24 = vrot.slane %v2085_v4, 7  ;;  %v2088_v27 = vshll.u32 %v11606_v1, 16  ;;  %v11632_v34 = vld [vmem:[#allocation2 + $0x70] sm:$0xf] }
  0x74   : > { %2810 = vrot.lane.b32.xlu0 %v2775_v36, %s11121_s17  ;;  %2816 = vrot.lane.b32.xlu1 %v2778_v6, %s11121_s17  ;;  %v2113_v32 = vrot.slane %v2111_v15, 7  ;;  %vm2661_vm14 = vcmask 27648   ;;  %vm405_vm15 = vcmask 125952   ;;  %vm429_vm2 = vcmask 125955  }
  0x75   : > { %10254 = vmatmul.mubr.msk.bf16.gmra.mrb[4].mxu0 %vm831_vm5, %v11494_v43  ;;  %406 = vst.msk [vmem:[#allocation3] sm:$0xf] %vm405_vm15, %v11119_v5  ;;  %414 = vst.msk [vmem:[#allocation3 + $0x10] sm:$0xf] %vm405_vm15, %v11119_v5  ;;  %vm2852_vm11 = vcmask 60448   ;;  %vm2917_vm12 = vcmask 126048  }
  0x76   : > { %10279 = vmatprep.mubr.msk.bf16.mxu0 %vm831_vm5, %v11503_v55  ;;  %v402_v39 = vld [vmem:[#allocation2 + $0x74] sm:$0x1]  ;;  %424 = vst.msk [vmem:[#allocation3 + $0xe4] sm:$0xf] %vm405_vm15, %v11119_v5  ;;  %vm11737_vm7 = vmand %vm429_vm2, %vm343_vm3  ;;  %vm408_vm3 = vcmask 122880  }
  0x77   : > { %v403_v42 = vsel %vm11303_vm10, 0, %v402_v39  ;;  %v2036_v39 = vld [vmem:[#allocation2 + $0x60] sm:$0x8]  ;;  %413 = vst.msk [vmem:[#allocation3 + $0xc] sm:$0xf] %vm405_vm15, %v11119_v5  ;;  %vm11763_vm8 = vmand %vm408_vm3, %vm331_vm6  ;;  %vm2694_vm6 = vcmask 93248  }
  0x78   : > { %2814 = vrot.lane.b32.xlu0 %v2777_v31, %s11121_s17  ;;  %2877 = vrot.lane.b32.xlu1 %v2776_v26, %s11122_s19  ;;  %404 = vst [vmem:[#allocation2 + $0x74] sm:$0x1] %v403_v42  ;;  %v2093_v26 = vshrl.u32 %v2032_v49, 16  ;;  %v2137_v42 = vshrl.u32 %v11632_v34, 16  ;;  %419 = vst.msk [vmem:[#allocation3 + $0xd8] sm:$0xf] %vm405_vm15, %v11119_v5 }
  0x79   : > { %420 = vst.msk [vmem:[#allocation3 + $0xdc] sm:$0xf] %vm405_vm15, %v11119_v5  ;;  %vm6582_vm15 = vcmask 1041408  }
  0x7c   : > { %2875 = vrot.lane.b32.xlu0 %v2775_v36, %s11122_s19  ;;  %2881 = vrot.lane.b32.xlu1 %v2778_v6, %s11122_s19  ;;  %v2101_v36 = vshll.u32 %v11608_v61, 16  ;;  %v11628_v6 = vld [vmem:[#allocation2 + $0x64] sm:$0xf] }
  0x7d   : > { %10280 = vmatmul.mubr.msk.bf16.vlgmr.msra.gmra.mrb[0].mxu0 %vm831_vm5, %v11531_v22 }
  0x7e   : > { %10283 = vmatprep.mubr.msk.bf16.mxu0 %vm831_vm5, %v11534_v23 }
  0x80   : > { %2879 = vrot.lane.b32.xlu0 %v2777_v31, %s11122_s19  ;;  %v2106_v31 = vshrl.u32 %v2034_v21, 16 }
  0x82   : > { %v1571_v33 = vpop.permute.xlu0 %1570 }
  0x83   : > { %10992 = vmatprep.subr.msk.bf16.mxu1 %vm844_vm0, %v1571_v33  ;;  %v1573_v0 = vsel %vm844_vm0, %v1571_v33, 0  ;;  %v1946_v37 = vpop.permute.xlu1 %1945  ;;  %v2114_v33 = vshll.u32 %v11610_v62, 16 }
  0x84   : > { %10258 = vmatpush3.bf16.msra.mxu1 %v1573_v0  ;;  %2818 = vrot.lane.b32.xlu0 %v2779_v40, %s11121_s17  ;;  %v2077_v0 = vor.u32 %v2075_v20, %v2074_v3 }
  0x85   : > { %10284 = vmatmul.mubr.msk.bf16.gmra.mrb[4].mxu0 %vm831_vm5, %v11549_v30 }
  0x86   : > { %v1644_v35 = vpop.permute.xlu0 %1643 }
  0x87   : > { %10260 = vmatmul.mubr.msk.bf16.vlgmr.msra.gmra.mrb[0].mxu1 %vm831_vm5, %v11475_v9  ;;  %10993 = vmatprep.subr.msk.bf16.mxu1 %vm844_vm0, %v1644_v35  ;;  %v1646_v47 = vsel %vm844_vm0, %v1644_v35, 0  ;;  %v2781_v9 = vld [vmem:[%s11501_s14 + $0x24] sm:$0xf]  ;;  %v9456_v35 = vrot.slane %v2080_v18, 11 }
  0x88   : > { %10268 = vmatpush3.bf16.msra.mxu1 %v1646_v47  ;;  %10263 = vmatprep.mubr.msk.bf16.mxu1 %vm831_vm5, %v11479_v59  ;;  %v1948_v59 = vsel %vm844_vm0, %v1946_v37, 0 }
  0x89   : > { %10995 = vmatprep.subr.msk.bf16.mxu1 %vm844_vm0, %v1946_v37  ;;  %2822 = vrot.lane.b32.xlu0 %v2781_v9, %s11121_s17  ;;  %v2090_v37 = vor.u32 %v2088_v27, %v2087_v24  ;;  %v2365_v24 = vld [vmem:[#allocation2 + $0x20] sm:$0x1] }
  0x8b   : > { %v2091_v52 = vsel %vm11294_vm9, %v9456_v35, %v2090_v37 }
  0x8d   : > { %2883 = vrot.lane.b32.xlu0 %v2779_v40, %s11122_s19  ;;  %v2124_v40 = vshrl.u32 %v11628_v6, 16 }
  0x8f   : > { %10264 = vmatmul.mubr.msk.bf16.gmra.mrb[4].mxu1 %vm831_vm5, %v11494_v43  ;;  %v2161_v46 = vpop.permute.xlu1 %2160  ;;  %v11591_v43 = vld [vmem:[#allocation2 + $0x1c] sm:$0xf] }
  0x90   : > { %10269 = vmatprep.mubr.msk.bf16.mxu1 %vm831_vm5, %v11424_v48  ;;  %v2024_v48 = vld [vmem:[#allocation2 + $0x18] sm:$0x8]  ;;  %v2046_v50 = vshrl.u32 %v11591_v43, 16  ;;  %v2175_v13 = vsel %vm844_vm0, %v2161_v46, 0 }
  0x91   : > { %2887 = vrot.lane.b32.xlu0 %v2781_v9, %s11122_s19  ;;  %v9457_v9 = vrot.slane %v2093_v26, 11 }
  0x92   : > { %v2048_v56 = vrot.slane %v2046_v50, 7  ;;  %v2038_v50 = vld [vmem:[#allocation2 + $0x6c] sm:$0x8] }
  0x93   : > { %v2132_v57 = vshrl.u32 %v2038_v50, 16 }
  0x97   : > { %10270 = vmatmul.mubr.msk.bf16.vlgmr.msra.gmra.mrb[0].mxu1 %vm831_vm5, %v11446_v14  ;;  %v2041_v14 = vshrl.u32 %v2024_v48, 16  ;;  %v2116_v48 = vor.u32 %v2114_v33, %v2113_v32  ;;  %v2370_v32 = vld [vmem:[#allocation2 + $0x40] sm:$0xf]  ;;  %v2372_v33 = vld [vmem:[#allocation2 + $0x4c] sm:$0xf] }
  0x98   : > { %10288 = vmatpush3.bf16.msra.mxu1 %v1948_v59  ;;  %10273 = vmatprep.mubr.msk.bf16.mxu1 %vm831_vm5, %v11451_v17  ;;  %v2049_v17 = vshll.u32 %v11591_v43, 16 }
  0x99   : > { %10996 = vmatprep.subr.msk.bf16.mxu1 %vm844_vm0, %v2161_v46  ;;  %v9453_v7 = vrot.slane %v2041_v14, 11  ;;  %v9458_v46 = vrot.slane %v2106_v31, 11  ;;  %v2119_v14 = vshrl.u32 %v2036_v39, 16  ;;  %v9470_v31 = vcombine.low %v11591_v43, %v11593_v41 }
  0x9a   : > { %v2051_v8 = vor.u32 %v2049_v17, %v2048_v56  ;;  %v2127_v17 = vshll.u32 %v11628_v6, 16  ;;  %v2126_v56 = vrot.slane %v2124_v40, 7  ;;  %v2440_v43 = vshll.u32 %v2372_v33, 16 }
  0x9b   : > { %v9459_v4 = vrot.slane %v2119_v14, 11 }
  0x9c   : > { %v2052_v28 = vsel %vm11294_vm9, %v9453_v7, %v2051_v8  ;;  %v2364_v7 = vld [vmem:[#allocation2 + $0x1c] sm:$0xf] }
  0x9d   : > { %v2381_v15 = vshrl.u32 %v2364_v7, 16 }
  0x9f   : > { %10274 = vmatmul.mubr.msk.bf16.gmra.mrb[4].mxu1 %vm831_vm5, %v11465_v38  ;;  %v2028_v38 = vld [vmem:[#allocation2 + $0x30] sm:$0x8]  ;;  %v2383_v27 = vrot.slane %v2381_v15, 4 }
  0xa0   : > { %10289 = vmatprep.mubr.msk.bf16.mxu1 %vm831_vm5, %v11503_v55  ;;  %v2064_v55 = vor.u32 %v2062_v58, %v2061_v53  ;;  %v2067_v19 = vshrl.u32 %v2028_v38, 16  ;;  %v2139_v53 = vrot.slane %v2137_v42, 7  ;;  %v2140_v58 = vshll.u32 %v11632_v34, 16 }
  0xa1   : > { %v2423_v42 = vshrl.u32 %v2370_v32, 16 }
  0xa2   : > { %v2275_v16 = vpop.permute.xlu0 %2274  ;;  %v2065_v29 = vsel %vm11294_vm9, %v9454_v10, %v2064_v55  ;;  %v2129_v10 = vor.u32 %v2127_v17, %v2126_v56  ;;  %v9460_v55 = vrot.slane %v2132_v57, 11  ;;  %v2142_v12 = vor.u32 %v2140_v58, %v2139_v53  ;;  %v2371_v53 = vld [vmem:[#allocation2 + $0x44] sm:$0x1] }
  0xa3   : > { %v9461_v47 = vcombine.low %v2052_v28, %v2065_v29  ;;  %v2289_v49 = vsel %vm844_vm0, %v2275_v16, 0  ;;  %v2425_v58 = vrot.slane %v2423_v42, 4 }
  0xa4   : > { %v2130_v3 = vsel %vm11294_vm9, %v9459_v4, %v2129_v10  ;;  %v2143_v18 = vsel %vm11294_vm9, %v9460_v55, %v2142_v12  ;;  %v2376_v4 = vld [vmem:[#allocation2 + $0x64] sm:$0xf]  ;;  %v2378_v10 = vld [vmem:[#allocation2 + $0x70] sm:$0xf]  ;;  %v2432_v12 = vshll.u32 %v2371_v53, 16 }
  0xa5   : > { %v9464_v28 = vcombine.low %v2130_v3, %v2143_v18  ;;  %v2479_v3 = vshrl.u32 %v2378_v10, 16  ;;  %v2482_v18 = vshll.u32 %v2378_v10, 16 }
  0xa7   : > { %10290 = vmatmul.mubr.msk.bf16.vlgmr.msra.gmra.mrb[0].mxu1 %vm831_vm5, %v11531_v22  ;;  %v2100_v22 = vrot.slane %v2098_v44, 7 }
  0xa8   : > { %10298 = vmatpush3.bf16.msra.mxu1 %v2175_v13  ;;  %10293 = vmatprep.mubr.msk.bf16.mxu1 %vm831_vm5, %v11534_v23  ;;  %v9455_v23 = vrot.slane %v2067_v19, 11  ;;  %v2366_v13 = vld [vmem:[#allocation2 + $0x28] sm:$0xf]  ;;  %v2384_v19 = vshll.u32 %v2364_v7, 16 }
  0xa9   : > { %10997 = vmatprep.subr.msk.bf16.mxu1 %vm844_vm0, %v2275_v16  ;;  %v2103_v59 = vor.u32 %v2101_v36, %v2100_v22  ;;  %v2395_v20 = vshrl.u32 %v2366_v13, 16  ;;  %v2398_v21 = vshll.u32 %v2366_v13, 16  ;;  %v2367_v16 = vld [vmem:[#allocation2 + $0x2c] sm:$0x1]  ;;  %v2368_v22 = vld [vmem:[#allocation2 + $0x34] sm:$0xf] }
  0xaa   : > { %v2078_v51 = vsel %vm11294_vm9, %v9455_v23, %v2077_v0  ;;  %v2386_v29 = vrot.slane %v2384_v19, 5  ;;  %v2390_v23 = vshll.u32 %v2365_v24, 16  ;;  %v2404_v0 = vshll.u32 %v2367_v16, 16  ;;  %v2373_v13 = vld [vmem:[#allocation2 + $0x50] sm:$0x1] }
  0xab   : > { %v2104_v38 = vsel %vm11294_vm9, %v9457_v9, %v2103_v59  ;;  %v9462_v2 = vcombine.low %v2078_v51, %v2091_v52  ;;  %v2397_v26 = vrot.slane %v2395_v20, 4  ;;  %v2400_v36 = vrot.slane %v2398_v21, 5  ;;  %v2369_v52 = vld [vmem:[#allocation2 + $0x38] sm:$0x1]  ;;  %v11674_v24 = vld [vmem:[%s11501_s14 + $0x2c] sm:$0xf] }
  0xac   : > { %v2409_v35 = vshrl.u32 %v2368_v22, 16  ;;  %v2412_v37 = vshll.u32 %v2368_v22, 16  ;;  %v2387_v39 = vor.u32 %v2386_v29, %v2383_v27  ;;  %v2426_v9 = vshll.u32 %v2370_v32, 16  ;;  %2826 = vrot.lane.b32.xlu0 %v11674_v24, %s11121_s17 }
  0xad   : > { %v2401_v40 = vor.u32 %v2400_v36, %v2397_v26  ;;  %v2437_v59 = vshrl.u32 %v2372_v33, 16  ;;  %v2392_v50 = vrot.slane %v2390_v23, 5  ;;  %v2406_v51 = vrot.slane %v2404_v0, 5  ;;  %v2782_v23 = vld [vmem:[%s11501_s14 + $0x28] sm:$0xf] }
  0xae   : > { %v2411_v14 = vrot.slane %v2409_v35, 4  ;;  %v2414_v17 = vrot.slane %v2412_v37, 5  ;;  %v2388_v56 = vrot.slane %v2387_v39, 4  ;;  %v2418_v55 = vshll.u32 %v2369_v52, 16  ;;  %v2377_v0 = vld [vmem:[#allocation2 + $0x68] sm:$0x1] }
  0xaf   : > { %10294 = vmatmul.mubr.msk.bf16.gmra.mrb[4].mxu1 %vm831_vm5, %v11549_v30  ;;  %v2117_v30 = vsel %vm11294_vm9, %v9458_v46, %v2116_v48  ;;  %v9471_v46 = vcombine.low %v11601_v54, %v11606_v1  ;;  %v2402_v57 = vrot.slane %v2401_v40, 4  ;;  %v2442_v1 = vrot.slane %v2440_v43, 5 }
  0xb0   : > { %10299 = vmatprep.mubr.msk.bf16.mxu1 %vm831_vm5, %v9461_v47  ;;  %v9463_v8 = vcombine.low %v2104_v38, %v2117_v30  ;;  %v2374_v47 = vld [vmem:[#allocation2 + $0x58] sm:$0xf]  ;;  %v2428_v38 = vrot.slane %v2426_v9, 5  ;;  %v9472_v30 = vcombine.low %v11608_v61, %v11610_v62  ;;  %v2393_v15 = vsel %vm11362_vm13, %v2388_v56, %v2392_v50 }
  0xb1   : > { %v2451_v41 = vshrl.u32 %v2374_v47, 16  ;;  %v2454_v48 = vshll.u32 %v2374_v47, 16  ;;  %v2407_v61 = vsel %vm11362_vm13, %v2402_v57, %v2406_v51  ;;  %v2415_v62 = vor.u32 %v2414_v17, %v2411_v14 }
  0xb2   : > { %v2429_v19 = vor.u32 %v2428_v38, %v2425_v58  ;;  %v2465_v20 = vshrl.u32 %v2376_v4, 16  ;;  %v2468_v21 = vshll.u32 %v2376_v4, 16  ;;  %v2446_v27 = vshll.u32 %v2373_v13, 16  ;;  %v11696_v38 = vld [vmem:[%s11501_s14 + $0x30] sm:$0xf] }
  0xb3   : > { %v2453_v7 = vrot.slane %v2451_v41, 4  ;;  %v9473_v26 = vcombine.low %v11628_v6, %v11632_v34  ;;  %v2420_v36 = vrot.slane %v2418_v55, 5  ;;  %v9479_v22 = vcombine.low %v2393_v15, %v2407_v61 }
  0xb4   : > { %v2430_v32 = vrot.slane %v2429_v19, 4  ;;  %v2434_v33 = vrot.slane %v2432_v12, 5  ;;  %v2467_v35 = vrot.slane %v2465_v20, 4  ;;  %v2470_v37 = vrot.slane %v2468_v21, 5  ;;  %v11717_v19 = vld [vmem:[%s11501_s14 + $0x38] sm:$0xf] }
  0xb5   : > { %v2481_v47 = vrot.slane %v2479_v3, 4  ;;  %v2484_v39 = vrot.slane %v2482_v18, 5  ;;  %v2448_v42 = vrot.slane %v2446_v27, 5  ;;  %v2474_v34 = vshll.u32 %v2377_v0, 16 }
  0xb6   : > { %v2435_v43 = vsel %vm11362_vm13, %v2430_v32, %v2434_v33  ;;  %v2471_v41 = vor.u32 %v2470_v37, %v2467_v35  ;;  %v431_v33 = vld [vmem:[#allocation3] sm:$0x8]  ;;  %v434_v37 = vld [vmem:[#allocation3 + $0xc] sm:$0x8] }
  0xb7   : > { %10300 = vmatmul.mubr.msk.bf16.vlgmr.msra.gmra.mrb[0].mxu1 %vm831_vm5, %v9462_v2  ;;  %v2439_v2 = vrot.slane %v2437_v59, 4  ;;  %v2476_v17 = vrot.slane %v2474_v34, 5  ;;  %v432_v0 = vsel %vm11737_vm7, 0, %v431_v33  ;;  %v435_v5 = vsel %vm11737_vm7, 0, %v434_v37 }
  0xb8   : > { %10308 = vmatpush3.bf16.msra.mxu1 %v2289_v49  ;;  %10303 = vmatprep.mubr.msk.bf16.mxu1 %vm831_vm5, %v9463_v8  ;;  %v2456_v8 = vrot.slane %v2454_v48, 5  ;;  %v2375_v49 = vld [vmem:[#allocation2 + $0x5c] sm:$0x1]  ;;  %v2485_v48 = vor.u32 %v2484_v39, %v2481_v47  ;;  %v2472_v57 = vrot.slane %v2471_v41, 4  ;;  %433 = vst [vmem:[#allocation3] sm:$0x8] %v432_v0 }
  0xb9   : > { %v2509_v44 = vpop.permute.xlu1 %2508  ;;  %v2443_v16 = vor.u32 %v2442_v1, %v2439_v2  ;;  %v2460_v29 = vshll.u32 %v2375_v49, 16  ;;  %436 = vst [vmem:[#allocation3 + $0xc] sm:$0x8] %v435_v5  ;;  %v2785_v47 = vld [vmem:[%s11501_s14 + $0x34] sm:$0xf] }
  0xba   : > { %10998 = vmatprep.subr.msk.bf16.mxu1 %vm844_vm0, %v2509_v44  ;;  %v2523_v54 = vsel %vm844_vm0, %v2509_v44, 0  ;;  %v2780_v44 = vld [vmem:[%s11501_s14 + $0x20] sm:$0xf]  ;;  %v2486_v53 = vrot.slane %v2485_v48, 4 }
  0xbb   : > { %2820 = vrot.lane.b32.xlu1 %v2780_v44, %s11121_s17  ;;  %v2444_v40 = vrot.slane %v2443_v16, 4  ;;  %v2462_v59 = vrot.slane %v2460_v29, 5 }
  0xbd   : > { %v2449_v51 = vsel %vm11362_vm13, %v2444_v40, %v2448_v42  ;;  %v415_v42 = vld [vmem:[#allocation3 + $0x14] sm:$0x1] }
  0xbf   : > { %10304 = vmatmul.mubr.msk.bf16.gmra.mrb[4].mxu1 %vm831_vm5, %v9464_v28  ;;  %v2457_v28 = vor.u32 %v2456_v8, %v2453_v7  ;;  %2824 = vrot.lane.b32.xlu1 %v2782_v23, %s11121_s17 }
  0xc0   : > { %10309 = vmatprep.mubr.msk.bf16.mxu1 %vm831_vm5, %v9470_v31  ;;  %v2416_v31 = vrot.slane %v2415_v62, 4 }
  0xc1   : > { %v2458_v9 = vrot.slane %v2457_v28, 4 }
  0xc2   : > { %v2421_v6 = vsel %vm11362_vm13, %v2416_v31, %v2420_v36  ;;  %v437_v31 = vld [vmem:[#allocation3 + $0x18] sm:$0x8] }
  0xc3   : > { %v2463_v52 = vsel %vm11362_vm13, %v2458_v9, %v2462_v59  ;;  %2885 = vrot.lane.b32.xlu1 %v2780_v44, %s11122_s19  ;;  %v9480_v14 = vcombine.low %v2421_v6, %v2435_v43  ;;  %v438_v32 = vsel %vm11737_vm7, 0, %v437_v31  ;;  %v416_v9 = vsel %vm11763_vm8, 0, %v415_v42  ;;  %v443_v59 = vld [vmem:[#allocation3 + $0x30] sm:$0x8]  ;;  %v497_v43 = vld [vmem:[#allocation3 + $0x20] sm:$0x1] }
  0xc4   : > { %v9481_v56 = vcombine.low %v2449_v51, %v2463_v52  ;;  %439 = vst [vmem:[#allocation3 + $0x18] sm:$0x8] %v438_v32  ;;  %417 = vst [vmem:[#allocation3 + $0x14] sm:$0x1] %v416_v9  ;;  %v498_v48 = vsel %vm11763_vm8, 0, %v497_v43 }
  0xc5   : > { %499 = vst [vmem:[#allocation3 + $0x20] sm:$0x1] %v498_v48  ;;  %v503_v52 = vld [vmem:[#allocation3 + $0x38] sm:$0x1]  ;;  %v458_v43 = vld [vmem:[#allocation3 + $0x6c] sm:$0x8] }
  0xc7   : > { %10310 = vmatmul.mubr.msk.bf16.vlgmr.msra.gmra.mrb[0].mxu1 %vm831_vm5, %v9471_v46  ;;  %v2379_v46 = vld [vmem:[#allocation2 + $0x74] sm:$0x1]  ;;  %2889 = vrot.lane.b32.xlu1 %v2782_v23, %s11122_s19  ;;  %v488_v23 = vld [vmem:[#allocation3 + $0xe4] sm:$0x8] }
  0xc8   : > { %10318 = vmatpush3.bf16.msra.mxu1 %v2523_v54  ;;  %10313 = vmatprep.mubr.msk.bf16.mxu1 %vm831_vm5, %v9472_v30  ;;  %v2488_v50 = vshll.u32 %v2379_v46, 16  ;;  %v2477_v30 = vsel %vm11362_vm13, %v2472_v57, %v2476_v17  ;;  %v489_v35 = vsel %vm11737_vm7, 0, %v488_v23  ;;  %v504_v17 = vsel %vm11763_vm8, 0, %v503_v52 }
  0xc9   : > { %490 = vst [vmem:[#allocation3 + $0xe4] sm:$0x8] %v489_v35  ;;  %505 = vst [vmem:[#allocation3 + $0x38] sm:$0x1] %v504_v17 }
  0xca   : > { %v2490_v58 = vrot.slane %v2488_v50, 5 }
  0xcb   : > { %2828 = vrot.lane.b32.xlu1 %v11696_v38, %s11121_s17  ;;  %v494_v34 = vld [vmem:[#allocation3 + $0x14] sm:$0x1] }
  0xcc   : > { %v2491_v2 = vsel %vm11362_vm13, %v2486_v53, %v2490_v58  ;;  %v495_v41 = vsel %vm11763_vm8, 0, %v494_v34  ;;  %v455_v58 = vld [vmem:[#allocation3 + $0x60] sm:$0x8] }
  0xcd   : > { %v9482_v4 = vcombine.low %v2477_v30, %v2491_v2  ;;  %496 = vst [vmem:[#allocation3 + $0x14] sm:$0x1] %v495_v41  ;;  %v456_v30 = vsel %vm11737_vm7, 0, %v455_v58 }
  0xce   : > { %457 = vst [vmem:[#allocation3 + $0x60] sm:$0x8] %v456_v30 }
  0xcf   : > { %10314 = vmatmul.mubr.msk.bf16.gmra.mrb[4].mxu1 %vm831_vm5, %v9473_v26 }
  0xd0   : > { %10319 = vmatprep.mubr.msk.bf16.mxu1 %vm831_vm5, %v9479_v22 }
  0xd6   : > { %v11759_v39 = vpop.permute.xlu0 %2617  ;;  %v11773_v6 = vpop.permute.xlu1 %2806 }
  0xd7   : > { %10320 = vmatmul.mubr.msk.bf16.vlgmr.msra.gmra.mrb[0].mxu1 %vm831_vm5, %v9480_v14  ;;  %v449_v14 = vld [vmem:[#allocation3 + $0x48] sm:$0x8] }
  0xd8   : > { %10323 = vmatprep.mubr.msk.bf16.mxu1 %vm831_vm5, %v9481_v56  ;;  %v450_v57 = vsel %vm11737_vm7, 0, %v449_v14  ;;  %v459_v14 = vsel %vm11737_vm7, 0, %v458_v43 }
  0xd9   : > { %451 = vst [vmem:[#allocation3 + $0x48] sm:$0x8] %v450_v57  ;;  %460 = vst [vmem:[#allocation3 + $0x6c] sm:$0x8] %v459_v14 }
  0xda   : > { %v11769_v46 = vpop.permute.xlu0 %2804  ;;  %v11781_v51 = vpop.permute.xlu1 %2869 }
  0xde   : > { %v11779_v50 = vpop.permute.xlu0 %2808  ;;  %v11789_v53 = vpop.permute.xlu1 %2873 }
  0xdf   : > { %10324 = vmatmul.mubr.msk.bf16.gmra.mrb[4].mxu1 %vm831_vm5, %v9482_v4 }
  0xe2   : > { %v11785_v56 = vpop.permute.xlu0 %2871  ;;  %v11795_v4 = vpop.permute.xlu1 %2812 }
  0xe6   : > { %v11793_v2 = vpop.permute.xlu0 %2810 }
 0x150   : > { %v10281_v54 = vpop.f32.mrb[0].mxu0 }
 0x151   : > { %v2607_v1 = vadd.f32 %v10281_v54, %v11508_v60  ;;  %v1903_v7 = vpop.f32.mrb[1].mxu0  ;;  %v11797_v54 = vpop.permute.xlu0 %2814 }
 0x152   : > { %v2605_v8 = vadd.f32 %v11508_v60, %v1903_v7  ;;  %v10282_v10 = vpop.f32.mrb[2].mxu0  ;;  %v461_v7 = vld [vmem:[#allocation3 + $0x78] sm:$0x8] }
 0x153   : > { %v9939_v55 = vpack.c.bf16 %v2607_v1, %v2607_v1  ;;  %v2608_v12 = vadd.f32 %v10282_v10, %v11508_v60  ;;  %v1906_v13 = vpop.f32.mrb[3].mxu0  ;;  %v11799_v1 = vpop.permute.xlu1 %2816 }
 0x154   : > { %v9937_v49 = vpack.c.bf16 %v2605_v8, %v2605_v8  ;;  %v2606_v15 = vadd.f32 %v11508_v60, %v1906_v13  ;;  %v462_v8 = vsel %vm11737_vm7, 0, %v461_v7 }
 0x155   : > { %2664 = vst.msk [vmem:[#allocation3 + $0x4c] sm:$0xf] %vm2661_vm14, %v9939_v55  ;;  %v9940_v61 = vpack.c.bf16 %v2608_v12, %v2608_v12  ;;  %2674 = vrot.lane.b32.xlu0 %v9939_v55, %s11121_s17  ;;  %463 = vst [vmem:[#allocation3 + $0x78] sm:$0x8] %v462_v8  ;;  %v11803_v10 = vpop.permute.xlu0 %2875  ;;  %v467_v12 = vld [vmem:[#allocation3 + $0x90] sm:$0x8] }
 0x156   : > { %2662 = vst.msk [vmem:[#allocation3 + $0x1c] sm:$0xf] %vm2661_vm14, %v9937_v49  ;;  %v9938_v62 = vpack.c.bf16 %v2606_v15, %v2606_v15  ;;  %2670 = vrot.lane.b32.xlu1 %v9937_v49, %s11121_s17  ;;  %v468_v13 = vsel %vm11737_vm7, 0, %v467_v12  ;;  %v500_v12 = vld [vmem:[#allocation3 + $0x2c] sm:$0x1] }
 0x157   : > { %2665 = vst.msk [vmem:[#allocation3 + $0x64] sm:$0xf] %vm2661_vm14, %v9940_v61  ;;  %v11805_v55 = vpop.permute.xlu1 %2877  ;;  %469 = vst [vmem:[#allocation3 + $0x90] sm:$0x8] %v468_v13 }
 0x158   : > { %2663 = vst.msk [vmem:[#allocation3 + $0x34] sm:$0xf] %vm2661_vm14, %v9938_v62  ;;  %v10285_v44 = vpop.f32.mrb[4].mxu0 }
 0x159   : > { %2676 = vrot.lane.b32.xlu0 %v9940_v61, %s11121_s17  ;;  %v2611_v20 = vadd.f32 %v10285_v44, %v11508_v60  ;;  %v1919_v21 = vpop.f32.mrb[5].mxu0  ;;  %v11809_v49 = vpop.permute.xlu0 %2879  ;;  %v509_v61 = vld [vmem:[#allocation3 + $0x50] sm:$0x1] }
 0x15a   : > { %v2609_v3 = vadd.f32 %v11508_v60, %v1919_v21  ;;  %v10286_v18 = vpop.f32.mrb[6].mxu0  ;;  %2832 = vrot.lane.b32.xlu1 %v11717_v19, %s11121_s17  ;;  %v510_v44 = vsel %vm11763_vm8, 0, %v509_v61  ;;  %v515_v21 = vld [vmem:[#allocation3 + $0x68] sm:$0x1] }
 0x15b   : > { %v9943_v16 = vpack.c.bf16 %v2611_v20, %v2611_v20  ;;  %v2612_v27 = vadd.f32 %v10286_v18, %v11508_v60  ;;  %v1922_v28 = vpop.f32.mrb[7].mxu0  ;;  %v11811_v15 = vpop.permute.xlu1 %2881  ;;  %511 = vst [vmem:[#allocation3 + $0x50] sm:$0x1] %v510_v44  ;;  %v446_v44 = vld [vmem:[#allocation3 + $0x3c] sm:$0x8] }
 0x15c   : > { %v9941_v29 = vpack.c.bf16 %v2609_v3, %v2609_v3  ;;  %v2610_v26 = vadd.f32 %v11508_v60, %v1922_v28  ;;  %v516_v3 = vsel %vm11763_vm8, 0, %v515_v21  ;;  %v452_v28 = vld [vmem:[#allocation3 + $0x54] sm:$0x8] }
 0x15d   : > { %2668 = vst.msk [vmem:[#allocation3 + $0xac] sm:$0xf] %vm2661_vm14, %v9943_v16  ;;  %2672 = vrot.lane.b32.xlu0 %v9938_v62, %s11121_s17  ;;  %v9944_v36 = vpack.c.bf16 %v2612_v27, %v2612_v27  ;;  %v11813_v62 = vpop.permute.xlu0 %2818  ;;  %517 = vst [vmem:[#allocation3 + $0x68] sm:$0x1] %v516_v3  ;;  %v447_v3 = vsel %vm11737_vm7, 0, %v446_v44 }
 0x15e   : > { %2666 = vst.msk [vmem:[#allocation3 + $0x7c] sm:$0xf] %vm2661_vm14, %v9941_v29  ;;  %v9942_v22 = vpack.c.bf16 %v2610_v26, %v2610_v26  ;;  %448 = vst [vmem:[#allocation3 + $0x3c] sm:$0x8] %v447_v3 }
 0x15f   : > { %2669 = vst.msk [vmem:[#allocation3 + $0xc4] sm:$0xf] %vm2661_vm14, %v9944_v36  ;;  %v11817_v20 = vpop.permute.xlu1 %2820 }
 0x160   : > { %2667 = vst.msk [vmem:[#allocation3 + $0x94] sm:$0xf] %vm2661_vm14, %v9942_v22 }
 0x161   : > { %2682 = vrot.lane.b32.xlu0 %v9943_v16, %s11121_s17  ;;  %v11821_v18 = vpop.permute.xlu0 %2822 }
 0x163   : > { %v11823_v16 = vpop.permute.xlu1 %2824 }
 0x165   : > { %2678 = vrot.lane.b32.xlu0 %v9941_v29, %s11121_s17  ;;  %v11830_v23 = vpop.permute.xlu0 %2883 }
 0x167   : > { %v11833_v5 = vpop.permute.xlu1 %2885 }
 0x169   : > { %2684 = vrot.lane.b32.xlu0 %v9944_v36, %s11121_s17  ;;  %v453_v36 = vsel %vm11737_vm7, 0, %v452_v28  ;;  %v11845_v41 = vpop.permute.xlu0 %2887  ;;  %v501_v28 = vsel %vm11763_vm8, 0, %v500_v12 }
 0x16a   : > { %454 = vst [vmem:[#allocation3 + $0x54] sm:$0x8] %v453_v36  ;;  %502 = vst [vmem:[#allocation3 + $0x2c] sm:$0x1] %v501_v28 }
 0x16b   : > { %v11852_v58 = vpop.permute.xlu1 %2889 }
 0x16d   : > { %2680 = vrot.lane.b32.xlu0 %v9942_v22, %s11121_s17 }
 0x171   : > { %2830 = vrot.lane.b32.xlu0 %v2785_v47, %s11121_s17 }
 0x175   : > { %2891 = vrot.lane.b32.xlu0 %v11674_v24, %s11122_s19  ;;  %v444_v24 = vsel %vm11737_vm7, 0, %v443_v59 }
 0x176   : > { %445 = vst [vmem:[#allocation3 + $0x30] sm:$0x8] %v444_v24  ;;  %v11043_v24 = vld [vmem:[%s13662_s4 + $0x4] sm:$0xff]  }
 0x177   : > { %10327 = vmatprep.subr.bf16.mxu0 %v11043_v24 }
 0x178   : > { %10328 = vmatpush3.bf16.msra.mxu0 %v11043_v24  ;;  %v473_v24 = vld [vmem:[#allocation3 + $0xa8] sm:$0x8] }
 0x179   : > { %2895 = vrot.lane.b32.xlu0 %v2785_v47, %s11122_s19  ;;  %v440_v47 = vld [vmem:[#allocation3 + $0x24] sm:$0x8] }
 0x17a   : > { %v441_v9 = vsel %vm11737_vm7, 0, %v440_v47 }
 0x17b   : > { %442 = vst [vmem:[#allocation3 + $0x24] sm:$0x8] %v441_v9  ;;  %v2936_v9 = vld [vmem:[#allocation3 + $0x18] sm:$0x8] }
 0x1aa   : > { %v10321_v27 = vpop.f32.mrb[0].mxu1 }
 0x1ab   : > { %v2622_v29 = vadd.f32 %v10321_v27, %v11759_v39  ;;  %v2559_v26 = vpop.f32.mrb[1].mxu1 }
 0x1ac   : > { %v2620_v22 = vadd.f32 %v11759_v39, %v2559_v26  ;;  %v10322_v31 = vpop.f32.mrb[2].mxu1  ;;  %v521_v26 = vld [vmem:[#allocation3 + $0x80] sm:$0x1] }
 0x1ad   : > { %v9947_v32 = vpack.c.bf16 %v2622_v29, %v2622_v29  ;;  %v2623_v33 = vadd.f32 %v10322_v31, %v11759_v39  ;;  %v2562_v0 = vpop.f32.mrb[3].mxu1  ;;  %v11873_v29 = vpop.permute.xlu1 %2828  ;;  %v522_v36 = vsel %vm11763_vm8, 0, %v521_v26 }
 0x1ae   : > { %v9945_v35 = vpack.c.bf16 %v2620_v22, %v2620_v22  ;;  %v2621_v37 = vadd.f32 %v11759_v39, %v2562_v0  ;;  %v464_v22 = vld [vmem:[#allocation3 + $0x84] sm:$0x8]  ;;  %523 = vst [vmem:[#allocation3 + $0x80] sm:$0x1] %v522_v36  ;;  %v512_v36 = vld [vmem:[#allocation3 + $0x5c] sm:$0x1] }
 0x1af   : > { %2734 = vst.msk [vmem:[#allocation3 + $0x58] sm:$0xf] %vm2661_vm14, %v9947_v32  ;;  %v9948_v42 = vpack.c.bf16 %v2623_v33, %v2623_v33  ;;  %2744 = vrot.lane.b32.xlu1 %v9947_v32, %s11121_s17  ;;  %v2935_v32 = vld [vmem:[#allocation3 + $0x10] sm:$0xf]  ;;  %v465_v33 = vsel %vm11737_vm7, 0, %v464_v22 }
 0x1b0   : > { %2732 = vst.msk [vmem:[#allocation3 + $0x28] sm:$0xf] %vm2661_vm14, %v9945_v35  ;;  %v9946_v59 = vpack.c.bf16 %v2621_v37, %v2621_v37  ;;  %466 = vst [vmem:[#allocation3 + $0x84] sm:$0x8] %v465_v33  ;;  %v2972_v47 = vshrl.u32 %v2935_v32, 16 }
 0x1b1   : > { %2735 = vst.msk [vmem:[#allocation3 + $0x70] sm:$0xf] %vm2661_vm14, %v9948_v42  ;;  %v518_v22 = vld [vmem:[#allocation3 + $0x74] sm:$0x1]  ;;  %v524_v33 = vld [vmem:[#allocation3 + $0x8c] sm:$0x1] }
 0x1b2   : > { %2733 = vst.msk [vmem:[#allocation3 + $0x40] sm:$0xf] %vm2661_vm14, %v9946_v59  ;;  %v10325_v34 = vpop.f32.mrb[4].mxu1 }
 0x1b3   : > { %v2626_v48 = vadd.f32 %v10325_v34, %v11759_v39  ;;  %v2575_v52 = vpop.f32.mrb[5].mxu1  ;;  %2740 = vrot.lane.b32.xlu1 %v9945_v35, %s11121_s17  ;;  %v527_v35 = vld [vmem:[#allocation3 + $0x98] sm:$0x1] }
 0x1b4   : > { %v2624_v17 = vadd.f32 %v11759_v39, %v2575_v52  ;;  %v10326_v57 = vpop.f32.mrb[6].mxu1  ;;  %v528_v37 = vsel %vm11763_vm8, 0, %v527_v35  ;;  %v2980_v52 = vshrl.u32 %v2936_v9, 16  ;;  %v2944_v9 = vld [vmem:[#allocation3 + $0x48] sm:$0x8] }
 0x1b5   : > { %v9951_v30 = vpack.c.bf16 %v2626_v48, %v2626_v48  ;;  %v2627_v7 = vadd.f32 %v10326_v57, %v11759_v39  ;;  %v2578_v8 = vpop.f32.mrb[7].mxu1  ;;  %529 = vst [vmem:[#allocation3 + $0x98] sm:$0x1] %v528_v37  ;;  %v474_v48 = vsel %vm11737_vm7, 0, %v473_v24  ;;  %v3930_v37 = vld [vmem:[#allocation3 + $0x18] sm:$0x8] }
 0x1b6   : > { %v9949_v13 = vpack.c.bf16 %v2624_v17, %v2624_v17  ;;  %v2625_v61 = vadd.f32 %v11759_v39, %v2578_v8  ;;  %v11869_v39 = vpop.permute.xlu0 %2826  ;;  %475 = vst [vmem:[#allocation3 + $0xa8] sm:$0x8] %v474_v48  ;;  %v3942_v24 = vld [vmem:[#allocation3 + $0x60] sm:$0x8] }
 0x1b7   : > { %2738 = vst.msk [vmem:[#allocation3 + $0xb8] sm:$0xf] %vm2661_vm14, %v9951_v30  ;;  %v11857_v21 = vpack.c.bf16 %v2627_v7, %v2627_v7  ;;  %2746 = vrot.lane.b32.xlu1 %v9948_v42, %s11121_s17 }
 0x1b8   : > { %2736 = vst.msk [vmem:[#allocation3 + $0x88] sm:$0xf] %vm2661_vm14, %v9949_v13  ;;  %v11863_v27 = vpack.c.bf16 %v2625_v61, %v2625_v61 }
 0x1b9   : > { %2739 = vst.msk [vmem:[#allocation3 + $0xd0] sm:$0xf] %vm2661_vm14, %v11857_v21 }
 0x1ba   : > { %2737 = vst.msk [vmem:[#allocation3 + $0xa0] sm:$0xf] %vm2661_vm14, %v11863_v27  ;;  %vm3223_vm14 = vcmask 130048  }
 0x1bb   : > { %2742 = vrot.lane.b32.xlu1 %v9946_v59, %s11121_s17  ;;  %v470_v59 = vld [vmem:[#allocation3 + $0x9c] sm:$0x8] }
 0x1bf   : > { %2752 = vrot.lane.b32.xlu1 %v9951_v30, %s11121_s17 }
 0x1c3   : > { %2748 = vrot.lane.b32.xlu1 %v9949_v13, %s11121_s17 }
 0x1c7   : > { %v2675_v31 = vpop.permute.xlu0 %2674  ;;  %2893 = vrot.lane.b32.xlu1 %v11696_v38, %s11122_s19 }
 0x1c8   : > { %2697 = vst.msk [vmem:[#allocation3 + $0x4c] sm:$0xf] %vm2694_vm6, %v2675_v31  ;;  %v2671_v0 = vpop.permute.xlu1 %2670  ;;  %v513_v31 = vsel %vm11763_vm8, 0, %v512_v36 }
 0x1c9   : > { %2857 = vst.msk [vmem:[#allocation3 + $0x4c] sm:$0xf] %vm2852_vm11, %v11795_v4  ;;  %v2934_v4 = vld [vmem:[#allocation3 + $0xc] sm:$0x8]  ;;  %514 = vst [vmem:[#allocation3 + $0x5c] sm:$0x1] %v513_v31 }
 0x1ca   : > { %2695 = vst.msk [vmem:[#allocation3 + $0x1c] sm:$0xf] %vm2694_vm6, %v2671_v0  ;;  %v2967_v43 = vshrl.u32 %v2934_v4, 16  ;;  %v525_v0 = vsel %vm11763_vm8, 0, %v524_v33  ;;  %v3934_v4 = vld [vmem:[#allocation3 + $0x30] sm:$0x8] }
 0x1cb   : > { %2922 = vst.msk [vmem:[#allocation3 + $0x4c] sm:$0xf] %vm2917_vm12, %v11805_v55  ;;  %v2677_v42 = vpop.permute.xlu0 %2676  ;;  %v2974_v55 = vrot.slane %v2972_v47, 7  ;;  %2750 = vrot.lane.b32.xlu1 %v11863_v27, %s11121_s17  ;;  %526 = vst [vmem:[#allocation3 + $0x8c] sm:$0x1] %v525_v0  ;;  %v3989_v48 = vshrl.u32 %v3934_v4, 16 }
 0x1cc   : > { %2853 = vst.msk [vmem:[#allocation3 + $0x1c] sm:$0xf] %vm2852_vm11, %v11769_v46  ;;  %v2975_v46 = vshll.u32 %v2935_v32, 16  ;;  %v9505_v7 = vrot.slane %v2967_v43, 11  ;;  %v2940_v47 = vld [vmem:[#allocation3 + $0x30] sm:$0x8] }
 0x1cd   : > { %2918 = vst.msk [vmem:[#allocation3 + $0x1c] sm:$0xf] %vm2917_vm12, %v11781_v51  ;;  %v471_v51 = vsel %vm11737_vm7, 0, %v470_v59  ;;  %v2948_v59 = vld [vmem:[#allocation3 + $0x60] sm:$0x8]  ;;  %v3006_v43 = vshrl.u32 %v2940_v47, 16 }
 0x1ce   : > { %2698 = vst.msk [vmem:[#allocation3 + $0x64] sm:$0xf] %vm2694_vm6, %v2677_v42  ;;  %472 = vst [vmem:[#allocation3 + $0x9c] sm:$0x8] %v471_v51  ;;  %v2977_v57 = vor.u32 %v2975_v46, %v2974_v55  ;;  %v3963_v42 = vshrl.u32 %v3930_v37, 16 }
 0x1cf   : > { %2859 = vst.msk [vmem:[#allocation3 + $0x64] sm:$0xf] %vm2852_vm11, %v11799_v1  ;;  %v2673_v34 = vpop.permute.xlu0 %2672  ;;  %v476_v1 = vld [vmem:[#allocation3 + $0xb4] sm:$0x8]  ;;  %2897 = vrot.lane.b32.xlu1 %v11717_v19, %s11122_s19  ;;  %v3938_v55 = vld [vmem:[#allocation3 + $0x48] sm:$0x8] }
 0x1d0   : > { %2924 = vst.msk [vmem:[#allocation3 + $0x64] sm:$0xf] %vm2917_vm12, %v11811_v15  ;;  %v479_v15 = vld [vmem:[#allocation3 + $0xc0] sm:$0x8]  ;;  %v477_v38 = vsel %vm11737_vm7, 0, %v476_v1  ;;  %v2978_v44 = vsel %vm11294_vm9, %v9505_v7, %v2977_v57 }
 0x1d1   : > { %2696 = vst.msk [vmem:[#allocation3 + $0x34] sm:$0xf] %vm2694_vm6, %v2673_v34  ;;  %v480_v14 = vsel %vm11737_vm7, 0, %v479_v15  ;;  %478 = vst [vmem:[#allocation3 + $0xb4] sm:$0x8] %v477_v38  ;;  %v3032_v15 = vshrl.u32 %v2944_v9, 16 }
 0x1d2   : > { %2855 = vst.msk [vmem:[#allocation3 + $0x34] sm:$0xf] %vm2852_vm11, %v11779_v50  ;;  %481 = vst [vmem:[#allocation3 + $0xc0] sm:$0x8] %v480_v14  ;;  %v4959_v46 = vld [vmem:[#allocation3 + $0x30] sm:$0x8] }
 0x1d3   : > { %2920 = vst.msk [vmem:[#allocation3 + $0x34] sm:$0xf] %vm2917_vm12, %v11789_v53  ;;  %v2683_v30 = vpop.permute.xlu0 %2682  ;;  %v9506_v53 = vrot.slane %v2980_v52, 11  ;;  %v4967_v34 = vld [vmem:[#allocation3 + $0x60] sm:$0x8]  ;;  %v5003_v52 = vshrl.u32 %v4959_v46, 16 }
 0x1d4   : > { %v2937_v17 = vld [vmem:[#allocation3 + $0x1c] sm:$0xf]  ;;  %2701 = vst.msk [vmem:[#allocation3 + $0xac] sm:$0xf] %vm2694_vm6, %v2683_v30  ;;  %v2952_v51 = vld [vmem:[#allocation3 + $0x78] sm:$0x8] }
 0x1d5   : > { %v9521_v50 = vcombine.low %v2935_v32, %v2937_v17  ;;  %v2985_v8 = vshrl.u32 %v2937_v17, 16  ;;  %v2988_v12 = vshll.u32 %v2937_v17, 16  ;;  %2865 = vst.msk [vmem:[#allocation3 + $0xac] sm:$0xf] %vm2852_vm11, %v11873_v29  ;;  %v2833_v29 = vpop.permute.xlu1 %2832  ;;  %v519_v32 = vsel %vm11763_vm8, 0, %v518_v22 }
 0x1d6   : > { %520 = vst [vmem:[#allocation3 + $0x74] sm:$0x1] %v519_v32  ;;  %v3946_v1 = vld [vmem:[#allocation3 + $0x78] sm:$0x8]  ;;  %v3058_v38 = vshrl.u32 %v2948_v59, 16  ;;  %v4015_v14 = vshrl.u32 %v3938_v55, 16 }
 0x1d7   : > { %10329 = vmatprep.mubr.msk.bf16.mxu0 %vm3223_vm14, %v9521_v50  ;;  %v2987_v13 = vrot.slane %v2985_v8, 7  ;;  %v2679_v61 = vpop.permute.xlu0 %2678  ;;  %v4041_v17 = vshrl.u32 %v3942_v24, 16  ;;  %v5055_v57 = vshrl.u32 %v4967_v34, 16  ;;  %v3084_v30 = vshrl.u32 %v2952_v51, 16  ;;  %v2938_v31 = vld [vmem:[#allocation3 + $0x24] sm:$0x8] }
 0x1d8   : > { %2699 = vst.msk [vmem:[#allocation3 + $0x7c] sm:$0xf] %vm2694_vm6, %v2679_v61  ;;  %v11956_v50 = vrot.slane %v3963_v42, 11  ;;  %v4067_v7 = vshrl.u32 %v3946_v1, 16  ;;  %v11958_v8 = vrot.slane %v3006_v43, 11  ;;  %v2993_v46 = vshrl.u32 %v2938_v31, 16 }
 0x1d9   : > { %v2990_v3 = vor.u32 %v2988_v12, %v2987_v13  ;;  %2861 = vst.msk [vmem:[#allocation3 + $0x7c] sm:$0xf] %vm2852_vm11, %v11817_v20  ;;  %v506_v20 = vld [vmem:[#allocation3 + $0x44] sm:$0x1]  ;;  %v2956_v12 = vld [vmem:[#allocation3 + $0x90] sm:$0x8] }
 0x1da   : > { %2926 = vst.msk [vmem:[#allocation3 + $0x7c] sm:$0xf] %vm2917_vm12, %v11833_v5  ;;  %v507_v5 = vsel %vm11763_vm8, 0, %v506_v20  ;;  %v3950_v13 = vld [vmem:[#allocation3 + $0x90] sm:$0x8]  ;;  %v11974_v20 = vrot.slane %v3084_v30, 11 }
 0x1db   : > { %v2991_v27 = vsel %vm11294_vm9, %v9506_v53, %v2990_v3  ;;  %v2685_v26 = vpop.permute.xlu0 %2684  ;;  %508 = vst [vmem:[#allocation3 + $0x44] sm:$0x1] %v507_v5  ;;  %v11960_v53 = vrot.slane %v3989_v48, 11  ;;  %v2946_v61 = vld [vmem:[#allocation3 + $0x54] sm:$0x8]  ;;  %v3110_v5 = vshrl.u32 %v2956_v12, 16 }
 0x1dc   : > { %v9538_v28 = vcombine.low %v2978_v44, %v2991_v27  ;;  %2702 = vst.msk [vmem:[#allocation3 + $0xc4] sm:$0xf] %vm2694_vm6, %v2685_v26  ;;  %v11962_v44 = vrot.slane %v3032_v15, 11  ;;  %v3940_v3 = vld [vmem:[#allocation3 + $0x54] sm:$0x8]  ;;  %v11964_v27 = vrot.slane %v5003_v52, 11 }
 0x1dd   : > { %2867 = vst.msk [vmem:[#allocation3 + $0xc4] sm:$0xf] %vm2852_vm11, %v2833_v29  ;;  %v11968_v29 = vrot.slane %v4015_v14, 11  ;;  %v11970_v26 = vrot.slane %v4041_v17, 11  ;;  %v11976_v36 = vrot.slane %v4067_v7, 11  ;;  %v4093_v22 = vshrl.u32 %v3950_v13, 16 }
 0x1de   : > { %3369 = vrot.lane.b32.xlu0 %v9538_v28, %s11120_s18  ;;  %13692 = vst [vmem:[#allocation8_spill] sm:$0xff] %v11964_v27  ;;  %v11966_v28 = vrot.slane %v3058_v38, 11  ;;  %v3045_v32 = vshrl.u32 %v2946_v61, 16  ;;  %v3932_v33 = vld [vmem:[#allocation3 + $0x24] sm:$0x8]  ;;  %v11991_v51 = vrot.slane %v3110_v5, 11 }
 0x1df   : > { %v2681_v19 = vpop.permute.xlu0 %2680  ;;  %13694 = vst [vmem:[#allocation10_spill] sm:$0xff] %v11976_v36  ;;  %v533_v37 = vld [vmem:[#allocation3 + $0xb0] sm:$0x1]  ;;  %v536_v47 = vld [vmem:[#allocation3 + $0xbc] sm:$0x1]  ;;  %v3976_v24 = vshrl.u32 %v3932_v33, 16 }
 0x1e0   : > { %2700 = vst.msk [vmem:[#allocation3 + $0x94] sm:$0xf] %vm2694_vm6, %v2681_v19  ;;  %v11972_v19 = vrot.slane %v5055_v57, 11  ;;  %v2950_v42 = vld [vmem:[#allocation3 + $0x6c] sm:$0x8]  ;;  %v534_v9 = vsel %vm11763_vm8, 0, %v533_v37 }
 0x1e1   : > { %2863 = vst.msk [vmem:[#allocation3 + $0x94] sm:$0xf] %vm2852_vm11, %v11823_v16  ;;  %v11948_v16 = vld [vmem:[%s13662_s4] sm:$0xf]  ;;  %v4957_v4 = vld [vmem:[#allocation3 + $0x24] sm:$0x8] }
 0x1e2   : > { %2928 = vst.msk [vmem:[#allocation3 + $0x94] sm:$0xf] %vm2917_vm12, %v11852_v58  ;;  %v530_v58 = vld [vmem:[#allocation3 + $0xa4] sm:$0x1]  ;;  %10999 = vmatprep.subr.msk.bf16.mxu0 %vm844_vm0, %v11948_v16  ;;  %13693 = vst [vmem:[#allocation9_spill] sm:$0xff] %v11972_v19  ;;  %v537_v55 = vsel %vm11763_vm8, 0, %v536_v47 }
 0x1e3   : > { %v531_v35 = vsel %vm11763_vm8, 0, %v530_v58  ;;  %v4028_v58 = vshrl.u32 %v3940_v3, 16  ;;  %v2942_v59 = vld [vmem:[#allocation3 + $0x3c] sm:$0x8]  ;;  %v3944_v34 = vld [vmem:[#allocation3 + $0x6c] sm:$0x8] }
 0x1e4   : > { %532 = vst [vmem:[#allocation3 + $0xa4] sm:$0x1] %v531_v35  ;;  %v11978_v35 = vld [vmem:[#allocation3 + $0x54] sm:$0x8]  ;;  %535 = vst [vmem:[#allocation3 + $0xb0] sm:$0x1] %v534_v9 }
 0x1e5   : > { %13695 = vst [vmem:[#allocation11_spill] sm:$0xff] %v11978_v35  ;;  %538 = vst [vmem:[#allocation3 + $0xbc] sm:$0x1] %v537_v55  ;;  %v11989_v43 = vrot.slane %v3045_v32, 11  ;;  %v3936_v48 = vld [vmem:[#allocation3 + $0x3c] sm:$0x8] }
 0x1e6   : > { %v11993_v1 = vrot.slane %v4093_v22, 11  ;;  %v11998_v38 = vld [vmem:[#allocation3 + $0x4c] sm:$0xf]  ;;  %v3071_v14 = vshrl.u32 %v2950_v42, 16  ;;  %v2954_v17 = vld [vmem:[#allocation3 + $0x84] sm:$0x8] }
 0x1e7   : > { %v4990_v57 = vshrl.u32 %v4957_v4, 16  ;;  %v3019_v30 = vshrl.u32 %v2942_v59, 16  ;;  %v12003_v7 = vld [vmem:[#allocation3 + $0x4c] sm:$0xf]  ;;  %v4054_v12 = vshrl.u32 %v3944_v34, 16  ;;  %v12009_v61 = vrot.slane %v2993_v46, 11 }
 0x1e8   : > { %13696 = vst [vmem:[#allocation12_spill] sm:$0xff] %v11993_v1  ;;  %v12007_v13 = vld [vmem:[#allocation3 + $0x34] sm:$0xf]  ;;  %v12011_v3 = vrot.slane %v3976_v24, 11  ;;  %v4002_v5 = vshrl.u32 %v3936_v48, 16  ;;  %v12013_v22 = vrot.slane %v4028_v58, 11 }
 0x1e9   : > { %v3037_v31 = vshrl.u32 %v11998_v38, 16  ;;  %v3097_v32 = vshrl.u32 %v2954_v17, 16  ;;  %v12018_v33 = vld [vmem:[#allocation3 + $0x1c] sm:$0xf]  ;;  %v12021_v47 = vrot.slane %v3071_v14, 11  ;;  %v4020_v42 = vshrl.u32 %v12003_v7, 16 }
 0x1ea   : > { %v12024_v4 = vrot.slane %v4990_v57, 11  ;;  %v539_v58 = vld [vmem:[#allocation3 + $0xc8] sm:$0x1]  ;;  %v12028_v9 = vrot.slane %v3019_v30, 11  ;;  %v12030_v55 = vrot.slane %v4054_v12, 11  ;;  %v3040_v34 = vshll.u32 %v11998_v38, 16 }
 0x1eb   : > { %v540_v46 = vsel %vm11763_vm8, 0, %v539_v58  ;;  %v3968_v48 = vshrl.u32 %v12018_v33, 16  ;;  %v3039_v57 = vrot.slane %v3037_v31, 7  ;;  %v12047_v30 = vrot.slane %v3097_v32, 11  ;;  %v12052_v45 = vld [vmem:[#allocation3 + $0x64] sm:$0xf] }
 0x1ec   : > { %13697 = vst [vmem:[#allocation13_spill] sm:$0xff] %v12024_v4  ;;  %541 = vst [vmem:[#allocation3 + $0xc8] sm:$0x1] %v540_v46  ;;  %v3971_v15 = vshll.u32 %v12018_v33, 16  ;;  %v2958_v46 = vld [vmem:[#allocation3 + $0x9c] sm:$0x8] }
 0x1ed   : > { %v2960_v31 = vld [vmem:[#allocation3 + $0xa8] sm:$0x8]  ;;  %v2962_v32 = vld [vmem:[#allocation3 + $0xb4] sm:$0x8]  ;;  %v3410_v63 = vsel %vm844_vm0, %v11948_v16, 0  ;;  %v3123_v35 = vshrl.u32 %v2958_v46, 16 }
 0x1ee   : > { %v2964_v1 = vld [vmem:[#allocation3 + $0xc0] sm:$0x8]  ;;  %v3149_v46 = vshrl.u32 %v2962_v32, 16 }
 0x221   : > { %v2745_v0 = vpop.permute.xlu1 %2744 }
 0x222   : > { %2766 = vst.msk [vmem:[#allocation3 + $0x58] sm:$0xf] %vm2694_vm6, %v2745_v0  ;;  %v3948_v0 = vld [vmem:[#allocation3 + $0x84] sm:$0x8] }
 0x223   : > { %2858 = vst.msk [vmem:[#allocation3 + $0x58] sm:$0xf] %vm2852_vm11, %v11797_v54  ;;  %v11996_v54 = vpop.permute.xlu0 %2830  ;;  %v4080_v14 = vshrl.u32 %v3948_v0, 16 }
 0x224   : > { %2923 = vst.msk [vmem:[#allocation3 + $0x58] sm:$0xf] %vm2917_vm12, %v11809_v49  ;;  %v12001_v49 = vld [vmem:[#allocation3 + $0x64] sm:$0xf] }
 0x225   : > { %v2741_v52 = vpop.permute.xlu1 %2740  ;;  %v3066_v58 = vshll.u32 %v12001_v49, 16  ;;  %v12058_v11 = vrot.slane %v4080_v14, 11  ;;  %v4046_v14 = vshrl.u32 %v12052_v45, 16 }
 0x226   : > { %2764 = vst.msk [vmem:[#allocation3 + $0x28] sm:$0xf] %vm2694_vm6, %v2741_v52  ;;  %v12042_v52 = vrot.slane %v4002_v5, 11  ;;  %v4022_v5 = vrot.slane %v4020_v42, 7 }
 0x227   : > { %2854 = vst.msk [vmem:[#allocation3 + $0x28] sm:$0xf] %vm2852_vm11, %v11773_v6  ;;  %v3063_v6 = vshrl.u32 %v12001_v49, 16  ;;  %v12038_v24 = vpop.permute.xlu0 %2891 }
 0x228   : > { %2919 = vst.msk [vmem:[#allocation3 + $0x28] sm:$0xf] %vm2917_vm12, %v11785_v56  ;;  %v3011_v56 = vshrl.u32 %v12007_v13, 16 }
 0x229   : > { %v2747_v37 = vpop.permute.xlu1 %2746 }
 0x22a   : > { %2767 = vst.msk [vmem:[#allocation3 + $0x70] sm:$0xf] %vm2694_vm6, %v2747_v37  ;;  %v3065_v37 = vrot.slane %v3063_v6, 7  ;;  %v3013_v0 = vrot.slane %v3011_v56, 7  ;;  %v3970_v6 = vrot.slane %v3968_v48, 7  ;;  %v3136_v48 = vshrl.u32 %v2960_v31, 16 }
 0x22b   : > { %2860 = vst.msk [vmem:[#allocation3 + $0x70] sm:$0xf] %vm2852_vm11, %v11813_v62  ;;  %v12036_v59 = vld [vmem:[#allocation3 + $0x58] sm:$0xf]  ;;  %v4023_v62 = vshll.u32 %v12003_v7, 16 }
 0x22c   : > { %2925 = vst.msk [vmem:[#allocation3 + $0x70] sm:$0xf] %vm2917_vm12, %v11830_v23  ;;  %v3050_v17 = vshrl.u32 %v12036_v59, 16  ;;  %v3014_v23 = vshll.u32 %v12007_v13, 16  ;;  %v12067_v4 = vor.u32 %v3066_v58, %v3065_v37  ;;  %v12075_v37 = vor.u32 %v3040_v34, %v3039_v57  ;;  %v12078_v31 = vld [vmem:[#allocation3 + $0x34] sm:$0xf] }
 0x22d   : > { %v2743_v12 = vpop.permute.xlu1 %2742  ;;  %v12086_v34 = vrot.slane %v3136_v48, 11  ;;  %v3162_v57 = vshrl.u32 %v2964_v1, 16  ;;  %v12088_v36 = vor.u32 %v3971_v15, %v3970_v6  ;;  %v12102_v1 = vld [vmem:[#allocation3 + $0x7c] sm:$0xf]  ;;  %v12115_v48 = vld [vmem:[#allocation3 + $0x64] sm:$0xf] }
 0x22e   : > { %2765 = vst.msk [vmem:[#allocation3 + $0x40] sm:$0xf] %vm2694_vm6, %v2743_v12  ;;  %v12063_v12 = vld [vmem:[#allocation3 + $0x7c] sm:$0xf]  ;;  %v3052_v56 = vrot.slane %v3050_v17, 7  ;;  %v3016_v27 = vor.u32 %v3014_v23, %v3013_v0  ;;  %v3053_v17 = vshll.u32 %v12036_v59, 16 }
 0x22f   : > { %2856 = vst.msk [vmem:[#allocation3 + $0x40] sm:$0xf] %vm2852_vm11, %v11793_v2  ;;  %v2939_v7 = vld [vmem:[#allocation3 + $0x28] sm:$0xf]  ;;  %v2896_v2 = vpop.permute.xlu0 %2895  ;;  %v3089_v58 = vshrl.u32 %v12063_v12, 16  ;;  %v4049_v23 = vshll.u32 %v12052_v45, 16 }
 0x230   : > { %2921 = vst.msk [vmem:[#allocation3 + $0x40] sm:$0xf] %vm2917_vm12, %v11803_v10  ;;  %v9522_v33 = vcombine.low %v2939_v7, %v12007_v13  ;;  %v2998_v42 = vshrl.u32 %v2939_v7, 16  ;;  %v3001_v13 = vshll.u32 %v2939_v7, 16  ;;  %v3055_v7 = vor.u32 %v3053_v17, %v3052_v56  ;;  %v3952_v15 = vld [vmem:[#allocation3 + $0x9c] sm:$0x8] }
 0x231   : > { %v2753_v19 = vpop.permute.xlu1 %2752  ;;  %v3092_v56 = vshll.u32 %v12063_v12, 16  ;;  %v4106_v17 = vshrl.u32 %v3952_v15, 16 }
 0x232   : > { %2770 = vst.msk [vmem:[#allocation3 + $0xb8] sm:$0xf] %vm2694_vm6, %v2753_v19  ;;  %10330 = vmatmul.mubr.msk.bf16.vlgmr.msra.gmra.mrb[8].mxu0 %vm3223_vm14, %v9522_v33  ;;  %v3000_v10 = vrot.slane %v2998_v42, 7  ;;  %v12080_v19 = vor.u32 %v4023_v62, %v4022_v5  ;;  %v3017_v62 = vsel %vm11294_vm9, %v11958_v8, %v3016_v27  ;;  %v3994_v5 = vshrl.u32 %v12078_v31, 16 }
 0x233   : > { %2866 = vst.msk [vmem:[#allocation3 + $0xb8] sm:$0xf] %vm2852_vm11, %v11996_v54  ;;  %v2951_v16 = vld [vmem:[#allocation3 + $0x70] sm:$0xf]  ;;  %10346 = vmatpush3.bf16.msra.mxu0 %v3410_v63  ;;  %v12084_v54 = vrot.slane %v3123_v35, 11  ;;  %v3069_v35 = vsel %vm11294_vm9, %v11966_v28, %v12067_v4  ;;  %v3056_v27 = vsel %vm11294_vm9, %v11989_v43, %v3055_v7 }
 0x234   : > { %v3003_v33 = vor.u32 %v3001_v13, %v3000_v10  ;;  %2931 = vst.msk [vmem:[#allocation3 + $0xb8] sm:$0xf] %vm2917_vm12, %v2896_v2  ;;  %v3076_v0 = vshrl.u32 %v2951_v16, 16  ;;  %v12107_v2 = vrot.slane %v3149_v46, 11  ;;  %v9524_v10 = vcombine.low %v12036_v59, %v12001_v49 }
 0x235   : > { %v2749_v42 = vpop.permute.xlu1 %2748  ;;  %v12120_v13 = vrot.slane %v3162_v57, 11  ;;  %v9525_v43 = vcombine.low %v2951_v16, %v12063_v12  ;;  %v3079_v7 = vshll.u32 %v2951_v16, 16  ;;  %v9541_v49 = vcombine.low %v3056_v27, %v3069_v35 }
 0x236   : > { %2768 = vst.msk [vmem:[#allocation3 + $0x88] sm:$0xf] %vm2694_vm6, %v2749_v42  ;;  %v3004_v63 = vsel %vm11294_vm9, %v12009_v61, %v3003_v33  ;;  %v3091_v61 = vrot.slane %v3089_v58, 7  ;;  %v3078_v4 = vrot.slane %v3076_v0, 7  ;;  %v12128_v33 = vld [vmem:[#allocation3 + $0x94] sm:$0xf] }
 0x237   : > { %2862 = vst.msk [vmem:[#allocation3 + $0x88] sm:$0xf] %vm2852_vm11, %v11821_v18  ;;  %v9539_v32 = vcombine.low %v3004_v63, %v3017_v62  ;;  %v2943_v6 = vld [vmem:[#allocation3 + $0x40] sm:$0xf]  ;;  %v12131_v59 = vrot.slane %v3994_v5, 7  ;;  %v3997_v0 = vshll.u32 %v12078_v31, 16 }
 0x238   : > { %2927 = vst.msk [vmem:[#allocation3 + $0x88] sm:$0xf] %vm2917_vm12, %v11845_v41  ;;  %v9523_v8 = vcombine.low %v2943_v6, %v11998_v38  ;;  %v3024_v28 = vshrl.u32 %v2943_v6, 16  ;;  %v4072_v41 = vshrl.u32 %v12102_v1, 16  ;;  %v12123_v38 = vld [vmem:[#allocation3 + $0x34] sm:$0xf]  ;;  %v3081_v63 = vor.u32 %v3079_v7, %v3078_v4 }
 0x239   : > { %v2894_v18 = vpop.permute.xlu1 %2893  ;;  %3371 = vrot.lane.b32.xlu1 %v9539_v32, %s11120_s18  ;;  %v3027_v46 = vshll.u32 %v2943_v6, 16  ;;  %v4048_v42 = vrot.slane %v4046_v14, 7  ;;  %v3094_v62 = vor.u32 %v3092_v56, %v3091_v61  ;;  %v12138_v32 = vld [vmem:[%s11501_s14 + $0x3c] sm:$0xf]  ;;  %v3115_v16 = vshrl.u32 %v12128_v33, 16 }
 0x23a   : > { %2930 = vst.msk [vmem:[#allocation3 + $0xac] sm:$0xf] %vm2917_vm12, %v2894_v18  ;;  %10333 = vmatprep.mubr.msk.bf16.mxu0 %vm3223_vm14, %v9523_v8  ;;  %v3026_v58 = vrot.slane %v3024_v28, 7  ;;  %v12141_v35 = vrot.slane %v4106_v17, 11  ;;  %v3043_v61 = vsel %vm11294_vm9, %v11962_v44, %v12075_v37  ;;  %v12155_v8 = vld [vmem:[#allocation3 + $0x28] sm:$0xf] }
 0x23b   : > { %10334 = vmatmul.mubr.msk.bf16.gmra.mrb[12].mxu0 %vm3223_vm14, %v9524_v10  ;;  %v12153_v56 = vld [vmem:[#allocation3 + $0xb8] sm:$0xf]  ;;  %v12157_v27 = vrot.slane %v4072_v41, 7  ;;  %v12172_v37 = vld [vmem:[#allocation3 + $0xa8] sm:$0x8]  ;;  %v3082_v41 = vsel %vm11294_vm9, %v12021_v47, %v3081_v63  ;;  %v3095_v17 = vsel %vm11294_vm9, %v11974_v20, %v3094_v62  ;;  %v3981_v63 = vshrl.u32 %v12155_v8, 16 }
 0x23c   : > { %10337 = vmatprep.mubr.msk.bf16.mxu0 %vm3223_vm14, %v9525_v43  ;;  %v3029_v57 = vor.u32 %v3027_v46, %v3026_v58  ;;  %13698 = vst [vmem:[#allocation14_spill] sm:$0xff] %v12141_v35  ;;  %v12166_v10 = vld [vmem:[#allocation3 + $0x58] sm:$0xf]  ;;  %v3937_v58 = vld [vmem:[#allocation3 + $0x40] sm:$0xf]  ;;  %v3154_v47 = vshrl.u32 %v12153_v56, 16 }
 0x23d   : > { %v2751_v15 = vpop.permute.xlu1 %2750  ;;  %3375 = vrot.lane.b32.xlu1 %v9541_v49, %s11120_s18  ;;  %v12183_v46 = vld [vmem:[#allocation3 + $0xb4] sm:$0x8]  ;;  %v3118_v49 = vshll.u32 %v12128_v33, 16  ;;  %v3157_v45 = vshll.u32 %v12153_v56, 16  ;;  %v3984_v44 = vshll.u32 %v12155_v8, 16 }
 0x23e   : > { %2769 = vst.msk [vmem:[#allocation3 + $0xa0] sm:$0xf] %vm2694_vm6, %v2751_v15  ;;  %v3030_v6 = vsel %vm11294_vm9, %v12028_v9, %v3029_v57  ;;  %v12203_v5 = vld [vmem:[#allocation3 + $0x94] sm:$0xf] }
 0x23f   : > { %2864 = vst.msk [vmem:[#allocation3 + $0xa0] sm:$0xf] %vm2852_vm11, %v11869_v39  ;;  %v9540_v4 = vcombine.low %v3030_v6, %v3043_v61  ;;  %v2955_v18 = vld [vmem:[#allocation3 + $0x88] sm:$0xf]  ;;  %v4033_v6 = vshrl.u32 %v12166_v10, 16  ;;  %v9542_v61 = vcombine.low %v3082_v41, %v3095_v17  ;;  %v3156_v41 = vrot.slane %v3154_v47, 7 }
 0x240   : > { %2929 = vst.msk [vmem:[#allocation3 + $0xa0] sm:$0xf] %vm2917_vm12, %v12038_v24  ;;  %v9526_v39 = vcombine.low %v2955_v18, %v12128_v33  ;;  %v3102_v43 = vshrl.u32 %v2955_v18, 16  ;;  %v3117_v24 = vrot.slane %v3115_v16, 7  ;;  %v3105_v62 = vshll.u32 %v2955_v18, 16 }
 0x241   : > { %v2898_v7 = vpop.permute.xlu1 %2897  ;;  %2834 = vrot.lane.b32.xlu1 %v12138_v32, %s11121_s17  ;;  %3373 = vrot.lane.b32.xlu0 %v9540_v4, %s11120_s18  ;;  %v12189_v57 = vld [vmem:[#allocation3 + $0xac] sm:$0xf]  ;;  %v4007_v16 = vshrl.u32 %v3937_v58, 16  ;;  %v12197_v4 = vld [vmem:[#allocation3 + $0x70] sm:$0xf]  ;;  %v12201_v33 = vor.u32 %v4049_v23, %v4048_v42  ;;  %v3983_v23 = vrot.slane %v3981_v63, 7 }
 0x242   : > { %2932 = vst.msk [vmem:[#allocation3 + $0xc4] sm:$0xf] %vm2917_vm12, %v2898_v7  ;;  %v3104_v20 = vrot.slane %v3102_v43, 7  ;;  %v3141_v15 = vshrl.u32 %v12189_v57, 16  ;;  %v3144_v14 = vshll.u32 %v12189_v57, 16  ;;  %v4035_v42 = vrot.slane %v4033_v6, 7 }
 0x243   : > { %10338 = vmatmul.mubr.msk.bf16.gmra.mrb[16].mxu0 %vm3223_vm14, %v9526_v39  ;;  %v3120_v39 = vor.u32 %v3118_v49, %v3117_v24  ;;  %v4036_v17 = vshll.u32 %v12166_v10, 16  ;;  %v4009_v12 = vrot.slane %v4007_v16, 7  ;;  %v4062_v7 = vshll.u32 %v12197_v4, 16  ;;  %v12220_v63 = vld [vmem:[#allocation3 + $0xb8] sm:$0xf] }
 0x244   : > { %v3107_v43 = vor.u32 %v3105_v62, %v3104_v20  ;;  %v3143_v18 = vrot.slane %v3141_v15, 7  ;;  %v4059_v20 = vshrl.u32 %v12197_v4, 16  ;;  %v3986_v6 = vor.u32 %v3984_v44, %v3983_v23  ;;  %v12232_v4 = vld [vmem:[#allocation3 + $0xac] sm:$0xf]  ;;  %v12239_v31 = vld [vmem:[%s13662_s4 + $0xc] sm:$0xf] }
 0x245   : > { %3377 = vrot.lane.b32.xlu1 %v9542_v61, %s11120_s18  ;;  %2754 = vrot.lane.b32.xlu0 %v11857_v21, %s11121_s17  ;;  %v4010_v61 = vshll.u32 %v3937_v58, 16  ;;  %v3121_v8 = vsel %vm11294_vm9, %v11991_v51, %v3120_v39  ;;  %v3159_v58 = vor.u32 %v3157_v45, %v3156_v41  ;;  %v12230_v16 = vor.u32 %v3997_v0, %v12131_v59  ;;  %v426_v39 = vld [vmem:[#allocation3 + $0xec] sm:$0x1] }
 0x246   : > { %v3108_v21 = vsel %vm11294_vm9, %v12047_v30, %v3107_v43  ;;  %v3146_v47 = vor.u32 %v3144_v14, %v3143_v18  ;;  %v3949_v30 = vld [vmem:[#allocation3 + $0x88] sm:$0xf]  ;;  %v4061_v62 = vrot.slane %v4059_v20, 7  ;;  %11000 = vmatprep.subr.msk.bf16.mxu0 %vm844_vm0, %v12239_v31  ;;  %v4137_v20 = vshrl.u32 %v12220_v63, 16 }
 0x247   : > { %v2959_v15 = vld [vmem:[#allocation3 + $0xa0] sm:$0xf]  ;;  %v9543_v28 = vcombine.low %v3108_v21, %v3121_v8  ;;  %v4012_v9 = vor.u32 %v4010_v61, %v4009_v12  ;;  %v4085_v45 = vshrl.u32 %v3949_v30, 16  ;;  %v482_v12 = vld [vmem:[#allocation3 + $0xcc] sm:$0x8] }
 0x248   : > { %v3128_v24 = vshrl.u32 %v2959_v15, 16  ;;  %v3131_v49 = vshll.u32 %v2959_v15, 16  ;;  %v3953_v35 = vld [vmem:[#allocation3 + $0xa0] sm:$0xf]  ;;  %v9527_v51 = vcombine.low %v2959_v15, %v12189_v57  ;;  %v3147_v0 = vsel %vm11294_vm9, %v12086_v34, %v3146_v47 }
 0x249   : > { %2899 = vrot.lane.b32.xlu0 %v12138_v32, %s11122_s19  ;;  %v2965_v10 = vld [vmem:[#allocation3 + $0xc4] sm:$0xf]  ;;  %v410_v32 = vld [vmem:[#allocation3 + $0x8] sm:$0x1]  ;;  %v4124_v57 = vshrl.u32 %v12232_v4, 16  ;;  %v4111_v21 = vshrl.u32 %v3953_v35, 16  ;;  %v4064_v8 = vor.u32 %v4062_v7, %v4061_v62  ;;  %v13699_v7 = vsel %vm11294_vm9, %v11956_v50, %v12088_v36 }
 0x24a   : > { %v3130_v14 = vrot.slane %v3128_v24, 7  ;;  %v3167_v43 = vshrl.u32 %v2965_v10, 16  ;;  %v3170_v18 = vshll.u32 %v2965_v10, 16  ;;  %v9528_v44 = vcombine.low %v12153_v56, %v2965_v10  ;;  %10341 = vmatprep.mubr.msk.bf16.mxu0 %vm3223_vm14, %v9527_v51 }
 0x24b   : > { %v3160_v56 = vsel %vm11294_vm9, %v12107_v2, %v3159_v58  ;;  %v411_v34 = vsel %vm11763_vm8, 0, %v410_v32  ;;  %v427_v2 = vsel %vm11763_vm8, 0, %v426_v39  ;;  %v3987_v24 = vsel %vm11294_vm9, %v12011_v3, %v3986_v6  ;;  %v4958_v6 = vld [vmem:[#allocation3 + $0x28] sm:$0xf] }
 0x24c   : > { %v3133_v59 = vor.u32 %v3131_v49, %v3130_v14  ;;  %v3169_v41 = vrot.slane %v3167_v43, 7  ;;  %10342 = vmatmul.mubr.msk.bf16.gmra.mrb[20].mxu0 %vm3223_vm14, %v9528_v44  ;;  %412 = vst [vmem:[#allocation3 + $0x8] sm:$0x1] %v411_v34  ;;  %v4038_v49 = vor.u32 %v4036_v17, %v4035_v42  ;;  %428 = vst [vmem:[#allocation3 + $0xec] sm:$0x1] %v427_v2  ;;  %v4087_v10 = vrot.slane %v4085_v45, 7 }
 0x24d   : > { %3379 = vrot.lane.b32.xlu0 %v9543_v28, %s11120_s18  ;;  %v4140_v58 = vshll.u32 %v12220_v63, 16  ;;  %v4013_v3 = vsel %vm11294_vm9, %v12042_v52, %v4012_v9  ;;  %v4088_v42 = vshll.u32 %v3949_v30, 16  ;;  %v4139_v17 = vrot.slane %v4137_v20, 7  ;;  %v13706_v2 = vld [vmem:[#allocation10_spill] sm:$0xff] }
 0x24e   : > { %v3134_v15 = vsel %vm11294_vm9, %v12084_v54, %v3133_v59  ;;  %v3172_v61 = vor.u32 %v3170_v18, %v3169_v41  ;;  %v483_v54 = vsel %vm11737_vm7, 0, %v482_v12  ;;  %v4113_v43 = vrot.slane %v4111_v21, 7  ;;  %v4966_v41 = vld [vmem:[#allocation3 + $0x58] sm:$0xf] }
 0x24f   : > { %v9544_v28 = vcombine.low %v3134_v15, %v3147_v0  ;;  %484 = vst [vmem:[#allocation3 + $0xcc] sm:$0x8] %v483_v54  ;;  %v4114_v18 = vshll.u32 %v3953_v35, 16  ;;  %v4126_v32 = vrot.slane %v4124_v57, 7  ;;  %v9586_v62 = vcombine.low %v13699_v7, %v3987_v24  ;;  %v13708_v54 = vld [vmem:[#allocation14_spill] sm:$0xff] }
 0x250   : > { %v3370_v23 = vpop.permute.xlu0 %3369  ;;  %v3173_v47 = vsel %vm11294_vm9, %v12120_v13, %v3172_v61  ;;  %v4127_v13 = vshll.u32 %v12232_v4, 16  ;;  %v4000_v52 = vsel %vm11294_vm9, %v11960_v53, %v12230_v16  ;;  %v13700_v9 = vshll.u32 %v12102_v1, 16 }
 0x251   : > { %10347 = vmatprep.mubr.msk.bf16.mxu0 %vm831_vm5, %v3370_v23  ;;  %3381 = vrot.lane.b32.xlu1 %v9544_v28, %s11120_s18  ;;  %v9545_v14 = vcombine.low %v3160_v56, %v3173_v47  ;;  %v4101_v30 = vshll.u32 %v12203_v5, 16  ;;  %v4039_v51 = vsel %vm11294_vm9, %v12013_v22, %v4038_v49  ;;  %v4090_v44 = vor.u32 %v4088_v42, %v4087_v10  ;;  %v4974_v49 = vld [vmem:[#allocation3 + $0x88] sm:$0xf] }
 0x252   : > { %v4077_v35 = vor.u32 %v13700_v9, %v12157_v27  ;;  %v13701_v39 = vshrl.u32 %v12203_v5, 16  ;;  %v4995_v36 = vshrl.u32 %v4958_v6, 16  ;;  %v9587_v59 = vcombine.low %v4000_v52, %v4013_v3  ;;  %v4973_v52 = vld [vmem:[#allocation3 + $0x84] sm:$0x8] }
 0x253   : > { %3383 = vrot.lane.b32.xlu0 %v9545_v14, %s11120_s18  ;;  %v4065_v53 = vsel %vm11294_vm9, %v12030_v55, %v4064_v8  ;;  %v13702_v1 = vshrl.u32 %v12172_v37, 16  ;;  %v13703_v16 = vshrl.u32 %v12183_v46, 16  ;;  %v491_v22 = vld [vmem:[#allocation3 + $0x8] sm:$0x1]  ;;  %v4116_v45 = vor.u32 %v4114_v18, %v4113_v43  ;;  %v548_v56 = vld [vmem:[#allocation3 + $0xec] sm:$0x1] }
 0x254   : > { %v4100_v50 = vrot.slane %v13701_v39, 7  ;;  %v4129_v23 = vor.u32 %v4127_v13, %v4126_v32  ;;  %v4142_v5 = vor.u32 %v4140_v58, %v4139_v17  ;;  %v492_v12 = vsel %vm11763_vm8, 0, %v491_v22  ;;  %v4975_v58 = vld [vmem:[#allocation3 + $0x90] sm:$0x8]  ;;  %v4976_v14 = vld [vmem:[#allocation3 + $0x94] sm:$0xf] }
 0x255   : > { %4195 = vrot.lane.b32.xlu1 %v9586_v62, %s11120_s18  ;;  %v9582_v27 = vrot.slane %v13702_v1, 11  ;;  %v9583_v0 = vrot.slane %v13703_v16, 11  ;;  %v13704_v55 = vsel %vm11294_vm9, %v11968_v29, %v12080_v19  ;;  %v4052_v46 = vsel %vm11294_vm9, %v11970_v26, %v12201_v33  ;;  %493 = vst [vmem:[#allocation3 + $0x8] sm:$0x1] %v492_v12  ;;  %v4982_v17 = vld [vmem:[#allocation3 + $0xb8] sm:$0xf] }
 0x256   : > { %v9588_v37 = vcombine.low %v13704_v55, %v4039_v51  ;;  %v13705_v57 = vshrl.u32 %v12123_v38, 16  ;;  %v549_v34 = vsel %vm11763_vm8, 0, %v548_v56  ;;  %v4091_v15 = vsel %vm11294_vm9, %v12058_v11, %v4090_v44  ;;  %v4984_v43 = vld [vmem:[#allocation3 + $0xc4] sm:$0xf]  ;;  %v485_v18 = vld [vmem:[#allocation3 + $0xd8] sm:$0x8] }
 0x257   : > { %4197 = vrot.lane.b32.xlu0 %v9587_v59, %s11120_s18  ;;  %v4103_v61 = vor.u32 %v4101_v30, %v4100_v50  ;;  %v4997_v21 = vrot.slane %v4995_v36, 7  ;;  %v5047_v29 = vshrl.u32 %v4966_v41, 16  ;;  %550 = vst [vmem:[#allocation3 + $0xec] sm:$0x1] %v549_v34  ;;  %v9589_v19 = vcombine.low %v4052_v46, %v4065_v53  ;;  %v13710_v32 = vld [vmem:[#allocation12_spill] sm:$0xff] }
 0x258   : > { %v5010_v20 = vrot.slane %v13705_v57, 7  ;;  %v4078_v26 = vsel %vm11294_vm9, %v13706_v2, %v4077_v35  ;;  %v13707_v33 = vshrl.u32 %v12115_v48, 16  ;;  %v5063_v24 = vshll.u32 %v12115_v48, 16  ;;  %v4981_v51 = vld [vmem:[#allocation3 + $0xb4] sm:$0x8]  ;;  %v13711_v53 = vld [vmem:[#allocation8_spill] sm:$0xff] }
 0x259   : > { %4199 = vrot.lane.b32.xlu1 %v9588_v37, %s11120_s18  ;;  %v4117_v11 = vsel %vm11294_vm9, %v13708_v54, %v4116_v45  ;;  %v4130_v47 = vsel %vm11294_vm9, %v9582_v27, %v4129_v23  ;;  %v4143_v8 = vsel %vm11294_vm9, %v9583_v0, %v4142_v5  ;;  %v4998_v10 = vshll.u32 %v4958_v6, 16  ;;  %v4983_v50 = vld [vmem:[#allocation3 + $0xc0] sm:$0x8]  ;;  %v13712_v27 = vld [vmem:[#allocation11_spill] sm:$0xff]  ;;  %v13714_v23 = vld [vmem:[#allocation13_spill] sm:$0xff] }
 0x25a   : > { %v5062_v28 = vrot.slane %v13707_v33, 7  ;;  %v9590_v3 = vcombine.low %v4078_v26, %v4091_v15  ;;  %v13709_v42 = vshll.u32 %v12123_v38, 16  ;;  %v4104_v13 = vsel %vm11294_vm9, %v13710_v32, %v4103_v61  ;;  %v13715_v2 = vld [vmem:[#allocation9_spill] sm:$0xff] }
 0x25b   : > { %4201 = vrot.lane.b32.xlu0 %v9589_v19, %s11120_s18  ;;  %v5000_v7 = vor.u32 %v4998_v10, %v4997_v21  ;;  %v5049_v62 = vrot.slane %v5047_v29, 7  ;;  %v5099_v9 = vshrl.u32 %v4974_v49, 16  ;;  %v9591_v6 = vcombine.low %v4104_v13, %v4117_v11 }
 0x25c   : > { %v5013_v48 = vor.u32 %v13709_v42, %v5010_v20  ;;  %v9592_v35 = vcombine.low %v4130_v47, %v4143_v8  ;;  %v5112_v30 = vshrl.u32 %v4976_v14, 16  ;;  %v486_v38 = vsel %vm11737_vm7, 0, %v485_v18  ;;  %v542_v18 = vld [vmem:[#allocation3 + $0xd4] sm:$0x1] }
 0x25d   : > { %4203 = vrot.lane.b32.xlu1 %v9590_v3, %s11120_s18  ;;  %v5050_v44 = vshll.u32 %v4966_v41, 16  ;;  %v5107_v39 = vshrl.u32 %v4975_v58, 16  ;;  %v5151_v36 = vshrl.u32 %v4982_v17, 16  ;;  %v5164_v59 = vshrl.u32 %v4984_v43, 16  ;;  %487 = vst [vmem:[#allocation3 + $0xd8] sm:$0x8] %v486_v38 }
 0x25e   : > { %v5014_v1 = vsel %vm11294_vm9, %v13711_v53, %v5013_v48  ;;  %v13713_v16 = vshrl.u32 %v13712_v27, 16  ;;  %v5065_v22 = vor.u32 %v5063_v24, %v5062_v28  ;;  %v5094_v45 = vshrl.u32 %v4973_v52, 16  ;;  %v3509_v52 = vld [vmem:[#allocation3 + $0x10] sm:$0xf] }
 0x25f   : > { %4205 = vrot.lane.b32.xlu0 %v9591_v6, %s11120_s18  ;;  %v5001_v60 = vsel %vm11294_vm9, %v13714_v23, %v5000_v7  ;;  %v5052_v41 = vor.u32 %v5050_v44, %v5049_v62  ;;  %v5101_v5 = vrot.slane %v5099_v9, 7  ;;  %v5115_v12 = vshll.u32 %v4976_v14, 16  ;;  %v421_v7 = vld [vmem:[#allocation3 + $0xe0] sm:$0x1]  ;;  %v3520_v27 = vld [vmem:[#allocation3 + $0x50] sm:$0x1] }
 0x260   : > { %v9639_v0 = vrot.slane %v13713_v16, 11  ;;  %v5114_v56 = vrot.slane %v5112_v30, 7  ;;  %v5146_v55 = vshrl.u32 %v4981_v51, 16  ;;  %v5154_v37 = vshll.u32 %v4982_v17, 16  ;;  %v12374_v17 = vld [vmem:[#allocation3 + $0xa0] sm:$0xf] }
 0x261   : > { %4207 = vrot.lane.b32.xlu1 %v9592_v35, %s11120_s18  ;;  %v5159_v46 = vshrl.u32 %v4983_v50, 16  ;;  %v5102_v57 = vshll.u32 %v4974_v49, 16  ;;  %v5153_v20 = vrot.slane %v5151_v36, 7  ;;  %v5166_v34 = vrot.slane %v5164_v59, 7  ;;  %v3511_v51 = vld [vmem:[#allocation3 + $0x1c] sm:$0xf] }
 0x262   : > { %v5167_v15 = vshll.u32 %v4984_v43, 16  ;;  %v9651_v61 = vcombine.low %v5001_v60, %v5014_v1  ;;  %v5053_v21 = vsel %vm11294_vm9, %v9639_v0, %v5052_v41  ;;  %v9643_v29 = vrot.slane %v5094_v45, 11  ;;  %v12376_v43 = vld [vmem:[#allocation3 + $0xac] sm:$0xf]  ;;  %v3512_v50 = vld [vmem:[#allocation3 + $0x20] sm:$0x1] }
 0x263   : > { %v5104_v19 = vor.u32 %v5102_v57, %v5101_v5  ;;  %v5066_v26 = vsel %vm11294_vm9, %v13715_v2, %v5065_v22  ;;  %v9644_v33 = vrot.slane %v5107_v39, 11  ;;  %v5117_v28 = vor.u32 %v5115_v12, %v5114_v56  ;;  %v3510_v39 = vld [vmem:[#allocation3 + $0x14] sm:$0x1]  ;;  %v3516_v36 = vld [vmem:[#allocation3 + $0x38] sm:$0x1] }
 0x264   : > { %v9647_v24 = vrot.slane %v5146_v55, 11  ;;  %v5156_v54 = vor.u32 %v5154_v37, %v5153_v20  ;;  %v9648_v49 = vrot.slane %v5159_v46, 11  ;;  %v5169_v11 = vor.u32 %v5167_v15, %v5166_v34  ;;  %v4963_v1 = vld [vmem:[#allocation3 + $0x48] sm:$0x8]  ;;  %v3515_v56 = vld [vmem:[#allocation3 + $0x34] sm:$0xf] }
 0x265   : > { %5222 = vrot.lane.b32.xlu1 %v9651_v61, %s11120_s18  ;;  %v9653_v47 = vcombine.low %v5053_v21, %v5066_v26  ;;  %v5105_v8 = vsel %vm11294_vm9, %v9643_v29, %v5104_v19  ;;  %v5118_v10 = vsel %vm11294_vm9, %v9644_v33, %v5117_v28  ;;  %v543_v13 = vsel %vm11763_vm8, 0, %v542_v18  ;;  %v4971_v55 = vld [vmem:[#allocation3 + $0x78] sm:$0x8]  ;;  %v4964_v57 = vld [vmem:[#allocation3 + $0x4c] sm:$0xf] }
 0x266   : > { %v5157_v58 = vsel %vm11294_vm9, %v9647_v24, %v5156_v54  ;;  %v5170_v14 = vsel %vm11294_vm9, %v9648_v49, %v5169_v11  ;;  %v9655_v3 = vcombine.low %v5105_v8, %v5118_v10  ;;  %544 = vst [vmem:[#allocation3 + $0xd4] sm:$0x1] %v543_v13  ;;  %v422_v62 = vsel %vm11763_vm8, 0, %v421_v7  ;;  %v3519_v20 = vld [vmem:[#allocation3 + $0x4c] sm:$0xf] }
 0x267   : > { %v9657_v42 = vcombine.low %v5157_v58, %v5170_v14  ;;  %423 = vst [vmem:[#allocation3 + $0xe0] sm:$0x1] %v422_v62  ;;  %v3542_v9 = vshrl.u32 %v3509_v52, 16  ;;  %v3545_v6 = vshll.u32 %v3509_v52, 16  ;;  %v3556_v59 = vshrl.u32 %v3511_v51, 16 }
 0x268   : > { %v3559_v53 = vshll.u32 %v3511_v51, 16  ;;  %v3551_v0 = vshll.u32 %v3510_v39, 16  ;;  %v3565_v22 = vshll.u32 %v3512_v50, 16  ;;  %v3593_v45 = vshll.u32 %v3516_v36, 16  ;;  %v3523_v61 = vld [vmem:[#allocation3 + $0x64] sm:$0xf] }
 0x269   : > { %5226 = vrot.lane.b32.xlu1 %v9653_v47, %s11120_s18  ;;  %v3544_v38 = vrot.slane %v3542_v9, 4  ;;  %v3547_v44 = vrot.slane %v3545_v6, 5  ;;  %v5029_v23 = vshrl.u32 %v4963_v1, 16  ;;  %v3621_v60 = vshll.u32 %v3520_v27, 16  ;;  %v3524_v21 = vld [vmem:[#allocation3 + $0x68] sm:$0x1] }
 0x26a   : > { %v3558_v41 = vrot.slane %v3556_v59, 4  ;;  %v3561_v40 = vrot.slane %v3559_v53, 5  ;;  %v12388_v12 = vrot.slane %v3551_v0, 5  ;;  %v12390_v37 = vrot.slane %v3565_v22, 5  ;;  %v3514_v19 = vld [vmem:[#allocation3 + $0x2c] sm:$0x1] }
 0x26b   : > { %v3548_v16 = vor.u32 %v3547_v44, %v3544_v38  ;;  %v12392_v46 = vrot.slane %v3593_v45, 5  ;;  %v12394_v34 = vrot.slane %v5029_v23, 11  ;;  %v12396_v15 = vrot.slane %v3621_v60, 5  ;;  %v12400_v47 = vld [vmem:[#allocation3 + $0x7c] sm:$0xf] }
 0x26c   : > { %v3562_v29 = vor.u32 %v3561_v40, %v3558_v41  ;;  %v3584_v2 = vshrl.u32 %v3515_v56, 16  ;;  %v3587_v26 = vshll.u32 %v3515_v56, 16  ;;  %v5081_v33 = vshrl.u32 %v4971_v55, 16  ;;  %v12405_v58 = vld [vmem:[%s13662_s4 + $0x10] sm:$0xf] }
 0x26d   : > { %5230 = vrot.lane.b32.xlu1 %v9655_v3, %s11120_s18  ;;  %v12386_v5 = vrot.slane %v3548_v16, 4  ;;  %v3815_v28 = vsel %vm844_vm0, %v12239_v31, 0  ;;  %v5034_v24 = vshrl.u32 %v4964_v57, 16  ;;  %v3612_v54 = vshrl.u32 %v3519_v20, 16  ;;  %v3527_v18 = vld [vmem:[#allocation3 + $0x7c] sm:$0xf] }
 0x26e   : > { %v545_v35 = vld [vmem:[#allocation3 + $0xe0] sm:$0x1]  ;;  %v3615_v49 = vshll.u32 %v3519_v20, 16  ;;  %v3640_v8 = vshrl.u32 %v3523_v61, 16  ;;  %v3643_v10 = vshll.u32 %v3523_v61, 16  ;;  %v3579_v3 = vshll.u32 %v3514_v19, 16 }
 0x26f   : > { %v546_v30 = vsel %vm11763_vm8, 0, %v545_v35  ;;  %v3554_v31 = vsel %vm11362_vm13, %v12386_v5, %v12388_v12  ;;  %v12412_v13 = vld [vmem:[#allocation3 + $0x80] sm:$0x1]  ;;  %v3563_v7 = vrot.slane %v3562_v29, 4  ;;  %v3586_v62 = vrot.slane %v3584_v2, 4 }
 0x270   : > { %547 = vst [vmem:[#allocation3 + $0xe0] sm:$0x1] %v546_v30  ;;  %v3589_v52 = vrot.slane %v3587_v26, 5  ;;  %v5037_v9 = vshll.u32 %v4964_v57, 16  ;;  %v4969_v6 = vld [vmem:[#allocation3 + $0x6c] sm:$0x8] }
 0x271   : > { %5234 = vrot.lane.b32.xlu1 %v9657_v42, %s11120_s18  ;;  %v3649_v42 = vshll.u32 %v3524_v21, 16  ;;  %v4961_v35 = vld [vmem:[#allocation3 + $0x3c] sm:$0x8]  ;;  %v5036_v30 = vrot.slane %v5034_v24, 7  ;;  %v3614_v51 = vrot.slane %v3612_v54, 4  ;;  %v3617_v38 = vrot.slane %v3615_v49, 5 }
 0x272   : > { %v5086_v44 = vshrl.u32 %v12400_v47, 16  ;;  %v3642_v50 = vrot.slane %v3640_v8, 4  ;;  %v3645_v36 = vrot.slane %v3643_v10, 5  ;;  %v3668_v59 = vshrl.u32 %v3527_v18, 16  ;;  %v3531_v22 = vld [vmem:[#allocation3 + $0x94] sm:$0xf] }
 0x273   : > { %v3671_v53 = vshll.u32 %v3527_v18, 16  ;;  %v12417_v1 = vrot.slane %v3579_v3, 5  ;;  %v12419_v27 = vrot.slane %v5081_v33, 11  ;;  %v12421_v16 = vrot.slane %v3649_v42, 5  ;;  %v3513_v23 = vld [vmem:[#allocation3 + $0x28] sm:$0xf] }
 0x274   : > { %v3677_v0 = vshll.u32 %v12412_v13, 16  ;;  %v3568_v45 = vsel %vm11362_vm13, %v3563_v7, %v12390_v37  ;;  %v3590_v60 = vor.u32 %v3589_v52, %v3586_v62  ;;  %v5016_v41 = vshrl.u32 %v4961_v35, 16  ;;  %v3518_v12 = vld [vmem:[#allocation3 + $0x44] sm:$0x1]  ;;  %v3522_v21 = vld [vmem:[#allocation3 + $0x5c] sm:$0x1] }
 0x275   : > { %v5068_v40 = vshrl.u32 %v4969_v6, 16  ;;  %v12427_v5 = vor.u32 %v5037_v9, %v5036_v30  ;;  %v3618_v56 = vor.u32 %v3617_v38, %v3614_v51  ;;  %v5088_v55 = vrot.slane %v5086_v44, 7  ;;  %v12436_v49 = vld [vmem:[#allocation3 + $0x40] sm:$0xf]  ;;  %v12442_v10 = vld [vmem:[#allocation3 + $0x98] sm:$0x1] }
 0x276   : > { %v5089_v57 = vshll.u32 %v12400_v47, 16  ;;  %v3646_v29 = vor.u32 %v3645_v36, %v3642_v50  ;;  %v3670_v19 = vrot.slane %v3668_v59, 4  ;;  %v3673_v2 = vrot.slane %v3671_v53, 5  ;;  %v3517_v3 = vld [vmem:[#allocation3 + $0x40] sm:$0xf] }
 0x277   : > { %v3696_v26 = vshrl.u32 %v3531_v22, 16  ;;  %v12431_v37 = vcombine.low %v3554_v31, %v3568_v45  ;;  %v3570_v33 = vshrl.u32 %v3513_v23, 16  ;;  %v3699_v24 = vshll.u32 %v3531_v22, 16  ;;  %v12450_v18 = vld [vmem:[#allocation3 + $0x70] sm:$0xf] }
 0x278   : > { %v12434_v54 = vrot.slane %v3590_v60, 4  ;;  %v3607_v47 = vshll.u32 %v3518_v12, 16  ;;  %v12440_v8 = vrot.slane %v5068_v40, 11  ;;  %v12448_v42 = vrot.slane %v3618_v56, 4  ;;  %v3526_v6 = vld [vmem:[#allocation3 + $0x74] sm:$0x1] }
 0x279   : > { %v12452_v13 = vor.u32 %v5089_v57, %v5088_v55  ;;  %v3635_v7 = vshll.u32 %v3522_v21, 16  ;;  %v12454_v9 = vrot.slane %v3646_v29, 4  ;;  %v3674_v35 = vor.u32 %v3673_v2, %v3670_v19  ;;  %v12462_v38 = vld [vmem:[#allocation3 + $0xc4] sm:$0xf]  ;;  %v3958_v45 = vld [vmem:[#allocation3 + $0xc0] sm:$0x8] }
 0x27a   : > { %v12456_v30 = vrot.slane %v3677_v0, 5  ;;  %v12458_v51 = vrot.slane %v3696_v26, 4  ;;  %v3572_v44 = vrot.slane %v3570_v33, 4  ;;  %v5021_v50 = vshrl.u32 %v12436_v49, 16  ;;  %v4977_v40 = vld [vmem:[#allocation3 + $0x9c] sm:$0x8] }
 0x27b   : > { %v12465_v36 = vrot.slane %v3699_v24, 5  ;;  %v3598_v59 = vshrl.u32 %v3517_v3, 16  ;;  %v3601_v53 = vshll.u32 %v3517_v3, 16  ;;  %v12468_v0 = vrot.slane %v3607_v47, 5  ;;  %v4979_v21 = vld [vmem:[#allocation3 + $0xa8] sm:$0x8] }
 0x27c   : > { %v5073_v22 = vshrl.u32 %v12450_v18, 16  ;;  %v4150_v55 = vshrl.u32 %v12462_v38, 16  ;;  %v3663_v29 = vshll.u32 %v3526_v6, 16  ;;  %v5023_v2 = vrot.slane %v5021_v50, 7  ;;  %v3525_v12 = vld [vmem:[#allocation3 + $0x70] sm:$0xf] }
 0x27d   : > { %v12492_v26 = vrot.slane %v3674_v35, 4  ;;  %v3600_v24 = vrot.slane %v3598_v59, 4  ;;  %v3603_v47 = vrot.slane %v3601_v53, 5  ;;  %v5120_v6 = vshrl.u32 %v4977_v40, 16  ;;  %v12505_v33 = vld [vmem:[#allocation3 + $0xa4] sm:$0x1] }
 0x27e   : > { %v5075_v3 = vrot.slane %v5073_v22, 7  ;;  %v5133_v48 = vshrl.u32 %v4979_v21, 16  ;;  %v4153_v35 = vshll.u32 %v12462_v38, 16  ;;  %v12502_v22 = vrot.slane %v3663_v29, 5 }
 0x27f   : > { %v12507_v57 = vrot.slane %v5120_v6, 11  ;;  %v3657_v31 = vshll.u32 %v3525_v12, 16 }
 0x280   : > { %v12509_v60 = vrot.slane %v5133_v48, 11 }
 0x2ab   : > { %v3372_v11 = vpop.permute.xlu1 %3371 }
 0x2ac   : > { %10348 = vmatmul.mubr.msk.bf16.vlgmr.msra.gmra.mrb[8].mxu0 %vm831_vm5, %v3372_v11  ;;  %v12438_v11 = vrot.slane %v5016_v41, 11  ;;  %v12479_v41 = vrot.slane %v3635_v7, 5  ;;  %v12496_v7 = vld [vmem:[#allocation3 + $0x8c] sm:$0x1] }
 0x2ad   : > { %10364 = vmatpush3.bf16.msra.mxu0 %v3815_v28  ;;  %v3573_v28 = vshll.u32 %v3513_v23, 16 }
 0x2ae   : > { %11001 = vmatprep.subr.msk.bf16.mxu0 %vm844_vm0, %v12405_v58 }
 0x2af   : > { %v3376_v39 = vpop.permute.xlu1 %3375 }
 0x2b3   : > { %v2835_v20 = vpop.permute.xlu1 %2834  ;;  %v3374_v61 = vpop.permute.xlu0 %3373 }
 0x2b4   : > { %10351 = vmatprep.mubr.msk.bf16.mxu0 %vm831_vm5, %v3374_v61  ;;  %v3604_v61 = vor.u32 %v3603_v47, %v3600_v24 }
 0x2b5   : > { %10352 = vmatmul.mubr.msk.bf16.gmra.mrb[12].mxu0 %vm831_vm5, %v3376_v39  ;;  %v3575_v39 = vrot.slane %v3573_v28, 5  ;;  %v4145_v28 = vshrl.u32 %v3958_v45, 16  ;;  %v3691_v45 = vshll.u32 %v12496_v7, 16 }
 0x2b7   : > { %v3378_v62 = vpop.permute.xlu1 %3377  ;;  %v2755_v52 = vpop.permute.xlu0 %2754  ;;  %v3576_v19 = vor.u32 %v3575_v39, %v3572_v44  ;;  %v4152_v44 = vrot.slane %v4150_v55, 7  ;;  %v5076_v39 = vshll.u32 %v12450_v18, 16  ;;  %v9584_v40 = vrot.slane %v4145_v28, 11 }
 0x2b8   : > { %2771 = vst.msk [vmem:[#allocation3 + $0xd0] sm:$0xf] %vm2694_vm6, %v2755_v52  ;;  %10355 = vmatprep.mubr.msk.bf16.mxu0 %vm831_vm5, %v3378_v62  ;;  %v3960_v62 = vld [vmem:[#allocation3 + $0xcc] sm:$0x8]  ;;  %v5024_v52 = vshll.u32 %v12436_v49, 16 }
 0x2b9   : > { %2868 = vst.msk [vmem:[#allocation3 + $0xd0] sm:$0xf] %vm2852_vm11, %v2835_v20  ;;  %v3521_v20 = vld [vmem:[#allocation3 + $0x58] sm:$0xf]  ;;  %v3577_v59 = vrot.slane %v3576_v19, 4  ;;  %v4158_v21 = vshrl.u32 %v3960_v62, 16  ;;  %v5078_v55 = vor.u32 %v5076_v39, %v5075_v3  ;;  %v4155_v19 = vor.u32 %v4153_v35, %v4152_v44 }
 0x2ba   : > { %v3626_v32 = vshrl.u32 %v3521_v20, 16  ;;  %v3629_v50 = vshll.u32 %v3521_v20, 16  ;;  %v5026_v53 = vor.u32 %v5024_v52, %v5023_v2  ;;  %v3654_v20 = vshrl.u32 %v3525_v12, 16 }
 0x2bb   : > { %v2900_v56 = vpop.permute.xlu0 %2899  ;;  %v3582_v24 = vsel %vm11362_vm13, %v3577_v59, %v12417_v1  ;;  %v5125_v12 = vshrl.u32 %v12374_v17, 16  ;;  %v9585_v47 = vrot.slane %v4158_v21, 11  ;;  %v3605_v3 = vrot.slane %v3604_v61, 4  ;;  %v12528_v1 = vld [vmem:[#allocation3 + $0xdc] sm:$0xf] }
 0x2bc   : > { %2933 = vst.msk [vmem:[#allocation3 + $0xd0] sm:$0xf] %vm2917_vm12, %v2900_v56  ;;  %v3628_v29 = vrot.slane %v3626_v32, 4  ;;  %v3631_v2 = vrot.slane %v3629_v50, 5  ;;  %v5027_v48 = vsel %vm11294_vm9, %v12438_v11, %v5026_v53  ;;  %v5079_v32 = vsel %vm11294_vm9, %v12440_v8, %v5078_v55 }
 0x2bd   : > { %v3656_v44 = vrot.slane %v3654_v20, 4  ;;  %v3659_v35 = vrot.slane %v3657_v31, 5  ;;  %v4156_v11 = vsel %vm11294_vm9, %v9584_v40, %v4155_v19  ;;  %v13717_v61 = vsel %vm11362_vm13, %v12434_v54, %v12392_v46  ;;  %v3529_v31 = vld [vmem:[#allocation3 + $0x88] sm:$0xf]  ;;  %v3533_v19 = vld [vmem:[#allocation3 + $0xa0] sm:$0xf] }
 0x2be   : > { %v9555_v50 = vcombine.low %v3582_v24, %v13717_v61  ;;  %v13718_v8 = vsel %vm11294_vm9, %v12394_v34, %v12427_v5  ;;  %v3632_v53 = vor.u32 %v3631_v2, %v3628_v29  ;;  %v5127_v55 = vrot.slane %v5125_v12, 7 }
 0x2bf   : > { %v3380_v56 = vpop.permute.xlu0 %3379  ;;  %v9652_v59 = vcombine.low %v5027_v48, %v13718_v8  ;;  %v5128_v40 = vshll.u32 %v12374_v17, 16  ;;  %v5141_v20 = vshll.u32 %v12376_v43, 16  ;;  %v3610_v46 = vsel %vm11362_vm13, %v3605_v3, %v12468_v0  ;;  %v4985_v48 = vld [vmem:[#allocation3 + $0xcc] sm:$0x8]  ;;  %v4987_v8 = vld [vmem:[#allocation3 + $0xd8] sm:$0x8] }
 0x2c0   : > { %10356 = vmatmul.mubr.msk.bf16.gmra.mrb[16].mxu0 %vm831_vm5, %v3380_v56  ;;  %v13719_v34 = vsel %vm11294_vm9, %v12419_v27, %v12452_v13  ;;  %v5190_v2 = vshrl.u32 %v12528_v1, 16  ;;  %v3682_v12 = vshrl.u32 %v3529_v31, 16  ;;  %v3633_v3 = vrot.slane %v3632_v53, 4 }
 0x2c1   : > { %v9654_v5 = vcombine.low %v5079_v32, %v13719_v34  ;;  %v5130_v61 = vor.u32 %v5128_v40, %v5127_v55  ;;  %v5172_v34 = vshrl.u32 %v4985_v48, 16 }
 0x2c2   : > { %v5192_v52 = vrot.slane %v5190_v2, 7  ;;  %v3684_v53 = vrot.slane %v3682_v12, 4  ;;  %v3638_v55 = vsel %vm11362_vm13, %v3633_v3, %v12479_v41  ;;  %v12576_v2 = vld [vmem:[%s13662_s4 + $0x14] sm:$0xff]  }
 0x2c3   : > { %v3382_v23 = vpop.permute.xlu1 %3381  ;;  %v12511_v56 = vld [vmem:[#allocation3 + $0xd0] sm:$0xf] }
 0x2c4   : > { %10359 = vmatprep.mubr.msk.bf16.mxu0 %vm831_vm5, %v3382_v23  ;;  %v4163_v28 = vshrl.u32 %v12511_v56, 16  ;;  %v5138_v23 = vshrl.u32 %v12376_v43, 16  ;;  %v4166_v6 = vshll.u32 %v12511_v56, 16  ;;  %v12555_v29 = vld [vmem:[#allocation3 + $0xd0] sm:$0xf] }
 0x2c5   : > { %v3384_v39 = vpop.permute.xlu0 %3383  ;;  %v5177_v27 = vshrl.u32 %v12555_v29, 16  ;;  %v5180_v12 = vshll.u32 %v12555_v29, 16 }
 0x2c6   : > { %v4165_v62 = vrot.slane %v4163_v28, 7  ;;  %v5140_v54 = vrot.slane %v5138_v23, 7  ;;  %v3535_v28 = vld [vmem:[#allocation3 + $0xac] sm:$0xf] }
 0x2c7   : > { %v3724_v13 = vshrl.u32 %v3535_v28, 16  ;;  %v3727_v32 = vshll.u32 %v3535_v28, 16 }
 0x2c8   : > { %10360 = vmatmul.mubr.msk.bf16.gmra.mrb[20].mxu0 %vm831_vm5, %v3384_v39  ;;  %v4168_v21 = vor.u32 %v4166_v6, %v4165_v62  ;;  %v3685_v62 = vshll.u32 %v3529_v31, 16  ;;  %v3710_v6 = vshrl.u32 %v3533_v19, 16  ;;  %v3713_v39 = vshll.u32 %v3533_v19, 16  ;;  %v3537_v19 = vld [vmem:[#allocation3 + $0xb8] sm:$0xf] }
 0x2c9   : > { %10365 = vmatprep.mubr.msk.bf16.mxu0 %vm831_vm5, %v12431_v37  ;;  %v3660_v37 = vor.u32 %v3659_v35, %v3656_v44  ;;  %v5143_v23 = vor.u32 %v5141_v20, %v5140_v54  ;;  %v13720_v44 = vsel %vm11362_vm13, %v12448_v42, %v12396_v15  ;;  %v4236_v54 = vsel %vm844_vm0, %v12405_v58, 0 }
 0x2ca   : > { %v4169_v24 = vsel %vm11294_vm9, %v9585_v47, %v4168_v21  ;;  %v5193_v47 = vshll.u32 %v12528_v1, 16  ;;  %v9556_v35 = vcombine.low %v3610_v46, %v13720_v44  ;;  %v3687_v31 = vrot.slane %v3685_v62, 5  ;;  %v3536_v21 = vld [vmem:[#allocation3 + $0xb0] sm:$0x1] }
 0x2cb   : > { %v9593_v0 = vcombine.low %v4156_v11, %v4169_v24  ;;  %v3661_v11 = vrot.slane %v3660_v37, 4  ;;  %v3712_v40 = vrot.slane %v3710_v6, 4  ;;  %v3715_v20 = vrot.slane %v3713_v39, 5  ;;  %v3539_v24 = vld [vmem:[#allocation3 + $0xc4] sm:$0xf] }
 0x2cc   : > { %v5179_v15 = vrot.slane %v5177_v27, 7  ;;  %v5185_v42 = vshrl.u32 %v4987_v8, 16  ;;  %v3726_v46 = vrot.slane %v3724_v13, 4  ;;  %v3729_v28 = vrot.slane %v3727_v32, 5 }
 0x2cd   : > { %4209 = vrot.lane.b32.xlu0 %v9593_v0, %s11120_s18  ;;  %v5131_v58 = vsel %vm11294_vm9, %v12507_v57, %v5130_v61  ;;  %v5144_v41 = vsel %vm11294_vm9, %v12509_v60, %v5143_v23  ;;  %v9649_v37 = vrot.slane %v5172_v34, 11  ;;  %v5195_v48 = vor.u32 %v5193_v47, %v5192_v52 }
 0x2ce   : > { %v3688_v62 = vor.u32 %v3687_v31, %v3684_v53  ;;  %v3738_v0 = vshrl.u32 %v3537_v19, 16  ;;  %v3741_v3 = vshll.u32 %v3537_v19, 16  ;;  %v3752_v6 = vshrl.u32 %v3539_v24, 16 }
 0x2cf   : > { %v3755_v39 = vshll.u32 %v3539_v24, 16  ;;  %v5182_v57 = vor.u32 %v5180_v12, %v5179_v15  ;;  %v9650_v61 = vrot.slane %v5185_v42, 11  ;;  %v3716_v60 = vor.u32 %v3715_v20, %v3712_v40 }
 0x2d0   : > { %10366 = vmatmul.mubr.msk.bf16.vlgmr.msra.gmra.mrb[8].mxu0 %vm831_vm5, %v9555_v50  ;;  %v3666_v50 = vsel %vm11362_vm13, %v3661_v11, %v12502_v22  ;;  %v3730_v27 = vor.u32 %v3729_v28, %v3726_v46  ;;  %v13721_v22 = vsel %vm11362_vm13, %v12454_v9, %v12421_v16  ;;  %v9656_v13 = vcombine.low %v5131_v58, %v5144_v41 }
 0x2d1   : > { %5224 = vrot.lane.b32.xlu0 %v9652_v59, %s11120_s18  ;;  %10369 = vmatprep.mubr.msk.bf16.mxu0 %vm831_vm5, %v9556_v35  ;;  %v3733_v59 = vshll.u32 %v3536_v21, 16  ;;  %v9557_v52 = vcombine.low %v3638_v55, %v13721_v22  ;;  %v3680_v32 = vsel %vm11362_vm13, %v12492_v26, %v12456_v30  ;;  %v3693_v23 = vrot.slane %v3691_v45, 5  ;;  %v3538_v35 = vld [vmem:[#allocation3 + $0xbc] sm:$0x1]  ;;  %v3540_v45 = vld [vmem:[#allocation3 + $0xc8] sm:$0x1] }
 0x2d2   : > { %10382 = vmatpush3.bf16.msra.mxu0 %v4236_v54  ;;  %v9558_v8 = vcombine.low %v3666_v50, %v3680_v32  ;;  %v3689_v34 = vrot.slane %v3688_v62, 4  ;;  %v13722_v47 = vshll.u32 %v12505_v33, 16  ;;  %v3740_v11 = vrot.slane %v3738_v0, 4  ;;  %v4198_v0 = vpop.permute.xlu0 %4197  ;;  %v11073_v22 = vld [vmem:[#allocation3 + $0x1c] sm:$0xf] }
 0x2d3   : > { %10399 = vmatprep.subr.bf16.mxu0 %v12576_v2  ;;  %v3735_v44 = vrot.slane %v3733_v59, 5  ;;  %v3743_v53 = vrot.slane %v3741_v3, 5  ;;  %v3754_v16 = vrot.slane %v3752_v6, 4  ;;  %v3757_v9 = vrot.slane %v3755_v39, 5  ;;  %v4196_v59 = vpop.permute.xlu1 %4195  ;;  %v4792_v3 = vld [vmem:[%s13662_s4 + $0x1c] sm:$0xf] }
 0x2d4   : > { %v5183_v31 = vsel %vm11294_vm9, %v9649_v37, %v5182_v57  ;;  %v5196_v30 = vsel %vm11294_vm9, %v9650_v61, %v5195_v48  ;;  %v3717_v26 = vrot.slane %v3716_v60, 4  ;;  %v3731_v7 = vrot.slane %v3730_v27, 4  ;;  %v11076_v32 = vld [vmem:[#allocation3 + $0x40] sm:$0xf] }
 0x2d5   : > { %5228 = vrot.lane.b32.xlu0 %v9654_v5, %s11120_s18  ;;  %v3721_v5 = vrot.slane %v13722_v47, 5  ;;  %v13723_v33 = vor.u32 %v12465_v36, %v12458_v51  ;;  %v13724_v55 = vshll.u32 %v12442_v10, 16  ;;  %v3694_v20 = vsel %vm11362_vm13, %v3689_v34, %v3693_v23  ;;  %v4536_v34 = vld [vmem:[#allocation3 + $0x1c] sm:$0xf]  ;;  %v11077_v47 = vld [vmem:[#allocation3 + $0x4c] sm:$0xf] }
 0x2d6   : > { %v3747_v19 = vshll.u32 %v3538_v35, 16  ;;  %v9658_v54 = vcombine.low %v5183_v31, %v5196_v30  ;;  %v3744_v15 = vor.u32 %v3743_v53, %v3740_v11  ;;  %v3758_v42 = vor.u32 %v3757_v9, %v3754_v16  ;;  %v4202_v39 = vpop.permute.xlu0 %4201  ;;  %v12652_v35 = vld [vmem:[%s13662_s4 + $0x20] sm:$0xf]  ;;  %v4540_v9 = vld [vmem:[#allocation3 + $0x34] sm:$0xf] }
 0x2d7   : > { %v3703_v21 = vrot.slane %v13723_v33, 4  ;;  %v3707_v40 = vrot.slane %v13724_v55, 5  ;;  %v3761_v46 = vshll.u32 %v3540_v45, 16  ;;  %v3722_v28 = vsel %vm11362_vm13, %v3717_v26, %v3721_v5  ;;  %v4200_v6 = vpop.permute.xlu1 %4199  ;;  %v11078_v5 = vld [vmem:[#allocation3 + $0x58] sm:$0xf] }
 0x2d8   : > { %10370 = vmatmul.mubr.msk.bf16.gmra.mrb[12].mxu0 %vm831_vm5, %v9557_v52  ;;  %v3736_v24 = vsel %vm11362_vm13, %v3731_v7, %v3735_v44  ;;  %v3749_v36 = vrot.slane %v3747_v19, 5  ;;  %v3745_v41 = vrot.slane %v3744_v15, 4  ;;  %v3759_v37 = vrot.slane %v3758_v42, 4  ;;  %v11074_v52 = vld [vmem:[#allocation3 + $0x28] sm:$0xf] }
 0x2d9   : > { %5232 = vrot.lane.b32.xlu0 %v9656_v13, %s11120_s18  ;;  %10373 = vmatprep.mubr.msk.bf16.mxu0 %vm831_vm5, %v9558_v8  ;;  %v3708_v10 = vsel %vm11362_vm13, %v3703_v21, %v3707_v40  ;;  %v9560_v58 = vcombine.low %v3722_v28, %v3736_v24  ;;  %v3763_v48 = vrot.slane %v3761_v46, 5  ;;  %v9602_v13 = vcombine.low %v11073_v22, %v11074_v52  ;;  %v4538_v11 = vld [vmem:[#allocation3 + $0x28] sm:$0xf]  ;;  %v4537_v31 = vld [vmem:[#allocation3 + $0x20] sm:$0x1] }
 0x2da   : > { %v9559_v51 = vcombine.low %v3694_v20, %v3708_v10  ;;  %v3750_v50 = vsel %vm11362_vm13, %v3745_v41, %v3749_v36  ;;  %v4206_v61 = vpop.permute.xlu0 %4205  ;;  %v4842_v8 = vsel %vm844_vm0, %v4792_v3, 0  ;;  %v9604_v44 = vcombine.low %v11077_v47, %v11078_v5  ;;  %v4544_v55 = vld [vmem:[#allocation3 + $0x4c] sm:$0xf]  ;;  %v11079_v40 = vld [vmem:[#allocation3 + $0x64] sm:$0xf] }
 0x2db   : > { %v3764_v12 = vsel %vm11362_vm13, %v3759_v37, %v3763_v48  ;;  %v4204_v57 = vpop.permute.xlu1 %4203  ;;  %v4569_v53 = vshrl.u32 %v4536_v34, 16  ;;  %v4572_v16 = vshll.u32 %v4536_v34, 16  ;;  %v4583_v30 = vshrl.u32 %v4538_v11, 16  ;;  %v11080_v20 = vld [vmem:[#allocation3 + $0x70] sm:$0xf] }
 0x2dc   : > { %v9561_v62 = vcombine.low %v3750_v50, %v3764_v12  ;;  %v4586_v26 = vshll.u32 %v4538_v11, 16  ;;  %v4597_v7 = vshrl.u32 %v4540_v9, 16  ;;  %v4600_v21 = vshll.u32 %v4540_v9, 16  ;;  %v11081_v15 = vld [vmem:[#allocation3 + $0x7c] sm:$0xf] }
 0x2dd   : > { %5236 = vrot.lane.b32.xlu0 %v9658_v54, %s11120_s18  ;;  %v4571_v45 = vrot.slane %v4569_v53, 4  ;;  %v4574_v33 = vrot.slane %v4572_v16, 5  ;;  %v9605_v19 = vcombine.low %v11079_v40, %v11080_v20  ;;  %v4578_v54 = vshll.u32 %v4537_v31, 16  ;;  %v11082_v42 = vld [vmem:[#allocation3 + $0x88] sm:$0xf] }
 0x2de   : > { %v9606_v46 = vcombine.low %v11081_v15, %v11082_v42  ;;  %v4539_v28 = vld [vmem:[#allocation3 + $0x2c] sm:$0x1]  ;;  %v4541_v24 = vld [vmem:[#allocation3 + $0x38] sm:$0x1]  ;;  %v4585_v10 = vrot.slane %v4583_v30, 4  ;;  %v4625_v41 = vshrl.u32 %v4544_v55, 16 }
 0x2df   : > { %v4208_v60 = vpop.permute.xlu1 %4207  ;;  %v4542_v36 = vld [vmem:[#allocation3 + $0x40] sm:$0xf]  ;;  %v4575_v37 = vor.u32 %v4574_v33, %v4571_v45  ;;  %v4543_v48 = vld [vmem:[#allocation3 + $0x44] sm:$0x1]  ;;  %v4602_v50 = vrot.slane %v4600_v21, 5 }
 0x2e0   : > { %10374 = vmatmul.mubr.msk.bf16.gmra.mrb[16].mxu0 %vm831_vm5, %v9559_v51  ;;  %v4588_v51 = vrot.slane %v4586_v26, 5  ;;  %v4546_v12 = vld [vmem:[#allocation3 + $0x58] sm:$0xf]  ;;  %v11083_v34 = vld [vmem:[#allocation3 + $0x94] sm:$0xf] }
 0x2e1   : > { %10377 = vmatprep.mubr.msk.bf16.mxu0 %vm831_vm5, %v9560_v58  ;;  %v4599_v58 = vrot.slane %v4597_v7, 4  ;;  %v4639_v22 = vshrl.u32 %v4546_v12, 16  ;;  %v4642_v52 = vshll.u32 %v4546_v12, 16  ;;  %v11084_v47 = vld [vmem:[#allocation3 + $0xa0] sm:$0xf] }
 0x2e2   : > { %v9607_v5 = vcombine.low %v11083_v34, %v11084_v47  ;;  %v4550_v31 = vld [vmem:[#allocation3 + $0x70] sm:$0xf]  ;;  %v4554_v21 = vld [vmem:[#allocation3 + $0x88] sm:$0xf]  ;;  %v12682_v12 = vld [vmem:[#allocation3 + $0x80] sm:$0x1] }
 0x2e3   : > { %v4641_v45 = vrot.slane %v4639_v22, 4  ;;  %v4644_v33 = vrot.slane %v4642_v52, 5  ;;  %v4549_v15 = vld [vmem:[#allocation3 + $0x68] sm:$0x1]  ;;  %v4690_v47 = vshll.u32 %v12682_v12, 16 }
 0x2e8   : > { %10378 = vmatmul.mubr.msk.bf16.gmra.mrb[20].mxu0 %vm831_vm5, %v9561_v62  ;;  %v4628_v62 = vshll.u32 %v4544_v55, 16  ;;  %v13725_v55 = vcombine.low %v12232_v4, %v12220_v63  ;;  %v4551_v63 = vld [vmem:[#allocation3 + $0x74] sm:$0x1] }
 0x2e9   : > { %10383 = vmatprep.mubr.msk.bf16.mxu0 %vm831_vm5, %v4196_v59  ;;  %v12660_v59 = vrot.slane %v4578_v54, 5 }
 0x2f0   : > { %10384 = vmatmul.mubr.msk.bf16.vlgmr.msra.gmra.mrb[8].mxu0 %vm831_vm5, %v4198_v0  ;;  %v4545_v0 = vld [vmem:[#allocation3 + $0x50] sm:$0x1] }
 0x2f1   : > { %10387 = vmatprep.mubr.msk.bf16.mxu0 %vm831_vm5, %v4200_v6  ;;  %10400 = vmatpush3.bf16.msra.mxu0 %v12576_v2  ;;  %v11075_v2 = vld [vmem:[#allocation3 + $0x34] sm:$0xf]  ;;  %v4606_v6 = vshll.u32 %v4541_v24, 16  ;;  %v4670_v24 = vshll.u32 %v4550_v31, 16 }
 0x2f2   : > { %11002 = vmatprep.subr.msk.bf16.mxu0 %vm844_vm0, %v4792_v3  ;;  %v9603_v23 = vcombine.low %v11075_v2, %v11076_v32  ;;  %v4592_v3 = vshll.u32 %v4539_v28, 16  ;;  %v4576_v2 = vrot.slane %v4575_v37, 4  ;;  %v4603_v32 = vor.u32 %v4602_v50, %v4599_v58 }
 0x2f3   : > { %v12662_v53 = vrot.slane %v4606_v6, 5  ;;  %v4667_v28 = vshrl.u32 %v4550_v31, 16  ;;  %v4698_v58 = vshll.u32 %v4554_v21, 16  ;;  %v4645_v37 = vor.u32 %v4644_v33, %v4641_v45  ;;  %v4556_v6 = vld [vmem:[#allocation3 + $0x94] sm:$0xf] }
 0x2f4   : > { %v4594_v7 = vrot.slane %v4592_v3, 5  ;;  %v4581_v40 = vsel %vm11362_vm13, %v4576_v2, %v12660_v59  ;;  %v12672_v20 = vrot.slane %v4603_v32, 4  ;;  %v4662_v50 = vshll.u32 %v4549_v15, 16  ;;  %v4558_v32 = vld [vmem:[#allocation3 + $0xa0] sm:$0xf] }
 0x2f5   : > { %v4700_v2 = vrot.slane %v4698_v58, 5  ;;  %v4723_v31 = vshrl.u32 %v4558_v32, 16 }
 0x2f6   : > { %v12691_v34 = vrot.slane %v4662_v50, 5 }
 0x2f8   : > { %10388 = vmatmul.mubr.msk.bf16.gmra.mrb[12].mxu0 %vm831_vm5, %v4202_v39  ;;  %v4611_v39 = vshrl.u32 %v4542_v36, 16 }
 0x2f9   : > { %10391 = vmatprep.mubr.msk.bf16.mxu0 %vm831_vm5, %v4204_v57  ;;  %v4614_v57 = vshll.u32 %v4542_v36, 16  ;;  %v4695_v36 = vshrl.u32 %v4554_v21, 16 }
 0x2fa   : > { %v4613_v16 = vrot.slane %v4611_v39, 4  ;;  %v9609_v39 = vcombine.low %v12462_v38, %v12511_v56 }
 0x2fb   : > { %v4616_v9 = vrot.slane %v4614_v57, 5  ;;  %v4669_v57 = vrot.slane %v4667_v28, 4  ;;  %v4712_v28 = vshll.u32 %v4556_v6, 16 }
 0x300   : > { %10392 = vmatmul.mubr.msk.bf16.gmra.mrb[16].mxu0 %vm831_vm5, %v4206_v61  ;;  %v4547_v61 = vld [vmem:[#allocation3 + $0x5c] sm:$0x1] }
 0x301   : > { %10395 = vmatprep.mubr.msk.bf16.mxu0 %vm831_vm5, %v4208_v60  ;;  %v4589_v60 = vor.u32 %v4588_v51, %v4585_v10  ;;  %v4648_v11 = vshll.u32 %v4547_v61, 16  ;;  %v4552_v10 = vld [vmem:[#allocation3 + $0x7c] sm:$0xf]  ;;  %v4617_v51 = vor.u32 %v4616_v9, %v4613_v16  ;;  %v4672_v61 = vrot.slane %v4670_v24, 5 }
 0x302   : > { %v4684_v3 = vshll.u32 %v4552_v10, 16  ;;  %v4709_v9 = vshrl.u32 %v4556_v6, 16  ;;  %v4714_v6 = vrot.slane %v4712_v28, 5 }
 0x303   : > { %v4590_v26 = vrot.slane %v4589_v60, 4  ;;  %v4676_v60 = vshll.u32 %v4551_v63, 16  ;;  %v4618_v52 = vrot.slane %v4617_v51, 4  ;;  %v4725_v51 = vrot.slane %v4723_v31, 4 }
 0x305   : > { %v4678_v16 = vrot.slane %v4676_v60, 5 }
 0x33f   : > { %v4210_v27 = vpop.permute.xlu0 %4209 }
 0x340   : > { %10396 = vmatmul.mubr.msk.bf16.gmra.mrb[20].mxu0 %vm831_vm5, %v4210_v27  ;;  %v4620_v27 = vshll.u32 %v4543_v48, 16 }
 0x341   : > { %10401 = vmatprep.mubr.msk.bf16.mxu0 %vm3223_vm14, %v9602_v13  ;;  %v4548_v13 = vld [vmem:[#allocation3 + $0x64] sm:$0xf] }
 0x342   : > { %v4653_v30 = vshrl.u32 %v4548_v13, 16  ;;  %v4656_v48 = vshll.u32 %v4548_v13, 16  ;;  %v4697_v13 = vrot.slane %v4695_v36, 4  ;;  %v12709_v36 = vld [vmem:[%s13662_s4 + $0x24] sm:$0xff]  }
 0x344   : > { %v12678_v4 = vrot.slane %v4653_v30, 4  ;;  %v4726_v30 = vshll.u32 %v4558_v32, 16  ;;  %v4701_v45 = vor.u32 %v4700_v2, %v4697_v13 }
 0x346   : > { %v4728_v63 = vrot.slane %v4726_v30, 5 }
 0x348   : > { %10402 = vmatmul.mubr.msk.bf16.vlgmr.msra.gmra.mrb[8].mxu0 %vm3223_vm14, %v9603_v23  ;;  %v4627_v23 = vrot.slane %v4625_v41, 4  ;;  %v4595_v41 = vsel %vm11362_vm13, %v4590_v26, %v4594_v7  ;;  %v4673_v7 = vor.u32 %v4672_v61, %v4669_v57  ;;  %v4729_v60 = vor.u32 %v4728_v63, %v4725_v51 }
 0x349   : > { %10405 = vmatprep.mubr.msk.bf16.mxu0 %vm3223_vm14, %v9604_v44  ;;  %10418 = vmatpush3.bf16.msra.mxu0 %v4842_v8  ;;  %v4630_v8 = vrot.slane %v4628_v62, 5  ;;  %v4634_v44 = vshll.u32 %v4545_v0, 16  ;;  %v4609_v62 = vsel %vm11362_vm13, %v12672_v20, %v12662_v53  ;;  %v4681_v0 = vshrl.u32 %v4552_v10, 16  ;;  %v4562_v53 = vld [vmem:[#allocation3 + $0xb8] sm:$0xf] }
 0x34a   : > { %11003 = vmatprep.subr.msk.bf16.mxu0 %vm844_vm0, %v12652_v35  ;;  %v9619_v22 = vcombine.low %v4581_v40, %v4595_v41  ;;  %v4751_v40 = vshrl.u32 %v4562_v53, 16  ;;  %v4754_v20 = vshll.u32 %v4562_v53, 16  ;;  %v5263_v10 = vsel %vm844_vm0, %v12652_v35, 0  ;;  %v4566_v35 = vld [vmem:[#allocation3 + $0xd0] sm:$0xf] }
 0x34b   : > { %v4631_v54 = vor.u32 %v4630_v8, %v4627_v23  ;;  %v12674_v42 = vrot.slane %v4634_v44, 5  ;;  %v4646_v23 = vrot.slane %v4645_v37, 4  ;;  %v4658_v8 = vrot.slane %v4656_v48, 5  ;;  %v4559_v37 = vld [vmem:[#allocation3 + $0xa4] sm:$0x1] }
 0x34c   : > { %v4683_v56 = vrot.slane %v4681_v0, 4  ;;  %v4686_v44 = vrot.slane %v4684_v3, 5  ;;  %v4674_v58 = vrot.slane %v4673_v7, 4  ;;  %v4702_v41 = vrot.slane %v4701_v45, 4 }
 0x34d   : > { %v4632_v59 = vrot.slane %v4631_v54, 4  ;;  %v4659_v54 = vor.u32 %v4658_v8, %v12678_v4  ;;  %v4561_v4 = vld [vmem:[#allocation3 + $0xb0] sm:$0x1]  ;;  %v4753_v12 = vrot.slane %v4751_v40, 4  ;;  %v4692_v0 = vrot.slane %v4690_v47, 5 }
 0x34e   : > { %v4687_v15 = vor.u32 %v4686_v44, %v4683_v56  ;;  %v4711_v3 = vrot.slane %v4709_v9, 4  ;;  %v4746_v13 = vshll.u32 %v4561_v4, 16  ;;  %v4779_v2 = vshrl.u32 %v4566_v35, 16  ;;  %v4567_v40 = vld [vmem:[#allocation3 + $0xd4] sm:$0x1] }
 0x34f   : > { %v4637_v38 = vsel %vm11362_vm13, %v4632_v59, %v12674_v42  ;;  %v4660_v59 = vrot.slane %v4659_v54, 4  ;;  %v4782_v32 = vshll.u32 %v4566_v35, 16  ;;  %v4730_v30 = vrot.slane %v4729_v60, 4 }
 0x350   : > { %10406 = vmatmul.mubr.msk.bf16.gmra.mrb[12].mxu0 %vm3223_vm14, %v9605_v19  ;;  %v4622_v19 = vrot.slane %v4620_v27, 5  ;;  %v4555_v27 = vld [vmem:[#allocation3 + $0x8c] sm:$0x1]  ;;  %v4688_v57 = vrot.slane %v4687_v15, 4  ;;  %v4715_v56 = vor.u32 %v4714_v6, %v4711_v3  ;;  %v5225_v3 = vpop.permute.xlu0 %5224  ;;  %v5819_v6 = vld [vmem:[%s13662_s4 + $0x2c] sm:$0xf] }
 0x351   : > { %10409 = vmatprep.mubr.msk.bf16.mxu0 %vm3223_vm14, %v9606_v46  ;;  %v12676_v46 = vrot.slane %v4648_v11, 5  ;;  %v4704_v11 = vshll.u32 %v4555_v27, 16  ;;  %v4732_v27 = vshll.u32 %v4559_v37, 16  ;;  %v4784_v7 = vrot.slane %v4782_v32, 5 }
 0x352   : > { %v4623_v26 = vsel %vm11362_vm13, %v4618_v52, %v4622_v19  ;;  %v4557_v19 = vld [vmem:[#allocation3 + $0x98] sm:$0x1]  ;;  %v4679_v52 = vsel %vm11362_vm13, %v4674_v58, %v4678_v16  ;;  %v4693_v16 = vsel %vm11362_vm13, %v4688_v57, %v4692_v0  ;;  %v5223_v0 = vpop.permute.xlu1 %5222 }
 0x353   : > { %v4651_v21 = vsel %vm11362_vm13, %v4646_v23, %v12676_v46  ;;  %v4706_v42 = vrot.slane %v4704_v11, 5  ;;  %v9620_v24 = vcombine.low %v4609_v62, %v4623_v26  ;;  %v4756_v62 = vrot.slane %v4754_v20, 5 }
 0x354   : > { %v9621_v46 = vcombine.low %v4637_v38, %v4651_v21  ;;  %v4718_v61 = vshll.u32 %v4557_v19, 16  ;;  %v4665_v38 = vsel %vm11362_vm13, %v4660_v59, %v12691_v34  ;;  %v4734_v9 = vrot.slane %v4732_v27, 5  ;;  %v5229_v57 = vpop.permute.xlu0 %5228 }
 0x355   : > { %v4707_v23 = vsel %vm11362_vm13, %v4702_v41, %v4706_v42  ;;  %v4757_v47 = vor.u32 %v4756_v62, %v4753_v12  ;;  %v9622_v53 = vcombine.low %v4665_v38, %v4679_v52  ;;  %v4781_v26 = vrot.slane %v4779_v2, 4  ;;  %v4565_v42 = vld [vmem:[#allocation3 + $0xc8] sm:$0x1]  ;;  %v11085_v52 = vld [vmem:[#allocation3 + $0x34] sm:$0xf] }
 0x356   : > { %v9623_v31 = vcombine.low %v4693_v16, %v4707_v23  ;;  %v4716_v34 = vrot.slane %v4715_v56, 4  ;;  %v4720_v20 = vrot.slane %v4718_v61, 5  ;;  %v4735_v28 = vsel %vm11362_vm13, %v4730_v30, %v4734_v9  ;;  %v11088_v38 = vld [vmem:[#allocation3 + $0x64] sm:$0xf]  ;;  %v11089_v56 = vld [vmem:[#allocation3 + $0x58] sm:$0xf] }
 0x357   : > { %v4758_v21 = vrot.slane %v4757_v47, 4  ;;  %v4774_v58 = vshll.u32 %v4565_v42, 16  ;;  %v5563_v9 = vld [vmem:[#allocation3 + $0x28] sm:$0xf] }
 0x358   : > { %10410 = vmatmul.mubr.msk.bf16.gmra.mrb[16].mxu0 %vm3223_vm14, %v9607_v5  ;;  %v4560_v5 = vld [vmem:[#allocation3 + $0xac] sm:$0xf]  ;;  %v4721_v63 = vsel %vm11362_vm13, %v4716_v34, %v4720_v20  ;;  %v5233_v60 = vpop.permute.xlu0 %5232  ;;  %v5567_v20 = vld [vmem:[#allocation3 + $0x40] sm:$0xf] }
 0x359   : > { %10413 = vmatprep.mubr.msk.bf16.mxu0 %vm3223_vm14, %v13725_v55  ;;  %v4737_v33 = vshrl.u32 %v4560_v5, 16  ;;  %v4740_v55 = vshll.u32 %v4560_v5, 16  ;;  %v9624_v41 = vcombine.low %v4721_v63, %v4735_v28  ;;  %v4776_v12 = vrot.slane %v4774_v58, 5  ;;  %v11091_v28 = vld [vmem:[#allocation3 + $0x88] sm:$0xf] }
 0x35b   : > { %v4739_v48 = vrot.slane %v4737_v33, 4  ;;  %v4742_v50 = vrot.slane %v4740_v55, 5  ;;  %v4748_v33 = vrot.slane %v4746_v13, 5  ;;  %v11086_v13 = vld [vmem:[#allocation3 + $0x28] sm:$0xf] }
 0x35c   : > { %v9667_v2 = vcombine.low %v11086_v13, %v11085_v52  ;;  %v5575_v13 = vld [vmem:[#allocation3 + $0x70] sm:$0xf] }
 0x35d   : > { %v4743_v8 = vor.u32 %v4742_v50, %v4739_v48 }
 0x35f   : > { %v4744_v45 = vrot.slane %v4743_v8, 4  ;;  %v11087_v8 = vld [vmem:[#allocation3 + $0x4c] sm:$0xf] }
 0x360   : > { %10414 = vmatmul.mubr.msk.bf16.gmra.mrb[20].mxu0 %vm3223_vm14, %v9609_v39  ;;  %v4563_v39 = vld [vmem:[#allocation3 + $0xbc] sm:$0x1]  ;;  %v9668_v47 = vcombine.low %v12436_v49, %v11087_v8  ;;  %v5596_v49 = vshrl.u32 %v5563_v9, 16 }
 0x361   : > { %10419 = vmatprep.mubr.msk.bf16.mxu0 %vm831_vm5, %v9619_v22  ;;  %v4564_v22 = vld [vmem:[#allocation3 + $0xc4] sm:$0xf]  ;;  %v4760_v5 = vshll.u32 %v4563_v39, 16  ;;  %v4749_v19 = vsel %vm11362_vm13, %v4744_v45, %v4748_v33  ;;  %v5227_v39 = vpop.permute.xlu1 %5226  ;;  %v5564_v45 = vld [vmem:[#allocation3 + $0x2c] sm:$0x1]  ;;  %v5599_v33 = vshll.u32 %v5563_v9, 16 }
 0x362   : > { %v4765_v44 = vshrl.u32 %v4564_v22, 16  ;;  %v4768_v11 = vshll.u32 %v4564_v22, 16  ;;  %v5237_v22 = vpop.permute.xlu0 %5236  ;;  %v5598_v58 = vrot.slane %v5596_v49, 4  ;;  %v5578_v9 = vld [vmem:[#allocation3 + $0x80] sm:$0x1] }
 0x363   : > { %v4762_v55 = vrot.slane %v4760_v5, 5  ;;  %v5869_v5 = vsel %vm844_vm0, %v5819_v6, 0 }
 0x364   : > { %v4767_v54 = vrot.slane %v4765_v44, 4  ;;  %v4770_v15 = vrot.slane %v4768_v11, 5  ;;  %v9669_v44 = vcombine.low %v11089_v56, %v11088_v38  ;;  %v5569_v11 = vld [vmem:[#allocation3 + $0x4c] sm:$0xf]  ;;  %v5579_v56 = vld [vmem:[#allocation3 + $0x88] sm:$0xf] }
 0x365   : > { %v4763_v51 = vsel %vm11362_vm13, %v4758_v21, %v4762_v55  ;;  %v5231_v61 = vpop.permute.xlu1 %5230  ;;  %v5638_v30 = vshrl.u32 %v5569_v11, 16 }
 0x366   : > { %v9625_v37 = vcombine.low %v4749_v19, %v4763_v51  ;;  %v5605_v19 = vshll.u32 %v5564_v45, 16  ;;  %v5572_v51 = vld [vmem:[#allocation3 + $0x5c] sm:$0x1] }
 0x368   : > { %10420 = vmatmul.mubr.msk.bf16.vlgmr.msra.gmra.mrb[8].mxu0 %vm831_vm5, %v9620_v24  ;;  %v4785_v24 = vor.u32 %v4784_v7, %v4781_v26  ;;  %v5641_v26 = vshll.u32 %v5569_v11, 16  ;;  %v5573_v7 = vld [vmem:[#allocation3 + $0x64] sm:$0xf] }
 0x369   : > { %10423 = vmatprep.mubr.msk.bf16.mxu0 %vm831_vm5, %v9621_v46  ;;  %10436 = vmatpush3.bf16.msra.mxu0 %v5263_v10  ;;  %v4788_v10 = vshll.u32 %v4567_v40, 16  ;;  %v4771_v46 = vor.u32 %v4770_v15, %v4767_v54  ;;  %v5235_v27 = vpop.permute.xlu1 %5234  ;;  %v11090_v40 = vld [vmem:[#allocation3 + $0x7c] sm:$0xf]  ;;  %v5570_v54 = vld [vmem:[#allocation3 + $0x50] sm:$0x1]  ;;  %v5640_v15 = vrot.slane %v5638_v30, 4 }
 0x36a   : > { %10453 = vmatprep.subr.bf16.mxu0 %v12709_v36  ;;  %v4786_v4 = vrot.slane %v4785_v24, 4  ;;  %v9670_v34 = vcombine.low %v12450_v18, %v11090_v40  ;;  %v5643_v42 = vrot.slane %v5641_v26, 5  ;;  %v11092_v24 = vld [vmem:[#allocation3 + $0x94] sm:$0xf]  ;;  %v5666_v63 = vshrl.u32 %v5573_v7, 16 }
 0x36b   : > { %v4790_v48 = vrot.slane %v4788_v10, 5  ;;  %v4772_v50 = vrot.slane %v4771_v46, 4  ;;  %v9671_v10 = vcombine.low %v11091_v28, %v11092_v24  ;;  %v5669_v46 = vshll.u32 %v5573_v7, 16  ;;  %v5577_v18 = vld [vmem:[#allocation3 + $0x7c] sm:$0xf] }
 0x36c   : > { %v11094_v11 = vld [vmem:[#allocation3 + $0xc4] sm:$0xf]  ;;  %v5581_v26 = vld [vmem:[#allocation3 + $0x94] sm:$0xf]  ;;  %v13726_v7 = vcombine.low %v12374_v17, %v12376_v43  ;;  %v5703_v28 = vshll.u32 %v5578_v9, 16 }
 0x36d   : > { %v4791_v62 = vsel %vm11362_vm13, %v4786_v4, %v4790_v48  ;;  %v4777_v35 = vsel %vm11362_vm13, %v4772_v50, %v4776_v12  ;;  %v5624_v48 = vshrl.u32 %v5567_v20, 16  ;;  %v5627_v50 = vshll.u32 %v5567_v20, 16 }
 0x36e   : > { %v9626_v59 = vcombine.low %v4777_v35, %v4791_v62  ;;  %v5647_v12 = vshll.u32 %v5570_v54, 16  ;;  %v5571_v62 = vld [vmem:[#allocation3 + $0x58] sm:$0xf]  ;;  %v5644_v35 = vor.u32 %v5643_v42, %v5640_v15  ;;  %v5708_v20 = vshrl.u32 %v5579_v56, 16 }
 0x36f   : > { %v5655_v52 = vshll.u32 %v5571_v62, 16  ;;  %v5711_v54 = vshll.u32 %v5579_v56, 16  ;;  %v5722_v24 = vshrl.u32 %v5581_v26, 16 }
 0x370   : > { %10424 = vmatmul.mubr.msk.bf16.gmra.mrb[12].mxu0 %vm831_vm5, %v9622_v53 }
 0x371   : > { %10427 = vmatprep.mubr.msk.bf16.mxu0 %vm831_vm5, %v9623_v31  ;;  %v5566_v31 = vld [vmem:[#allocation3 + $0x38] sm:$0x1] }
 0x372   : > { %v5619_v55 = vshll.u32 %v5566_v31, 16  ;;  %v5680_v31 = vshrl.u32 %v5575_v13, 16 }
 0x374   : > { %v12762_v4 = vrot.slane %v5619_v55, 5  ;;  %v5683_v55 = vshll.u32 %v5575_v13, 16 }
 0x378   : > { %10428 = vmatmul.mubr.msk.bf16.gmra.mrb[16].mxu0 %vm831_vm5, %v9624_v41  ;;  %v5601_v41 = vrot.slane %v5599_v33, 5  ;;  %v5657_v33 = vrot.slane %v5655_v52, 5 }
 0x379   : > { %10431 = vmatprep.mubr.msk.bf16.mxu0 %vm831_vm5, %v9625_v37 }
 0x380   : > { %10432 = vmatmul.mubr.msk.bf16.gmra.mrb[20].mxu0 %vm831_vm5, %v9626_v59  ;;  %v5574_v59 = vld [vmem:[#allocation3 + $0x68] sm:$0x1] }
 0x381   : > { %10437 = vmatprep.mubr.msk.bf16.mxu0 %vm831_vm5, %v5223_v0  ;;  %v5661_v0 = vshll.u32 %v5572_v51, 16  ;;  %v5675_v38 = vshll.u32 %v5574_v59, 16  ;;  %v5725_v51 = vshll.u32 %v5581_v26, 16  ;;  %v5724_v59 = vrot.slane %v5722_v24, 4 }
 0x383   : > { %v12782_v42 = vrot.slane %v5675_v38, 5 }
 0x388   : > { %10438 = vmatmul.mubr.msk.bf16.vlgmr.msra.gmra.mrb[8].mxu0 %vm831_vm5, %v5225_v3  ;;  %v12765_v3 = vrot.slane %v5605_v19, 5  ;;  %v5582_v19 = vld [vmem:[#allocation3 + $0x98] sm:$0x1] }
 0x389   : > { %10441 = vmatprep.mubr.msk.bf16.mxu0 %vm831_vm5, %v5227_v39  ;;  %10454 = vmatpush3.bf16.msra.mxu0 %v12709_v36  ;;  %v5565_v36 = vld [vmem:[#allocation3 + $0x34] sm:$0xf]  ;;  %v5668_v39 = vrot.slane %v5666_v63, 4 }
 0x38a   : > { %11004 = vmatprep.subr.msk.bf16.mxu0 %vm844_vm0, %v5819_v6  ;;  %v5610_v32 = vshrl.u32 %v5565_v36, 16  ;;  %v5613_v23 = vshll.u32 %v5565_v36, 16  ;;  %v5568_v6 = vld [vmem:[#allocation3 + $0x44] sm:$0x1]  ;;  %v5629_v36 = vrot.slane %v5627_v50, 5  ;;  %v5713_v50 = vrot.slane %v5711_v54, 5 }
 0x38b   : > { %v5633_v8 = vshll.u32 %v5568_v6, 16  ;;  %v5585_v6 = vld [vmem:[#allocation3 + $0xac] sm:$0xf] }
 0x38c   : > { %v5612_v53 = vrot.slane %v5610_v32, 4  ;;  %v5615_v16 = vrot.slane %v5613_v23, 5  ;;  %v12771_v32 = vrot.slane %v5647_v12, 5  ;;  %v5697_v23 = vshll.u32 %v5577_v18, 16  ;;  %v5583_v12 = vld [vmem:[#allocation3 + $0xa0] sm:$0xf] }
 0x38d   : > { %v5635_v15 = vrot.slane %v5633_v8, 5 }
 0x38e   : > { %v5616_v21 = vor.u32 %v5615_v16, %v5612_v53 }
 0x390   : > { %10442 = vmatmul.mubr.msk.bf16.gmra.mrb[12].mxu0 %vm831_vm5, %v5229_v57  ;;  %v12760_v37 = vrot.slane %v5616_v21, 4  ;;  %v5671_v57 = vrot.slane %v5669_v46, 5  ;;  %v5576_v21 = vld [vmem:[#allocation3 + $0x74] sm:$0x1] }
 0x391   : > { %10445 = vmatprep.mubr.msk.bf16.mxu0 %vm831_vm5, %v5231_v61  ;;  %v5694_v61 = vshrl.u32 %v5577_v18, 16 }
 0x392   : > { %v5672_v16 = vor.u32 %v5671_v57, %v5668_v39 }
 0x393   : > { %v5696_v30 = vrot.slane %v5694_v61, 4  ;;  %v5727_v61 = vrot.slane %v5725_v51, 5 }
 0x394   : > { %v5673_v43 = vrot.slane %v5672_v16, 4 }
 0x398   : > { %10446 = vmatmul.mubr.msk.bf16.gmra.mrb[16].mxu0 %vm831_vm5, %v5233_v60  ;;  %v5602_v60 = vor.u32 %v5601_v41, %v5598_v58  ;;  %v5682_v58 = vrot.slane %v5680_v31, 4  ;;  %v5685_v41 = vrot.slane %v5683_v55, 5  ;;  %v5588_v55 = vld [vmem:[#allocation3 + $0xbc] sm:$0x1] }
 0x399   : > { %10449 = vmatprep.mubr.msk.bf16.mxu0 %vm831_vm5, %v5235_v27  ;;  %v5622_v27 = vsel %vm11362_vm13, %v12760_v37, %v12762_v4  ;;  %v5580_v37 = vld [vmem:[#allocation3 + $0x8c] sm:$0x1] }
 0x39a   : > { %v5603_v45 = vrot.slane %v5602_v60, 4  ;;  %v5717_v57 = vshll.u32 %v5580_v37, 16  ;;  %v5587_v60 = vld [vmem:[#allocation3 + $0xb8] sm:$0xf]  ;;  %v5686_v13 = vor.u32 %v5685_v41, %v5682_v58  ;;  %v5773_v58 = vshll.u32 %v5588_v55, 16 }
 0x39b   : > { %v5767_v8 = vshll.u32 %v5587_v60, 16 }
 0x39c   : > { %v5608_v63 = vsel %vm11362_vm13, %v5603_v45, %v12765_v3  ;;  %v5678_v3 = vsel %vm11362_vm13, %v5673_v43, %v12782_v42  ;;  %v5687_v31 = vrot.slane %v5686_v13, 4  ;;  %v5586_v45 = vld [vmem:[#allocation3 + $0xb0] sm:$0x1] }
 0x39d   : > { %v9684_v39 = vcombine.low %v5608_v63, %v5622_v27 }
 0x3a0   : > { %10450 = vmatmul.mubr.msk.bf16.gmra.mrb[20].mxu0 %vm831_vm5, %v5237_v22  ;;  %v5652_v22 = vshrl.u32 %v5571_v62, 16  ;;  %v9674_v62 = vcombine.low %v12555_v29, %v12528_v1  ;;  %v5739_v1 = vshll.u32 %v5583_v12, 16 }
 0x3a1   : > { %10455 = vmatprep.mubr.msk.bf16.mxu0 %vm3223_vm14, %v9667_v2  ;;  %v5626_v2 = vrot.slane %v5624_v48, 4  ;;  %v5710_v48 = vrot.slane %v5708_v20, 4 }
 0x3a2   : > { %v5654_v49 = vrot.slane %v5652_v22, 4  ;;  %v5589_v22 = vld [vmem:[#allocation3 + $0xc4] sm:$0xf] }
 0x3a3   : > { %v5630_v40 = vor.u32 %v5629_v36, %v5626_v2  ;;  %v5736_v2 = vshrl.u32 %v5583_v12, 16  ;;  %v5714_v27 = vor.u32 %v5713_v50, %v5710_v48  ;;  %v5750_v36 = vshrl.u32 %v5585_v6, 16 }
 0x3a4   : > { %v5658_v46 = vor.u32 %v5657_v33, %v5654_v49  ;;  %v5781_v38 = vshll.u32 %v5589_v22, 16  ;;  %v5741_v49 = vrot.slane %v5739_v1, 5 }
 0x3a5   : > { %v5631_v4 = vrot.slane %v5630_v40, 4  ;;  %v5738_v26 = vrot.slane %v5736_v2, 4  ;;  %v5752_v33 = vrot.slane %v5750_v36, 4  ;;  %v5594_v36 = vld [vmem:[#allocation3 + $0xe0] sm:$0x1] }
 0x3a6   : > { %v5659_v52 = vrot.slane %v5658_v46, 4  ;;  %v5783_v54 = vrot.slane %v5781_v38, 5  ;;  %v5759_v46 = vshll.u32 %v5586_v45, 16 }
 0x3a7   : > { %v5636_v29 = vsel %vm11362_vm13, %v5631_v4, %v5635_v15  ;;  %v5742_v63 = vor.u32 %v5741_v49, %v5738_v26 }
 0x3a8   : > { %10456 = vmatmul.mubr.msk.bf16.vlgmr.msra.gmra.mrb[8].mxu0 %vm3223_vm14, %v9668_v47  ;;  %v12773_v47 = vrot.slane %v5644_v35, 4  ;;  %v12793_v35 = vrot.slane %v5703_v28, 5  ;;  %v5590_v28 = vld [vmem:[#allocation3 + $0xc8] sm:$0x1] }
 0x3a9   : > { %10459 = vmatprep.mubr.msk.bf16.mxu0 %vm3223_vm14, %v9669_v44  ;;  %10472 = vmatpush3.bf16.msra.mxu0 %v5869_v5  ;;  %v12775_v5 = vrot.slane %v5661_v0, 5  ;;  %v11093_v44 = vld [vmem:[#allocation3 + $0xb8] sm:$0xf]  ;;  %v5731_v0 = vshll.u32 %v5582_v19, 16  ;;  %v5593_v19 = vld [vmem:[#allocation3 + $0xdc] sm:$0xf] }
 0x3aa   : > { %v9673_v53 = vcombine.low %v11093_v44, %v11094_v11  ;;  %v5650_v17 = vsel %vm11362_vm13, %v12773_v47, %v12771_v32  ;;  %v5753_v32 = vshll.u32 %v5585_v6, 16  ;;  %v5778_v47 = vshrl.u32 %v5589_v22, 16 }
 0x3ab   : > { %v5719_v11 = vrot.slane %v5717_v57, 5  ;;  %v9685_v16 = vcombine.low %v5636_v29, %v5650_v17  ;;  %v5664_v9 = vsel %vm11362_vm13, %v5659_v52, %v12775_v5  ;;  %v5733_v42 = vrot.slane %v5731_v0, 5 }
 0x3ac   : > { %v5780_v20 = vrot.slane %v5778_v47, 4  ;;  %v9686_v15 = vcombine.low %v5664_v9, %v5678_v3  ;;  %v5806_v12 = vshrl.u32 %v5593_v19, 16  ;;  %v5761_v3 = vrot.slane %v5759_v46, 5 }
 0x3ad   : > { %v5775_v57 = vrot.slane %v5773_v58, 5 }
 0x3ae   : > { %v5784_v4 = vor.u32 %v5783_v54, %v5780_v20  ;;  %v5808_v1 = vrot.slane %v5806_v12, 4  ;;  %v595_v12 = vld [vmem:[#allocation4 + $0x84] sm:$0x8]  ;;  %v625_v20 = vld [vmem:[#allocation4 + $0x2c] sm:$0x1] }
 0x3b0   : > { %10460 = vmatmul.mubr.msk.bf16.gmra.mrb[12].mxu0 %vm3223_vm14, %v9670_v34  ;;  %v5699_v34 = vrot.slane %v5697_v23, 5  ;;  %v5764_v23 = vshrl.u32 %v5587_v60, 16  ;;  %v5785_v22 = vrot.slane %v5784_v4, 4 }
 0x3b1   : > { %10463 = vmatprep.mubr.msk.bf16.mxu0 %vm3223_vm14, %v9671_v10  ;;  %v5689_v10 = vshll.u32 %v5576_v21, 16  ;;  %v5755_v21 = vrot.slane %v5753_v32, 5 }
 0x3b2   : > { %v5700_v18 = vor.u32 %v5699_v34, %v5696_v30  ;;  %v5584_v30 = vld [vmem:[#allocation3 + $0xa4] sm:$0x1]  ;;  %v5766_v40 = vrot.slane %v5764_v23, 4  ;;  %v5769_v34 = vrot.slane %v5767_v8, 5 }
 0x3b3   : > { %v5691_v56 = vrot.slane %v5689_v10, 5  ;;  %v5745_v43 = vshll.u32 %v5584_v30, 16  ;;  %v5591_v10 = vld [vmem:[#allocation3 + $0xd0] sm:$0xf]  ;;  %v5756_v41 = vor.u32 %v5755_v21, %v5752_v33  ;;  %v11056_v33 = vld [vmem:[%s13664_s6] sm:$0x3c]  }
 0x3b4   : > { %v5701_v44 = vrot.slane %v5700_v18, 4  ;;  %v5770_v37 = vor.u32 %v5769_v34, %v5766_v40  ;;  %v5787_v18 = vshll.u32 %v5590_v28, 16  ;;  %v5792_v48 = vshrl.u32 %v5591_v10, 16  ;;  %v562_v40 = vld [vmem:[#allocation4] sm:$0x8] }
 0x3b5   : > { %v5692_v5 = vsel %vm11362_vm13, %v5687_v31, %v5691_v56  ;;  %v5795_v50 = vshll.u32 %v5591_v10, 16  ;;  %v5747_v0 = vrot.slane %v5745_v43, 5  ;;  %v6392_v21 = vrot.slane %v11056_v33, 2  ;;  %v565_v34 = vld [vmem:[#allocation4 + $0xc] sm:$0x8] }
 0x3b6   : > { %v5706_v24 = vsel %vm11362_vm13, %v5701_v44, %v12793_v35  ;;  %v5771_v60 = vrot.slane %v5770_v37, 4  ;;  %v5789_v52 = vrot.slane %v5787_v18, 5  ;;  %v5794_v13 = vrot.slane %v5792_v48, 4  ;;  %v571_v28 = vld [vmem:[#allocation4 + $0x24] sm:$0x8] }
 0x3b7   : > { %v9687_v35 = vcombine.low %v5692_v5, %v5706_v24  ;;  %v5797_v2 = vrot.slane %v5795_v50, 5  ;;  %11005 = vmatprep.subr.msk.bf16.mxu1 %vm844_vm0, %v6392_v21  ;;  %v6418_v55 = vsel %vm844_vm0, %v6392_v21, 0  ;;  %v563_v54 = vsel %vm11235_vm4, 0, %v562_v40  ;;  %v577_v43 = vld [vmem:[#allocation4 + $0x3c] sm:$0x8] }
 0x3b8   : > { %10464 = vmatmul.mubr.msk.bf16.gmra.mrb[16].mxu0 %vm3223_vm14, %v13726_v7  ;;  %v5715_v7 = vrot.slane %v5714_v27, 4  ;;  %v5592_v27 = vld [vmem:[#allocation3 + $0xd4] sm:$0x1]  ;;  %v5776_v8 = vsel %vm11362_vm13, %v5771_v60, %v5775_v57  ;;  %v5790_v47 = vsel %vm11362_vm13, %v5785_v22, %v5789_v52  ;;  %10490 = vmatpush3.bf16.msra.mxu1 %v6418_v55  ;;  %564 = vst [vmem:[#allocation4] sm:$0x8] %v563_v54  ;;  %v572_v24 = vsel %vm11235_vm4, 0, %v571_v28 }
 0x3b9   : > { %10467 = vmatprep.mubr.msk.bf16.mxu0 %vm3223_vm14, %v9673_v53  ;;  %v5728_v53 = vor.u32 %v5727_v61, %v5724_v59  ;;  %v5757_v61 = vrot.slane %v5756_v41, 4  ;;  %v5798_v38 = vor.u32 %v5797_v2, %v5794_v13  ;;  %v5801_v56 = vshll.u32 %v5592_v27, 16  ;;  %573 = vst [vmem:[#allocation4 + $0x24] sm:$0x8] %v572_v24  ;;  %v586_v41 = vld [vmem:[#allocation4 + $0x60] sm:$0x8] }
 0x3ba   : > { %v5720_v51 = vsel %vm11362_vm13, %v5715_v7, %v5719_v11  ;;  %v5815_v11 = vshll.u32 %v5594_v36, 16  ;;  %v589_v37 = vld [vmem:[#allocation4 + $0x6c] sm:$0x8]  ;;  %v587_v4 = vsel %vm11235_vm4, 0, %v586_v41  ;;  %v592_v48 = vld [vmem:[#allocation4 + $0x78] sm:$0x8] }
 0x3bb   : > { %v5729_v17 = vrot.slane %v5728_v53, 4  ;;  %v5762_v23 = vsel %vm11362_vm13, %v5757_v61, %v5761_v3  ;;  %v5799_v9 = vrot.slane %v5798_v38, 4  ;;  %v5803_v31 = vrot.slane %v5801_v56, 5  ;;  %588 = vst [vmem:[#allocation4 + $0x60] sm:$0x8] %v587_v4 }
 0x3bc   : > { %v5817_v26 = vrot.slane %v5815_v11, 5  ;;  %v590_v18 = vsel %vm11235_vm4, 0, %v589_v37  ;;  %v593_v50 = vsel %vm11235_vm4, 0, %v592_v48  ;;  %v607_v3 = vld [vmem:[#allocation4 + $0xb4] sm:$0x8] }
 0x3bd   : > { %v5734_v59 = vsel %vm11362_vm13, %v5729_v17, %v5733_v42  ;;  %v5804_v7 = vsel %vm11362_vm13, %v5799_v9, %v5803_v31  ;;  %v568_v42 = vld [vmem:[#allocation4 + $0x18] sm:$0x8]  ;;  %v574_v17 = vld [vmem:[#allocation4 + $0x30] sm:$0x8]  ;;  %591 = vst [vmem:[#allocation4 + $0x6c] sm:$0x8] %v590_v18 }
 0x3be   : > { %v9688_v6 = vcombine.low %v5720_v51, %v5734_v59  ;;  %v569_v5 = vsel %vm11235_vm4, 0, %v568_v42  ;;  %v575_v10 = vsel %vm11235_vm4, 0, %v574_v17  ;;  %v580_v51 = vld [vmem:[#allocation4 + $0x48] sm:$0x8]  ;;  %594 = vst [vmem:[#allocation4 + $0x78] sm:$0x8] %v593_v50 }
 0x3bf   : > { %570 = vst [vmem:[#allocation4 + $0x18] sm:$0x8] %v569_v5  ;;  %576 = vst [vmem:[#allocation4 + $0x30] sm:$0x8] %v575_v10  ;;  %v581_v46 = vsel %vm11235_vm4, 0, %v580_v51  ;;  %v608_v61 = vsel %vm11235_vm4, 0, %v607_v3 }
 0x3c0   : > { %10468 = vmatmul.mubr.msk.bf16.gmra.mrb[20].mxu0 %vm3223_vm14, %v9674_v62  ;;  %v5809_v62 = vshll.u32 %v5593_v19, 16  ;;  %v578_v19 = vsel %vm11235_vm4, 0, %v577_v43  ;;  %582 = vst [vmem:[#allocation4 + $0x48] sm:$0x8] %v581_v46  ;;  %609 = vst [vmem:[#allocation4 + $0xb4] sm:$0x8] %v608_v61 }
 0x3c1   : > { %10473 = vmatprep.mubr.msk.bf16.mxu0 %vm831_vm5, %v9684_v39  ;;  %v5743_v39 = vrot.slane %v5742_v63, 4  ;;  %v583_v63 = vld [vmem:[#allocation4 + $0x54] sm:$0x8]  ;;  %579 = vst [vmem:[#allocation4 + $0x3c] sm:$0x8] %v578_v19  ;;  %v626_v5 = vsel %vm11303_vm10, 0, %v625_v20 }
 0x3c2   : > { %v5811_v29 = vrot.slane %v5809_v62, 5  ;;  %v584_v58 = vsel %vm11235_vm4, 0, %v583_v63  ;;  %v596_v62 = vsel %vm11235_vm4, 0, %v595_v12  ;;  %v610_v60 = vld [vmem:[#allocation4 + $0xc0] sm:$0x8] }
 0x3c3   : > { %v5748_v32 = vsel %vm11362_vm13, %v5743_v39, %v5747_v0  ;;  %585 = vst [vmem:[#allocation4 + $0x54] sm:$0x8] %v584_v58  ;;  %597 = vst [vmem:[#allocation4 + $0x84] sm:$0x8] %v596_v62  ;;  %v601_v0 = vld [vmem:[#allocation4 + $0x9c] sm:$0x8] }
 0x3c4   : > { %v5812_v44 = vor.u32 %v5811_v29, %v5808_v1  ;;  %v9689_v53 = vcombine.low %v5748_v32, %v5762_v23  ;;  %v604_v39 = vld [vmem:[#allocation4 + $0xa8] sm:$0x8]  ;;  %v611_v22 = vsel %vm11235_vm4, 0, %v610_v60  ;;  %v12872_v52 = vld [vmem:[#allocation4 + $0x4] sm:$0xf] }
 0x3c5   : > { %v605_v57 = vsel %vm11235_vm4, 0, %v604_v39  ;;  %612 = vst [vmem:[#allocation4 + $0xc0] sm:$0x8] %v611_v22  ;;  %v6104_v13 = vld [vmem:[#allocation4] sm:$0x8]  ;;  %v6142_v36 = vshrl.u32 %v12872_v52, 16 }
 0x3c6   : > { %v5813_v30 = vrot.slane %v5812_v44, 4  ;;  %606 = vst [vmem:[#allocation4 + $0xa8] sm:$0x8] %v605_v57  ;;  %v553_v1 = vld [vmem:[#allocation4 + $0x8] sm:$0x1]  ;;  %v6137_v27 = vshrl.u32 %v6104_v13, 16 }
 0x3c7   : > { %v613_v29 = vld [vmem:[#allocation4 + $0xcc] sm:$0x8]  ;;  %v12880_v23 = vld [vmem:[%s13664_s6] sm:$0x3]  ;;  %v554_v38 = vsel %vm11303_vm10, 0, %v553_v1  ;;  %v12888_v31 = vrot.slane %v6142_v36, 7 }
 0x3c8   : > { %10474 = vmatmul.mubr.msk.bf16.vlgmr.msra.gmra.mrb[8].mxu0 %vm831_vm5, %v9685_v16  ;;  %v9690_v16 = vcombine.low %v5776_v8, %v5790_v47  ;;  %v5818_v45 = vsel %vm11362_vm13, %v5813_v30, %v5817_v26  ;;  %v614_v32 = vsel %vm11235_vm4, 0, %v613_v29  ;;  %v6108_v56 = vld [vmem:[#allocation4 + $0x18] sm:$0x8]  ;;  %v6110_v44 = vld [vmem:[#allocation4 + $0x24] sm:$0x8]  ;;  %11006 = vmatprep.subr.msk.bf16.mxu1 %vm6582_vm15, %v12880_v23  ;;  %v12886_v9 = vrot.slane %v6137_v27, 11 }
 0x3c9   : > { %10477 = vmatprep.mubr.msk.bf16.mxu0 %vm831_vm5, %v9686_v15  ;;  %v9691_v49 = vcombine.low %v5804_v7, %v5818_v45  ;;  %v566_v15 = vsel %vm11235_vm4, 0, %v565_v34  ;;  %615 = vst [vmem:[#allocation4 + $0xcc] sm:$0x8] %v614_v32  ;;  %v6112_v11 = vld [vmem:[#allocation4 + $0x30] sm:$0x8]  ;;  %v6145_v30 = vshll.u32 %v12872_v52, 16 }
 0x3ca   : > { %567 = vst [vmem:[#allocation4 + $0xc] sm:$0x8] %v566_v15  ;;  %555 = vst [vmem:[#allocation4 + $0x8] sm:$0x1] %v554_v38  ;;  %v6118_v26 = vld [vmem:[#allocation4 + $0x54] sm:$0x8] }
 0x3cb   : > { %v6163_v45 = vshrl.u32 %v6108_v56, 16  ;;  %v6189_v33 = vshrl.u32 %v6112_v11, 16  ;;  %v6120_v21 = vld [vmem:[#allocation4 + $0x60] sm:$0x8]  ;;  %v6122_v34 = vld [vmem:[#allocation4 + $0x6c] sm:$0x8] }
 0x3cc   : > { %v6228_v54 = vshrl.u32 %v6118_v26, 16  ;;  %v7110_v42 = vld [vmem:[#allocation4 + $0x18] sm:$0x8]  ;;  %v619_v28 = vld [vmem:[#allocation4 + $0x14] sm:$0x1]  ;;  %v6241_v24 = vshrl.u32 %v6120_v21, 16 }
 0x3cd   : > { %v6124_v17 = vld [vmem:[#allocation4 + $0x78] sm:$0x8]  ;;  %v620_v43 = vsel %vm11303_vm10, 0, %v619_v28  ;;  %627 = vst [vmem:[#allocation4 + $0x2c] sm:$0x1] %v626_v5  ;;  %v12897_v19 = vrot.slane %v6163_v45, 11 }
 0x3ce   : > { %v628_v10 = vld [vmem:[#allocation4 + $0x38] sm:$0x1]  ;;  %621 = vst [vmem:[#allocation4 + $0x14] sm:$0x1] %v620_v43  ;;  %v622_v63 = vld [vmem:[#allocation4 + $0x20] sm:$0x1] }
 0x3cf   : > { %v629_v46 = vsel %vm11303_vm10, 0, %v628_v10  ;;  %v12903_v41 = vrot.slane %v6189_v33, 11  ;;  %v623_v4 = vsel %vm11303_vm10, 0, %v622_v63  ;;  %v12913_v50 = vrot.slane %v6228_v54, 11  ;;  %v7114_v39 = vld [vmem:[#allocation4 + $0x30] sm:$0x8] }
 0x3d0   : > { %10478 = vmatmul.mubr.msk.bf16.gmra.mrb[12].mxu0 %vm831_vm5, %v9687_v35  ;;  %v598_v35 = vld [vmem:[#allocation4 + $0x90] sm:$0x8]  ;;  %630 = vst [vmem:[#allocation4 + $0x38] sm:$0x1] %v629_v46  ;;  %v6254_v12 = vshrl.u32 %v6122_v34, 16  ;;  %v12915_v62 = vrot.slane %v6241_v24, 11 }
 0x3d1   : > { %10481 = vmatprep.mubr.msk.bf16.mxu0 %vm831_vm5, %v9688_v6  ;;  %v599_v59 = vsel %vm11235_vm4, 0, %v598_v35  ;;  %v602_v6 = vsel %vm11235_vm4, 0, %v601_v0  ;;  %v6106_v2 = vld [vmem:[#allocation4 + $0xc] sm:$0x8]  ;;  %v616_v51 = vld [vmem:[#allocation4 + $0x8] sm:$0x1] }
 0x3d2   : > { %600 = vst [vmem:[#allocation4 + $0x90] sm:$0x8] %v599_v59  ;;  %603 = vst [vmem:[#allocation4 + $0x9c] sm:$0x8] %v602_v6  ;;  %v6150_v8 = vshrl.u32 %v6106_v2, 16  ;;  %v617_v37 = vsel %vm11303_vm10, 0, %v616_v51 }
 0x3d3   : > { %v7108_v15 = vld [vmem:[#allocation4 + $0xc] sm:$0x8]  ;;  %618 = vst [vmem:[#allocation4 + $0x8] sm:$0x1] %v617_v37  ;;  %624 = vst [vmem:[#allocation4 + $0x20] sm:$0x1] %v623_v4 }
 0x3d4   : > { %v12891_v7 = vrot.slane %v6150_v8, 11  ;;  %v6267_v35 = vshrl.u32 %v6124_v17, 16  ;;  %v7141_v59 = vshrl.u32 %v7108_v15, 16  ;;  %v7154_v0 = vshrl.u32 %v7110_v42, 16  ;;  %v7112_v6 = vld [vmem:[#allocation4 + $0x24] sm:$0x8] }
 0x3d5   : > { %v7116_v3 = vld [vmem:[#allocation4 + $0x3c] sm:$0x8]  ;;  %v6126_v57 = vld [vmem:[#allocation4 + $0x84] sm:$0x8]  ;;  %v7118_v61 = vld [vmem:[#allocation4 + $0x48] sm:$0x8] }
 0x3d6   : > { %v637_v60 = vld [vmem:[#allocation4 + $0x5c] sm:$0x1]  ;;  %v631_v2 = vld [vmem:[#allocation4 + $0x44] sm:$0x1]  ;;  %v7167_v1 = vshrl.u32 %v7112_v6, 16  ;;  %v7180_v29 = vshrl.u32 %v7114_v39, 16 }
 0x3d7   : > { %v632_v27 = vsel %vm11303_vm10, 0, %v631_v2  ;;  %v638_v36 = vsel %vm11303_vm10, 0, %v637_v60  ;;  %v6280_v32 = vshrl.u32 %v6126_v57, 16  ;;  %v6132_v8 = vld [vmem:[#allocation4 + $0xa8] sm:$0x8]  ;;  %v7193_v38 = vshrl.u32 %v7116_v3, 16 }
 0x3d8   : > { %10482 = vmatmul.mubr.msk.bf16.gmra.mrb[16].mxu0 %vm831_vm5, %v9689_v53  ;;  %v6114_v53 = vld [vmem:[#allocation4 + $0x3c] sm:$0x8]  ;;  %633 = vst [vmem:[#allocation4 + $0x44] sm:$0x1] %v632_v27  ;;  %v634_v56 = vld [vmem:[#allocation4 + $0x50] sm:$0x1] }
 0x3d9   : > { %10485 = vmatprep.mubr.msk.bf16.mxu0 %vm831_vm5, %v9690_v16  ;;  %v6116_v16 = vld [vmem:[#allocation4 + $0x48] sm:$0x8]  ;;  %v6202_v55 = vshrl.u32 %v6114_v53, 16  ;;  %v6128_v22 = vld [vmem:[#allocation4 + $0x90] sm:$0x8]  ;;  %v12923_v45 = vrot.slane %v7141_v59, 11 }
 0x3da   : > { %v6215_v40 = vshrl.u32 %v6116_v16, 16  ;;  %v6130_v13 = vld [vmem:[#allocation4 + $0x9c] sm:$0x8]  ;;  %639 = vst [vmem:[#allocation4 + $0x5c] sm:$0x1] %v638_v36  ;;  %v6293_v11 = vshrl.u32 %v6128_v22, 16 }
 0x3db   : > { %v12909_v18 = vrot.slane %v6202_v55, 11  ;;  %v6306_v53 = vshrl.u32 %v6130_v13, 16  ;;  %v7206_v16 = vshrl.u32 %v7118_v61, 16  ;;  %v6134_v26 = vld [vmem:[#allocation4 + $0xb4] sm:$0x8]  ;;  %v12927_v21 = vrot.slane %v6267_v35, 11 }
 0x3dc   : > { %v12911_v48 = vrot.slane %v6215_v40, 11  ;;  %v640_v33 = vld [vmem:[#allocation4 + $0x68] sm:$0x1]  ;;  %v6319_v55 = vshrl.u32 %v6132_v8, 16  ;;  %v7120_v40 = vld [vmem:[#allocation4 + $0x54] sm:$0x8] }
 0x3dd   : > { %v635_v34 = vsel %vm11303_vm10, 0, %v634_v56  ;;  %v641_v20 = vsel %vm11303_vm10, 0, %v640_v33  ;;  %v12933_v54 = vrot.slane %v6280_v32, 11  ;;  %v12935_v15 = vrot.slane %v7167_v1, 11  ;;  %v649_v10 = vld [vmem:[#allocation4 + $0x8c] sm:$0x1] }
 0x3de   : > { %v12937_v42 = vrot.slane %v7180_v29, 11  ;;  %v12939_v28 = vrot.slane %v7193_v38, 11  ;;  %636 = vst [vmem:[#allocation4 + $0x50] sm:$0x1] %v635_v34  ;;  %642 = vst [vmem:[#allocation4 + $0x68] sm:$0x1] %v641_v20 }
 0x3df   : > { %v12941_v5 = vrot.slane %v6293_v11, 11  ;;  %v12943_v24 = vrot.slane %v6306_v53, 11  ;;  %v6332_v17 = vshrl.u32 %v6134_v26, 16  ;;  %v12945_v43 = vrot.slane %v7206_v16, 11  ;;  %v7122_v51 = vld [vmem:[#allocation4 + $0x60] sm:$0x8] }
 0x3e0   : > { %10486 = vmatmul.mubr.msk.bf16.gmra.mrb[20].mxu0 %vm831_vm5, %v9691_v49  ;;  %v6176_v49 = vshrl.u32 %v6110_v44, 16  ;;  %v12921_v44 = vrot.slane %v6254_v12, 11  ;;  %v7219_v63 = vshrl.u32 %v7120_v40, 16  ;;  %v643_v46 = vld [vmem:[#allocation4 + $0x74] sm:$0x1]  ;;  %v650_v37 = vsel %vm11303_vm10, 0, %v649_v10 }
 0x3e1   : > { %v12949_v4 = vrot.slane %v6319_v55, 11  ;;  %v7124_v12 = vld [vmem:[#allocation4 + $0x6c] sm:$0x8]  ;;  %v7126_v35 = vld [vmem:[#allocation4 + $0x78] sm:$0x8]  ;;  %v644_v59 = vsel %vm11303_vm10, 0, %v643_v46 }
 0x3e2   : > { %v12901_v58 = vrot.slane %v6176_v49, 11  ;;  %v12925_v49 = vrot.slane %v7154_v0, 11  ;;  %651 = vst [vmem:[#allocation4 + $0x8c] sm:$0x1] %v650_v37  ;;  %v7128_v0 = vld [vmem:[#allocation4 + $0x84] sm:$0x8] }
 0x3e3   : > { %645 = vst [vmem:[#allocation4 + $0x74] sm:$0x1] %v644_v59  ;;  %v646_v6 = vld [vmem:[#allocation4 + $0x80] sm:$0x1]  ;;  %v652_v39 = vld [vmem:[#allocation4 + $0x98] sm:$0x1] }
 0x3e4   : > { %v7130_v3 = vld [vmem:[#allocation4 + $0x90] sm:$0x8]  ;;  %v7132_v57 = vld [vmem:[#allocation4 + $0x9c] sm:$0x8]  ;;  %v647_v61 = vsel %vm11303_vm10, 0, %v646_v6  ;;  %v653_v60 = vsel %vm11303_vm10, 0, %v652_v39 }
 0x3e5   : > { %v12957_v22 = vrot.slane %v6332_v17, 11  ;;  %v7232_v13 = vshrl.u32 %v7122_v51, 16  ;;  %v7134_v2 = vld [vmem:[#allocation4 + $0xa8] sm:$0x8]  ;;  %v7136_v1 = vld [vmem:[#allocation4 + $0xb4] sm:$0x8] }
 0x3e6   : > { %648 = vst [vmem:[#allocation4 + $0x80] sm:$0x1] %v647_v61  ;;  %654 = vst [vmem:[#allocation4 + $0x98] sm:$0x1] %v653_v60  ;;  %v12959_v29 = vrot.slane %v7219_v63, 11  ;;  %v7245_v27 = vshrl.u32 %v7124_v12, 16 }
 0x3e7   : > { %v7258_v36 = vshrl.u32 %v7126_v35, 16  ;;  %v7271_v32 = vshrl.u32 %v7128_v0, 16  ;;  %v7284_v8 = vshrl.u32 %v7130_v3, 16  ;;  %v7297_v38 = vshrl.u32 %v7132_v57, 16  ;;  %v8143_v56 = vld [vmem:[#allocation4 + $0x18] sm:$0x8] }
 0x3e8   : > { %v8145_v11 = vld [vmem:[#allocation4 + $0x24] sm:$0x8]  ;;  %v7310_v53 = vshrl.u32 %v7134_v2, 16  ;;  %v7323_v16 = vshrl.u32 %v7136_v1, 16  ;;  %v8147_v26 = vld [vmem:[#allocation4 + $0x30] sm:$0x8] }
 0x3e9   : > { %v661_v33 = vld [vmem:[#allocation4 + $0xbc] sm:$0x1]  ;;  %v8149_v55 = vld [vmem:[#allocation4 + $0x3c] sm:$0x8]  ;;  %v8151_v40 = vld [vmem:[#allocation4 + $0x48] sm:$0x8] }
 0x3ea   : > { %v655_v34 = vld [vmem:[#allocation4 + $0xa4] sm:$0x1]  ;;  %v8176_v20 = vshrl.u32 %v8143_v56, 16  ;;  %v8189_v17 = vshrl.u32 %v8145_v11, 16  ;;  %v8153_v10 = vld [vmem:[#allocation4 + $0x54] sm:$0x8] }
 0x3eb   : > { %v656_v51 = vsel %vm11303_vm10, 0, %v655_v34  ;;  %v662_v63 = vsel %vm11303_vm10, 0, %v661_v33  ;;  %v12965_v46 = vrot.slane %v7232_v13, 11  ;;  %v12967_v37 = vrot.slane %v7245_v27, 11  ;;  %v658_v59 = vld [vmem:[#allocation4 + $0xb0] sm:$0x1] }
 0x3ec   : > { %v12969_v12 = vrot.slane %v7258_v36, 11  ;;  %v8202_v35 = vshrl.u32 %v8147_v26, 16  ;;  %657 = vst [vmem:[#allocation4 + $0xa4] sm:$0x1] %v656_v51  ;;  %663 = vst [vmem:[#allocation4 + $0xbc] sm:$0x1] %v662_v63 }
 0x3ed   : > { %v12974_v0 = vld [vmem:[%s13663_s5] ss:$0 sm:$0xff]  ;;  %v12976_v6 = vrot.slane %v7271_v32, 11  ;;  %v8215_v39 = vshrl.u32 %v8149_v55, 16  ;;  %v8228_v3 = vshrl.u32 %v8151_v40, 16  ;;  %v659_v57 = vsel %vm11303_vm10, 0, %v658_v59 }
 0x3ee   : > { %v12980_v61 = vrot.slane %v7284_v8, 11  ;;  %v12982_v60 = vrot.slane %v7297_v38, 11  ;;  %v12984_v13 = vrot.slane %v7310_v53, 11  ;;  %v7138_v2 = vld [vmem:[#allocation4 + $0xc0] sm:$0x8]  ;;  %v8241_v1 = vshrl.u32 %v8153_v10, 16 }
 0x3ef   : > { %660 = vst [vmem:[#allocation4 + $0xb0] sm:$0x1] %v659_v57  ;;  %v12986_v36 = vrot.slane %v7323_v16, 11  ;;  %v12988_v56 = vrot.slane %v8176_v20, 11  ;;  %v12990_v32 = vrot.slane %v8189_v17, 11  ;;  %v12996_v8 = vor.u32 %v6145_v30, %v12888_v31 }
 0x3f0   : > { %v8155_v11 = vld [vmem:[#allocation4 + $0x60] sm:$0x8]  ;;  %v12998_v38 = vrot.slane %v8202_v35, 11  ;;  %v8157_v53 = vld [vmem:[#allocation4 + $0x6c] sm:$0x8]  ;;  %v7336_v34 = vshrl.u32 %v7138_v2, 16 }
 0x3f1   : > { %13729 = vst [vmem:[#allocation10_spill] sm:$0xff] %v12990_v32  ;;  %v8159_v55 = vld [vmem:[#allocation4 + $0x78] sm:$0x8]  ;;  %v13001_v20 = vrot.slane %v8215_v39, 11  ;;  %v13003_v17 = vrot.slane %v8228_v3, 11  ;;  %v13006_v57 = vrot.slane %v8241_v1, 11 }
 0x3f2   : > { %13730 = vst [vmem:[#allocation14_spill] sm:$0xff] %v12998_v38  ;;  %v8161_v10 = vld [vmem:[#allocation4 + $0x84] sm:$0x8]  ;;  %v8254_v31 = vshrl.u32 %v8155_v11, 16  ;;  %v8174_v30 = vld [vmem:[#allocation4 + $0xd0] sm:$0xf] }
 0x3f3   : > { %13731 = vst [vmem:[#allocation12_spill] sm:$0xff] %v13001_v20  ;;  %13732 = vst [vmem:[#allocation8_spill] sm:$0xff] %v13003_v17  ;;  %v8267_v14 = vshrl.u32 %v8157_v53, 16  ;;  %v8163_v47 = vld [vmem:[#allocation4 + $0x90] sm:$0x8]  ;;  %v8293_v20 = vshrl.u32 %v8161_v10, 16 }
 0x3f4   : > { %13733 = vst [vmem:[#allocation11_spill] sm:$0xff] %v13006_v57  ;;  %v8165_v3 = vld [vmem:[#allocation4 + $0x9c] sm:$0x8]  ;;  %v8167_v17 = vld [vmem:[#allocation4 + $0xa8] sm:$0x8]  ;;  %v8306_v10 = vshrl.u32 %v8163_v47, 16 }
 0x3f5   : > { %v8169_v11 = vld [vmem:[#allocation4 + $0xb4] sm:$0x8]  ;;  %v8332_v57 = vshrl.u32 %v8167_v17, 16  ;;  %v8173_v1 = vld [vmem:[#allocation4 + $0xcc] sm:$0x8]  ;;  %vm6557_vm4 = vcmask 31744  }
 0x49b   : > { %v10475_v27 = vpop.f32.mrb[8].mxu0 }
 0x49c   : > { %v5993_v26 = vadd.f32 %v10475_v27, %v12974_v0  ;;  %v5905_v33 = vpop.f32.mrb[9].mxu0 }
 0x49d   : > { %v5991_v16 = vadd.f32 %v12974_v0, %v5905_v33  ;;  %v10476_v40 = vpop.f32.mrb[10].mxu0  ;;  %v8280_v33 = vshrl.u32 %v8159_v55, 16  ;;  %v13014_v55 = vrot.slane %v7336_v34, 11  ;;  %v8345_v34 = vshrl.u32 %v8169_v11, 16 }
 0x49e   : > { %v6009_v51 = vmax.f32 %v5993_v26, 0.0  ;;  %v5994_v63 = vadd.f32 %v10476_v40, %v12974_v0  ;;  %v5908_v59 = vpop.f32.mrb[11].mxu0  ;;  %v8171_v40 = vld [vmem:[#allocation4 + $0xc0] sm:$0x8] }
 0x49f   : > { %v6007_v35 = vmax.f32 %v5991_v16, 0.0  ;;  %v5992_v27 = vadd.f32 %v12974_v0, %v5908_v59  ;;  %v8376_v16 = vshrl.u32 %v8174_v30, 16 }
 0x4a0   : > { %v9955_v2 = vpack.c.bf16 %v6009_v51, %v6009_v51  ;;  %v6010_v39 = vmax.f32 %v5994_v63, 0.0  ;;  %v13016_v51 = vrot.slane %v8254_v31, 11  ;;  %v8358_v31 = vshrl.u32 %v8171_v40, 16 }
 0x4a1   : > { %v9953_v38 = vpack.c.bf16 %v6007_v35, %v6007_v35  ;;  %v6008_v26 = vmax.f32 %v5992_v27, 0.0  ;;  %v13019_v35 = vrot.slane %v8267_v14, 11  ;;  %v8319_v27 = vshrl.u32 %v8165_v3, 16 }
 0x4a2   : > { %6090 = vst.msk [vmem:[#allocation4 + $0x28] sm:$0xf] %vm327_vm1, %v9955_v2  ;;  %v9956_v53 = vpack.c.bf16 %v6010_v39, %v6010_v39  ;;  %13734 = vst [vmem:[#allocation13_spill] sm:$0xff] %v13016_v51  ;;  %v13023_v39 = vrot.slane %v8280_v33, 11  ;;  %v8378_v14 = vrot.slane %v8376_v16, 7  ;;  %v8379_v3 = vshll.u32 %v8174_v30, 16 }
 0x4a3   : > { %6088 = vst.msk [vmem:[#allocation4 + $0x10] sm:$0xf] %vm327_vm1, %v9953_v38  ;;  %v9954_v63 = vpack.c.bf16 %v6008_v26, %v6008_v26  ;;  %v10479_v59 = vpop.f32.mrb[12].mxu0  ;;  %13735 = vst [vmem:[#allocation9_spill] sm:$0xff] %v13019_v35  ;;  %v13027_v26 = vrot.slane %v8293_v20, 11  ;;  %v13030_v51 = vrot.slane %v8306_v10, 11 }
 0x4a4   : > { %6091 = vst.msk [vmem:[#allocation4 + $0x34] sm:$0xf] %vm327_vm1, %v9956_v53  ;;  %v5997_v32 = vadd.f32 %v10479_v59, %v12974_v0  ;;  %v5921_v2 = vpop.f32.mrb[13].mxu0  ;;  %13736 = vst [vmem:[#allocation5_spill] sm:$0xff] %v13023_v39  ;;  %v8371_v59 = vshrl.u32 %v8173_v1, 16  ;;  %v13033_v40 = vrot.slane %v8319_v27, 11 }
 0x4a5   : > { %6089 = vst.msk [vmem:[#allocation4 + $0x1c] sm:$0xf] %vm327_vm1, %v9954_v63  ;;  %v5995_v47 = vadd.f32 %v12974_v0, %v5921_v2  ;;  %v10480_v38 = vpop.f32.mrb[14].mxu0  ;;  %13737 = vst [vmem:[#allocation15_spill] sm:$0xff] %v13027_v26  ;;  %v13035_v63 = vrot.slane %v8332_v57, 11  ;;  %v13037_v20 = vrot.slane %v8345_v34, 11  ;;  %v13041_v26 = vor.u32 %v8379_v3, %v8378_v14 }
 0x4a6   : > { %v6013_v17 = vmax.f32 %v5997_v32, 0.0  ;;  %v5998_v35 = vadd.f32 %v10480_v38, %v12974_v0  ;;  %v5924_v53 = vpop.f32.mrb[15].mxu0  ;;  %13738 = vst [vmem:[#allocation16_spill] sm:$0xff] %v13030_v51  ;;  %13739 = vst [vmem:[#allocation17_spill] sm:$0xff] %v13033_v40  ;;  %v13039_v16 = vrot.slane %v8358_v31, 11  ;;  %v6584_v1 = vsel %vm6582_vm15, %v12880_v23, 0 }
 0x4a7   : > { %v6011_v33 = vmax.f32 %v5995_v47, 0.0  ;;  %v5996_v11 = vadd.f32 %v12974_v0, %v5924_v53  ;;  %13740 = vst [vmem:[#allocation18_spill] sm:$0xff] %v13035_v63  ;;  %13741 = vst [vmem:[#allocation19_spill] sm:$0xff] %v13037_v20 }
 0x4a8   : > { %v9959_v2 = vpack.c.bf16 %v6013_v17, %v6013_v17  ;;  %v6014_v39 = vmax.f32 %v5998_v35, 0.0  ;;  %13742 = vst [vmem:[#allocation20_spill] sm:$0xff] %v13039_v16  ;;  %13743 = vst [vmem:[#allocation21_spill] sm:$0xff] %v13041_v26  ;;  %v13046_v17 = vrot.slane %v8371_v59, 11 }
 0x4a9   : > { %v9957_v32 = vpack.c.bf16 %v6011_v33, %v6011_v33  ;;  %v6012_v30 = vmax.f32 %v5996_v11, 0.0  ;;  %v6111_v38 = vld [vmem:[#allocation4 + $0x28] sm:$0xf] }
 0x4aa   : > { %6094 = vst.msk [vmem:[#allocation4 + $0x58] sm:$0xf] %vm327_vm1, %v9959_v2  ;;  %v9960_v10 = vpack.c.bf16 %v6014_v39, %v6014_v39  ;;  %v6107_v27 = vld [vmem:[#allocation4 + $0x10] sm:$0xf]  ;;  %v6181_v57 = vshrl.u32 %v6111_v38, 16  ;;  %v6184_v47 = vshll.u32 %v6111_v38, 16 }
 0x4ab   : > { %13744 = vst [vmem:[#allocation22_spill] sm:$0xff] %v13046_v17  ;;  %6092 = vst.msk [vmem:[#allocation4 + $0x40] sm:$0xf] %vm327_vm1, %v9957_v32  ;;  %v9958_v35 = vpack.c.bf16 %v6012_v30, %v6012_v30  ;;  %v10483_v34 = vpop.f32.mrb[16].mxu0  ;;  %v9733_v31 = vcombine.low %v12872_v52, %v6107_v27  ;;  %v6155_v53 = vshrl.u32 %v6107_v27, 16  ;;  %v6158_v14 = vshll.u32 %v6107_v27, 16 }
 0x4ac   : > { %v6113_v3 = vld [vmem:[#allocation4 + $0x34] sm:$0xf]  ;;  %6095 = vst.msk [vmem:[#allocation4 + $0x64] sm:$0xf] %vm327_vm1, %v9960_v10  ;;  %v6001_v23 = vadd.f32 %v10483_v34, %v12974_v0  ;;  %v5937_v33 = vpop.f32.mrb[17].mxu0  ;;  %v6183_v11 = vrot.slane %v6181_v57, 7 }
 0x4ad   : > { %v6109_v39 = vld [vmem:[#allocation4 + $0x1c] sm:$0xf]  ;;  %v6194_v2 = vshrl.u32 %v6113_v3, 16  ;;  %v6197_v16 = vshll.u32 %v6113_v3, 16  ;;  %6093 = vst.msk [vmem:[#allocation4 + $0x4c] sm:$0xf] %vm327_vm1, %v9958_v35  ;;  %v5999_v59 = vadd.f32 %v12974_v0, %v5937_v33  ;;  %10491 = vmatprep.mubr.msk.bf16.mxu1 %vm831_vm5, %v9733_v31 }
 0x4ae   : > { %v10484_v32 = vpop.f32.mrb[18].mxu0  ;;  %v9734_v52 = vcombine.low %v6109_v39, %v6111_v38  ;;  %v6157_v30 = vrot.slane %v6155_v53, 7  ;;  %v6168_v27 = vshrl.u32 %v6109_v39, 16  ;;  %v6017_v20 = vmax.f32 %v6001_v23, 0.0 }
 0x4af   : > { %v6002_v10 = vadd.f32 %v10484_v32, %v12974_v0  ;;  %v5940_v17 = vpop.f32.mrb[19].mxu0  ;;  %v6171_v34 = vshll.u32 %v6109_v39, 16  ;;  %v6186_v26 = vor.u32 %v6184_v47, %v6183_v11  ;;  %v6015_v63 = vmax.f32 %v5999_v59, 0.0 }
 0x4b0   : > { %v6000_v57 = vadd.f32 %v12974_v0, %v5940_v17  ;;  %10492 = vmatmul.mubr.msk.bf16.vlgmr.msra.gmra.mrb[8].mxu1 %vm831_vm5, %v9734_v52  ;;  %v6160_v35 = vor.u32 %v6158_v14, %v6157_v30  ;;  %v6170_v40 = vrot.slane %v6168_v27, 7  ;;  %v9963_v33 = vpack.c.bf16 %v6017_v20, %v6017_v20 }
 0x4b1   : > { %v6018_v51 = vmax.f32 %v6002_v10, 0.0  ;;  %v6187_v38 = vsel %vm11294_vm9, %v12901_v58, %v6186_v26  ;;  %v6196_v31 = vrot.slane %v6194_v2, 7  ;;  %10508 = vmatpush3.bf16.msra.mxu1 %v6584_v1  ;;  %v9961_v53 = vpack.c.bf16 %v6015_v63, %v6015_v63  ;;  %v6119_v17 = vld [vmem:[#allocation4 + $0x58] sm:$0xf] }
 0x4b2   : > { %v6016_v23 = vmax.f32 %v6000_v57, 0.0  ;;  %v6161_v47 = vsel %vm11294_vm9, %v12891_v7, %v6160_v35  ;;  %v6173_v39 = vor.u32 %v6171_v34, %v6170_v40  ;;  %6098 = vst.msk [vmem:[#allocation4 + $0x88] sm:$0xf] %vm327_vm1, %v9963_v33  ;;  %v13745_v20 = vsel %vm11294_vm9, %v12886_v9, %v12996_v8  ;;  %v6115_v58 = vld [vmem:[#allocation4 + $0x40] sm:$0xf] }
 0x4b3   : > { %v9964_v14 = vpack.c.bf16 %v6018_v51, %v6018_v51  ;;  %v9750_v11 = vcombine.low %v13745_v20, %v6161_v47  ;;  %v6199_v26 = vor.u32 %v6197_v16, %v6196_v31  ;;  %v6233_v1 = vshrl.u32 %v6119_v17, 16  ;;  %6096 = vst.msk [vmem:[#allocation4 + $0x70] sm:$0xf] %vm327_vm1, %v9961_v53  ;;  %v10487_v2 = vpop.f32.mrb[20].mxu0  ;;  %v6121_v10 = vld [vmem:[#allocation4 + $0x64] sm:$0xf] }
 0x4b4   : > { %v9962_v63 = vpack.c.bf16 %v6016_v23, %v6016_v23  ;;  %v9735_v59 = vcombine.low %v6113_v3, %v6115_v58  ;;  %v6174_v7 = vsel %vm11294_vm9, %v12897_v19, %v6173_v39  ;;  %v6207_v40 = vshrl.u32 %v6115_v58, 16  ;;  %v5953_v9 = vpop.f32.mrb[21].mxu0  ;;  %v6117_v16 = vld [vmem:[#allocation4 + $0x4c] sm:$0xf] }
 0x4b5   : > { %6099 = vst.msk [vmem:[#allocation4 + $0x94] sm:$0xf] %vm327_vm1, %v9964_v14  ;;  %v6005_v51 = vadd.f32 %v10487_v2, %v12974_v0  ;;  %6541 = vrot.lane.b32.xlu1 %v9750_v11, %s11123_s25  ;;  %v9751_v8 = vcombine.low %v6174_v7, %v6187_v38  ;;  %v6200_v32 = vsel %vm11294_vm9, %v12903_v41, %v6199_v26  ;;  %v6210_v3 = vshll.u32 %v6115_v58, 16  ;;  %v10488_v52 = vpop.f32.mrb[22].mxu0 }
 0x4b6   : > { %6097 = vst.msk [vmem:[#allocation4 + $0x7c] sm:$0xf] %vm327_vm1, %v9962_v63  ;;  %v6003_v19 = vadd.f32 %v12974_v0, %v5953_v9  ;;  %10495 = vmatprep.mubr.msk.bf16.mxu1 %vm831_vm5, %v9735_v59  ;;  %v9736_v30 = vcombine.low %v6117_v16, %v6119_v17  ;;  %v6209_v27 = vrot.slane %v6207_v40, 7  ;;  %v6220_v34 = vshrl.u32 %v6117_v16, 16  ;;  %v5956_v33 = vpop.f32.mrb[23].mxu0 }
 0x4b7   : > { %v6021_v57 = vmax.f32 %v6005_v51, 0.0  ;;  %v6006_v35 = vadd.f32 %v10488_v52, %v12974_v0  ;;  %6543 = vrot.lane.b32.xlu0 %v9751_v8, %s11123_s25  ;;  %v6223_v38 = vshll.u32 %v6117_v16, 16  ;;  %v6235_v41 = vrot.slane %v6233_v1, 7 }
 0x4b8   : > { %v6019_v31 = vmax.f32 %v6003_v19, 0.0  ;;  %v6004_v53 = vadd.f32 %v12974_v0, %v5956_v33  ;;  %10496 = vmatmul.mubr.msk.bf16.gmra.mrb[12].mxu1 %vm831_vm5, %v9736_v30  ;;  %v6212_v23 = vor.u32 %v6210_v3, %v6209_v27  ;;  %v6222_v47 = vrot.slane %v6220_v34, 7 }
 0x4b9   : > { %v9967_v39 = vpack.c.bf16 %v6021_v57, %v6021_v57  ;;  %v6022_v14 = vmax.f32 %v6006_v35, 0.0  ;;  %v6236_v20 = vshll.u32 %v6119_v17, 16  ;;  %v6246_v11 = vshrl.u32 %v6121_v10, 16  ;;  %v6127_v59 = vld [vmem:[#allocation4 + $0x88] sm:$0xf] }
 0x4ba   : > { %v9965_v58 = vpack.c.bf16 %v6019_v31, %v6019_v31  ;;  %v6020_v26 = vmax.f32 %v6004_v53, 0.0  ;;  %v6213_v63 = vsel %vm11294_vm9, %v12909_v18, %v6212_v23  ;;  %v6225_v2 = vor.u32 %v6223_v38, %v6222_v47  ;;  %v6123_v7 = vld [vmem:[#allocation4 + $0x70] sm:$0xf]  ;;  %v7111_v31 = vld [vmem:[#allocation4 + $0x1c] sm:$0xf] }
 0x4bb   : > { %6102 = vst.msk [vmem:[#allocation4 + $0xb8] sm:$0xf] %vm327_vm1, %v9967_v39  ;;  %v9968_v1 = vpack.c.bf16 %v6022_v14, %v6022_v14  ;;  %v9752_v0 = vcombine.low %v6200_v32, %v6213_v63  ;;  %v6238_v40 = vor.u32 %v6236_v20, %v6235_v41  ;;  %v6248_v51 = vrot.slane %v6246_v11, 7  ;;  %v7109_v57 = vld [vmem:[#allocation4 + $0x10] sm:$0xf] }
 0x4bc   : > { %6100 = vst.msk [vmem:[#allocation4 + $0xa0] sm:$0xf] %vm327_vm1, %v9965_v58  ;;  %v9966_v9 = vpack.c.bf16 %v6020_v26, %v6020_v26  ;;  %v9737_v17 = vcombine.low %v6121_v10, %v6123_v7  ;;  %v6226_v8 = vsel %vm11294_vm9, %v12911_v48, %v6225_v2  ;;  %v6249_v16 = vshll.u32 %v6121_v10, 16  ;;  %v6129_v3 = vld [vmem:[#allocation4 + $0x94] sm:$0xf] }
 0x4bd   : > { %6103 = vst.msk [vmem:[#allocation4 + $0xc4] sm:$0xf] %vm327_vm1, %v9968_v1  ;;  %6545 = vrot.lane.b32.xlu1 %v9752_v0, %s11123_s25  ;;  %v6239_v18 = vsel %vm11294_vm9, %v12913_v50, %v6238_v40  ;;  %v6125_v32 = vld [vmem:[#allocation4 + $0x7c] sm:$0xf]  ;;  %v6259_v19 = vshrl.u32 %v6123_v7, 16  ;;  %v6262_v52 = vshll.u32 %v6123_v7, 16 }
 0x4be   : > { %v6285_v30 = vshrl.u32 %v6127_v59, 16  ;;  %6101 = vst.msk [vmem:[#allocation4 + $0xac] sm:$0xf] %vm327_vm1, %v9966_v9  ;;  %10499 = vmatprep.mubr.msk.bf16.mxu1 %vm831_vm5, %v9737_v17  ;;  %v9753_v27 = vcombine.low %v6226_v8, %v6239_v18  ;;  %v9738_v48 = vcombine.low %v6125_v32, %v6127_v59  ;;  %v6251_v10 = vor.u32 %v6249_v16, %v6248_v51  ;;  %v13116_v16 = vld [vmem:[#allocation4 + $0x28] sm:$0xf] }
 0x4bf   : > { %v6272_v34 = vshrl.u32 %v6125_v32, 16  ;;  %v6261_v35 = vrot.slane %v6259_v19, 7  ;;  %v6275_v33 = vshll.u32 %v6125_v32, 16  ;;  %v6288_v41 = vshll.u32 %v6127_v59, 16  ;;  %v13118_v18 = vld [vmem:[#allocation4 + $0x34] sm:$0xf] }
 0x4c0   : > { %v6287_v38 = vrot.slane %v6285_v30, 7  ;;  %6547 = vrot.lane.b32.xlu0 %v9753_v27, %s11123_s25  ;;  %10500 = vmatmul.mubr.msk.bf16.gmra.mrb[16].mxu1 %vm831_vm5, %v9738_v48  ;;  %v6252_v50 = vsel %vm11294_vm9, %v12915_v62, %v6251_v10  ;;  %v6298_v23 = vshrl.u32 %v6129_v3, 16  ;;  %v6301_v47 = vshll.u32 %v6129_v3, 16 }
 0x4c1   : > { %v6274_v53 = vrot.slane %v6272_v34, 7  ;;  %v6264_v39 = vor.u32 %v6262_v52, %v6261_v35  ;;  %v7146_v20 = vshrl.u32 %v7109_v57, 16  ;;  %v7149_v11 = vshll.u32 %v7109_v57, 16 }
 0x4c2   : > { %v6290_v14 = vor.u32 %v6288_v41, %v6287_v38  ;;  %v6135_v26 = vld [vmem:[#allocation4 + $0xb8] sm:$0xf]  ;;  %v6300_v63 = vrot.slane %v6298_v23, 7  ;;  %v7159_v2 = vshrl.u32 %v7111_v31, 16  ;;  %v7162_v59 = vshll.u32 %v7111_v31, 16 }
 0x4c3   : > { %v6277_v58 = vor.u32 %v6275_v33, %v6274_v53  ;;  %v6265_v1 = vsel %vm11294_vm9, %v12921_v44, %v6264_v39  ;;  %v6131_v0 = vld [vmem:[#allocation4 + $0xa0] sm:$0xf]  ;;  %v6337_v7 = vshrl.u32 %v6135_v26, 16  ;;  %v6340_v40 = vshll.u32 %v6135_v26, 16 }
 0x4c4   : > { %v6291_v62 = vsel %vm11294_vm9, %v12933_v54, %v6290_v14  ;;  %v9754_v51 = vcombine.low %v6252_v50, %v6265_v1  ;;  %v9739_v9 = vcombine.low %v6129_v3, %v6131_v0  ;;  %v6303_v8 = vor.u32 %v6301_v47, %v6300_v63  ;;  %v13147_v63 = vld [vmem:[#allocation4 + $0x4c] sm:$0xf] }
 0x4c5   : > { %v6278_v17 = vsel %vm11294_vm9, %v12927_v21, %v6277_v58  ;;  %v6133_v44 = vld [vmem:[#allocation4 + $0xac] sm:$0xf]  ;;  %v6311_v19 = vshrl.u32 %v6131_v0, 16  ;;  %v6314_v52 = vshll.u32 %v6131_v0, 16  ;;  %v6339_v30 = vrot.slane %v6337_v7, 7 }
 0x4c6   : > { %v9755_v32 = vcombine.low %v6278_v17, %v6291_v62  ;;  %6549 = vrot.lane.b32.xlu1 %v9754_v51, %s11123_s25  ;;  %10503 = vmatprep.mubr.msk.bf16.mxu1 %vm831_vm5, %v9739_v9  ;;  %v9740_v54 = vcombine.low %v6133_v44, %v6135_v26  ;;  %v6304_v3 = vsel %vm11294_vm9, %v12941_v5, %v6303_v8  ;;  %v6324_v21 = vshrl.u32 %v6133_v44, 16  ;;  %v13154_v62 = vld [vmem:[#allocation4 + $0x64] sm:$0xf]  ;;  %v13165_v8 = vld [vmem:[#allocation4 + $0x70] sm:$0xf] }
 0x4c7   : > { %v6327_v27 = vshll.u32 %v6133_v44, 16  ;;  %v6313_v48 = vrot.slane %v6311_v19, 7  ;;  %v6342_v10 = vor.u32 %v6340_v40, %v6339_v30  ;;  %v7148_v34 = vrot.slane %v7146_v20, 7  ;;  %v13134_v20 = vld [vmem:[#allocation4 + $0x40] sm:$0xf] }
 0x4c8   : > { %6551 = vrot.lane.b32.xlu0 %v9755_v32, %s11123_s25  ;;  %v7161_v57 = vrot.slane %v7159_v2, 7  ;;  %10504 = vmatmul.mubr.msk.bf16.gmra.mrb[20].mxu1 %vm831_vm5, %v9740_v54  ;;  %v6326_v35 = vrot.slane %v6324_v21, 7  ;;  %v7172_v33 = vshrl.u32 %v13116_v16, 16  ;;  %v7175_v38 = vshll.u32 %v13116_v16, 16  ;;  %v13149_v2 = vld [vmem:[#allocation4 + $0x58] sm:$0xf] }
 0x4c9   : > { %v7185_v41 = vshrl.u32 %v13118_v18, 16  ;;  %v6316_v31 = vor.u32 %v6314_v52, %v6313_v48  ;;  %v6343_v5 = vsel %vm11294_vm9, %v12957_v22, %v6342_v10  ;;  %v7151_v50 = vor.u32 %v7149_v11, %v7148_v34 }
 0x4ca   : > { %v7164_v53 = vor.u32 %v7162_v59, %v7161_v57  ;;  %v6329_v23 = vor.u32 %v6327_v27, %v6326_v35  ;;  %v7174_v47 = vrot.slane %v7172_v33, 7  ;;  %v7188_v14 = vshll.u32 %v13118_v18, 16  ;;  %v13176_v27 = vld [vmem:[#allocation4 + $0x88] sm:$0xf] }
 0x4cb   : > { %v7187_v39 = vrot.slane %v7185_v41, 7  ;;  %v6317_v58 = vsel %vm11294_vm9, %v12943_v24, %v6316_v31  ;;  %v7152_v26 = vsel %vm11294_vm9, %v12923_v45, %v7151_v50  ;;  %v9816_v11 = vcombine.low %v13116_v16, %v13118_v18  ;;  %v13187_v50 = vld [vmem:[#allocation4 + $0x94] sm:$0xf] }
 0x4cc   : > { %v7165_v22 = vsel %vm11294_vm9, %v12925_v49, %v7164_v53  ;;  %v9756_v59 = vcombine.low %v6304_v3, %v6317_v58  ;;  %v6330_v24 = vsel %vm11294_vm9, %v12949_v4, %v6329_v23  ;;  %v7177_v0 = vor.u32 %v7175_v38, %v7174_v47  ;;  %v13197_v58 = vld [vmem:[#allocation4 + $0xa0] sm:$0xf] }
 0x4cd   : > { %v9799_v1 = vcombine.low %v7152_v26, %v7165_v22  ;;  %v9757_v45 = vcombine.low %v6330_v24, %v6343_v5  ;;  %v7190_v7 = vor.u32 %v7188_v14, %v7187_v39  ;;  %v7198_v49 = vshrl.u32 %v13134_v20, 16  ;;  %v13202_v24 = vld [vmem:[#allocation4 + $0xac] sm:$0xf] }
 0x4ce   : > { %v7201_v40 = vshll.u32 %v13134_v20, 16  ;;  %6553 = vrot.lane.b32.xlu1 %v9756_v59, %s11123_s25  ;;  %v7178_v51 = vsel %vm11294_vm9, %v12935_v15, %v7177_v0  ;;  %v7211_v9 = vshrl.u32 %v13147_v63, 16  ;;  %v7214_v4 = vshll.u32 %v13147_v63, 16  ;;  %v13173_v15 = vld [vmem:[#allocation4 + $0x7c] sm:$0xf] }
 0x4cf   : > { %v7224_v17 = vshrl.u32 %v13149_v2, 16  ;;  %6555 = vrot.lane.b32.xlu0 %v9757_v45, %s11123_s25  ;;  %v7191_v32 = vsel %vm11294_vm9, %v12937_v42, %v7190_v7  ;;  %v7200_v44 = vrot.slane %v7198_v49, 7  ;;  %v7227_v19 = vshll.u32 %v13149_v2, 16  ;;  %v13206_v45 = vld [vmem:[#allocation4 + $0xb8] sm:$0xf] }
 0x4d0   : > { %v7237_v52 = vshrl.u32 %v13154_v62, 16  ;;  %v9800_v30 = vcombine.low %v7178_v51, %v7191_v32  ;;  %v7213_v54 = vrot.slane %v7211_v9, 7  ;;  %v7240_v21 = vshll.u32 %v13154_v62, 16  ;;  %v13214_v51 = vld [vmem:[#allocation4 + $0xc4] sm:$0xf] }
 0x4d1   : > { %v7226_v3 = vrot.slane %v7224_v17, 7  ;;  %v7203_v48 = vor.u32 %v7201_v40, %v7200_v44  ;;  %v7250_v34 = vshrl.u32 %v13165_v8, 16  ;;  %v7253_v42 = vshll.u32 %v13165_v8, 16  ;;  %v8144_v44 = vld [vmem:[#allocation4 + $0x1c] sm:$0xf] }
 0x4d2   : > { %v7239_v10 = vrot.slane %v7237_v52, 7  ;;  %7373 = vrot.lane.b32.xlu1 %v9799_v1, %s11123_s25  ;;  %v7216_v57 = vor.u32 %v7214_v4, %v7213_v54  ;;  %v7263_v33 = vshrl.u32 %v13173_v15, 16  ;;  %v7266_v38 = vshll.u32 %v13173_v15, 16 }
 0x4d3   : > { %v7229_v35 = vor.u32 %v7227_v19, %v7226_v3  ;;  %7375 = vrot.lane.b32.xlu0 %v9800_v30, %s11123_s25  ;;  %v7204_v41 = vsel %vm11294_vm9, %v12939_v28, %v7203_v48  ;;  %v7252_v5 = vrot.slane %v7250_v34, 7  ;;  %v7276_v53 = vshrl.u32 %v13176_v27, 16 }
 0x4d4   : > { %v7242_v31 = vor.u32 %v7240_v21, %v7239_v10  ;;  %v7217_v23 = vsel %vm11294_vm9, %v12945_v43, %v7216_v57  ;;  %v7265_v39 = vrot.slane %v7263_v33, 7  ;;  %v7279_v14 = vshll.u32 %v13176_v27, 16 }
 0x4d5   : > { %v7230_v47 = vsel %vm11294_vm9, %v12959_v29, %v7229_v35  ;;  %v9801_v28 = vcombine.low %v7204_v41, %v7217_v23  ;;  %v7255_v22 = vor.u32 %v7253_v42, %v7252_v5  ;;  %v7278_v59 = vrot.slane %v7276_v53, 7  ;;  %v8146_v42 = vld [vmem:[#allocation4 + $0x28] sm:$0xf]  ;;  %v13233_v41 = vld [vmem:[#allocation4 + $0x34] sm:$0xf] }
 0x4d6   : > { %v7243_v26 = vsel %vm11294_vm9, %v12965_v46, %v7242_v31  ;;  %v7268_v43 = vor.u32 %v7266_v38, %v7265_v39  ;;  %v7289_v0 = vshrl.u32 %v13187_v50, 16  ;;  %v7292_v29 = vshll.u32 %v13187_v50, 16 }
 0x4d7   : > { %v9802_v1 = vcombine.low %v7230_v47, %v7243_v26  ;;  %7377 = vrot.lane.b32.xlu1 %v9801_v28, %s11123_s25  ;;  %v7256_v7 = vsel %vm11294_vm9, %v12967_v37, %v7255_v22  ;;  %v7281_v49 = vor.u32 %v7279_v14, %v7278_v59  ;;  %v7302_v46 = vshrl.u32 %v13197_v58, 16  ;;  %v13238_v47 = vld [vmem:[#allocation4 + $0x40] sm:$0xf] }
 0x4d8   : > { %v7305_v40 = vshll.u32 %v13197_v58, 16  ;;  %v7269_v9 = vsel %vm11294_vm9, %v12969_v12, %v7268_v43  ;;  %v7291_v4 = vrot.slane %v7289_v0, 7  ;;  %v7315_v17 = vshrl.u32 %v13202_v24, 16 }
 0x4d9   : > { %7379 = vrot.lane.b32.xlu0 %v9802_v1, %s11123_s25  ;;  %v7318_v32 = vshll.u32 %v13202_v24, 16  ;;  %v9803_v37 = vcombine.low %v7256_v7, %v7269_v9  ;;  %v7282_v19 = vsel %vm11294_vm9, %v12976_v6, %v7281_v49  ;;  %v7304_v52 = vrot.slane %v7302_v46, 7  ;;  %v8152_v1 = vld [vmem:[#allocation4 + $0x4c] sm:$0xf]  ;;  %v8154_v7 = vld [vmem:[#allocation4 + $0x58] sm:$0xf] }
 0x4da   : > { %v7328_v30 = vshrl.u32 %v13206_v45, 16  ;;  %v7294_v54 = vor.u32 %v7292_v29, %v7291_v4  ;;  %v7317_v3 = vrot.slane %v7315_v17, 7  ;;  %v7331_v21 = vshll.u32 %v13206_v45, 16  ;;  %v8156_v9 = vld [vmem:[#allocation4 + $0x64] sm:$0xf] }
 0x4db   : > { %v7341_v12 = vshrl.u32 %v13214_v51, 16  ;;  %7381 = vrot.lane.b32.xlu1 %v9803_v37, %s11123_s25  ;;  %v7307_v48 = vor.u32 %v7305_v40, %v7304_v52  ;;  %v7344_v34 = vshll.u32 %v13214_v51, 16  ;;  %v8181_v57 = vshrl.u32 %v8144_v44, 16 }
 0x4dc   : > { %v7330_v10 = vrot.slane %v7328_v30, 7  ;;  %v7295_v6 = vsel %vm11294_vm9, %v12980_v61, %v7294_v54  ;;  %v7320_v35 = vor.u32 %v7318_v32, %v7317_v3  ;;  %v8184_v38 = vshll.u32 %v8144_v44, 16  ;;  %v8158_v30 = vld [vmem:[#allocation4 + $0x70] sm:$0xf]  ;;  %v13746_v54 = vld [vmem:[#allocation10_spill] sm:$0xff] }
 0x4dd   : > { %v7343_v33 = vrot.slane %v7341_v12, 7  ;;  %v9804_v31 = vcombine.low %v7282_v19, %v7295_v6  ;;  %v7308_v5 = vsel %vm11294_vm9, %v12982_v60, %v7307_v48  ;;  %v8183_v23 = vrot.slane %v8181_v57, 7  ;;  %v8160_v48 = vld [vmem:[#allocation4 + $0x7c] sm:$0xf] }
 0x4de   : > { %v7333_v53 = vor.u32 %v7331_v21, %v7330_v10  ;;  %v7321_v39 = vsel %vm11294_vm9, %v12984_v13, %v7320_v35  ;;  %v8194_v61 = vshrl.u32 %v8146_v42, 16  ;;  %v8197_v28 = vshll.u32 %v8146_v42, 16  ;;  %v13748_v35 = vld [vmem:[#allocation12_spill] sm:$0xff] }
 0x4df   : > { %v7346_v14 = vor.u32 %v7344_v34, %v7343_v33  ;;  %7383 = vrot.lane.b32.xlu0 %v9804_v31, %s11123_s25  ;;  %v9805_v26 = vcombine.low %v7308_v5, %v7321_v39  ;;  %v8186_v59 = vor.u32 %v8184_v38, %v8183_v23  ;;  %v8207_v60 = vshrl.u32 %v13233_v41, 16  ;;  %v13747_v34 = vld [vmem:[#allocation14_spill] sm:$0xff] }
 0x4e0   : > { %v7334_v22 = vsel %vm11294_vm9, %v12986_v36, %v7333_v53  ;;  %v8196_v0 = vrot.slane %v8194_v61, 7  ;;  %v8210_v13 = vshll.u32 %v13233_v41, 16  ;;  %v8220_v29 = vshrl.u32 %v13238_v47, 16  ;;  %v8162_v53 = vld [vmem:[#allocation4 + $0x88] sm:$0xf] }
 0x4e1   : > { %v7347_v43 = vsel %vm11294_vm9, %v13014_v55, %v7346_v14  ;;  %7385 = vrot.lane.b32.xlu1 %v9805_v26, %s11123_s25  ;;  %v8187_v36 = vsel %vm11294_vm9, %v12988_v56, %v8186_v59  ;;  %v8209_v46 = vrot.slane %v8207_v60, 7  ;;  %v8223_v40 = vshll.u32 %v13238_v47, 16  ;;  %v13749_v26 = vld [vmem:[#allocation8_spill] sm:$0xff] }
 0x4e2   : > { %v9806_v49 = vcombine.low %v7334_v22, %v7347_v43  ;;  %v8199_v4 = vor.u32 %v8197_v28, %v8196_v0  ;;  %v8222_v17 = vrot.slane %v8220_v29, 7  ;;  %v9882_v55 = vcombine.low %v13233_v41, %v13238_v47  ;;  %v8164_v28 = vld [vmem:[#allocation4 + $0x94] sm:$0xf]  ;;  %v8166_v43 = vld [vmem:[#allocation4 + $0xa0] sm:$0xf]  ;;  %v13750_v0 = vld [vmem:[#allocation11_spill] sm:$0xff] }
 0x4e3   : > { %v8233_v32 = vshrl.u32 %v8152_v1, 16  ;;  %v8212_v44 = vor.u32 %v8210_v13, %v8209_v46  ;;  %v8236_v37 = vshll.u32 %v8152_v1, 16  ;;  %v8246_v19 = vshrl.u32 %v8154_v7, 16  ;;  %v8755_v41 = vld [vmem:[#allocation4 + $0x2c] sm:$0x1] }
 0x4e4   : > { %7387 = vrot.lane.b32.xlu0 %v9806_v49, %s11123_s25  ;;  %v8249_v52 = vshll.u32 %v8154_v7, 16  ;;  %v8200_v56 = vsel %vm11294_vm9, %v13746_v54, %v8199_v4  ;;  %v8225_v3 = vor.u32 %v8223_v40, %v8222_v17  ;;  %v8259_v12 = vshrl.u32 %v8156_v9, 16  ;;  %v13751_v40 = vld [vmem:[#allocation13_spill] sm:$0xff] }
 0x4e5   : > { %v8235_v21 = vrot.slane %v8233_v32, 7  ;;  %v9865_v10 = vcombine.low %v8187_v36, %v8200_v56  ;;  %v8213_v42 = vsel %vm11294_vm9, %v13747_v34, %v8212_v44  ;;  %v8248_v57 = vrot.slane %v8246_v19, 7  ;;  %v8168_v36 = vld [vmem:[#allocation4 + $0xac] sm:$0xf] }
 0x4e6   : > { %v8262_v6 = vshll.u32 %v8156_v9, 16  ;;  %v8226_v33 = vsel %vm11294_vm9, %v13748_v35, %v8225_v3  ;;  %v8261_v31 = vrot.slane %v8259_v12, 7  ;;  %v8272_v5 = vshrl.u32 %v8158_v30, 16  ;;  %v8172_v12 = vld [vmem:[#allocation4 + $0xc4] sm:$0xf] }
 0x4e7   : > { %v8238_v38 = vor.u32 %v8236_v37, %v8235_v21  ;;  %8408 = vrot.lane.b32.xlu1 %v9865_v10, %s11123_s25  ;;  %v9866_v23 = vcombine.low %v8213_v42, %v8226_v33  ;;  %v8251_v39 = vor.u32 %v8249_v52, %v8248_v57  ;;  %v8275_v14 = vshll.u32 %v8158_v30, 16  ;;  %v8170_v52 = vld [vmem:[#allocation4 + $0xb8] sm:$0xf] }
 0x4e8   : > { %v8285_v61 = vshrl.u32 %v8160_v48, 16  ;;  %v8264_v59 = vor.u32 %v8262_v6, %v8261_v31  ;;  %v8274_v60 = vrot.slane %v8272_v5, 7  ;;  %v8288_v1 = vshll.u32 %v8160_v48, 16  ;;  %v13752_v30 = vld [vmem:[#allocation9_spill] sm:$0xff]  ;;  %v13754_v5 = vld [vmem:[#allocation15_spill] sm:$0xff] }
 0x4e9   : > { %v8239_v22 = vsel %vm11294_vm9, %v13749_v26, %v8238_v38  ;;  %8410 = vrot.lane.b32.xlu0 %v9866_v23, %s11123_s25  ;;  %v8252_v13 = vsel %vm11294_vm9, %v13750_v0, %v8251_v39  ;;  %v8298_v7 = vshrl.u32 %v8162_v53, 16  ;;  %v8301_v49 = vshll.u32 %v8162_v53, 16  ;;  %v13753_v10 = vld [vmem:[#allocation5_spill] sm:$0xff] }
 0x4ea   : > { %v8287_v29 = vrot.slane %v8285_v61, 7  ;;  %v9867_v46 = vcombine.low %v8239_v22, %v8252_v13  ;;  %v8265_v9 = vsel %vm11294_vm9, %v13751_v40, %v8264_v59  ;;  %v8277_v4 = vor.u32 %v8275_v14, %v8274_v60  ;;  %v11067_v6 = vld [vmem:[%s13664_s6 + $0x4] ss:$0 sps:$4 sm:$0xcc]  }
 0x4eb   : > { %v8311_v17 = vshrl.u32 %v8164_v28, 16  ;;  %v8300_v44 = vrot.slane %v8298_v7, 7  ;;  %v8314_v37 = vshll.u32 %v8164_v28, 16  ;;  %v8324_v19 = vshrl.u32 %v8166_v43, 16  ;;  %v13755_v28 = vld [vmem:[#allocation16_spill] sm:$0xff]  ;;  %v13756_v60 = vld [vmem:[#allocation17_spill] sm:$0xff] }
 0x4ec   : > { %v8290_v32 = vor.u32 %v8288_v1, %v8287_v29  ;;  %8412 = vrot.lane.b32.xlu1 %v9867_v46, %s11123_s25  ;;  %v8278_v54 = vsel %vm11294_vm9, %v13752_v30, %v8277_v4  ;;  %v8327_v3 = vshll.u32 %v8166_v43, 16  ;;  %v8337_v21 = vshrl.u32 %v8168_v36, 16  ;;  %v13757_v7 = vld [vmem:[#allocation18_spill] sm:$0xff]  ;;  %v13758_v40 = vld [vmem:[#allocation21_spill] sm:$0xff] }
 0x4ed   : > { %v8313_v56 = vrot.slane %v8311_v17, 7  ;;  %v9868_v48 = vcombine.low %v8265_v9, %v8278_v54  ;;  %v8303_v42 = vor.u32 %v8301_v49, %v8300_v44  ;;  %v8326_v57 = vrot.slane %v8324_v19, 7  ;;  %v13759_v9 = vld [vmem:[#allocation22_spill] sm:$0xff]  ;;  %v13760_v17 = vld [vmem:[#allocation19_spill] sm:$0xff] }
 0x4ee   : > { %v8291_v34 = vsel %vm11294_vm9, %v13753_v10, %v8290_v32  ;;  %v8339_v33 = vrot.slane %v8337_v21, 7  ;;  %v8340_v38 = vshll.u32 %v8168_v36, 16  ;;  %v8350_v31 = vshrl.u32 %v8170_v52, 16  ;;  %v13332_v10 = vld [vmem:[%s13664_s6 + $0x8] sm:$0x3] }
 0x4ef   : > { %v8316_v35 = vor.u32 %v8314_v37, %v8313_v56  ;;  %8414 = vrot.lane.b32.xlu0 %v9868_v48, %s11123_s25  ;;  %v8304_v53 = vsel %vm11294_vm9, %v13754_v5, %v8303_v42  ;;  %v8329_v23 = vor.u32 %v8327_v3, %v8326_v57  ;;  %v8353_v39 = vshll.u32 %v8170_v52, 16  ;;  %v13761_v37 = vld [vmem:[#allocation20_spill] sm:$0xff]  ;;  %v6683_v48 = vld [vmem:[#allocation4 + $0x4] sm:$0xf] }
 0x4f0   : > { %v8363_v14 = vshrl.u32 %v8172_v12, 16  ;;  %v9869_v61 = vcombine.low %v8291_v34, %v8304_v53  ;;  %v8342_v22 = vor.u32 %v8340_v38, %v8339_v33  ;;  %v8352_v59 = vrot.slane %v8350_v31, 7  ;;  %v664_v34 = vld [vmem:[#allocation4 + $0xc8] sm:$0x1]  ;;  %v6685_v42 = vld [vmem:[#allocation4 + $0x10] sm:$0xf] }
 0x4f1   : > { %v8317_v26 = vsel %vm11294_vm9, %v13755_v28, %v8316_v35  ;;  %v8330_v1 = vsel %vm11294_vm9, %v13756_v60, %v8329_v23  ;;  %v8366_v0 = vshll.u32 %v8172_v12, 16  ;;  %v6967_v13 = vrot.slane %v11067_v6, 2  ;;  %v6687_v53 = vld [vmem:[#allocation4 + $0x1c] sm:$0xf]  ;;  %v6689_v28 = vld [vmem:[#allocation4 + $0x28] sm:$0xf] }
 0x4f2   : > { %v8365_v43 = vrot.slane %v8363_v14, 7  ;;  %8416 = vrot.lane.b32.xlu1 %v9869_v61, %s11123_s25  ;;  %v9870_v29 = vcombine.low %v8317_v26, %v8330_v1  ;;  %v8343_v49 = vsel %vm11294_vm9, %v13757_v7, %v8342_v22  ;;  %v8355_v36 = vor.u32 %v8353_v39, %v8352_v59  ;;  %v6684_v61 = vld [vmem:[#allocation4 + $0x8] sm:$0x1]  ;;  %v6686_v59 = vld [vmem:[#allocation4 + $0x14] sm:$0x1] }
 0x4f3   : > { %v8382_v4 = vsel %vm11294_vm9, %v13759_v9, %v13758_v40  ;;  %11007 = vmatprep.subr.msk.bf16.mxu1 %vm6582_vm15, %v6967_v13  ;;  %v9819_v30 = vcombine.low %v13165_v8, %v13173_v15  ;;  %v9820_v54 = vcombine.low %v13176_v27, %v13187_v50  ;;  %v9821_v56 = vcombine.low %v13197_v58, %v13202_v24  ;;  %v6693_v7 = vld [vmem:[#allocation4 + $0x40] sm:$0xf]  ;;  %v6691_v40 = vld [vmem:[#allocation4 + $0x34] sm:$0xf] }
 0x4f4   : > { %v8368_v46 = vor.u32 %v8366_v0, %v8365_v43  ;;  %8418 = vrot.lane.b32.xlu0 %v9870_v29, %s11123_s25  ;;  %v8356_v32 = vsel %vm11294_vm9, %v13760_v17, %v8355_v36  ;;  %v9822_v3 = vcombine.low %v13206_v45, %v13214_v51  ;;  %v6993_v21 = vsel %vm6582_vm15, %v6967_v13, 0  ;;  %v6690_v43 = vld [vmem:[#allocation4 + $0x2c] sm:$0x1]  ;;  %v6688_v13 = vld [vmem:[#allocation4 + $0x20] sm:$0x1] }
 0x4f5   : > { %v9871_v44 = vcombine.low %v8343_v49, %v8356_v32  ;;  %v6716_v57 = vshrl.u32 %v6683_v48, 16  ;;  %v6719_v6 = vshll.u32 %v6683_v48, 16  ;;  %v665_v33 = vsel %vm11303_vm10, 0, %v664_v34  ;;  %v6692_v29 = vld [vmem:[#allocation4 + $0x38] sm:$0x1] }
 0x4f6   : > { %v8369_v19 = vsel %vm11294_vm9, %v13761_v37, %v8368_v46  ;;  %v6730_v31 = vshrl.u32 %v6685_v42, 16  ;;  %v6733_v5 = vshll.u32 %v6685_v42, 16  ;;  %666 = vst [vmem:[#allocation4 + $0xc8] sm:$0x1] %v665_v33  ;;  %v6744_v26 = vshrl.u32 %v6687_v53, 16 }
 0x4f7   : > { %v9872_v52 = vcombine.low %v8369_v19, %v8382_v4  ;;  %8420 = vrot.lane.b32.xlu1 %v9871_v44, %s11123_s25  ;;  %v6718_v23 = vrot.slane %v6716_v57, 4  ;;  %v6721_v39 = vrot.slane %v6719_v6, 5  ;;  %v6747_v22 = vshll.u32 %v6687_v53, 16  ;;  %v6694_v44 = vld [vmem:[#allocation4 + $0x44] sm:$0x1] }
 0x4f8   : > { %v6732_v60 = vrot.slane %v6730_v31, 4  ;;  %v6735_v1 = vrot.slane %v6733_v5, 5  ;;  %v6725_v49 = vshll.u32 %v6684_v61, 16  ;;  %v6758_v36 = vshrl.u32 %v6689_v28, 16  ;;  %v6698_v5 = vld [vmem:[#allocation4 + $0x5c] sm:$0x1] }
 0x4f9   : > { %8422 = vrot.lane.b32.xlu0 %v9872_v52, %s11123_s25  ;;  %v6722_v0 = vor.u32 %v6721_v39, %v6718_v23  ;;  %v6761_v46 = vshll.u32 %v6689_v28, 16  ;;  %v6739_v9 = vshll.u32 %v6686_v59, 16  ;;  %v6746_v4 = vrot.slane %v6744_v26, 4  ;;  %v6700_v61 = vld [vmem:[#allocation4 + $0x68] sm:$0x1]  ;;  %s13608_s25 = scalar_lea.vmem %s13666_s8, %s9935_s11 }
 0x4fa   : > { %v6749_v17 = vrot.slane %v6747_v22, 5  ;;  %v6767_v32 = vshll.u32 %v6690_v43, 16  ;;  %v6736_v37 = vor.u32 %v6735_v1, %v6732_v60  ;;  %v6781_v19 = vshll.u32 %v6692_v29, 16  ;;  %v6695_v60 = vld [vmem:[#allocation4 + $0x4c] sm:$0xf] }
 0x4fb   : > { %v6786_v52 = vshrl.u32 %v6693_v7, 16  ;;  %v6753_v48 = vshll.u32 %v6688_v13, 16  ;;  %v6772_v34 = vshrl.u32 %v6691_v40, 16  ;;  %v6775_v42 = vshll.u32 %v6691_v40, 16  ;;  %v6701_v29 = vld [vmem:[#allocation4 + $0x70] sm:$0xf] }
 0x4fc   : > { %v6727_v6 = vrot.slane %v6725_v49, 5  ;;  %v6760_v33 = vrot.slane %v6758_v36, 4  ;;  %v6795_v31 = vshll.u32 %v6694_v44, 16  ;;  %v6741_v53 = vrot.slane %v6739_v9, 5  ;;  %v6697_v40 = vld [vmem:[#allocation4 + $0x58] sm:$0xf] }
 0x4fd   : > { %v6750_v23 = vor.u32 %v6749_v17, %v6746_v4  ;;  %v13342_v39 = vrot.slane %v6767_v32, 5  ;;  %v6737_v28 = vrot.slane %v6736_v37, 4  ;;  %v13345_v26 = vrot.slane %v6781_v19, 5  ;;  %v6699_v44 = vld [vmem:[#allocation4 + $0x64] sm:$0xf] }
 0x4fe   : > { %v6788_v22 = vrot.slane %v6786_v52, 4  ;;  %v6755_v1 = vrot.slane %v6753_v48, 5  ;;  %v6774_v43 = vrot.slane %v6772_v34, 4  ;;  %v6823_v13 = vshll.u32 %v6698_v5, 16 }
 0x4ff   : > { %v6751_v4 = vrot.slane %v6750_v23, 4  ;;  %v6800_v17 = vshrl.u32 %v6695_v60, 16  ;;  %v6803_v32 = vshll.u32 %v6695_v60, 16  ;;  %v6837_v37 = vshll.u32 %v6700_v61, 16 }
 0x500   : > { %v6742_v19 = vsel %vm11362_vm13, %v6737_v28, %v6741_v53  ;;  %v6828_v5 = vshrl.u32 %v6699_v44, 16  ;;  %v6831_v23 = vshll.u32 %v6699_v44, 16 }
 0x501   : > { %v6802_v53 = vrot.slane %v6800_v17, 4  ;;  %v6805_v61 = vrot.slane %v6803_v32, 5  ;;  %v13358_v28 = vrot.slane %v6837_v37, 5  ;;  %v7414_v32 = vsel %vm6582_vm15, %v13332_v10, 0 }
 0x502   : > { %v6830_v44 = vrot.slane %v6828_v5, 4 }
 0x527   : > { %v6542_v25 = vpop.permute.xlu1 %6541 }
 0x528   : > { %10509 = vmatprep.mubr.msk.bf16.mxu1 %vm6557_vm4, %v6542_v25  ;;  %v6789_v25 = vshll.u32 %v6693_v7, 16 }
 0x529   : > { %v6544_v12 = vpop.permute.xlu0 %6543 }
 0x52a   : > { %10510 = vmatmul.mubr.msk.bf16.vlgmr.msra.gmra.mrb[8].mxu1 %vm6557_vm4, %v6544_v12  ;;  %v6723_v12 = vrot.slane %v6722_v0, 4  ;;  %v6791_v59 = vrot.slane %v6789_v25, 5  ;;  %v6777_v0 = vrot.slane %v6775_v42, 5  ;;  %v6842_v25 = vshrl.u32 %v6701_v29, 16 }
 0x52b   : > { %10526 = vmatpush3.bf16.msra.mxu1 %v6993_v21  ;;  %v6814_v42 = vshrl.u32 %v6697_v40, 16 }
 0x52c   : > { %11008 = vmatprep.subr.msk.bf16.mxu1 %vm6582_vm15, %v13332_v10  ;;  %v6728_v49 = vsel %vm11362_vm13, %v6723_v12, %v6727_v6  ;;  %v6792_v52 = vor.u32 %v6791_v59, %v6788_v22  ;;  %v6778_v34 = vor.u32 %v6777_v0, %v6774_v43  ;;  %v6817_v12 = vshll.u32 %v6697_v40, 16  ;;  %v6703_v22 = vld [vmem:[#allocation4 + $0x7c] sm:$0xf] }
 0x52d   : > { %v6756_v59 = vsel %vm11362_vm13, %v6751_v4, %v6755_v1  ;;  %v6844_v43 = vrot.slane %v6842_v25, 4  ;;  %v6833_v1 = vrot.slane %v6831_v23, 5  ;;  %v13372_v4 = vld [vmem:[%s13664_s6 + $0x8] sm:$0x3c]   ;;  %v6859_v25 = vshll.u32 %v6703_v22, 16 }
 0x52e   : > { %v6793_v60 = vrot.slane %v6792_v52, 4  ;;  %v6819_v40 = vrot.slane %v6817_v12, 5  ;;  %v6856_v52 = vshrl.u32 %v6703_v22, 16  ;;  %v6704_v23 = vld [vmem:[#allocation4 + $0x80] sm:$0x1] }
 0x52f   : > { %v6546_v38 = vpop.permute.xlu1 %6545  ;;  %v6834_v5 = vor.u32 %v6833_v1, %v6830_v44  ;;  %v6710_v1 = vld [vmem:[#allocation4 + $0xa4] sm:$0x1] }
 0x530   : > { %10513 = vmatprep.mubr.msk.bf16.mxu1 %vm6557_vm4, %v6546_v38  ;;  %v6763_v38 = vrot.slane %v6761_v46, 5  ;;  %v13349_v46 = vrot.slane %v6795_v31, 5  ;;  %v6702_v31 = vld [vmem:[#allocation4 + $0x74] sm:$0x1] }
 0x532   : > { %v6548_v14 = vpop.permute.xlu0 %6547  ;;  %v6764_v36 = vor.u32 %v6763_v38, %v6760_v33 }
 0x533   : > { %10514 = vmatmul.mubr.msk.bf16.gmra.mrb[12].mxu1 %vm6557_vm4, %v6548_v14  ;;  %v6696_v14 = vld [vmem:[#allocation4 + $0x50] sm:$0x1] }
 0x534   : > { %v6809_v9 = vshll.u32 %v6696_v14, 16  ;;  %v6765_v33 = vrot.slane %v6764_v36, 4  ;;  %v9766_v14 = vcombine.low %v6728_v49, %v6742_v19  ;;  %v6816_v36 = vrot.slane %v6814_v42, 4 }
 0x535   : > { %v6851_v49 = vshll.u32 %v6702_v31, 16  ;;  %v6806_v19 = vor.u32 %v6805_v61, %v6802_v53  ;;  %v7576_v61 = vrot.slane %v13372_v4, 2 }
 0x536   : > { %v13356_v38 = vrot.slane %v6809_v9, 5  ;;  %v6709_v9 = vld [vmem:[#allocation4 + $0xa0] sm:$0xf]  ;;  %v6770_v17 = vsel %vm11362_vm13, %v6765_v33, %v13342_v39  ;;  %v6820_v12 = vor.u32 %v6819_v40, %v6816_v36  ;;  %v6711_v36 = vld [vmem:[#allocation4 + $0xac] sm:$0xf] }
 0x537   : > { %v9767_v37 = vcombine.low %v6756_v59, %v6770_v17  ;;  %v6901_v42 = vshll.u32 %v6709_v9, 16  ;;  %v6807_v59 = vrot.slane %v6806_v19, 4  ;;  %v6865_v19 = vshll.u32 %v6704_v23, 16 }
 0x538   : > { %v6550_v21 = vpop.permute.xlu1 %6549 }
 0x539   : > { %10517 = vmatprep.mubr.msk.bf16.mxu1 %vm6557_vm4, %v6550_v21  ;;  %v6845_v21 = vshll.u32 %v6701_v29, 16  ;;  %v6779_v29 = vrot.slane %v6778_v34, 4  ;;  %v6898_v34 = vshrl.u32 %v6709_v9, 16  ;;  %v6853_v9 = vrot.slane %v6851_v49, 5 }
 0x53a   : > { %v6552_v57 = vpop.permute.xlu0 %6551  ;;  %v6812_v49 = vsel %vm11362_vm13, %v6807_v59, %v13356_v38 }
 0x53b   : > { %10518 = vmatmul.mubr.msk.bf16.gmra.mrb[16].mxu1 %vm6557_vm4, %v6552_v57  ;;  %v13353_v57 = vrot.slane %v6823_v13, 5  ;;  %v6847_v0 = vrot.slane %v6845_v21, 5  ;;  %v6705_v13 = vld [vmem:[#allocation4 + $0x88] sm:$0xf]  ;;  %v6707_v21 = vld [vmem:[#allocation4 + $0x94] sm:$0xf]  ;;  %v6784_v10 = vsel %vm11362_vm13, %v6779_v29, %v13345_v26 }
 0x53c   : > { %v6870_v33 = vshrl.u32 %v6705_v13, 16  ;;  %v6873_v31 = vshll.u32 %v6705_v13, 16  ;;  %v6887_v53 = vshll.u32 %v6707_v21, 16  ;;  %v6900_v26 = vrot.slane %v6898_v34, 4 }
 0x53d   : > { %v6848_v39 = vor.u32 %v6847_v0, %v6844_v43  ;;  %v6708_v43 = vld [vmem:[#allocation4 + $0x98] sm:$0x1]  ;;  %v6903_v29 = vrot.slane %v6901_v42, 5  ;;  %v6821_v13 = vrot.slane %v6820_v12, 4  ;;  %v6907_v12 = vshll.u32 %v6710_v1, 16 }
 0x53e   : > { %v6872_v40 = vrot.slane %v6870_v33, 4  ;;  %v6875_v17 = vrot.slane %v6873_v31, 5  ;;  %v6893_v42 = vshll.u32 %v6708_v43, 16 }
 0x53f   : > { %v6849_v0 = vrot.slane %v6848_v39, 4  ;;  %v6915_v39 = vshll.u32 %v6711_v36, 16 }
 0x540   : > { %v6554_v48 = vpop.permute.xlu1 %6553  ;;  %v6876_v33 = vor.u32 %v6875_v17, %v6872_v40  ;;  %v6714_v17 = vld [vmem:[#allocation4 + $0xbc] sm:$0x1] }
 0x541   : > { %10521 = vmatprep.mubr.msk.bf16.mxu1 %vm6557_vm4, %v6554_v48  ;;  %v6556_v6 = vpop.permute.xlu0 %6555  ;;  %v6798_v48 = vsel %vm11362_vm13, %v6793_v60, %v13349_v46  ;;  %v6858_v46 = vrot.slane %v6856_v52, 4  ;;  %v6861_v60 = vrot.slane %v6859_v25, 5  ;;  %v6889_v25 = vrot.slane %v6887_v53, 5 }
 0x542   : > { %v9768_v22 = vcombine.low %v6784_v10, %v6798_v48  ;;  %v6713_v48 = vld [vmem:[#allocation4 + $0xb8] sm:$0xf]  ;;  %v6854_v34 = vsel %vm11362_vm13, %v6849_v0, %v6853_v9  ;;  %v6904_v10 = vor.u32 %v6903_v29, %v6900_v26  ;;  %v6909_v0 = vrot.slane %v6907_v12, 5  ;;  %v6712_v9 = vld [vmem:[#allocation4 + $0xb0] sm:$0x1] }
 0x543   : > { %10522 = vmatmul.mubr.msk.bf16.gmra.mrb[20].mxu1 %vm6557_vm4, %v6556_v6  ;;  %v6706_v6 = vld [vmem:[#allocation4 + $0x8c] sm:$0x1]  ;;  %v6926_v31 = vshrl.u32 %v6713_v48, 16  ;;  %v6877_v26 = vrot.slane %v6876_v33, 4 }
 0x544   : > { %10527 = vmatprep.mubr.msk.bf16.mxu1 %vm6557_vm4, %v9766_v14  ;;  %v6884_v14 = vshrl.u32 %v6707_v21, 16  ;;  %v6879_v44 = vshll.u32 %v6706_v6, 16  ;;  %v6835_v21 = vrot.slane %v6834_v5, 4  ;;  %v6826_v6 = vsel %vm11362_vm13, %v6821_v13, %v13353_v57  ;;  %v559_v57 = vld [vmem:[#allocation4 + $0xd4] sm:$0x1] }
 0x545   : > { %v6929_v5 = vshll.u32 %v6713_v48, 16  ;;  %v9769_v23 = vcombine.low %v6812_v49, %v6826_v6  ;;  %v6905_v43 = vrot.slane %v6904_v10, 4  ;;  %v6935_v49 = vshll.u32 %v6714_v17, 16 }
 0x546   : > { %v6886_v52 = vrot.slane %v6884_v14, 4  ;;  %v6840_v38 = vsel %vm11362_vm13, %v6835_v21, %v13358_v28  ;;  %v6867_v14 = vrot.slane %v6865_v19, 5  ;;  %v6881_v29 = vrot.slane %v6879_v44, 5 }
 0x547   : > { %v6931_v13 = vrot.slane %v6929_v5, 5  ;;  %v6895_v28 = vrot.slane %v6893_v42, 5  ;;  %v6921_v19 = vshll.u32 %v6712_v9, 16  ;;  %v6937_v12 = vrot.slane %v6935_v49, 5  ;;  %v11096_v9 = vld [vmem:[#allocation4 + $0x1c] sm:$0xf] }
 0x548   : > { %v6890_v53 = vor.u32 %v6889_v25, %v6886_v52  ;;  %v560_v52 = vsel %vm11303_vm10, 0, %v559_v57  ;;  %v6910_v25 = vsel %vm11362_vm13, %v6905_v43, %v6909_v0  ;;  %v6882_v44 = vsel %vm11362_vm13, %v6877_v26, %v6881_v29  ;;  %v11095_v0 = vld [vmem:[#allocation4 + $0x10] sm:$0xf]  ;;  %v7727_v49 = vld [vmem:[#allocation4 + $0x4c] sm:$0xf] }
 0x549   : > { %561 = vst [vmem:[#allocation4 + $0xd4] sm:$0x1] %v560_v52  ;;  %v6923_v42 = vrot.slane %v6921_v19, 5  ;;  %v9815_v57 = vcombine.low %v11095_v0, %v11096_v9  ;;  %v9817_v29 = vcombine.low %v13134_v20, %v13147_v63  ;;  %v7723_v20 = vld [vmem:[#allocation4 + $0x34] sm:$0xf]  ;;  %v9818_v52 = vcombine.low %v13149_v2, %v13154_v62 }
 0x54a   : > { %v6891_v40 = vrot.slane %v6890_v53, 4  ;;  %v7602_v53 = vsel %vm844_vm0, %v7576_v61, 0  ;;  %v7720_v63 = vld [vmem:[#allocation4 + $0x20] sm:$0x1]  ;;  %v7721_v19 = vld [vmem:[#allocation4 + $0x28] sm:$0xf] }
 0x54b   : > { %10528 = vmatmul.mubr.msk.bf16.vlgmr.msra.gmra.mrb[8].mxu1 %vm6557_vm4, %v9767_v37  ;;  %v6862_v37 = vor.u32 %v6861_v60, %v6858_v46  ;;  %v6917_v60 = vrot.slane %v6915_v39, 5  ;;  %v7781_v62 = vshll.u32 %v7721_v19, 16  ;;  %v7730_v9 = vld [vmem:[#allocation4 + $0x5c] sm:$0x1] }
 0x54c   : > { %10531 = vmatprep.mubr.msk.bf16.mxu1 %vm6557_vm4, %v9768_v22  ;;  %10544 = vmatpush3.bf16.msra.mxu1 %v7414_v32  ;;  %v6912_v32 = vshrl.u32 %v6711_v36, 16  ;;  %v9770_v22 = vcombine.low %v6840_v38, %v6854_v34  ;;  %v6928_v36 = vrot.slane %v6926_v31, 4  ;;  %v7374_v38 = vpop.permute.xlu1 %7373 }
 0x54d   : > { %11009 = vmatprep.subr.msk.bf16.mxu1 %vm844_vm0, %v7576_v61  ;;  %v6863_v59 = vrot.slane %v6862_v37, 4  ;;  %v7783_v15 = vrot.slane %v7781_v62, 5 }
 0x54e   : > { %v6914_v46 = vrot.slane %v6912_v32, 4  ;;  %v6932_v48 = vor.u32 %v6931_v13, %v6928_v36  ;;  %v6896_v32 = vsel %vm11362_vm13, %v6891_v40, %v6895_v28  ;;  %v7719_v36 = vld [vmem:[#allocation4 + $0x1c] sm:$0xf]  ;;  %v13440_v13 = vld [vmem:[%s13664_s6 + $0x10] sm:$0x3] }
 0x54f   : > { %v6868_v1 = vsel %vm11362_vm13, %v6863_v59, %v6867_v14  ;;  %v9772_v39 = vcombine.low %v6896_v32, %v6910_v25  ;;  %v11069_v14 = vld [vmem:[%s13664_s6 + $0xc] ss:$0 sps:$4 sm:$0xcc]   ;;  %v7717_v40 = vld [vmem:[#allocation4 + $0x10] sm:$0xf]  ;;  %v7764_v28 = vshrl.u32 %v7719_v36, 16 }
 0x550   : > { %v6918_v21 = vor.u32 %v6917_v60, %v6914_v46  ;;  %v9771_v37 = vcombine.low %v6868_v1, %v6882_v44  ;;  %v6933_v10 = vrot.slane %v6932_v48, 4  ;;  %v667_v33 = vld [vmem:[#allocation4 + $0xd4] sm:$0x1]  ;;  %v8001_v35 = vrot.slane %v11069_v14, 2  ;;  %v7378_v59 = vpop.permute.xlu1 %7377  ;;  %v7722_v32 = vld [vmem:[#allocation4 + $0x2c] sm:$0x1] }
 0x551   : > { %v668_v31 = vsel %vm11303_vm10, 0, %v667_v33  ;;  %v7767_v17 = vshll.u32 %v7719_v36, 16  ;;  %v7750_v1 = vshrl.u32 %v7717_v40, 16  ;;  %v7766_v16 = vrot.slane %v7764_v28, 4  ;;  %v7718_v25 = vld [vmem:[#allocation4 + $0x14] sm:$0x1] }
 0x552   : > { %v6919_v34 = vrot.slane %v6918_v21, 4  ;;  %v6938_v5 = vsel %vm11362_vm13, %v6933_v10, %v6937_v12  ;;  %669 = vst [vmem:[#allocation4 + $0xd4] sm:$0x1] %v668_v31  ;;  %v8027_v26 = vsel %vm6582_vm15, %v8001_v35, 0  ;;  %v7753_v21 = vshll.u32 %v7717_v40, 16 }
 0x553   : > { %10532 = vmatmul.mubr.msk.bf16.gmra.mrb[12].mxu1 %vm6557_vm4, %v9769_v23  ;;  %v7769_v18 = vrot.slane %v7767_v17, 5  ;;  %v7792_v44 = vshrl.u32 %v7723_v20, 16  ;;  %v7795_v48 = vshll.u32 %v7723_v20, 16  ;;  %v7726_v10 = vld [vmem:[#allocation4 + $0x44] sm:$0x1]  ;;  %v7820_v31 = vshrl.u32 %v7727_v49, 16 }
 0x554   : > { %10535 = vmatprep.mubr.msk.bf16.mxu1 %vm6557_vm4, %v9770_v22  ;;  %v6924_v6 = vsel %vm11362_vm13, %v6919_v34, %v6923_v42  ;;  %v7376_v22 = vpop.permute.xlu0 %7375  ;;  %v7382_v60 = vpop.permute.xlu1 %7381  ;;  %v7778_v34 = vshrl.u32 %v7721_v19, 16  ;;  %v7752_v42 = vrot.slane %v7750_v1, 4  ;;  %v7755_v2 = vrot.slane %v7753_v21, 5  ;;  %v7731_v20 = vld [vmem:[#allocation4 + $0x64] sm:$0xf] }
 0x555   : > { %v9773_v23 = vcombine.low %v6924_v6, %v6938_v5  ;;  %v7770_v6 = vor.u32 %v7769_v18, %v7766_v16  ;;  %v7823_v5 = vshll.u32 %v7727_v49, 16  ;;  %v7797_v14 = vrot.slane %v7795_v48, 5  ;;  %v7732_v21 = vld [vmem:[#allocation4 + $0x68] sm:$0x1]  ;;  %v7733_v18 = vld [vmem:[#allocation4 + $0x70] sm:$0xf] }
 0x556   : > { %v7780_v8 = vrot.slane %v7778_v34, 4  ;;  %v7843_v19 = vshll.u32 %v7730_v9, 16  ;;  %v7851_v48 = vshll.u32 %v7731_v20, 16  ;;  %v7857_v58 = vshll.u32 %v7732_v21, 16  ;;  %v7738_v21 = vld [vmem:[#allocation4 + $0x8c] sm:$0x1] }
 0x557   : > { %v7825_v0 = vrot.slane %v7823_v5, 5  ;;  %v7865_v34 = vshll.u32 %v7733_v18, 16  ;;  %v7734_v5 = vld [vmem:[#allocation4 + $0x74] sm:$0x1] }
 0x558   : > { %v7380_v46 = vpop.permute.xlu0 %7379  ;;  %v7386_v4 = vpop.permute.xlu1 %7385  ;;  %v7784_v1 = vor.u32 %v7783_v15, %v7780_v8  ;;  %v7743_v15 = vld [vmem:[#allocation4 + $0xac] sm:$0xf] }
 0x559   : > { %v7867_v8 = vrot.slane %v7865_v34, 5 }
 0x55b   : > { %10536 = vmatmul.mubr.msk.bf16.gmra.mrb[16].mxu1 %vm6557_vm4, %v9771_v37  ;;  %v7773_v37 = vshll.u32 %v7720_v63, 16 }
 0x55c   : > { %10539 = vmatprep.mubr.msk.bf16.mxu1 %vm6557_vm4, %v9772_v39  ;;  %v7384_v43 = vpop.permute.xlu0 %7383  ;;  %v7724_v39 = vld [vmem:[#allocation4 + $0x38] sm:$0x1] }
 0x560   : > { %v7388_v61 = vpop.permute.xlu0 %7387 }
 0x563   : > { %10540 = vmatmul.mubr.msk.bf16.gmra.mrb[20].mxu1 %vm6557_vm4, %v9773_v23  ;;  %v7759_v23 = vshll.u32 %v7718_v25, 16 }
 0x564   : > { %10545 = vmatprep.mubr.msk.bf16.mxu1 %vm6557_vm4, %v7374_v38  ;;  %v7794_v38 = vrot.slane %v7792_v44, 4  ;;  %v7848_v44 = vshrl.u32 %v7731_v20, 16 }
 0x56b   : > { %10546 = vmatmul.mubr.msk.bf16.vlgmr.msra.gmra.mrb[8].mxu1 %vm6557_vm4, %v7376_v22  ;;  %v7801_v22 = vshll.u32 %v7724_v39, 16  ;;  %v7862_v39 = vshrl.u32 %v7733_v18, 16 }
 0x56c   : > { %10549 = vmatprep.mubr.msk.bf16.mxu1 %vm6557_vm4, %v7378_v59  ;;  %10562 = vmatpush3.bf16.msra.mxu1 %v7602_v53  ;;  %v7775_v53 = vrot.slane %v7773_v37, 5  ;;  %v7815_v59 = vshll.u32 %v7726_v10, 16 }
 0x56d   : > { %11010 = vmatprep.subr.msk.bf16.mxu1 %vm6582_vm15, %v8001_v35  ;;  %v7787_v35 = vshll.u32 %v7722_v32, 16  ;;  %v7803_v40 = vrot.slane %v7801_v22, 5  ;;  %v7785_v32 = vrot.slane %v7784_v1, 4  ;;  %v8449_v1 = vsel %vm6582_vm15, %v13440_v13, 0 }
 0x56e   : > { %v13460_v28 = vrot.slane %v7815_v59, 5  ;;  %v7736_v59 = vld [vmem:[#allocation4 + $0x80] sm:$0x1] }
 0x56f   : > { %v7789_v36 = vrot.slane %v7787_v35, 5  ;;  %v7739_v35 = vld [vmem:[#allocation4 + $0x94] sm:$0xf] }
 0x570   : > { %v7907_v9 = vshll.u32 %v7739_v35, 16 }
 0x571   : > { %v7790_v22 = vsel %vm11362_vm13, %v7785_v32, %v7789_v36  ;;  %v7932_v36 = vshrl.u32 %v7743_v15, 16  ;;  %v7744_v32 = vld [vmem:[#allocation4 + $0xb0] sm:$0x1] }
 0x573   : > { %10550 = vmatmul.mubr.msk.bf16.gmra.mrb[12].mxu1 %vm6557_vm4, %v7380_v46  ;;  %v7756_v46 = vor.u32 %v7755_v2, %v7752_v42 }
 0x574   : > { %10553 = vmatprep.mubr.msk.bf16.mxu1 %vm6557_vm4, %v7382_v60 }
 0x575   : > { %v7757_v63 = vrot.slane %v7756_v46, 4  ;;  %v7864_v46 = vrot.slane %v7862_v39, 4  ;;  %v7899_v39 = vshll.u32 %v7738_v21, 16 }
 0x57b   : > { %10554 = vmatmul.mubr.msk.bf16.gmra.mrb[16].mxu1 %vm6557_vm4, %v7384_v43  ;;  %v7771_v43 = vrot.slane %v7770_v6, 4 }
 0x57c   : > { %10557 = vmatprep.mubr.msk.bf16.mxu1 %vm6557_vm4, %v7386_v4 }
 0x57d   : > { %v7776_v27 = vsel %vm11362_vm13, %v7771_v43, %v7775_v53  ;;  %v13491_v43 = vld [vmem:[%s13664_s6 + $0x10] sm:$0x3c]  }
 0x583   : > { %10558 = vmatmul.mubr.msk.bf16.gmra.mrb[20].mxu1 %vm6557_vm4, %v7388_v61  ;;  %v7822_v61 = vrot.slane %v7820_v31, 4  ;;  %v7853_v31 = vrot.slane %v7851_v48, 5  ;;  %v7934_v48 = vrot.slane %v7932_v36, 4 }
 0x584   : > { %10563 = vmatprep.mubr.msk.bf16.mxu1 %vm831_vm5, %v9815_v57  ;;  %v7761_v57 = vrot.slane %v7759_v23, 5  ;;  %v13476_v23 = vrot.slane %v7843_v19, 5 }
 0x586   : > { %v7762_v37 = vsel %vm11362_vm13, %v7757_v63, %v7761_v57  ;;  %v7741_v57 = vld [vmem:[#allocation4 + $0xa0] sm:$0xf] }
 0x587   : > { %v9832_v42 = vcombine.low %v7762_v37, %v7776_v27  ;;  %v7918_v19 = vshrl.u32 %v7741_v57, 16  ;;  %v8611_v27 = vrot.slane %v13491_v43, 2 }
 0x58b   : > { %10564 = vmatmul.mubr.msk.bf16.vlgmr.msra.gmra.mrb[8].mxu1 %vm831_vm5, %v9816_v11  ;;  %v7725_v11 = vld [vmem:[#allocation4 + $0x40] sm:$0xf] }
 0x58c   : > { %10567 = vmatprep.mubr.msk.bf16.mxu1 %vm831_vm5, %v9817_v29  ;;  %10580 = vmatpush3.bf16.msra.mxu1 %v8027_v26  ;;  %v7806_v12 = vshrl.u32 %v7725_v11, 16  ;;  %v7809_v33 = vshll.u32 %v7725_v11, 16  ;;  %v7798_v26 = vor.u32 %v7797_v14, %v7794_v38  ;;  %v7729_v29 = vld [vmem:[#allocation4 + $0x58] sm:$0xf]  ;;  %v13478_v38 = vrot.slane %v7857_v58, 5 }
 0x58d   : > { %11011 = vmatprep.subr.msk.bf16.mxu1 %vm6582_vm15, %v13440_v13  ;;  %v7834_v16 = vshrl.u32 %v7729_v29, 16  ;;  %v7837_v25 = vshll.u32 %v7729_v29, 16  ;;  %v7885_v29 = vshll.u32 %v7736_v59, 16  ;;  %v7747_v58 = vld [vmem:[#allocation4 + $0xc4] sm:$0xf] }
 0x58e   : > { %v7808_v60 = vrot.slane %v7806_v12, 4  ;;  %v7811_v4 = vrot.slane %v7809_v33, 5  ;;  %v7799_v11 = vrot.slane %v7798_v26, 4  ;;  %v7850_v33 = vrot.slane %v7848_v44, 4 }
 0x58f   : > { %v7836_v10 = vrot.slane %v7834_v16, 4  ;;  %v7839_v6 = vrot.slane %v7837_v25, 5  ;;  %v7740_v16 = vld [vmem:[#allocation4 + $0x98] sm:$0x1]  ;;  %v7887_v44 = vrot.slane %v7885_v29, 5 }
 0x590   : > { %v7812_v50 = vor.u32 %v7811_v4, %v7808_v60  ;;  %v7804_v12 = vsel %vm11362_vm13, %v7799_v11, %v7803_v40  ;;  %v7737_v60 = vld [vmem:[#allocation4 + $0x88] sm:$0xf]  ;;  %v7935_v40 = vshll.u32 %v7743_v15, 16  ;;  %v7909_v11 = vrot.slane %v7907_v9, 5 }
 0x591   : > { %v7840_v4 = vor.u32 %v7839_v6, %v7836_v10  ;;  %v7890_v20 = vshrl.u32 %v7737_v60, 16  ;;  %v7893_v63 = vshll.u32 %v7737_v60, 16  ;;  %v7913_v34 = vshll.u32 %v7740_v16, 16  ;;  %v7742_v6 = vld [vmem:[#allocation4 + $0xa4] sm:$0x1] }
 0x592   : > { %v7813_v2 = vrot.slane %v7812_v50, 4 }
 0x593   : > { %10568 = vmatmul.mubr.msk.bf16.gmra.mrb[12].mxu1 %vm831_vm5, %v9818_v52  ;;  %v7735_v52 = vld [vmem:[#allocation4 + $0x7c] sm:$0xf]  ;;  %v7841_v50 = vrot.slane %v7840_v4, 4  ;;  %v7895_v37 = vrot.slane %v7893_v63, 5  ;;  %v7915_v15 = vrot.slane %v7913_v34, 5 }
 0x594   : > { %10571 = vmatprep.mubr.msk.bf16.mxu1 %vm831_vm5, %v9819_v30  ;;  %v7728_v30 = vld [vmem:[#allocation4 + $0x50] sm:$0x1]  ;;  %v7876_v24 = vshrl.u32 %v7735_v52, 16  ;;  %v7818_v45 = vsel %vm11362_vm13, %v7813_v2, %v13460_v28 }
 0x595   : > { %v7829_v17 = vshll.u32 %v7728_v30, 16  ;;  %v9833_v30 = vcombine.low %v7790_v22, %v7804_v12 }
 0x596   : > { %v7878_v14 = vrot.slane %v7876_v24, 4 }
 0x597   : > { %v7831_v49 = vrot.slane %v7829_v17, 5  ;;  %v7868_v17 = vor.u32 %v7867_v8, %v7864_v46 }
 0x599   : > { %v7869_v13 = vrot.slane %v7868_v17, 4 }
 0x59b   : > { %10572 = vmatmul.mubr.msk.bf16.gmra.mrb[16].mxu1 %vm831_vm5, %v9820_v54  ;;  %v7826_v54 = vor.u32 %v7825_v0, %v7822_v61  ;;  %v7854_v61 = vor.u32 %v7853_v31, %v7850_v33  ;;  %v7904_v0 = vshrl.u32 %v7739_v35, 16  ;;  %v7960_v33 = vshrl.u32 %v7747_v58, 16 }
 0x59c   : > { %10575 = vmatprep.mubr.msk.bf16.mxu1 %vm831_vm5, %v9821_v56  ;;  %v7879_v56 = vshll.u32 %v7735_v52, 16  ;;  %v7921_v52 = vshll.u32 %v7741_v57, 16  ;;  %v7963_v31 = vshll.u32 %v7747_v58, 16  ;;  %v7941_v35 = vshll.u32 %v7744_v32, 16  ;;  %v8411_v32 = vpop.permute.xlu0 %8410 }
 0x59d   : > { %v7827_v62 = vrot.slane %v7826_v54, 4  ;;  %v7855_v54 = vrot.slane %v7854_v61, 4  ;;  %v7906_v18 = vrot.slane %v7904_v0, 4  ;;  %v7962_v60 = vrot.slane %v7960_v33, 4  ;;  %v7748_v0 = vld [vmem:[#allocation4 + $0xc8] sm:$0x1] }
 0x59e   : > { %v7881_v53 = vrot.slane %v7879_v56, 5  ;;  %v7892_v56 = vrot.slane %v7890_v20, 4  ;;  %v7923_v2 = vrot.slane %v7921_v52, 5  ;;  %v7965_v4 = vrot.slane %v7963_v31, 5  ;;  %v8752_v33 = vld [vmem:[#allocation4 + $0x1c] sm:$0xf] }
 0x59f   : > { %v7832_v51 = vsel %vm11362_vm13, %v7827_v62, %v7831_v49  ;;  %v7937_v49 = vrot.slane %v7935_v40, 5  ;;  %v7745_v62 = vld [vmem:[#allocation4 + $0xb8] sm:$0xf]  ;;  %v7860_v10 = vsel %vm11362_vm13, %v7855_v54, %v13478_v38  ;;  %v7910_v12 = vor.u32 %v7909_v11, %v7906_v18  ;;  %v11099_v31 = vld [vmem:[#allocation4 + $0x4c] sm:$0xf] }
 0x5a0   : > { %v7882_v26 = vor.u32 %v7881_v53, %v7878_v14  ;;  %v9834_v28 = vcombine.low %v7818_v45, %v7832_v51  ;;  %v7896_v59 = vor.u32 %v7895_v37, %v7892_v56  ;;  %v7946_v46 = vshrl.u32 %v7745_v62, 16  ;;  %v8415_v34 = vpop.permute.xlu0 %8414 }
 0x5a1   : > { %v7938_v53 = vor.u32 %v7937_v49, %v7934_v48  ;;  %v7949_v8 = vshll.u32 %v7745_v62, 16  ;;  %v7927_v45 = vshll.u32 %v7742_v6, 16  ;;  %v7943_v61 = vrot.slane %v7941_v35, 5  ;;  %v11097_v62 = vld [vmem:[#allocation4 + $0x1c] sm:$0xf] }
 0x5a2   : > { %v7883_v25 = vrot.slane %v7882_v26, 4  ;;  %v7897_v9 = vrot.slane %v7896_v59, 4  ;;  %v7901_v57 = vrot.slane %v7899_v39, 5  ;;  %v7948_v26 = vrot.slane %v7946_v46, 4  ;;  %v8756_v59 = vld [vmem:[#allocation4 + $0x34] sm:$0xf] }
 0x5a3   : > { %10576 = vmatmul.mubr.msk.bf16.gmra.mrb[20].mxu1 %vm831_vm5, %v9822_v3  ;;  %v7871_v3 = vshll.u32 %v7734_v5, 16  ;;  %v7846_v5 = vsel %vm11362_vm13, %v7841_v50, %v13476_v23  ;;  %v7939_v23 = vrot.slane %v7938_v53, 4  ;;  %v7951_v29 = vrot.slane %v7949_v8, 5  ;;  %v8754_v53 = vld [vmem:[#allocation4 + $0x28] sm:$0xf] }
 0x5a4   : > { %10581 = vmatprep.mubr.msk.bf16.mxu1 %vm6557_vm4, %v9832_v42  ;;  %v7920_v42 = vrot.slane %v7918_v19, 4  ;;  %v7888_v14 = vsel %vm11362_vm13, %v7883_v25, %v7887_v44  ;;  %v9835_v38 = vcombine.low %v7846_v5, %v7860_v10  ;;  %v7929_v40 = vrot.slane %v7927_v45, 5  ;;  %v11098_v10 = vld [vmem:[#allocation4 + $0x28] sm:$0xf]  ;;  %v11100_v5 = vld [vmem:[#allocation4 + $0x58] sm:$0xf] }
 0x5a5   : > { %v7873_v24 = vrot.slane %v7871_v3, 5  ;;  %v7911_v3 = vrot.slane %v7910_v12, 4  ;;  %v7966_v20 = vor.u32 %v7965_v4, %v7962_v60  ;;  %v7969_v63 = vshll.u32 %v7748_v0, 16  ;;  %v8753_v4 = vld [vmem:[#allocation4 + $0x20] sm:$0x1] }
 0x5a6   : > { %v7902_v21 = vsel %vm11362_vm13, %v7897_v9, %v7901_v57  ;;  %v7952_v19 = vor.u32 %v7951_v29, %v7948_v26  ;;  %v8637_v56 = vsel %vm844_vm0, %v8611_v27, 0  ;;  %v9881_v12 = vcombine.low %v11097_v62, %v11098_v10  ;;  %v8760_v29 = vld [vmem:[#allocation4 + $0x4c] sm:$0xf] }
 0x5a7   : > { %v7874_v22 = vsel %vm11362_vm13, %v7869_v13, %v7873_v24  ;;  %v7916_v17 = vsel %vm11362_vm13, %v7911_v3, %v7915_v15  ;;  %v7967_v18 = vrot.slane %v7966_v20, 4  ;;  %v7971_v11 = vrot.slane %v7969_v63, 5  ;;  %v8409_v13 = vpop.permute.xlu1 %8408  ;;  %v11071_v24 = vld [vmem:[%s13664_s6 + $0x14] ss:$0 sps:$4 sm:$0xcc]  }
 0x5a8   : > { %v9836_v51 = vcombine.low %v7874_v22, %v7888_v14  ;;  %v9837_v50 = vcombine.low %v7902_v21, %v7916_v17  ;;  %v7953_v25 = vrot.slane %v7952_v19, 4  ;;  %v9036_v37 = vrot.slane %v11071_v24, 2  ;;  %v11102_v3 = vld [vmem:[#allocation4 + $0x70] sm:$0xf]  ;;  %v8757_v20 = vld [vmem:[#allocation4 + $0x38] sm:$0x1] }
 0x5a9   : > { %v7972_v48 = vsel %vm11362_vm13, %v7967_v18, %v7971_v11  ;;  %v9883_v14 = vcombine.low %v11099_v31, %v11100_v5  ;;  %v8785_v35 = vshrl.u32 %v8752_v33, 16  ;;  %v8788_v22 = vshll.u32 %v8752_v33, 16  ;;  %v8768_v33 = vld [vmem:[#allocation4 + $0x7c] sm:$0xf] }
 0x5aa   : > { %v9062_v6 = vsel %vm6582_vm15, %v9036_v37, 0  ;;  %v8799_v46 = vshrl.u32 %v8754_v53, 16  ;;  %v8802_v8 = vshll.u32 %v8754_v53, 16  ;;  %v8813_v45 = vshrl.u32 %v8756_v59, 16 }
 0x5ab   : > { %10582 = vmatmul.mubr.msk.bf16.vlgmr.msra.gmra.mrb[8].mxu1 %vm6557_vm4, %v9833_v30  ;;  %v7924_v30 = vor.u32 %v7923_v2, %v7920_v42  ;;  %v8413_v39 = vpop.permute.xlu1 %8412  ;;  %v8419_v2 = vpop.permute.xlu0 %8418  ;;  %v8787_v15 = vrot.slane %v8785_v35, 4  ;;  %v8816_v26 = vshll.u32 %v8756_v59, 16  ;;  %v8808_v17 = vshll.u32 %v8755_v41, 16  ;;  %v8764_v35 = vld [vmem:[#allocation4 + $0x64] sm:$0xf] }
 0x5ac   : > { %10585 = vmatprep.mubr.msk.bf16.mxu1 %vm6557_vm4, %v9834_v28  ;;  %10598 = vmatpush3.bf16.msra.mxu1 %v8449_v1  ;;  %v7746_v28 = vld [vmem:[#allocation4 + $0xbc] sm:$0x1]  ;;  %v7944_v1 = vsel %vm11362_vm13, %v7939_v23, %v7943_v61  ;;  %v11104_v61 = vld [vmem:[#allocation4 + $0x88] sm:$0xf]  ;;  %v8801_v9 = vrot.slane %v8799_v46, 4  ;;  %v8804_v57 = vrot.slane %v8802_v8, 5 }
 0x5ad   : > { %11012 = vmatprep.subr.msk.bf16.mxu1 %vm844_vm0, %v8611_v27  ;;  %v7925_v36 = vrot.slane %v7924_v30, 4  ;;  %v7955_v52 = vshll.u32 %v7746_v28, 16  ;;  %v8790_v30 = vrot.slane %v8788_v22, 5  ;;  %v11103_v23 = vld [vmem:[#allocation4 + $0x7c] sm:$0xf]  ;;  %v8794_v28 = vshll.u32 %v8753_v4, 16 }
 0x5ae   : > { %v9885_v0 = vcombine.low %v11103_v23, %v11104_v61  ;;  %v8815_v63 = vrot.slane %v8813_v45, 4  ;;  %v8822_v24 = vshll.u32 %v8757_v20, 16  ;;  %v8810_v62 = vrot.slane %v8808_v17, 5  ;;  %v8770_v41 = vld [vmem:[#allocation4 + $0x88] sm:$0xf] }
 0x5af   : > { %v7930_v54 = vsel %vm11362_vm13, %v7925_v36, %v7929_v40  ;;  %v7957_v44 = vrot.slane %v7955_v52, 5  ;;  %v8417_v42 = vpop.permute.xlu1 %8416  ;;  %v8423_v27 = vpop.permute.xlu0 %8422  ;;  %v8762_v36 = vld [vmem:[#allocation4 + $0x58] sm:$0xf]  ;;  %v8791_v40 = vor.u32 %v8790_v30, %v8787_v15  ;;  %v8841_v52 = vshrl.u32 %v8760_v29, 16  ;;  %v8767_v61 = vld [vmem:[#allocation4 + $0x74] sm:$0x1] }
 0x5b0   : > { %v9838_v16 = vcombine.low %v7930_v54, %v7944_v1  ;;  %v8759_v1 = vld [vmem:[#allocation4 + $0x44] sm:$0x1]  ;;  %v8805_v54 = vor.u32 %v8804_v57, %v8801_v9  ;;  %v8855_v18 = vshrl.u32 %v8762_v36, 16  ;;  %v8858_v11 = vshll.u32 %v8762_v36, 16  ;;  %v8769_v36 = vld [vmem:[#allocation4 + $0x80] sm:$0x1] }
 0x5b1   : > { %v7958_v49 = vsel %vm11362_vm13, %v7953_v25, %v7957_v44  ;;  %v11105_v25 = vld [vmem:[#allocation4 + $0x94] sm:$0xf]  ;;  %v11106_v44 = vld [vmem:[#allocation4 + $0xa0] sm:$0xf]  ;;  %v8824_v22 = vrot.slane %v8822_v24, 5  ;;  %v8897_v30 = vshrl.u32 %v8768_v33, 16 }
 0x5b2   : > { %v9839_v58 = vcombine.low %v7958_v49, %v7972_v48  ;;  %v9886_v48 = vcombine.low %v11105_v25, %v11106_v44  ;;  %v11107_v49 = vld [vmem:[#allocation4 + $0xac] sm:$0xf]  ;;  %v8806_v31 = vrot.slane %v8805_v54, 4  ;;  %v8860_v53 = vrot.slane %v8858_v11, 5  ;;  %v8774_v11 = vld [vmem:[#allocation4 + $0xa0] sm:$0xf] }
 0x5b3   : > { %10586 = vmatmul.mubr.msk.bf16.gmra.mrb[12].mxu1 %vm6557_vm4, %v9835_v38  ;;  %v8421_v43 = vpop.permute.xlu1 %8420  ;;  %v8758_v38 = vld [vmem:[#allocation4 + $0x40] sm:$0xf]  ;;  %v8900_v45 = vshll.u32 %v8768_v33, 16  ;;  %v8869_v4 = vshrl.u32 %v8764_v35, 16  ;;  %v8911_v17 = vshrl.u32 %v8770_v41, 16  ;;  %v8914_v20 = vshll.u32 %v8770_v41, 16 }
 0x5b4   : > { %10589 = vmatprep.mubr.msk.bf16.mxu1 %vm6557_vm4, %v9836_v51  ;;  %v11101_v51 = vld [vmem:[#allocation4 + $0x64] sm:$0xf]  ;;  %v8827_v47 = vshrl.u32 %v8758_v38, 16 }
 0x5b5   : > { %v9884_v60 = vcombine.low %v11101_v51, %v11102_v3  ;;  %v8916_v24 = vrot.slane %v8914_v20, 5 }
 0x5b6   : > { %v8829_v21 = vrot.slane %v8827_v47, 4  ;;  %v8811_v47 = vsel %vm11362_vm13, %v8806_v31, %v8810_v62 }
 0x5bb   : > { %10590 = vmatmul.mubr.msk.bf16.gmra.mrb[16].mxu1 %vm6557_vm4, %v9837_v50  ;;  %v8844_v50 = vshll.u32 %v8760_v29, 16 }
 0x5bc   : > { %10593 = vmatprep.mubr.msk.bf16.mxu1 %vm6557_vm4, %v9838_v16  ;;  %v8818_v16 = vrot.slane %v8816_v26, 5 }
 0x5be   : > { %v8819_v5 = vor.u32 %v8818_v16, %v8815_v63  ;;  %v8892_v16 = vshll.u32 %v8767_v61, 16 }
 0x5c3   : > { %10594 = vmatmul.mubr.msk.bf16.gmra.mrb[20].mxu1 %vm6557_vm4, %v9839_v58  ;;  %v11108_v58 = vld [vmem:[#allocation4 + $0xb8] sm:$0xf] }
 0x5c4   : > { %10599 = vmatprep.mubr.msk.bf16.mxu1 %vm6557_vm4, %v8409_v13  ;;  %v9887_v13 = vcombine.low %v11107_v49, %v11108_v58 }
 0x5cb   : > { %10600 = vmatmul.mubr.msk.bf16.vlgmr.msra.gmra.mrb[8].mxu1 %vm6557_vm4, %v8411_v32  ;;  %v11110_v32 = vld [vmem:[#allocation4 + $0xc4] sm:$0xf] }
 0x5cc   : > { %10603 = vmatprep.mubr.msk.bf16.mxu1 %vm6557_vm4, %v8413_v39  ;;  %10616 = vmatpush3.bf16.msra.mxu1 %v8637_v56  ;;  %v8761_v56 = vld [vmem:[#allocation4 + $0x50] sm:$0x1] }
 0x5cd   : > { %11013 = vmatprep.subr.msk.bf16.mxu1 %vm6582_vm15, %v9036_v37  ;;  %v11109_v37 = vld [vmem:[#allocation4 + $0xd0] sm:$0xf]  ;;  %v8850_v59 = vshll.u32 %v8761_v56, 16  ;;  %v8776_v56 = vld [vmem:[#allocation4 + $0xac] sm:$0xf] }
 0x5ce   : > { %v9888_v39 = vcombine.low %v11110_v32, %v11109_v37  ;;  %v8953_v33 = vshrl.u32 %v8776_v56, 16  ;;  %v8956_v31 = vshll.u32 %v8776_v56, 16 }
 0x5cf   : > { %v8852_v57 = vrot.slane %v8850_v59, 5 }
 0x5d0   : > { %v8955_v41 = vrot.slane %v8953_v33, 4 }
 0x5d3   : > { %10604 = vmatmul.mubr.msk.bf16.gmra.mrb[12].mxu1 %vm6557_vm4, %v8415_v34  ;;  %v8792_v34 = vrot.slane %v8791_v40, 4  ;;  %v8899_v40 = vrot.slane %v8897_v30, 4 }
 0x5d4   : > { %10607 = vmatprep.mubr.msk.bf16.mxu1 %vm6557_vm4, %v8417_v42  ;;  %v8796_v42 = vrot.slane %v8794_v28, 5  ;;  %v8902_v28 = vrot.slane %v8900_v45, 5 }
 0x5d6   : > { %v8903_v58 = vor.u32 %v8902_v28, %v8899_v40  ;;  %v8779_v28 = vld [vmem:[#allocation4 + $0xbc] sm:$0x1] }
 0x5db   : > { %10608 = vmatmul.mubr.msk.bf16.gmra.mrb[16].mxu1 %vm6557_vm4, %v8419_v2  ;;  %v8836_v2 = vshll.u32 %v8759_v1, 16 }
 0x5dc   : > { %10611 = vmatprep.mubr.msk.bf16.mxu1 %vm6557_vm4, %v8421_v43  ;;  %v8763_v43 = vld [vmem:[#allocation4 + $0x5c] sm:$0x1] }
 0x5dd   : > { %v8838_v15 = vrot.slane %v8836_v2, 5  ;;  %v8942_v2 = vshll.u32 %v8774_v11, 16 }
 0x5e3   : > { %10612 = vmatmul.mubr.msk.bf16.gmra.mrb[20].mxu1 %vm6557_vm4, %v8423_v27  ;;  %v8766_v27 = vld [vmem:[#allocation4 + $0x70] sm:$0xf] }
 0x5e4   : > { %10617 = vmatprep.mubr.msk.bf16.mxu1 %vm831_vm5, %v9881_v12  ;;  %v8843_v12 = vrot.slane %v8841_v52, 4  ;;  %v8883_v46 = vshrl.u32 %v8766_v27, 16  ;;  %v8886_v8 = vshll.u32 %v8766_v27, 16  ;;  %v8871_v52 = vrot.slane %v8869_v4, 4 }
 0x5e5   : > { %v8894_v27 = vrot.slane %v8892_v16, 5 }
 0x5e6   : > { %v8885_v26 = vrot.slane %v8883_v46, 4  ;;  %v8888_v29 = vrot.slane %v8886_v8, 5  ;;  %v8944_v46 = vrot.slane %v8942_v2, 5 }
 0x5e8   : > { %v8889_v44 = vor.u32 %v8888_v29, %v8885_v26 }
 0x5eb   : > { %10618 = vmatmul.mubr.msk.bf16.vlgmr.msra.gmra.mrb[8].mxu1 %vm831_vm5, %v9882_v55  ;;  %v8830_v55 = vshll.u32 %v8758_v38, 16  ;;  %v8797_v38 = vsel %vm11362_vm13, %v8792_v34, %v8796_v42  ;;  %v8772_v34 = vld [vmem:[#allocation4 + $0x94] sm:$0xf]  ;;  %v8939_v42 = vshrl.u32 %v8774_v11, 16 }
 0x5ec   : > { %10621 = vmatprep.mubr.msk.bf16.mxu1 %vm831_vm5, %v9883_v14  ;;  %10634 = vmatpush3.bf16.msra.mxu1 %v9062_v6  ;;  %v8846_v6 = vrot.slane %v8844_v50, 5  ;;  %v8857_v14 = vrot.slane %v8855_v18, 4  ;;  %v9898_v9 = vcombine.low %v8797_v38, %v8811_v47  ;;  %v8906_v18 = vshll.u32 %v8769_v36, 16 }
 0x5ed   : > { %v8832_v19 = vrot.slane %v8830_v55, 5  ;;  %v8820_v55 = vrot.slane %v8819_v5, 4  ;;  %v8904_v5 = vrot.slane %v8903_v58, 4  ;;  %v8941_v59 = vrot.slane %v8939_v42, 4  ;;  %v8781_v58 = vld [vmem:[#allocation4 + $0xc8] sm:$0x1] }
 0x5ee   : > { %v8847_v3 = vor.u32 %v8846_v6, %v8843_v12  ;;  %v8861_v23 = vor.u32 %v8860_v53, %v8857_v14  ;;  %v8908_v62 = vrot.slane %v8906_v18, 5  ;;  %v8890_v12 = vrot.slane %v8889_v44, 4  ;;  %v8783_v42 = vld [vmem:[#allocation4 + $0xd4] sm:$0x1] }
 0x5ef   : > { %v8833_v10 = vor.u32 %v8832_v19, %v8829_v21  ;;  %v8765_v19 = vld [vmem:[#allocation4 + $0x68] sm:$0x1]  ;;  %v8825_v25 = vsel %vm11362_vm13, %v8820_v55, %v8824_v22  ;;  %v8925_v53 = vshrl.u32 %v8772_v34, 16  ;;  %v8775_v22 = vld [vmem:[#allocation4 + $0xa4] sm:$0x1]  ;;  %v8958_v47 = vrot.slane %v8956_v31, 5 }
 0x5f0   : > { %v8848_v1 = vrot.slane %v8847_v3, 4  ;;  %v8862_v50 = vrot.slane %v8861_v23, 4  ;;  %v8878_v49 = vshll.u32 %v8765_v19, 16  ;;  %v8780_v3 = vld [vmem:[#allocation4 + $0xc4] sm:$0xf]  ;;  %v8909_v26 = vsel %vm11362_vm13, %v8904_v5, %v8908_v62 }
 0x5f1   : > { %v8834_v51 = vrot.slane %v8833_v10, 4  ;;  %v8778_v10 = vld [vmem:[#allocation4 + $0xb8] sm:$0xf]  ;;  %v8782_v55 = vld [vmem:[#allocation4 + $0xd0] sm:$0xf]  ;;  %v8927_v61 = vrot.slane %v8925_v53, 4  ;;  %v8945_v29 = vor.u32 %v8944_v46, %v8941_v59 }
 0x5f2   : > { %v8853_v32 = vsel %vm11362_vm13, %v8848_v1, %v8852_v57  ;;  %v8967_v8 = vshrl.u32 %v8778_v10, 16  ;;  %v8970_v38 = vshll.u32 %v8778_v10, 16  ;;  %v8880_v45 = vrot.slane %v8878_v49, 5  ;;  %v8777_v57 = vld [vmem:[#allocation4 + $0xb0] sm:$0x1] }
 0x5f3   : > { %10622 = vmatmul.mubr.msk.bf16.gmra.mrb[12].mxu1 %vm831_vm5, %v9884_v60  ;;  %v8864_v60 = vshll.u32 %v8763_v43, 16  ;;  %v8839_v63 = vsel %vm11362_vm13, %v8834_v51, %v8838_v15  ;;  %v8773_v51 = vld [vmem:[#allocation4 + $0x98] sm:$0x1]  ;;  %v8984_v20 = vshll.u32 %v8780_v3, 16  ;;  %v8998_v1 = vshll.u32 %v8782_v55, 16 }
 0x5f4   : > { %10625 = vmatprep.mubr.msk.bf16.mxu1 %vm831_vm5, %v9885_v0  ;;  %v8872_v0 = vshll.u32 %v8764_v35, 16  ;;  %v9899_v37 = vcombine.low %v8825_v25, %v8839_v63  ;;  %v8928_v35 = vshll.u32 %v8772_v34, 16  ;;  %v8969_v36 = vrot.slane %v8967_v8, 4 }
 0x5f5   : > { %v8866_v21 = vrot.slane %v8864_v60, 5  ;;  %v8895_v60 = vsel %vm11362_vm13, %v8890_v12, %v8894_v27  ;;  %v8972_v40 = vrot.slane %v8970_v38, 5  ;;  %v8995_v63 = vshrl.u32 %v8782_v55, 16 }
 0x5f6   : > { %v8874_v54 = vrot.slane %v8872_v0, 5  ;;  %v8930_v0 = vrot.slane %v8928_v35, 5  ;;  %v8934_v19 = vshll.u32 %v8773_v51, 16  ;;  %v8946_v44 = vrot.slane %v8945_v29, 4 }
 0x5f7   : > { %v8976_v49 = vshll.u32 %v8779_v28, 16  ;;  %v8997_v56 = vrot.slane %v8995_v63, 4  ;;  %v8990_v62 = vshll.u32 %v8781_v58, 16  ;;  %v9004_v33 = vshll.u32 %v8783_v42, 16 }
 0x5f8   : > { %v8875_v43 = vor.u32 %v8874_v54, %v8871_v52  ;;  %v8959_v52 = vor.u32 %v8958_v47, %v8955_v41  ;;  %v8931_v18 = vor.u32 %v8930_v0, %v8927_v61 }
 0x5f9   : > { %v8978_v27 = vrot.slane %v8976_v49, 5  ;;  %v8992_v35 = vrot.slane %v8990_v62, 5  ;;  %v9006_v8 = vrot.slane %v9004_v33, 5 }
 0x5fa   : > { %v8876_v30 = vrot.slane %v8875_v43, 4  ;;  %v8932_v2 = vrot.slane %v8931_v18, 4 }
 0x5fb   : > { %10626 = vmatmul.mubr.msk.bf16.gmra.mrb[16].mxu1 %vm831_vm5, %v9886_v48  ;;  %v8771_v48 = vld [vmem:[#allocation4 + $0x8c] sm:$0x1] }
 0x5fc   : > { %10629 = vmatprep.mubr.msk.bf16.mxu1 %vm831_vm5, %v9887_v13  ;;  %v8913_v13 = vrot.slane %v8911_v17, 4  ;;  %v8920_v6 = vshll.u32 %v8771_v48, 16  ;;  %v8981_v17 = vshrl.u32 %v8780_v3, 16  ;;  %v8973_v48 = vor.u32 %v8972_v40, %v8969_v36 }
 0x5fe   : > { %v8917_v14 = vor.u32 %v8916_v24, %v8913_v13  ;;  %v8922_v4 = vrot.slane %v8920_v6, 5  ;;  %v8983_v13 = vrot.slane %v8981_v17, 4  ;;  %v8986_v24 = vrot.slane %v8984_v20, 5 }
 0x5ff   : > { %v8974_v43 = vrot.slane %v8973_v48, 4 }
 0x600   : > { %v8918_v23 = vrot.slane %v8917_v14, 4  ;;  %v8987_v12 = vor.u32 %v8986_v24, %v8983_v13 }
 0x601   : > { %v8979_v53 = vsel %vm11362_vm13, %v8974_v43, %v8978_v27 }
 0x602   : > { %v8923_v16 = vsel %vm11362_vm13, %v8918_v23, %v8922_v4  ;;  %v8988_v59 = vrot.slane %v8987_v12, 4 }
 0x603   : > { %10630 = vmatmul.mubr.msk.bf16.gmra.mrb[20].mxu1 %vm831_vm5, %v9888_v39  ;;  %v8867_v39 = vsel %vm11362_vm13, %v8862_v50, %v8866_v21  ;;  %v8881_v21 = vsel %vm11362_vm13, %v8876_v30, %v8880_v45  ;;  %v8962_v50 = vshll.u32 %v8777_v57, 16  ;;  %v9902_v25 = vcombine.low %v8909_v26, %v8923_v16  ;;  %v13598_v45 = vld [vmem:[%s13665_s7] ss:$0 sm:$0xff] }
 0x604   : > { %10635 = vmatprep.mubr.msk.bf16.mxu1 %vm6557_vm4, %v9898_v9  ;;  %v9900_v15 = vcombine.low %v8853_v32, %v8867_v39  ;;  %v8948_v9 = vshll.u32 %v8775_v22, 16  ;;  %v9901_v54 = vcombine.low %v8881_v21, %v8895_v60  ;;  %v8960_v32 = vrot.slane %v8959_v52, 4 }
 0x605   : > { %v8964_v34 = vrot.slane %v8962_v50, 5  ;;  %v8936_v39 = vrot.slane %v8934_v19, 5  ;;  %v8993_v38 = vsel %vm11362_vm13, %v8988_v59, %v8992_v35 }
 0x606   : > { %v8950_v11 = vrot.slane %v8948_v9, 5 }
 0x607   : > { %v8965_v31 = vsel %vm11362_vm13, %v8960_v32, %v8964_v34  ;;  %v8937_v5 = vsel %vm11362_vm13, %v8932_v2, %v8936_v39 }
 0x608   : > { %v8951_v10 = vsel %vm11362_vm13, %v8946_v44, %v8950_v11  ;;  %v9904_v22 = vcombine.low %v8965_v31, %v8979_v53 }
 0x609   : > { %v9903_v14 = vcombine.low %v8937_v5, %v8951_v10 }
 0x60b   : > { %10636 = vmatmul.mubr.msk.bf16.vlgmr.msra.gmra.mrb[8].mxu1 %vm6557_vm4, %v9899_v37  ;;  %v9000_v37 = vrot.slane %v8998_v1, 5 }
 0x60c   : > { %10639 = vmatprep.mubr.msk.bf16.mxu1 %vm6557_vm4, %v9900_v15 }
 0x60d   : > { %v9001_v6 = vor.u32 %v9000_v37, %v8997_v56 }
 0x60f   : > { %v9002_v46 = vrot.slane %v9001_v6, 4 }
 0x611   : > { %v9007_v15 = vsel %vm11362_vm13, %v9002_v46, %v9006_v8 }
 0x612   : > { %v9905_v30 = vcombine.low %v8993_v38, %v9007_v15 }
 0x613   : > { %10640 = vmatmul.mubr.msk.bf16.gmra.mrb[12].mxu1 %vm6557_vm4, %v9901_v54 }
 0x614   : > { %10643 = vmatprep.mubr.msk.bf16.mxu1 %vm6557_vm4, %v9902_v25 }
 0x61b   : > { %10644 = vmatmul.mubr.msk.bf16.gmra.mrb[16].mxu1 %vm6557_vm4, %v9903_v14 }
 0x61c   : > { %10647 = vmatprep.mubr.msk.bf16.mxu1 %vm6557_vm4, %v9904_v22 }
 0x623   : > { %10648 = vmatmul.mubr.msk.bf16.gmra.mrb[20].mxu1 %vm6557_vm4, %v9905_v30 }
 0x6de   : > { %v10637_v51 = vpop.f32.mrb[8].mxu1 }
 0x6df   : > { %v9186_v3 = vadd.f32 %v10637_v51, %v13598_v45  ;;  %v9098_v60 = vpop.f32.mrb[9].mxu1 }
 0x6e0   : > { %v9184_v4 = vadd.f32 %v13598_v45, %v9098_v60  ;;  %v10638_v41 = vpop.f32.mrb[10].mxu1 }
 0x6e1   : > { %v9202_v47 = vmax.f32 %v9186_v3, 0.0  ;;  %v9187_v55 = vadd.f32 %v10638_v41, %v13598_v45  ;;  %v9101_v7 = vpop.f32.mrb[11].mxu1 }
 0x6e2   : > { %v9200_v23 = vmax.f32 %v9184_v4, 0.0  ;;  %v9185_v61 = vadd.f32 %v13598_v45, %v9101_v7 }
 0x6e3   : > { %v9971_v0 = vpack.c.bf16 %v9202_v47, %v9202_v47  ;;  %v9203_v9 = vmax.f32 %v9187_v55, 0.0 }
 0x6e4   : > { %v9969_v57 = vpack.c.bf16 %v9200_v23, %v9200_v23  ;;  %v9201_v26 = vmax.f32 %v9185_v61, 0.0 }
 0x6e5   : > { %9282 = vst.msk [vmem:[%s13608_s25 + $0x8] sm:$0xf] %vm327_vm1, %v9971_v0  ;;  %v9972_v29 = vpack.c.bf16 %v9203_v9, %v9203_v9 }
 0x6e6   : > { %9280 = vst.msk [vmem:[%s13608_s25] sm:$0xf] %vm327_vm1, %v9969_v57  ;;  %v9970_v36 = vpack.c.bf16 %v9201_v26, %v9201_v26  ;;  %v10641_v40 = vpop.f32.mrb[12].mxu1 }
 0x6e7   : > { %9283 = vst.msk [vmem:[%s13608_s25 + $0xc] sm:$0xf] %vm327_vm1, %v9972_v29  ;;  %v9190_v28 = vadd.f32 %v10641_v40, %v13598_v45  ;;  %v9114_v17 = vpop.f32.mrb[13].mxu1 }
 0x6e8   : > { %9281 = vst.msk [vmem:[%s13608_s25 + $0x4] sm:$0xf] %vm327_vm1, %v9970_v36  ;;  %v9188_v20 = vadd.f32 %v13598_v45, %v9114_v17  ;;  %v10642_v63 = vpop.f32.mrb[14].mxu1 }
 0x6e9   : > { %v9206_v1 = vmax.f32 %v9190_v28, 0.0  ;;  %v9191_v21 = vadd.f32 %v10642_v63, %v13598_v45  ;;  %v9117_v19 = vpop.f32.mrb[15].mxu1 }
 0x6ea   : > { %v9204_v52 = vmax.f32 %v9188_v20, 0.0  ;;  %v9189_v50 = vadd.f32 %v13598_v45, %v9117_v19 }
 0x6eb   : > { %v9975_v54 = vpack.c.bf16 %v9206_v1, %v9206_v1  ;;  %v9207_v16 = vmax.f32 %v9191_v21, 0.0 }
 0x6ec   : > { %v9973_v18 = vpack.c.bf16 %v9204_v52, %v9204_v52  ;;  %v9205_v11 = vmax.f32 %v9189_v50, 0.0 }
 0x6ed   : > { %9286 = vst.msk [vmem:[%s13608_s25 + $0x18] sm:$0xf] %vm327_vm1, %v9975_v54  ;;  %v9976_v25 = vpack.c.bf16 %v9207_v16, %v9207_v16 }
 0x6ee   : > { %9284 = vst.msk [vmem:[%s13608_s25 + $0x10] sm:$0xf] %vm327_vm1, %v9973_v18  ;;  %v9974_v44 = vpack.c.bf16 %v9205_v11, %v9205_v11  ;;  %v10645_v48 = vpop.f32.mrb[16].mxu1 }
 0x6ef   : > { %9287 = vst.msk [vmem:[%s13608_s25 + $0x1c] sm:$0xf] %vm327_vm1, %v9976_v25  ;;  %v9194_v49 = vadd.f32 %v10645_v48, %v13598_v45  ;;  %v9130_v58 = vpop.f32.mrb[17].mxu1 }
 0x6f0   : > { %9285 = vst.msk [vmem:[%s13608_s25 + $0x14] sm:$0xf] %vm327_vm1, %v9974_v44  ;;  %v9192_v13 = vadd.f32 %v13598_v45, %v9130_v58  ;;  %v10646_v24 = vpop.f32.mrb[18].mxu1 }
 0x6f1   : > { %v9210_v56 = vmax.f32 %v9194_v49, 0.0  ;;  %v9195_v37 = vadd.f32 %v10646_v24, %v13598_v45  ;;  %v9133_v32 = vpop.f32.mrb[19].mxu1 }
 0x6f2   : > { %v9208_v34 = vmax.f32 %v9192_v13, 0.0  ;;  %v9193_v42 = vadd.f32 %v13598_v45, %v9133_v32 }
 0x6f3   : > { %v9979_v2 = vpack.c.bf16 %v9210_v56, %v9210_v56  ;;  %v9211_v39 = vmax.f32 %v9195_v37, 0.0 }
 0x6f4   : > { %v9977_v43 = vpack.c.bf16 %v9208_v34, %v9208_v34  ;;  %v9209_v27 = vmax.f32 %v9193_v42, 0.0 }
 0x6f5   : > { %9290 = vst.msk [vmem:[%s13608_s25 + $0x28] sm:$0xf] %vm327_vm1, %v9979_v2  ;;  %v9980_v62 = vpack.c.bf16 %v9211_v39, %v9211_v39 }
 0x6f6   : > { %9288 = vst.msk [vmem:[%s13608_s25 + $0x20] sm:$0xf] %vm327_vm1, %v9977_v43  ;;  %v9978_v10 = vpack.c.bf16 %v9209_v27, %v9209_v27  ;;  %v10649_v12 = vpop.f32.mrb[20].mxu1 }
 0x6f7   : > { %9291 = vst.msk [vmem:[%s13608_s25 + $0x2c] sm:$0xf] %vm327_vm1, %v9980_v62  ;;  %v9198_v6 = vadd.f32 %v10649_v12, %v13598_v45  ;;  %v9146_v33 = vpop.f32.mrb[21].mxu1 }
 0x6f8   : > { %9289 = vst.msk [vmem:[%s13608_s25 + $0x24] sm:$0xf] %vm327_vm1, %v9978_v10  ;;  %v9196_v31 = vadd.f32 %v13598_v45, %v9146_v33  ;;  %v10650_v5 = vpop.f32.mrb[22].mxu1 }
 0x6f9   : > { %v9214_v14 = vmax.f32 %v9198_v6, 0.0  ;;  %v9199_v53 = vadd.f32 %v10650_v5, %v13598_v45  ;;  %v9149_v35 = vpop.f32.mrb[23].mxu1 }
 0x6fa   : > { %v9212_v22 = vmax.f32 %v9196_v31, 0.0  ;;  %v9197_v59 = vadd.f32 %v13598_v45, %v9149_v35 }
 0x6fb   : > { %v9983_v46 = vpack.c.bf16 %v9214_v14, %v9214_v14  ;;  %v9215_v8 = vmax.f32 %v9199_v53, 0.0 }
 0x6fc   : > { %v9981_v38 = vpack.c.bf16 %v9212_v22, %v9212_v22  ;;  %v9213_v15 = vmax.f32 %v9197_v59, 0.0 }
 0x6fd   : > { %9294 = vst.msk [vmem:[%s13608_s25 + $0x38] sm:$0xf] %vm327_vm1, %v9983_v46  ;;  %v9984_v30 = vpack.c.bf16 %v9215_v8, %v9215_v8 }
 0x6fe   : > { %9292 = vst.msk [vmem:[%s13608_s25 + $0x30] sm:$0xf] %vm327_vm1, %v9981_v38  ;;  %v9982_v51 = vpack.c.bf16 %v9213_v15, %v9213_v15 }
 0x6ff   : > { %9295 = vst.msk [vmem:[%s13608_s25 + $0x3c] sm:$0xf] %vm327_vm1, %v9984_v30 }
 0x700   : > { %9293 = vst.msk [vmem:[%s13608_s25 + $0x34] sm:$0xf] %vm327_vm1, %v9982_v51 }
 0x701 PF: > { %s18_s27 = sadd.s32 1, %s11117_s27  }
 0x702   : > { %p15_p4 = scmp.ge.s32.totalorder %s18_s27, 4  }
 0x704   :  { %17 = sbr.rel (!%p15_p4) target bundleno = 1 (0x1), region = 94 }

</bundles_post_ra>
